<compile_context>
chip_gen: v7x
topology: tpu7x:2x2x1
jax: 0.10.0
libtpu: 0.0.40
codegen_flags: <defaults>
</compile_context>

<pallas_src>
import jax
import jax.numpy as jnp
from jax.experimental import pallas as pl
from jax.experimental.pallas import tpu as pltpu

# ----------------------------- configuration ---------------------------------
CS = 16  # channel scale factor (demo shrink; set to 1 for the full-size network)
C4096, C512, C256, C128, C64 = 4096 // CS, 512 // CS, 256 // CS, 128 // CS, 64 // CS
BN_EPS = 1e-5
ACT_DTYPE = jnp.bfloat16   # activations / weights on the matmul path
LANE = 128                 # TPU lane width
LTILE_MAX = 1536           # lane-tile cap for the conv kernels (fits all gens comfortably)
FIRST_COL_TILE = 512       # output-column tile for the first (8x8) deconv

# decoder body after the first 8x8 deconv (mirrors the torch.nn.Sequential)
LAYOUT = [
    ("unpool",),
    ("conv3", C512, C512), ("conv3", C512, C512), ("conv3", C512, C512),
    ("unpool",),
    ("conv3", C512, C512), ("conv3", C512, C512), ("conv3", C512, C256),
    ("unpool",),
    ("conv3", C256, C256), ("conv3", C256, C256), ("conv3", C256, C128),
    ("unpool",),
    ("conv3", C128, C128), ("conv3", C128, C64),
    ("unpool",),
    ("conv3", C64, C64),
    ("conv1", C64, 1),
]


# ----------------------------- small helpers ----------------------------------
def _round_up(x, m):
    return (x + m - 1) // m * m


def _pick_tile(total, cap):
    """Largest multiple of 128 that divides `total` (itself a multiple of 128) and is <= cap."""
    assert total % LANE == 0
    units = total // LANE
    best = 1
    for d in range(1, units + 1):
        if units % d == 0 and d * LANE <= cap:
            best = d
    return best * LANE


def _vmem_limit(*nbytes):
    """Explicit scoped-VMEM budget: double everything + headroom, clamped so it is valid on
    v5e/v6e (128 MiB physical) and v7x (64 MiB physical)."""
    need = 2 * int(sum(nbytes)) + (4 << 20)
    return int(min(max(need, 8 << 20), 48 << 20))


def fold_bn(p):
    s = p["gamma"] / jnp.sqrt(p["var"] + BN_EPS)
    t = (p["b"] - p["mean"]) * s + p["beta"]
    return s, t


# ----------------------------- Pallas kernels ---------------------------------
def _first_deconv_kernel(x_ref, w_ref, t_ref, o_ref):
    # (N, Cin) @ (Cin, col_tile) bf16 matmul (BN scale pre-folded into W) + shift + ReLU.
    z = jnp.dot(x_ref[...], w_ref[...], preferred_element_type=jnp.float32)
    o_ref[...] = jnp.maximum(z + t_ref[...], 0.0).astype(o_ref.dtype)


def first_deconv_layer(x_nchw, p):
    """ConvTranspose2d(Cin, Cout, (8,8), padding=0) on a 1x1 input, + BN + ReLU."""
    n, cin, h, w = x_nchw.shape
    assert h == 1 and w == 1
    wgt = p["w"]                                    # (Cin, Cout, 8, 8)
    cout, kh, kw = wgt.shape[1], wgt.shape[2], wgt.shape[3]
    scale, shift = fold_bn(p)
    cols = cout * kh * kw
    assert cols % LANE == 0
    col_tile = _pick_tile(cols, FIRST_COL_TILE)
    # columns ordered (co, ky, kx), co slow; fold the BN scale into the weight columns
    wr = (wgt.reshape(cin, cols) * jnp.repeat(scale, kh * kw)[None, :]).astype(ACT_DTYPE)
    t_cols = jnp.repeat(shift, kh * kw)[None, :]    # (1, cols) f32 shift
    x2 = x_nchw.reshape(n, cin).astype(ACT_DTYPE)
    vlim = _vmem_limit(n * cin * 2, cin * col_tile * 2, col_tile * 4, n * col_tile * 2)
    # TODO(synk): at CS=1 add a K grid axis + f32 VMEM accumulator (weight = 256 MB bf16).
    out = pl.pallas_call(
        _first_deconv_kernel,
        out_shape=jax.ShapeDtypeStruct((n, cols), ACT_DTYPE),
        grid_spec=pltpu.PrefetchScalarGridSpec(
            num_scalar_prefetch=0,
            grid=(cols // col_tile,),
            in_specs=[
                pl.BlockSpec((n, cin), lambda j: (0, 0)),          # resident input
                pl.BlockSpec((cin, col_tile), lambda j: (0, j)),   # streamed weight tiles
                pl.BlockSpec((1, col_tile), lambda j: (0, j)),     # streamed shift tiles
            ],
            out_specs=pl.BlockSpec((n, col_tile), lambda j: (0, j)),
        ),
        compiler_params=pltpu.CompilerParams(
            dimension_semantics=("parallel",),
            vmem_limit_bytes=vlim,
        ),
    )(x2, wr, t_cols)
    return out.reshape(n, cout, kh, kw)             # (N, Cout, 8, 8) bf16


def _make_conv3_kernel(offsets, cin, ltile, activation):
    """Per (sample, lane-tile): build the (9*Cin, Ltile) im2col block once, then ONE fused
    K=9*Cin MXU matmul + folded-BN shift + activation, lane-dense store."""
    def kernel(a_ref, b_ref, w_ref, s_ref, o_ref, halo_ref, col_ref):
        hpad = halo_ref.shape[1] - ltile
        # assemble the haloed lane window (both copies are lane-aligned)
        halo_ref[:, :ltile] = a_ref[0]
        halo_ref[:, ltile:] = b_ref[0, :, :hpad]
        # im2col: 9 statically-offset shifted views stacked along the sublane axis
        for t, off in enumerate(offsets):
            col_ref[t * cin:(t + 1) * cin, :] = halo_ref[:, off:off + ltile]
        # single fused MXU matmul, K = 9*Cin, f32 accumulation
        y = jnp.dot(w_ref[...], col_ref[...], preferred_element_type=jnp.float32)
        y = y + s_ref[...]
        if activation == "relu":
            y = jnp.maximum(y, 0.0)
        elif activation == "sigmoid":
            y = jax.nn.sigmoid(y)
        o_ref[0] = y.astype(o_ref.dtype)
    return kernel


def conv3_flat_pallas(x_flat, w2d, shift, offsets, lout_padded, ltile, hpad, activation):
    """x_flat: (N, Cin, lout_padded + ltile) bf16 padded flat plane;
    w2d: (Cout, 9*Cin) bf16 (flipped taps, BN scale folded); shift: (Cout,) f32."""
    n, cin, lin = x_flat.shape
    cout, kcin = w2d.shape
    ntiles = lout_padded // ltile
    assert lin == lout_padded + ltile
    kernel = _make_conv3_kernel(tuple(offsets), cin, ltile, activation)
    vlim = _vmem_limit(
        2 * 2 * cin * ltile * 2,        # a + b input blocks, double buffered (bf16)
        2 * cout * ltile * 2,           # output block, double buffered (bf16)
        cout * kcin * 2 + cout * 4,     # resident weights + shift
        cin * (ltile + hpad) * 2,       # halo scratch
        kcin * ltile * 2,               # im2col scratch
    )
    return pl.pallas_call(
        kernel,
        out_shape=jax.ShapeDtypeStruct((n, cout, lout_padded), ACT_DTYPE),
        grid_spec=pltpu.PrefetchScalarGridSpec(
            num_scalar_prefetch=0,
            grid=(n, ntiles),
            in_specs=[
                pl.BlockSpec((1, cin, ltile), lambda i, j: (i, 0, j)),       # lane tile j
                pl.BlockSpec((1, cin, ltile), lambda i, j: (i, 0, j + 1)),   # halo tile j+1
                pl.BlockSpec((cout, kcin), lambda i, j: (0, 0)),             # resident weights
                pl.BlockSpec((cout, 1), lambda i, j: (0, 0)),                # resident shift
            ],
            out_specs=pl.BlockSpec((1, cout, ltile), lambda i, j: (i, 0, j)),
            scratch_shapes=[
                pltpu.VMEM((cin, ltile + hpad), ACT_DTYPE),   # haloed window
                pltpu.VMEM((kcin, ltile), ACT_DTYPE),         # im2col block
            ],
        ),
        compiler_params=pltpu.CompilerParams(
            dimension_semantics=("parallel", "parallel"),
            vmem_limit_bytes=vlim,
        ),
    )(x_flat, x_flat, w2d, shift[:, None])


def _make_conv1_kernel(activation):
    def kernel(x_ref, w_ref, s_ref, o_ref):
        y = jnp.dot(w_ref[...], x_ref[0], preferred_element_type=jnp.float32)
        y = y + s_ref[...]
        if activation == "relu":
            y = jnp.maximum(y, 0.0)
        elif activation == "sigmoid":
            y = jax.nn.sigmoid(y)
        o_ref[0] = y.astype(o_ref.dtype)
    return kernel


def conv1_flat_pallas(x_flat, w2d, shift, lout_padded, ltile, activation, out_dtype):
    n, cin, lin = x_flat.shape
    cout = w2d.shape[0]
    assert lin == lout_padded
    ntiles = lout_padded // ltile
    kernel = _make_conv1_kernel(activation)
    vlim = _vmem_limit(2 * cin * ltile * 2,
                       2 * cout * ltile * jnp.dtype(out_dtype).itemsize,
                       cout * cin * 2 + cout * 4)
    return pl.pallas_call(
        kernel,
        out_shape=jax.ShapeDtypeStruct((n, cout, lout_padded), out_dtype),
        grid_spec=pltpu.PrefetchScalarGridSpec(
            num_scalar_prefetch=0,
            grid=(n, ntiles),
            in_specs=[
                pl.BlockSpec((1, cin, ltile), lambda i, j: (i, 0, j)),
                pl.BlockSpec((cout, cin), lambda i, j: (0, 0)),
                pl.BlockSpec((cout, 1), lambda i, j: (0, 0)),
            ],
            out_specs=pl.BlockSpec((1, cout, ltile), lambda i, j: (i, 0, j)),
        ),
        compiler_params=pltpu.CompilerParams(
            dimension_semantics=("parallel", "parallel"),
            vmem_limit_bytes=vlim,
        ),
    )(x_flat, w2d, shift[:, None])


# ----------------------------- glue (plain JAX) --------------------------------
def convt_bn_act(x_nchw, p, k, activation, use_bn):
    """ConvTranspose2d(k, stride=1, pad=k//2) + (folded) BN + activation."""
    n, cin, h, w = x_nchw.shape
    wgt = p["w"]                                    # (Cin, Cout, k, k) f32
    cout = wgt.shape[1]
    if use_bn:
        scale, shift = fold_bn(p)
    else:
        scale = jnp.ones((cout,), jnp.float32)
        shift = p["b"]

    if k == 3:
        # ConvTranspose2d(3x3, stride 1, pad 1) == correlation with the flipped kernel.
        pw = w + 2                                  # padded width
        lout = h * pw                               # flat span (wrap columns cropped below)
        lout_padded = _round_up(lout, LANE)         # lane-dense output
        ltile = _pick_tile(lout_padded, LTILE_MAX)
        hneed = 2 * pw + 2                          # farthest tap offset
        assert ltile >= hneed
        hpad = _round_up(hneed, LANE)
        lin_padded = lout_padded + ltile            # room for the j+1 halo block
        assert lin_padded >= (h + 2) * pw
        offsets = tuple(a * pw + b for a in range(3) for b in range(3))
        # flipped taps, tap-major columns, BN scale folded in -> (Cout, 9*Cin)
        w2d = (jnp.flip(wgt, axis=(2, 3)).transpose(1, 2, 3, 0).reshape(cout, 9 * cin)
               * scale[:, None]).astype(ACT_DTYPE)
        # zero-padded plane, flattened, lane-padded (XLA fuses this with the unpool mask)
        xp = jnp.pad(x_nchw, ((0, 0), (0, 0), (1, 1), (1, 1))).reshape(n, cin, (h + 2) * pw)
        x_flat = jnp.pad(xp, ((0, 0), (0, 0), (0, lin_padded - (h + 2) * pw))).astype(ACT_DTYPE)
        out = conv3_flat_pallas(x_flat, w2d, shift, offsets, lout_padded, ltile, hpad,
                                activation)
        # crop lane-padding tail + wrap columns: flat q = y*(w+2) + x, keep x < w
        return out[:, :, :lout].reshape(n, cout, h, pw)[:, :, :, :w]

    else:  # 1x1 conv (+ sigmoid), no spatial padding needed
        lout = h * w
        lout_padded = _round_up(lout, LANE)
        ltile = _pick_tile(lout_padded, LTILE_MAX)
        w2d = (wgt.transpose(1, 2, 3, 0).reshape(cout, cin) * scale[:, None]).astype(ACT_DTYPE)
        x_flat = x_nchw.reshape(n, cin, lout)
        x_flat = jnp.pad(x_flat, ((0, 0), (0, 0), (0, lout_padded - lout))).astype(ACT_DTYPE)
        out = conv1_flat_pallas(x_flat, w2d, shift, lout_padded, ltile, activation,
                                jnp.float32)
        return out[:, :, :lout].reshape(n, cout, h, w)


def max_unpool2x2(x_nchw, idx_nchw):
    """MaxUnpool2d(2, stride=2): out[y, x] = x[y//2, x//2] iff idx[y//2, x//2] == y*2W + x.

    Left to XLA on purpose: it is a pure elementwise mask after a 2x nearest upsample and
    fuses with the pad/flatten that produces the next conv kernel's bf16 input.
    TODO(synk): fold this mask into the consuming conv kernel to drop the HBM round trip.
    """
    n, c, h, w = x_nchw.shape
    ho, wo = 2 * h, 2 * w
    xu = jnp.repeat(jnp.repeat(x_nchw, 2, axis=2), 2, axis=3)
    iu = jnp.repeat(jnp.repeat(idx_nchw, 2, axis=2), 2, axis=3)
    pos = (jnp.arange(ho, dtype=jnp.int32)[:, None] * wo
           + jnp.arange(wo, dtype=jnp.int32)[None, :])
    return jnp.where(iu == pos[None, None], xu, jnp.array(0, x_nchw.dtype))


# ----------------------------- parameters --------------------------------------
def init_convt(key, cin, cout, kh, kw, bn):
    # kaiming_normal_(mode='fan_out', nonlinearity='relu') on a ConvTranspose2d weight
    # of shape (Cin, Cout, kH, kW): fan_out = Cin * kH * kW (PyTorch convention).
    std = (2.0 / (cin * kh * kw)) ** 0.5
    p = {
        "w": std * jax.random.normal(key, (cin, cout, kh, kw), jnp.float32),
        "b": jnp.zeros((cout,), jnp.float32),
    }
    if bn:
        p.update(
            gamma=jnp.ones((cout,), jnp.float32),
            beta=jnp.zeros((cout,), jnp.float32),
            mean=jnp.zeros((cout,), jnp.float32),
            var=jnp.ones((cout,), jnp.float32),
        )
    return p


def init_params(key):
    key, k0 = jax.random.split(key)
    params = {"first": init_convt(k0, C4096, C512, 8, 8, bn=True), "convs": []}
    for item in LAYOUT:
        if item[0] == "conv3":
            key, k = jax.random.split(key)
            params["convs"].append(init_convt(k, item[1], item[2], 3, 3, bn=True))
        elif item[0] == "conv1":
            key, k = jax.random.split(key)
            params["convs"].append(init_convt(k, item[1], item[2], 1, 1, bn=False))
    return params


def make_pool_indices(key, n):
    # Indices as produced by MaxPool2d(2, stride=2, return_indices=True):
    # flat index into the (2H, 2W) plane, within each 2x2 window.
    shapes = {
        "pool1": (n, C64, 128, 128),   # consumed last by the decoder
        "pool2": (n, C128, 64, 64),
        "pool3": (n, C256, 32, 32),
        "pool4": (n, C512, 16, 16),
        "pool5": (n, C512, 8, 8),      # consumed first by the decoder
    }
    d = {}
    for name, shp in shapes.items():
        key, k1, k2 = jax.random.split(key, 3)
        _, _, h, w = shp
        dy = jax.random.randint(k1, shp, 0, 2)
        dx = jax.random.randint(k2, shp, 0, 2)
        hh = jnp.arange(h)[None, None, :, None]
        ww = jnp.arange(w)[None, None, None, :]
        d[name] = ((2 * hh + dy) * (2 * w) + (2 * ww + dx)).astype(jnp.int32)
    return d


# ----------------------------- forward pass -------------------------------------
def decoder_forward(x, params, pool_indices):
    """x: (N, C4096, 1, 1) NCHW  ->  (N, 1, 256, 256) NCHW (f32, sigmoid)."""
    keys = list(pool_indices.keys())
    h = first_deconv_layer(x, params["first"])      # (N, C512, 8, 8) bf16
    ci = 0
    for item in LAYOUT:
        if item[0] == "unpool":
            h = max_unpool2x2(h, pool_indices[keys.pop(-1)])
        elif item[0] == "conv3":
            h = convt_bn_act(h, params["convs"][ci], k=3, activation="relu", use_bn=True)
            ci += 1
        else:  # conv1 + sigmoid, no BN, f32 output
            h = convt_bn_act(h, params["convs"][ci], k=1, activation="sigmoid", use_bn=False)
            ci += 1
    return h


# ----------------------------- demo ---------------------------------------------
if __name__ == "__main__":
    key = jax.random.PRNGKey(0)
    kp, kx, ki = jax.random.split(key, 3)

    N = 2
    params = init_params(kp)
    x = jax.random.normal(kx, (N, C4096, 1, 1), jnp.float32)
    pool_indices = make_pool_indices(ki, N)

    fwd = jax.jit(decoder_forward)
    out = jax.block_until_ready(fwd(x, params, pool_indices))

    assert out.shape == (N, 1, 256, 256), out.shape
    assert out.dtype == jnp.float32
    assert bool(jnp.all(jnp.isfinite(out)))
    assert bool(jnp.all((out >= 0.0) & (out <= 1.0)))  # sigmoid output range
    print("KERNEL_OK")
</pallas_src>

<mosaic_0001>
module attributes {stable_mosaic.version = 11 : i64} {
  func.func @_first_deconv_kernel(%arg0: i32, %arg1: memref<2x256xbf16, #tpu.memory_space<vmem>>, %arg2: memref<256x512xbf16, #tpu.memory_space<vmem>>, %arg3: memref<1x512xf32, #tpu.memory_space<vmem>>, %arg4: memref<2x512xbf16, #tpu.memory_space<vmem>>) attributes {dimension_semantics = [#tpu.dimension_semantics<parallel>], iteration_bounds = array<i64: 4>, scalar_prefetch = 0 : i64, scratch_operands = 0 : i64, tpu.core_type = #tpu.core_type<tc>, window_params = [{pipeline_mode = #tpu.pipeline_mode<synchronous>, transform_indices = @transform_0, window_bounds = array<i64: 2, 256>}, {transform_indices = @transform_1, window_bounds = array<i64: 256, 512>}, {transform_indices = @transform_2, window_bounds = array<i64: 1, 512>}, {transform_indices = @transform_3, window_bounds = array<i64: 2, 512>}]} {
    %c0 = arith.constant 0 : index
    %c0_0 = arith.constant 0 : index
    %0 = vector.load %arg1[%c0, %c0_0] : memref<2x256xbf16, #tpu.memory_space<vmem>>, vector<2x256xbf16>
    %c0_1 = arith.constant 0 : index
    %c0_2 = arith.constant 0 : index
    %1 = vector.load %arg2[%c0_1, %c0_2] : memref<256x512xbf16, #tpu.memory_space<vmem>>, vector<256x512xbf16>
    %cst = arith.constant dense<0.000000e+00> : vector<2x512xf32>
    %2 = tpu.matmul %0, %1, %cst {dimension_numbers = #tpu.dot_dimension_numbers<[1], [0], [0], [1], [0, 0, 1, 1], [], []>} : vector<2x256xbf16>, vector<256x512xbf16>, vector<2x512xf32> -> vector<2x512xf32>
    %c0_3 = arith.constant 0 : index
    %c0_4 = arith.constant 0 : index
    %3 = vector.load %arg3[%c0_3, %c0_4] : memref<1x512xf32, #tpu.memory_space<vmem>>, vector<1x512xf32>
    %4 = vector.broadcast %3 : vector<1x512xf32> to vector<2x512xf32>
    %5 = arith.addf %2, %4 : vector<2x512xf32>
    %cst_5 = arith.constant 0.000000e+00 : f32
    %6 = vector.broadcast %cst_5 : f32 to vector<2x512xf32>
    %7 = arith.maximumf %5, %6 : vector<2x512xf32>
    %8 = arith.truncf %7 : vector<2x512xf32> to vector<2x512xbf16>
    %c0_6 = arith.constant 0 : index
    %c0_7 = arith.constant 0 : index
    %9 = vector.load %arg4[%c0_6, %c0_7] : memref<2x512xbf16, #tpu.memory_space<vmem>>, vector<2x512xbf16>
    tpu.vector_store %arg4[%c0_6, %c0_7], %8 {strides = array<i32>} : memref<2x512xbf16, #tpu.memory_space<vmem>>, vector<2x512xbf16>,
    return
  }
  func.func @transform_0(%arg0: i32) -> (i32, i32) {
    %c0_i32 = arith.constant 0 : i32
    %c0_i32_0 = arith.constant 0 : i32
    %c0_i32_1 = arith.constant 0 : i32
    return %c0_i32, %c0_i32_0 : i32, i32
  }
  func.func @transform_1(%arg0: i32) -> (i32, i32) {
    %c0_i32 = arith.constant 0 : i32
    %c0_i32_0 = arith.constant 0 : i32
    return %c0_i32, %arg0 : i32, i32
  }
  func.func @transform_2(%arg0: i32) -> (i32, i32) {
    %c0_i32 = arith.constant 0 : i32
    %c0_i32_0 = arith.constant 0 : i32
    return %c0_i32, %arg0 : i32, i32
  }
  func.func @transform_3(%arg0: i32) -> (i32, i32) {
    %c0_i32 = arith.constant 0 : i32
    %c0_i32_0 = arith.constant 0 : i32
    return %c0_i32, %arg0 : i32, i32
  }
}

module attributes {stable_mosaic.version = 11 : i64} {
  func.func @kernel(%arg0: i32, %arg1: i32, %arg2: memref<1x32x384xbf16, #tpu.memory_space<vmem>>, %arg3: memref<1x32x384xbf16, #tpu.memory_space<vmem>>, %arg4: memref<32x288xbf16, #tpu.memory_space<vmem>>, %arg5: memref<32x1xf32, #tpu.memory_space<vmem>>, %arg6: memref<1x32x384xbf16, #tpu.memory_space<vmem>>, %arg7: memref<32x512xbf16, #tpu.memory_space<vmem>>, %arg8: memref<288x384xbf16, #tpu.memory_space<vmem>>) attributes {dimension_semantics = [#tpu.dimension_semantics<parallel>, #tpu.dimension_semantics<parallel>], iteration_bounds = array<i64: 2, 1>, scalar_prefetch = 0 : i64, scratch_operands = 2 : i64, tpu.core_type = #tpu.core_type<tc>, window_params = [{transform_indices = @transform_0, window_bounds = array<i64: 1, 32, 384>}, {transform_indices = @transform_1, window_bounds = array<i64: 1, 32, 384>}, {pipeline_mode = #tpu.pipeline_mode<synchronous>, transform_indices = @transform_2, window_bounds = array<i64: 32, 288>}, {pipeline_mode = #tpu.pipeline_mode<synchronous>, transform_indices = @transform_3, window_bounds = array<i64: 32, 1>}, {transform_indices = @transform_4, window_bounds = array<i64: 1, 32, 384>}]} {
    %c0 = arith.constant 0 : index
    %c0_0 = arith.constant 0 : index
    %c0_1 = arith.constant 0 : index
    %0 = vector.load %arg2[%c0, %c0_0, %c0_1] : memref<1x32x384xbf16, #tpu.memory_space<vmem>>, vector<1x32x384xbf16>
    %1 = vector.shape_cast %0 : vector<1x32x384xbf16> to vector<32x384xbf16>
    %c0_2 = arith.constant 0 : index
    %c0_3 = arith.constant 0 : index
    %2 = vector.load %arg7[%c0_2, %c0_3] : memref<32x512xbf16, #tpu.memory_space<vmem>>, vector<32x384xbf16>
    tpu.vector_store %arg7[%c0_2, %c0_3], %1 {strides = array<i32>} : memref<32x512xbf16, #tpu.memory_space<vmem>>, vector<32x384xbf16>,
    %c0_4 = arith.constant 0 : index
    %c0_5 = arith.constant 0 : index
    %c0_6 = arith.constant 0 : index
    %3 = vector.load %arg3[%c0_4, %c0_5, %c0_6] : memref<1x32x384xbf16, #tpu.memory_space<vmem>>, vector<1x32x128xbf16>
    %4 = vector.shape_cast %3 : vector<1x32x128xbf16> to vector<32x128xbf16>
    %c0_7 = arith.constant 0 : index
    %c384 = arith.constant 384 : index
    %5 = vector.load %arg7[%c0_7, %c384] : memref<32x512xbf16, #tpu.memory_space<vmem>>, vector<32x128xbf16>
    tpu.vector_store %arg7[%c0_7, %c384], %4 {strides = array<i32>} : memref<32x512xbf16, #tpu.memory_space<vmem>>, vector<32x128xbf16>,
    %c0_8 = arith.constant 0 : index
    %c0_9 = arith.constant 0 : index
    %6 = vector.load %arg7[%c0_8, %c0_9] : memref<32x512xbf16, #tpu.memory_space<vmem>>, vector<32x384xbf16>
    %c0_10 = arith.constant 0 : index
    %c0_11 = arith.constant 0 : index
    %7 = vector.load %arg8[%c0_10, %c0_11] : memref<288x384xbf16, #tpu.memory_space<vmem>>, vector<32x384xbf16>
    tpu.vector_store %arg8[%c0_10, %c0_11], %6 {strides = array<i32>} : memref<288x384xbf16, #tpu.memory_space<vmem>>, vector<32x384xbf16>,
    %c0_12 = arith.constant 0 : index
    %c1 = arith.constant 1 : index
    %8 = vector.load %arg7[%c0_12, %c1] : memref<32x512xbf16, #tpu.memory_space<vmem>>, vector<32x384xbf16>
    %c32 = arith.constant 32 : index
    %c0_13 = arith.constant 0 : index
    %9 = vector.load %arg8[%c32, %c0_13] : memref<288x384xbf16, #tpu.memory_space<vmem>>, vector<32x384xbf16>
    tpu.vector_store %arg8[%c32, %c0_13], %8 {strides = array<i32>} : memref<288x384xbf16, #tpu.memory_space<vmem>>, vector<32x384xbf16>,
    %c0_14 = arith.constant 0 : index
    %c2 = arith.constant 2 : index
    %10 = vector.load %arg7[%c0_14, %c2] : memref<32x512xbf16, #tpu.memory_space<vmem>>, vector<32x384xbf16>
    %c64 = arith.constant 64 : index
    %c0_15 = arith.constant 0 : index
    %11 = vector.load %arg8[%c64, %c0_15] : memref<288x384xbf16, #tpu.memory_space<vmem>>, vector<32x384xbf16>
    tpu.vector_store %arg8[%c64, %c0_15], %10 {strides = array<i32>} : memref<288x384xbf16, #tpu.memory_space<vmem>>, vector<32x384xbf16>,
    %c0_16 = arith.constant 0 : index
    %c18 = arith.constant 18 : index
    %12 = vector.load %arg7[%c0_16, %c18] : memref<32x512xbf16, #tpu.memory_space<vmem>>, vector<32x384xbf16>
    %c96 = arith.constant 96 : index
    %c0_17 = arith.constant 0 : index
    %13 = vector.load %arg8[%c96, %c0_17] : memref<288x384xbf16, #tpu.memory_space<vmem>>, vector<32x384xbf16>
    tpu.vector_store %arg8[%c96, %c0_17], %12 {strides = array<i32>} : memref<288x384xbf16, #tpu.memory_space<vmem>>, vector<32x384xbf16>,
    %c0_18 = arith.constant 0 : index
    %c19 = arith.constant 19 : index
    %14 = vector.load %arg7[%c0_18, %c19] : memref<32x512xbf16, #tpu.memory_space<vmem>>, vector<32x384xbf16>
    %c128 = arith.constant 128 : index
    %c0_19 = arith.constant 0 : index
    %15 = vector.load %arg8[%c128, %c0_19] : memref<288x384xbf16, #tpu.memory_space<vmem>>, vector<32x384xbf16>
    tpu.vector_store %arg8[%c128, %c0_19], %14 {strides = array<i32>} : memref<288x384xbf16, #tpu.memory_space<vmem>>, vector<32x384xbf16>,
    %c0_20 = arith.constant 0 : index
    %c20 = arith.constant 20 : index
    %16 = vector.load %arg7[%c0_20, %c20] : memref<32x512xbf16, #tpu.memory_space<vmem>>, vector<32x384xbf16>
    %c160 = arith.constant 160 : index
    %c0_21 = arith.constant 0 : index
    %17 = vector.load %arg8[%c160, %c0_21] : memref<288x384xbf16, #tpu.memory_space<vmem>>, vector<32x384xbf16>
    tpu.vector_store %arg8[%c160, %c0_21], %16 {strides = array<i32>} : memref<288x384xbf16, #tpu.memory_space<vmem>>, vector<32x384xbf16>,
    %c0_22 = arith.constant 0 : index
    %c36 = arith.constant 36 : index
    %18 = vector.load %arg7[%c0_22, %c36] : memref<32x512xbf16, #tpu.memory_space<vmem>>, vector<32x384xbf16>
    %c192 = arith.constant 192 : index
    %c0_23 = arith.constant 0 : index
    %19 = vector.load %arg8[%c192, %c0_23] : memref<288x384xbf16, #tpu.memory_space<vmem>>, vector<32x384xbf16>
    tpu.vector_store %arg8[%c192, %c0_23], %18 {strides = array<i32>} : memref<288x384xbf16, #tpu.memory_space<vmem>>, vector<32x384xbf16>,
    %c0_24 = arith.constant 0 : index
    %c37 = arith.constant 37 : index
    %20 = vector.load %arg7[%c0_24, %c37] : memref<32x512xbf16, #tpu.memory_space<vmem>>, vector<32x384xbf16>
    %c224 = arith.constant 224 : index
    %c0_25 = arith.constant 0 : index
    %21 = vector.load %arg8[%c224, %c0_25] : memref<288x384xbf16, #tpu.memory_space<vmem>>, vector<32x384xbf16>
    tpu.vector_store %arg8[%c224, %c0_25], %20 {strides = array<i32>} : memref<288x384xbf16, #tpu.memory_space<vmem>>, vector<32x384xbf16>,
    %c0_26 = arith.constant 0 : index
    %c38 = arith.constant 38 : index
    %22 = vector.load %arg7[%c0_26, %c38] : memref<32x512xbf16, #tpu.memory_space<vmem>>, vector<32x384xbf16>
    %c256 = arith.constant 256 : index
    %c0_27 = arith.constant 0 : index
    %23 = vector.load %arg8[%c256, %c0_27] : memref<288x384xbf16, #tpu.memory_space<vmem>>, vector<32x384xbf16>
    tpu.vector_store %arg8[%c256, %c0_27], %22 {strides = array<i32>} : memref<288x384xbf16, #tpu.memory_space<vmem>>, vector<32x384xbf16>,
    %c0_28 = arith.constant 0 : index
    %c0_29 = arith.constant 0 : index
    %24 = vector.load %arg4[%c0_28, %c0_29] : memref<32x288xbf16, #tpu.memory_space<vmem>>, vector<32x288xbf16>
    %c0_30 = arith.constant 0 : index
    %c0_31 = arith.constant 0 : index
    %25 = vector.load %arg8[%c0_30, %c0_31] : memref<288x384xbf16, #tpu.memory_space<vmem>>, vector<288x384xbf16>
    %cst = arith.constant dense<0.000000e+00> : vector<32x384xf32>
    %26 = tpu.matmul %24, %25, %cst {dimension_numbers = #tpu.dot_dimension_numbers<[1], [0], [0], [1], [0, 0, 1, 1], [], []>} : vector<32x288xbf16>, vector<288x384xbf16>, vector<32x384xf32> -> vector<32x384xf32>
    %c0_32 = arith.constant 0 : index
    %c0_33 = arith.constant 0 : index
    %27 = vector.load %arg5[%c0_32, %c0_33] : memref<32x1xf32, #tpu.memory_space<vmem>>, vector<32x1xf32>
    %28 = vector.broadcast %27 : vector<32x1xf32> to vector<32x384xf32>
    %29 = arith.addf %26, %28 : vector<32x384xf32>
    %cst_34 = arith.constant 0.000000e+00 : f32
    %30 = vector.broadcast %cst_34 : f32 to vector<32x384xf32>
    %31 = arith.maximumf %29, %30 : vector<32x384xf32>
    %32 = arith.truncf %31 : vector<32x384xf32> to vector<32x384xbf16>
    %c0_35 = arith.constant 0 : index
    %c0_36 = arith.constant 0 : index
    %c0_37 = arith.constant 0 : index
    %33 = vector.load %arg6[%c0_35, %c0_36, %c0_37] : memref<1x32x384xbf16, #tpu.memory_space<vmem>>, vector<1x32x384xbf16>
    %34 = vector.shape_cast %33 : vector<1x32x384xbf16> to vector<32x384xbf16>
    %35 = vector.shape_cast %32 : vector<32x384xbf16> to vector<1x32x384xbf16>
    tpu.vector_store %arg6[%c0_35, %c0_36, %c0_37], %35 {strides = array<i32>} : memref<1x32x384xbf16, #tpu.memory_space<vmem>>, vector<1x32x384xbf16>,
    return
  }
  func.func @transform_0(%arg0: i32, %arg1: i32) -> (i32, i32, i32) {
    %c0_i32 = arith.constant 0 : i32
    %c0_i32_0 = arith.constant 0 : i32
    return %arg0, %c0_i32, %arg1 : i32, i32, i32
  }
  func.func @transform_1(%arg0: i32, %arg1: i32) -> (i32, i32, i32) {
    %c1_i32 = arith.constant 1 : i32
    %0 = arith.addi %arg1, %c1_i32 : i32
    %c0_i32 = arith.constant 0 : i32
    %c0_i32_0 = arith.constant 0 : i32
    return %arg0, %c0_i32, %0 : i32, i32, i32
  }
  func.func @transform_2(%arg0: i32, %arg1: i32) -> (i32, i32) {
    %c0_i32 = arith.constant 0 : i32
    %c0_i32_0 = arith.constant 0 : i32
    %c0_i32_1 = arith.constant 0 : i32
    return %c0_i32, %c0_i32_0 : i32, i32
  }
  func.func @transform_3(%arg0: i32, %arg1: i32) -> (i32, i32) {
    %c0_i32 = arith.constant 0 : i32
    %c0_i32_0 = arith.constant 0 : i32
    %c0_i32_1 = arith.constant 0 : i32
    return %c0_i32, %c0_i32_0 : i32, i32
  }
  func.func @transform_4(%arg0: i32, %arg1: i32) -> (i32, i32, i32) {
    %c0_i32 = arith.constant 0 : i32
    %c0_i32_0 = arith.constant 0 : i32
    return %arg0, %c0_i32, %arg1 : i32, i32, i32
  }
}

module attributes {stable_mosaic.version = 11 : i64} {
  func.func @kernel(%arg0: i32, %arg1: i32, %arg2: memref<1x32x1152xbf16, #tpu.memory_space<vmem>>, %arg3: memref<1x32x1152xbf16, #tpu.memory_space<vmem>>, %arg4: memref<32x288xbf16, #tpu.memory_space<vmem>>, %arg5: memref<32x1xf32, #tpu.memory_space<vmem>>, %arg6: memref<1x32x1152xbf16, #tpu.memory_space<vmem>>, %arg7: memref<32x1280xbf16, #tpu.memory_space<vmem>>, %arg8: memref<288x1152xbf16, #tpu.memory_space<vmem>>) attributes {dimension_semantics = [#tpu.dimension_semantics<parallel>, #tpu.dimension_semantics<parallel>], iteration_bounds = array<i64: 2, 1>, scalar_prefetch = 0 : i64, scratch_operands = 2 : i64, tpu.core_type = #tpu.core_type<tc>, window_params = [{transform_indices = @transform_0, window_bounds = array<i64: 1, 32, 1152>}, {transform_indices = @transform_1, window_bounds = array<i64: 1, 32, 1152>}, {pipeline_mode = #tpu.pipeline_mode<synchronous>, transform_indices = @transform_2, window_bounds = array<i64: 32, 288>}, {pipeline_mode = #tpu.pipeline_mode<synchronous>, transform_indices = @transform_3, window_bounds = array<i64: 32, 1>}, {transform_indices = @transform_4, window_bounds = array<i64: 1, 32, 1152>}]} {
    %c0 = arith.constant 0 : index
    %c0_0 = arith.constant 0 : index
    %c0_1 = arith.constant 0 : index
    %0 = vector.load %arg2[%c0, %c0_0, %c0_1] : memref<1x32x1152xbf16, #tpu.memory_space<vmem>>, vector<1x32x1152xbf16>
    %1 = vector.shape_cast %0 : vector<1x32x1152xbf16> to vector<32x1152xbf16>
    %c0_2 = arith.constant 0 : index
    %c0_3 = arith.constant 0 : index
    %2 = vector.load %arg7[%c0_2, %c0_3] : memref<32x1280xbf16, #tpu.memory_space<vmem>>, vector<32x1152xbf16>
    tpu.vector_store %arg7[%c0_2, %c0_3], %1 {strides = array<i32>} : memref<32x1280xbf16, #tpu.memory_space<vmem>>, vector<32x1152xbf16>,
    %c0_4 = arith.constant 0 : index
    %c0_5 = arith.constant 0 : index
    %c0_6 = arith.constant 0 : index
    %3 = vector.load %arg3[%c0_4, %c0_5, %c0_6] : memref<1x32x1152xbf16, #tpu.memory_space<vmem>>, vector<1x32x128xbf16>
    %4 = vector.shape_cast %3 : vector<1x32x128xbf16> to vector<32x128xbf16>
    %c0_7 = arith.constant 0 : index
    %c1152 = arith.constant 1152 : index
    %5 = vector.load %arg7[%c0_7, %c1152] : memref<32x1280xbf16, #tpu.memory_space<vmem>>, vector<32x128xbf16>
    tpu.vector_store %arg7[%c0_7, %c1152], %4 {strides = array<i32>} : memref<32x1280xbf16, #tpu.memory_space<vmem>>, vector<32x128xbf16>,
    %c0_8 = arith.constant 0 : index
    %c0_9 = arith.constant 0 : index
    %6 = vector.load %arg7[%c0_8, %c0_9] : memref<32x1280xbf16, #tpu.memory_space<vmem>>, vector<32x1152xbf16>
    %c0_10 = arith.constant 0 : index
    %c0_11 = arith.constant 0 : index
    %7 = vector.load %arg8[%c0_10, %c0_11] : memref<288x1152xbf16, #tpu.memory_space<vmem>>, vector<32x1152xbf16>
    tpu.vector_store %arg8[%c0_10, %c0_11], %6 {strides = array<i32>} : memref<288x1152xbf16, #tpu.memory_space<vmem>>, vector<32x1152xbf16>,
    %c0_12 = arith.constant 0 : index
    %c1 = arith.constant 1 : index
    %8 = vector.load %arg7[%c0_12, %c1] : memref<32x1280xbf16, #tpu.memory_space<vmem>>, vector<32x1152xbf16>
    %c32 = arith.constant 32 : index
    %c0_13 = arith.constant 0 : index
    %9 = vector.load %arg8[%c32, %c0_13] : memref<288x1152xbf16, #tpu.memory_space<vmem>>, vector<32x1152xbf16>
    tpu.vector_store %arg8[%c32, %c0_13], %8 {strides = array<i32>} : memref<288x1152xbf16, #tpu.memory_space<vmem>>, vector<32x1152xbf16>,
    %c0_14 = arith.constant 0 : index
    %c2 = arith.constant 2 : index
    %10 = vector.load %arg7[%c0_14, %c2] : memref<32x1280xbf16, #tpu.memory_space<vmem>>, vector<32x1152xbf16>
    %c64 = arith.constant 64 : index
    %c0_15 = arith.constant 0 : index
    %11 = vector.load %arg8[%c64, %c0_15] : memref<288x1152xbf16, #tpu.memory_space<vmem>>, vector<32x1152xbf16>
    tpu.vector_store %arg8[%c64, %c0_15], %10 {strides = array<i32>} : memref<288x1152xbf16, #tpu.memory_space<vmem>>, vector<32x1152xbf16>,
    %c0_16 = arith.constant 0 : index
    %c34 = arith.constant 34 : index
    %12 = vector.load %arg7[%c0_16, %c34] : memref<32x1280xbf16, #tpu.memory_space<vmem>>, vector<32x1152xbf16>
    %c96 = arith.constant 96 : index
    %c0_17 = arith.constant 0 : index
    %13 = vector.load %arg8[%c96, %c0_17] : memref<288x1152xbf16, #tpu.memory_space<vmem>>, vector<32x1152xbf16>
    tpu.vector_store %arg8[%c96, %c0_17], %12 {strides = array<i32>} : memref<288x1152xbf16, #tpu.memory_space<vmem>>, vector<32x1152xbf16>,
    %c0_18 = arith.constant 0 : index
    %c35 = arith.constant 35 : index
    %14 = vector.load %arg7[%c0_18, %c35] : memref<32x1280xbf16, #tpu.memory_space<vmem>>, vector<32x1152xbf16>
    %c128 = arith.constant 128 : index
    %c0_19 = arith.constant 0 : index
    %15 = vector.load %arg8[%c128, %c0_19] : memref<288x1152xbf16, #tpu.memory_space<vmem>>, vector<32x1152xbf16>
    tpu.vector_store %arg8[%c128, %c0_19], %14 {strides = array<i32>} : memref<288x1152xbf16, #tpu.memory_space<vmem>>, vector<32x1152xbf16>,
    %c0_20 = arith.constant 0 : index
    %c36 = arith.constant 36 : index
    %16 = vector.load %arg7[%c0_20, %c36] : memref<32x1280xbf16, #tpu.memory_space<vmem>>, vector<32x1152xbf16>
    %c160 = arith.constant 160 : index
    %c0_21 = arith.constant 0 : index
    %17 = vector.load %arg8[%c160, %c0_21] : memref<288x1152xbf16, #tpu.memory_space<vmem>>, vector<32x1152xbf16>
    tpu.vector_store %arg8[%c160, %c0_21], %16 {strides = array<i32>} : memref<288x1152xbf16, #tpu.memory_space<vmem>>, vector<32x1152xbf16>,
    %c0_22 = arith.constant 0 : index
    %c68 = arith.constant 68 : index
    %18 = vector.load %arg7[%c0_22, %c68] : memref<32x1280xbf16, #tpu.memory_space<vmem>>, vector<32x1152xbf16>
    %c192 = arith.constant 192 : index
    %c0_23 = arith.constant 0 : index
    %19 = vector.load %arg8[%c192, %c0_23] : memref<288x1152xbf16, #tpu.memory_space<vmem>>, vector<32x1152xbf16>
    tpu.vector_store %arg8[%c192, %c0_23], %18 {strides = array<i32>} : memref<288x1152xbf16, #tpu.memory_space<vmem>>, vector<32x1152xbf16>,
    %c0_24 = arith.constant 0 : index
    %c69 = arith.constant 69 : index
    %20 = vector.load %arg7[%c0_24, %c69] : memref<32x1280xbf16, #tpu.memory_space<vmem>>, vector<32x1152xbf16>
    %c224 = arith.constant 224 : index
    %c0_25 = arith.constant 0 : index
    %21 = vector.load %arg8[%c224, %c0_25] : memref<288x1152xbf16, #tpu.memory_space<vmem>>, vector<32x1152xbf16>
    tpu.vector_store %arg8[%c224, %c0_25], %20 {strides = array<i32>} : memref<288x1152xbf16, #tpu.memory_space<vmem>>, vector<32x1152xbf16>,
    %c0_26 = arith.constant 0 : index
    %c70 = arith.constant 70 : index
    %22 = vector.load %arg7[%c0_26, %c70] : memref<32x1280xbf16, #tpu.memory_space<vmem>>, vector<32x1152xbf16>
    %c256 = arith.constant 256 : index
    %c0_27 = arith.constant 0 : index
    %23 = vector.load %arg8[%c256, %c0_27] : memref<288x1152xbf16, #tpu.memory_space<vmem>>, vector<32x1152xbf16>
    tpu.vector_store %arg8[%c256, %c0_27], %22 {strides = array<i32>} : memref<288x1152xbf16, #tpu.memory_space<vmem>>, vector<32x1152xbf16>,
    %c0_28 = arith.constant 0 : index
    %c0_29 = arith.constant 0 : index
    %24 = vector.load %arg4[%c0_28, %c0_29] : memref<32x288xbf16, #tpu.memory_space<vmem>>, vector<32x288xbf16>
    %c0_30 = arith.constant 0 : index
    %c0_31 = arith.constant 0 : index
    %25 = vector.load %arg8[%c0_30, %c0_31] : memref<288x1152xbf16, #tpu.memory_space<vmem>>, vector<288x1152xbf16>
    %cst = arith.constant dense<0.000000e+00> : vector<32x1152xf32>
    %26 = tpu.matmul %24, %25, %cst {dimension_numbers = #tpu.dot_dimension_numbers<[1], [0], [0], [1], [0, 0, 1, 1], [], []>} : vector<32x288xbf16>, vector<288x1152xbf16>, vector<32x1152xf32> -> vector<32x1152xf32>
    %c0_32 = arith.constant 0 : index
    %c0_33 = arith.constant 0 : index
    %27 = vector.load %arg5[%c0_32, %c0_33] : memref<32x1xf32, #tpu.memory_space<vmem>>, vector<32x1xf32>
    %28 = vector.broadcast %27 : vector<32x1xf32> to vector<32x1152xf32>
    %29 = arith.addf %26, %28 : vector<32x1152xf32>
    %cst_34 = arith.constant 0.000000e+00 : f32
    %30 = vector.broadcast %cst_34 : f32 to vector<32x1152xf32>
    %31 = arith.maximumf %29, %30 : vector<32x1152xf32>
    %32 = arith.truncf %31 : vector<32x1152xf32> to vector<32x1152xbf16>
    %c0_35 = arith.constant 0 : index
    %c0_36 = arith.constant 0 : index
    %c0_37 = arith.constant 0 : index
    %33 = vector.load %arg6[%c0_35, %c0_36, %c0_37] : memref<1x32x1152xbf16, #tpu.memory_space<vmem>>, vector<1x32x1152xbf16>
    %34 = vector.shape_cast %33 : vector<1x32x1152xbf16> to vector<32x1152xbf16>
    %35 = vector.shape_cast %32 : vector<32x1152xbf16> to vector<1x32x1152xbf16>
    tpu.vector_store %arg6[%c0_35, %c0_36, %c0_37], %35 {strides = array<i32>} : memref<1x32x1152xbf16, #tpu.memory_space<vmem>>, vector<1x32x1152xbf16>,
    return
  }
  func.func @transform_0(%arg0: i32, %arg1: i32) -> (i32, i32, i32) {
    %c0_i32 = arith.constant 0 : i32
    %c0_i32_0 = arith.constant 0 : i32
    return %arg0, %c0_i32, %arg1 : i32, i32, i32
  }
  func.func @transform_1(%arg0: i32, %arg1: i32) -> (i32, i32, i32) {
    %c1_i32 = arith.constant 1 : i32
    %0 = arith.addi %arg1, %c1_i32 : i32
    %c0_i32 = arith.constant 0 : i32
    %c0_i32_0 = arith.constant 0 : i32
    return %arg0, %c0_i32, %0 : i32, i32, i32
  }
  func.func @transform_2(%arg0: i32, %arg1: i32) -> (i32, i32) {
    %c0_i32 = arith.constant 0 : i32
    %c0_i32_0 = arith.constant 0 : i32
    %c0_i32_1 = arith.constant 0 : i32
    return %c0_i32, %c0_i32_0 : i32, i32
  }
  func.func @transform_3(%arg0: i32, %arg1: i32) -> (i32, i32) {
    %c0_i32 = arith.constant 0 : i32
    %c0_i32_0 = arith.constant 0 : i32
    %c0_i32_1 = arith.constant 0 : i32
    return %c0_i32, %c0_i32_0 : i32, i32
  }
  func.func @transform_4(%arg0: i32, %arg1: i32) -> (i32, i32, i32) {
    %c0_i32 = arith.constant 0 : i32
    %c0_i32_0 = arith.constant 0 : i32
    return %arg0, %c0_i32, %arg1 : i32, i32, i32
  }
}

module attributes {stable_mosaic.version = 11 : i64} {
  func.func @kernel(%arg0: i32, %arg1: i32, %arg2: memref<1x32x1152xbf16, #tpu.memory_space<vmem>>, %arg3: memref<1x32x1152xbf16, #tpu.memory_space<vmem>>, %arg4: memref<16x288xbf16, #tpu.memory_space<vmem>>, %arg5: memref<16x1xf32, #tpu.memory_space<vmem>>, %arg6: memref<1x16x1152xbf16, #tpu.memory_space<vmem>>, %arg7: memref<32x1280xbf16, #tpu.memory_space<vmem>>, %arg8: memref<288x1152xbf16, #tpu.memory_space<vmem>>) attributes {dimension_semantics = [#tpu.dimension_semantics<parallel>, #tpu.dimension_semantics<parallel>], iteration_bounds = array<i64: 2, 1>, scalar_prefetch = 0 : i64, scratch_operands = 2 : i64, tpu.core_type = #tpu.core_type<tc>, window_params = [{transform_indices = @transform_0, window_bounds = array<i64: 1, 32, 1152>}, {transform_indices = @transform_1, window_bounds = array<i64: 1, 32, 1152>}, {pipeline_mode = #tpu.pipeline_mode<synchronous>, transform_indices = @transform_2, window_bounds = array<i64: 16, 288>}, {pipeline_mode = #tpu.pipeline_mode<synchronous>, transform_indices = @transform_3, window_bounds = array<i64: 16, 1>}, {transform_indices = @transform_4, window_bounds = array<i64: 1, 16, 1152>}]} {
    %c0 = arith.constant 0 : index
    %c0_0 = arith.constant 0 : index
    %c0_1 = arith.constant 0 : index
    %0 = vector.load %arg2[%c0, %c0_0, %c0_1] : memref<1x32x1152xbf16, #tpu.memory_space<vmem>>, vector<1x32x1152xbf16>
    %1 = vector.shape_cast %0 : vector<1x32x1152xbf16> to vector<32x1152xbf16>
    %c0_2 = arith.constant 0 : index
    %c0_3 = arith.constant 0 : index
    %2 = vector.load %arg7[%c0_2, %c0_3] : memref<32x1280xbf16, #tpu.memory_space<vmem>>, vector<32x1152xbf16>
    tpu.vector_store %arg7[%c0_2, %c0_3], %1 {strides = array<i32>} : memref<32x1280xbf16, #tpu.memory_space<vmem>>, vector<32x1152xbf16>,
    %c0_4 = arith.constant 0 : index
    %c0_5 = arith.constant 0 : index
    %c0_6 = arith.constant 0 : index
    %3 = vector.load %arg3[%c0_4, %c0_5, %c0_6] : memref<1x32x1152xbf16, #tpu.memory_space<vmem>>, vector<1x32x128xbf16>
    %4 = vector.shape_cast %3 : vector<1x32x128xbf16> to vector<32x128xbf16>
    %c0_7 = arith.constant 0 : index
    %c1152 = arith.constant 1152 : index
    %5 = vector.load %arg7[%c0_7, %c1152] : memref<32x1280xbf16, #tpu.memory_space<vmem>>, vector<32x128xbf16>
    tpu.vector_store %arg7[%c0_7, %c1152], %4 {strides = array<i32>} : memref<32x1280xbf16, #tpu.memory_space<vmem>>, vector<32x128xbf16>,
    %c0_8 = arith.constant 0 : index
    %c0_9 = arith.constant 0 : index
    %6 = vector.load %arg7[%c0_8, %c0_9] : memref<32x1280xbf16, #tpu.memory_space<vmem>>, vector<32x1152xbf16>
    %c0_10 = arith.constant 0 : index
    %c0_11 = arith.constant 0 : index
    %7 = vector.load %arg8[%c0_10, %c0_11] : memref<288x1152xbf16, #tpu.memory_space<vmem>>, vector<32x1152xbf16>
    tpu.vector_store %arg8[%c0_10, %c0_11], %6 {strides = array<i32>} : memref<288x1152xbf16, #tpu.memory_space<vmem>>, vector<32x1152xbf16>,
    %c0_12 = arith.constant 0 : index
    %c1 = arith.constant 1 : index
    %8 = vector.load %arg7[%c0_12, %c1] : memref<32x1280xbf16, #tpu.memory_space<vmem>>, vector<32x1152xbf16>
    %c32 = arith.constant 32 : index
    %c0_13 = arith.constant 0 : index
    %9 = vector.load %arg8[%c32, %c0_13] : memref<288x1152xbf16, #tpu.memory_space<vmem>>, vector<32x1152xbf16>
    tpu.vector_store %arg8[%c32, %c0_13], %8 {strides = array<i32>} : memref<288x1152xbf16, #tpu.memory_space<vmem>>, vector<32x1152xbf16>,
    %c0_14 = arith.constant 0 : index
    %c2 = arith.constant 2 : index
    %10 = vector.load %arg7[%c0_14, %c2] : memref<32x1280xbf16, #tpu.memory_space<vmem>>, vector<32x1152xbf16>
    %c64 = arith.constant 64 : index
    %c0_15 = arith.constant 0 : index
    %11 = vector.load %arg8[%c64, %c0_15] : memref<288x1152xbf16, #tpu.memory_space<vmem>>, vector<32x1152xbf16>
    tpu.vector_store %arg8[%c64, %c0_15], %10 {strides = array<i32>} : memref<288x1152xbf16, #tpu.memory_space<vmem>>, vector<32x1152xbf16>,
    %c0_16 = arith.constant 0 : index
    %c34 = arith.constant 34 : index
    %12 = vector.load %arg7[%c0_16, %c34] : memref<32x1280xbf16, #tpu.memory_space<vmem>>, vector<32x1152xbf16>
    %c96 = arith.constant 96 : index
    %c0_17 = arith.constant 0 : index
    %13 = vector.load %arg8[%c96, %c0_17] : memref<288x1152xbf16, #tpu.memory_space<vmem>>, vector<32x1152xbf16>
    tpu.vector_store %arg8[%c96, %c0_17], %12 {strides = array<i32>} : memref<288x1152xbf16, #tpu.memory_space<vmem>>, vector<32x1152xbf16>,
    %c0_18 = arith.constant 0 : index
    %c35 = arith.constant 35 : index
    %14 = vector.load %arg7[%c0_18, %c35] : memref<32x1280xbf16, #tpu.memory_space<vmem>>, vector<32x1152xbf16>
    %c128 = arith.constant 128 : index
    %c0_19 = arith.constant 0 : index
    %15 = vector.load %arg8[%c128, %c0_19] : memref<288x1152xbf16, #tpu.memory_space<vmem>>, vector<32x1152xbf16>
    tpu.vector_store %arg8[%c128, %c0_19], %14 {strides = array<i32>} : memref<288x1152xbf16, #tpu.memory_space<vmem>>, vector<32x1152xbf16>,
    %c0_20 = arith.constant 0 : index
    %c36 = arith.constant 36 : index
    %16 = vector.load %arg7[%c0_20, %c36] : memref<32x1280xbf16, #tpu.memory_space<vmem>>, vector<32x1152xbf16>
    %c160 = arith.constant 160 : index
    %c0_21 = arith.constant 0 : index
    %17 = vector.load %arg8[%c160, %c0_21] : memref<288x1152xbf16, #tpu.memory_space<vmem>>, vector<32x1152xbf16>
    tpu.vector_store %arg8[%c160, %c0_21], %16 {strides = array<i32>} : memref<288x1152xbf16, #tpu.memory_space<vmem>>, vector<32x1152xbf16>,
    %c0_22 = arith.constant 0 : index
    %c68 = arith.constant 68 : index
    %18 = vector.load %arg7[%c0_22, %c68] : memref<32x1280xbf16, #tpu.memory_space<vmem>>, vector<32x1152xbf16>
    %c192 = arith.constant 192 : index
    %c0_23 = arith.constant 0 : index
    %19 = vector.load %arg8[%c192, %c0_23] : memref<288x1152xbf16, #tpu.memory_space<vmem>>, vector<32x1152xbf16>
    tpu.vector_store %arg8[%c192, %c0_23], %18 {strides = array<i32>} : memref<288x1152xbf16, #tpu.memory_space<vmem>>, vector<32x1152xbf16>,
    %c0_24 = arith.constant 0 : index
    %c69 = arith.constant 69 : index
    %20 = vector.load %arg7[%c0_24, %c69] : memref<32x1280xbf16, #tpu.memory_space<vmem>>, vector<32x1152xbf16>
    %c224 = arith.constant 224 : index
    %c0_25 = arith.constant 0 : index
    %21 = vector.load %arg8[%c224, %c0_25] : memref<288x1152xbf16, #tpu.memory_space<vmem>>, vector<32x1152xbf16>
    tpu.vector_store %arg8[%c224, %c0_25], %20 {strides = array<i32>} : memref<288x1152xbf16, #tpu.memory_space<vmem>>, vector<32x1152xbf16>,
    %c0_26 = arith.constant 0 : index
    %c70 = arith.constant 70 : index
    %22 = vector.load %arg7[%c0_26, %c70] : memref<32x1280xbf16, #tpu.memory_space<vmem>>, vector<32x1152xbf16>
    %c256 = arith.constant 256 : index
    %c0_27 = arith.constant 0 : index
    %23 = vector.load %arg8[%c256, %c0_27] : memref<288x1152xbf16, #tpu.memory_space<vmem>>, vector<32x1152xbf16>
    tpu.vector_store %arg8[%c256, %c0_27], %22 {strides = array<i32>} : memref<288x1152xbf16, #tpu.memory_space<vmem>>, vector<32x1152xbf16>,
    %c0_28 = arith.constant 0 : index
    %c0_29 = arith.constant 0 : index
    %24 = vector.load %arg4[%c0_28, %c0_29] : memref<16x288xbf16, #tpu.memory_space<vmem>>, vector<16x288xbf16>
    %c0_30 = arith.constant 0 : index
    %c0_31 = arith.constant 0 : index
    %25 = vector.load %arg8[%c0_30, %c0_31] : memref<288x1152xbf16, #tpu.memory_space<vmem>>, vector<288x1152xbf16>
    %cst = arith.constant dense<0.000000e+00> : vector<16x1152xf32>
    %26 = tpu.matmul %24, %25, %cst {dimension_numbers = #tpu.dot_dimension_numbers<[1], [0], [0], [1], [0, 0, 1, 1], [], []>} : vector<16x288xbf16>, vector<288x1152xbf16>, vector<16x1152xf32> -> vector<16x1152xf32>
    %c0_32 = arith.constant 0 : index
    %c0_33 = arith.constant 0 : index
    %27 = vector.load %arg5[%c0_32, %c0_33] : memref<16x1xf32, #tpu.memory_space<vmem>>, vector<16x1xf32>
    %28 = vector.broadcast %27 : vector<16x1xf32> to vector<16x1152xf32>
    %29 = arith.addf %26, %28 : vector<16x1152xf32>
    %cst_34 = arith.constant 0.000000e+00 : f32
    %30 = vector.broadcast %cst_34 : f32 to vector<16x1152xf32>
    %31 = arith.maximumf %29, %30 : vector<16x1152xf32>
    %32 = arith.truncf %31 : vector<16x1152xf32> to vector<16x1152xbf16>
    %c0_35 = arith.constant 0 : index
    %c0_36 = arith.constant 0 : index
    %c0_37 = arith.constant 0 : index
    %33 = vector.load %arg6[%c0_35, %c0_36, %c0_37] : memref<1x16x1152xbf16, #tpu.memory_space<vmem>>, vector<1x16x1152xbf16>
    %34 = vector.shape_cast %33 : vector<1x16x1152xbf16> to vector<16x1152xbf16>
    %35 = vector.shape_cast %32 : vector<16x1152xbf16> to vector<1x16x1152xbf16>
    tpu.vector_store %arg6[%c0_35, %c0_36, %c0_37], %35 {strides = array<i32>} : memref<1x16x1152xbf16, #tpu.memory_space<vmem>>, vector<1x16x1152xbf16>,
    return
  }
  func.func @transform_0(%arg0: i32, %arg1: i32) -> (i32, i32, i32) {
    %c0_i32 = arith.constant 0 : i32
    %c0_i32_0 = arith.constant 0 : i32
    return %arg0, %c0_i32, %arg1 : i32, i32, i32
  }
  func.func @transform_1(%arg0: i32, %arg1: i32) -> (i32, i32, i32) {
    %c1_i32 = arith.constant 1 : i32
    %0 = arith.addi %arg1, %c1_i32 : i32
    %c0_i32 = arith.constant 0 : i32
    %c0_i32_0 = arith.constant 0 : i32
    return %arg0, %c0_i32, %0 : i32, i32, i32
  }
  func.func @transform_2(%arg0: i32, %arg1: i32) -> (i32, i32) {
    %c0_i32 = arith.constant 0 : i32
    %c0_i32_0 = arith.constant 0 : i32
    %c0_i32_1 = arith.constant 0 : i32
    return %c0_i32, %c0_i32_0 : i32, i32
  }
  func.func @transform_3(%arg0: i32, %arg1: i32) -> (i32, i32) {
    %c0_i32 = arith.constant 0 : i32
    %c0_i32_0 = arith.constant 0 : i32
    %c0_i32_1 = arith.constant 0 : i32
    return %c0_i32, %c0_i32_0 : i32, i32
  }
  func.func @transform_4(%arg0: i32, %arg1: i32) -> (i32, i32, i32) {
    %c0_i32 = arith.constant 0 : i32
    %c0_i32_0 = arith.constant 0 : i32
    return %arg0, %c0_i32, %arg1 : i32, i32, i32
  }
}

module attributes {stable_mosaic.version = 11 : i64} {
  func.func @kernel(%arg0: i32, %arg1: i32, %arg2: memref<1x16x1408xbf16, #tpu.memory_space<vmem>>, %arg3: memref<1x16x1408xbf16, #tpu.memory_space<vmem>>, %arg4: memref<16x144xbf16, #tpu.memory_space<vmem>>, %arg5: memref<16x1xf32, #tpu.memory_space<vmem>>, %arg6: memref<1x16x1408xbf16, #tpu.memory_space<vmem>>, %arg7: memref<16x1664xbf16, #tpu.memory_space<vmem>>, %arg8: memref<144x1408xbf16, #tpu.memory_space<vmem>>) attributes {dimension_semantics = [#tpu.dimension_semantics<parallel>, #tpu.dimension_semantics<parallel>], iteration_bounds = array<i64: 2, 3>, scalar_prefetch = 0 : i64, scratch_operands = 2 : i64, tpu.core_type = #tpu.core_type<tc>, window_params = [{transform_indices = @transform_0, window_bounds = array<i64: 1, 16, 1408>}, {transform_indices = @transform_1, window_bounds = array<i64: 1, 16, 1408>}, {pipeline_mode = #tpu.pipeline_mode<synchronous>, transform_indices = @transform_2, window_bounds = array<i64: 16, 144>}, {pipeline_mode = #tpu.pipeline_mode<synchronous>, transform_indices = @transform_3, window_bounds = array<i64: 16, 1>}, {transform_indices = @transform_4, window_bounds = array<i64: 1, 16, 1408>}]} {
    %c0 = arith.constant 0 : index
    %c0_0 = arith.constant 0 : index
    %c0_1 = arith.constant 0 : index
    %0 = vector.load %arg2[%c0, %c0_0, %c0_1] : memref<1x16x1408xbf16, #tpu.memory_space<vmem>>, vector<1x16x1408xbf16>
    %1 = vector.shape_cast %0 : vector<1x16x1408xbf16> to vector<16x1408xbf16>
    %c0_2 = arith.constant 0 : index
    %c0_3 = arith.constant 0 : index
    %2 = vector.load %arg7[%c0_2, %c0_3] : memref<16x1664xbf16, #tpu.memory_space<vmem>>, vector<16x1408xbf16>
    tpu.vector_store %arg7[%c0_2, %c0_3], %1 {strides = array<i32>} : memref<16x1664xbf16, #tpu.memory_space<vmem>>, vector<16x1408xbf16>,
    %c0_4 = arith.constant 0 : index
    %c0_5 = arith.constant 0 : index
    %c0_6 = arith.constant 0 : index
    %3 = vector.load %arg3[%c0_4, %c0_5, %c0_6] : memref<1x16x1408xbf16, #tpu.memory_space<vmem>>, vector<1x16x256xbf16>
    %4 = vector.shape_cast %3 : vector<1x16x256xbf16> to vector<16x256xbf16>
    %c0_7 = arith.constant 0 : index
    %c1408 = arith.constant 1408 : index
    %5 = vector.load %arg7[%c0_7, %c1408] : memref<16x1664xbf16, #tpu.memory_space<vmem>>, vector<16x256xbf16>
    tpu.vector_store %arg7[%c0_7, %c1408], %4 {strides = array<i32>} : memref<16x1664xbf16, #tpu.memory_space<vmem>>, vector<16x256xbf16>,
    %c0_8 = arith.constant 0 : index
    %c0_9 = arith.constant 0 : index
    %6 = vector.load %arg7[%c0_8, %c0_9] : memref<16x1664xbf16, #tpu.memory_space<vmem>>, vector<16x1408xbf16>
    %c0_10 = arith.constant 0 : index
    %c0_11 = arith.constant 0 : index
    %7 = vector.load %arg8[%c0_10, %c0_11] : memref<144x1408xbf16, #tpu.memory_space<vmem>>, vector<16x1408xbf16>
    tpu.vector_store %arg8[%c0_10, %c0_11], %6 {strides = array<i32>} : memref<144x1408xbf16, #tpu.memory_space<vmem>>, vector<16x1408xbf16>,
    %c0_12 = arith.constant 0 : index
    %c1 = arith.constant 1 : index
    %8 = vector.load %arg7[%c0_12, %c1] : memref<16x1664xbf16, #tpu.memory_space<vmem>>, vector<16x1408xbf16>
    %c16 = arith.constant 16 : index
    %c0_13 = arith.constant 0 : index
    %9 = vector.load %arg8[%c16, %c0_13] : memref<144x1408xbf16, #tpu.memory_space<vmem>>, vector<16x1408xbf16>
    tpu.vector_store %arg8[%c16, %c0_13], %8 {strides = array<i32>} : memref<144x1408xbf16, #tpu.memory_space<vmem>>, vector<16x1408xbf16>,
    %c0_14 = arith.constant 0 : index
    %c2 = arith.constant 2 : index
    %10 = vector.load %arg7[%c0_14, %c2] : memref<16x1664xbf16, #tpu.memory_space<vmem>>, vector<16x1408xbf16>
    %c32 = arith.constant 32 : index
    %c0_15 = arith.constant 0 : index
    %11 = vector.load %arg8[%c32, %c0_15] : memref<144x1408xbf16, #tpu.memory_space<vmem>>, vector<16x1408xbf16>
    tpu.vector_store %arg8[%c32, %c0_15], %10 {strides = array<i32>} : memref<144x1408xbf16, #tpu.memory_space<vmem>>, vector<16x1408xbf16>,
    %c0_16 = arith.constant 0 : index
    %c66 = arith.constant 66 : index
    %12 = vector.load %arg7[%c0_16, %c66] : memref<16x1664xbf16, #tpu.memory_space<vmem>>, vector<16x1408xbf16>
    %c48 = arith.constant 48 : index
    %c0_17 = arith.constant 0 : index
    %13 = vector.load %arg8[%c48, %c0_17] : memref<144x1408xbf16, #tpu.memory_space<vmem>>, vector<16x1408xbf16>
    tpu.vector_store %arg8[%c48, %c0_17], %12 {strides = array<i32>} : memref<144x1408xbf16, #tpu.memory_space<vmem>>, vector<16x1408xbf16>,
    %c0_18 = arith.constant 0 : index
    %c67 = arith.constant 67 : index
    %14 = vector.load %arg7[%c0_18, %c67] : memref<16x1664xbf16, #tpu.memory_space<vmem>>, vector<16x1408xbf16>
    %c64 = arith.constant 64 : index
    %c0_19 = arith.constant 0 : index
    %15 = vector.load %arg8[%c64, %c0_19] : memref<144x1408xbf16, #tpu.memory_space<vmem>>, vector<16x1408xbf16>
    tpu.vector_store %arg8[%c64, %c0_19], %14 {strides = array<i32>} : memref<144x1408xbf16, #tpu.memory_space<vmem>>, vector<16x1408xbf16>,
    %c0_20 = arith.constant 0 : index
    %c68 = arith.constant 68 : index
    %16 = vector.load %arg7[%c0_20, %c68] : memref<16x1664xbf16, #tpu.memory_space<vmem>>, vector<16x1408xbf16>
    %c80 = arith.constant 80 : index
    %c0_21 = arith.constant 0 : index
    %17 = vector.load %arg8[%c80, %c0_21] : memref<144x1408xbf16, #tpu.memory_space<vmem>>, vector<16x1408xbf16>
    tpu.vector_store %arg8[%c80, %c0_21], %16 {strides = array<i32>} : memref<144x1408xbf16, #tpu.memory_space<vmem>>, vector<16x1408xbf16>,
    %c0_22 = arith.constant 0 : index
    %c132 = arith.constant 132 : index
    %18 = vector.load %arg7[%c0_22, %c132] : memref<16x1664xbf16, #tpu.memory_space<vmem>>, vector<16x1408xbf16>
    %c96 = arith.constant 96 : index
    %c0_23 = arith.constant 0 : index
    %19 = vector.load %arg8[%c96, %c0_23] : memref<144x1408xbf16, #tpu.memory_space<vmem>>, vector<16x1408xbf16>
    tpu.vector_store %arg8[%c96, %c0_23], %18 {strides = array<i32>} : memref<144x1408xbf16, #tpu.memory_space<vmem>>, vector<16x1408xbf16>,
    %c0_24 = arith.constant 0 : index
    %c133 = arith.constant 133 : index
    %20 = vector.load %arg7[%c0_24, %c133] : memref<16x1664xbf16, #tpu.memory_space<vmem>>, vector<16x1408xbf16>
    %c112 = arith.constant 112 : index
    %c0_25 = arith.constant 0 : index
    %21 = vector.load %arg8[%c112, %c0_25] : memref<144x1408xbf16, #tpu.memory_space<vmem>>, vector<16x1408xbf16>
    tpu.vector_store %arg8[%c112, %c0_25], %20 {strides = array<i32>} : memref<144x1408xbf16, #tpu.memory_space<vmem>>, vector<16x1408xbf16>,
    %c0_26 = arith.constant 0 : index
    %c134 = arith.constant 134 : index
    %22 = vector.load %arg7[%c0_26, %c134] : memref<16x1664xbf16, #tpu.memory_space<vmem>>, vector<16x1408xbf16>
    %c128 = arith.constant 128 : index
    %c0_27 = arith.constant 0 : index
    %23 = vector.load %arg8[%c128, %c0_27] : memref<144x1408xbf16, #tpu.memory_space<vmem>>, vector<16x1408xbf16>
    tpu.vector_store %arg8[%c128, %c0_27], %22 {strides = array<i32>} : memref<144x1408xbf16, #tpu.memory_space<vmem>>, vector<16x1408xbf16>,
    %c0_28 = arith.constant 0 : index
    %c0_29 = arith.constant 0 : index
    %24 = vector.load %arg4[%c0_28, %c0_29] : memref<16x144xbf16, #tpu.memory_space<vmem>>, vector<16x144xbf16>
    %c0_30 = arith.constant 0 : index
    %c0_31 = arith.constant 0 : index
    %25 = vector.load %arg8[%c0_30, %c0_31] : memref<144x1408xbf16, #tpu.memory_space<vmem>>, vector<144x1408xbf16>
    %cst = arith.constant dense<0.000000e+00> : vector<16x1408xf32>
    %26 = tpu.matmul %24, %25, %cst {dimension_numbers = #tpu.dot_dimension_numbers<[1], [0], [0], [1], [0, 0, 1, 1], [], []>} : vector<16x144xbf16>, vector<144x1408xbf16>, vector<16x1408xf32> -> vector<16x1408xf32>
    %c0_32 = arith.constant 0 : index
    %c0_33 = arith.constant 0 : index
    %27 = vector.load %arg5[%c0_32, %c0_33] : memref<16x1xf32, #tpu.memory_space<vmem>>, vector<16x1xf32>
    %28 = vector.broadcast %27 : vector<16x1xf32> to vector<16x1408xf32>
    %29 = arith.addf %26, %28 : vector<16x1408xf32>
    %cst_34 = arith.constant 0.000000e+00 : f32
    %30 = vector.broadcast %cst_34 : f32 to vector<16x1408xf32>
    %31 = arith.maximumf %29, %30 : vector<16x1408xf32>
    %32 = arith.truncf %31 : vector<16x1408xf32> to vector<16x1408xbf16>
    %c0_35 = arith.constant 0 : index
    %c0_36 = arith.constant 0 : index
    %c0_37 = arith.constant 0 : index
    %33 = vector.load %arg6[%c0_35, %c0_36, %c0_37] : memref<1x16x1408xbf16, #tpu.memory_space<vmem>>, vector<1x16x1408xbf16>
    %34 = vector.shape_cast %33 : vector<1x16x1408xbf16> to vector<16x1408xbf16>
    %35 = vector.shape_cast %32 : vector<16x1408xbf16> to vector<1x16x1408xbf16>
    tpu.vector_store %arg6[%c0_35, %c0_36, %c0_37], %35 {strides = array<i32>} : memref<1x16x1408xbf16, #tpu.memory_space<vmem>>, vector<1x16x1408xbf16>,
    return
  }
  func.func @transform_0(%arg0: i32, %arg1: i32) -> (i32, i32, i32) {
    %c0_i32 = arith.constant 0 : i32
    %c0_i32_0 = arith.constant 0 : i32
    return %arg0, %c0_i32, %arg1 : i32, i32, i32
  }
  func.func @transform_1(%arg0: i32, %arg1: i32) -> (i32, i32, i32) {
    %c1_i32 = arith.constant 1 : i32
    %0 = arith.addi %arg1, %c1_i32 : i32
    %c0_i32 = arith.constant 0 : i32
    %c0_i32_0 = arith.constant 0 : i32
    return %arg0, %c0_i32, %0 : i32, i32, i32
  }
  func.func @transform_2(%arg0: i32, %arg1: i32) -> (i32, i32) {
    %c0_i32 = arith.constant 0 : i32
    %c0_i32_0 = arith.constant 0 : i32
    %c0_i32_1 = arith.constant 0 : i32
    return %c0_i32, %c0_i32_0 : i32, i32
  }
  func.func @transform_3(%arg0: i32, %arg1: i32) -> (i32, i32) {
    %c0_i32 = arith.constant 0 : i32
    %c0_i32_0 = arith.constant 0 : i32
    %c0_i32_1 = arith.constant 0 : i32
    return %c0_i32, %c0_i32_0 : i32, i32
  }
  func.func @transform_4(%arg0: i32, %arg1: i32) -> (i32, i32, i32) {
    %c0_i32 = arith.constant 0 : i32
    %c0_i32_0 = arith.constant 0 : i32
    return %arg0, %c0_i32, %arg1 : i32, i32, i32
  }
}

module attributes {stable_mosaic.version = 11 : i64} {
  func.func @kernel(%arg0: i32, %arg1: i32, %arg2: memref<1x16x1408xbf16, #tpu.memory_space<vmem>>, %arg3: memref<1x16x1408xbf16, #tpu.memory_space<vmem>>, %arg4: memref<8x144xbf16, #tpu.memory_space<vmem>>, %arg5: memref<8x1xf32, #tpu.memory_space<vmem>>, %arg6: memref<1x8x1408xbf16, #tpu.memory_space<vmem>>, %arg7: memref<16x1664xbf16, #tpu.memory_space<vmem>>, %arg8: memref<144x1408xbf16, #tpu.memory_space<vmem>>) attributes {dimension_semantics = [#tpu.dimension_semantics<parallel>, #tpu.dimension_semantics<parallel>], iteration_bounds = array<i64: 2, 3>, scalar_prefetch = 0 : i64, scratch_operands = 2 : i64, tpu.core_type = #tpu.core_type<tc>, window_params = [{transform_indices = @transform_0, window_bounds = array<i64: 1, 16, 1408>}, {transform_indices = @transform_1, window_bounds = array<i64: 1, 16, 1408>}, {pipeline_mode = #tpu.pipeline_mode<synchronous>, transform_indices = @transform_2, window_bounds = array<i64: 8, 144>}, {pipeline_mode = #tpu.pipeline_mode<synchronous>, transform_indices = @transform_3, window_bounds = array<i64: 8, 1>}, {transform_indices = @transform_4, window_bounds = array<i64: 1, 8, 1408>}]} {
    %c0 = arith.constant 0 : index
    %c0_0 = arith.constant 0 : index
    %c0_1 = arith.constant 0 : index
    %0 = vector.load %arg2[%c0, %c0_0, %c0_1] : memref<1x16x1408xbf16, #tpu.memory_space<vmem>>, vector<1x16x1408xbf16>
    %1 = vector.shape_cast %0 : vector<1x16x1408xbf16> to vector<16x1408xbf16>
    %c0_2 = arith.constant 0 : index
    %c0_3 = arith.constant 0 : index
    %2 = vector.load %arg7[%c0_2, %c0_3] : memref<16x1664xbf16, #tpu.memory_space<vmem>>, vector<16x1408xbf16>
    tpu.vector_store %arg7[%c0_2, %c0_3], %1 {strides = array<i32>} : memref<16x1664xbf16, #tpu.memory_space<vmem>>, vector<16x1408xbf16>,
    %c0_4 = arith.constant 0 : index
    %c0_5 = arith.constant 0 : index
    %c0_6 = arith.constant 0 : index
    %3 = vector.load %arg3[%c0_4, %c0_5, %c0_6] : memref<1x16x1408xbf16, #tpu.memory_space<vmem>>, vector<1x16x256xbf16>
    %4 = vector.shape_cast %3 : vector<1x16x256xbf16> to vector<16x256xbf16>
    %c0_7 = arith.constant 0 : index
    %c1408 = arith.constant 1408 : index
    %5 = vector.load %arg7[%c0_7, %c1408] : memref<16x1664xbf16, #tpu.memory_space<vmem>>, vector<16x256xbf16>
    tpu.vector_store %arg7[%c0_7, %c1408], %4 {strides = array<i32>} : memref<16x1664xbf16, #tpu.memory_space<vmem>>, vector<16x256xbf16>,
    %c0_8 = arith.constant 0 : index
    %c0_9 = arith.constant 0 : index
    %6 = vector.load %arg7[%c0_8, %c0_9] : memref<16x1664xbf16, #tpu.memory_space<vmem>>, vector<16x1408xbf16>
    %c0_10 = arith.constant 0 : index
    %c0_11 = arith.constant 0 : index
    %7 = vector.load %arg8[%c0_10, %c0_11] : memref<144x1408xbf16, #tpu.memory_space<vmem>>, vector<16x1408xbf16>
    tpu.vector_store %arg8[%c0_10, %c0_11], %6 {strides = array<i32>} : memref<144x1408xbf16, #tpu.memory_space<vmem>>, vector<16x1408xbf16>,
    %c0_12 = arith.constant 0 : index
    %c1 = arith.constant 1 : index
    %8 = vector.load %arg7[%c0_12, %c1] : memref<16x1664xbf16, #tpu.memory_space<vmem>>, vector<16x1408xbf16>
    %c16 = arith.constant 16 : index
    %c0_13 = arith.constant 0 : index
    %9 = vector.load %arg8[%c16, %c0_13] : memref<144x1408xbf16, #tpu.memory_space<vmem>>, vector<16x1408xbf16>
    tpu.vector_store %arg8[%c16, %c0_13], %8 {strides = array<i32>} : memref<144x1408xbf16, #tpu.memory_space<vmem>>, vector<16x1408xbf16>,
    %c0_14 = arith.constant 0 : index
    %c2 = arith.constant 2 : index
    %10 = vector.load %arg7[%c0_14, %c2] : memref<16x1664xbf16, #tpu.memory_space<vmem>>, vector<16x1408xbf16>
    %c32 = arith.constant 32 : index
    %c0_15 = arith.constant 0 : index
    %11 = vector.load %arg8[%c32, %c0_15] : memref<144x1408xbf16, #tpu.memory_space<vmem>>, vector<16x1408xbf16>
    tpu.vector_store %arg8[%c32, %c0_15], %10 {strides = array<i32>} : memref<144x1408xbf16, #tpu.memory_space<vmem>>, vector<16x1408xbf16>,
    %c0_16 = arith.constant 0 : index
    %c66 = arith.constant 66 : index
    %12 = vector.load %arg7[%c0_16, %c66] : memref<16x1664xbf16, #tpu.memory_space<vmem>>, vector<16x1408xbf16>
    %c48 = arith.constant 48 : index
    %c0_17 = arith.constant 0 : index
    %13 = vector.load %arg8[%c48, %c0_17] : memref<144x1408xbf16, #tpu.memory_space<vmem>>, vector<16x1408xbf16>
    tpu.vector_store %arg8[%c48, %c0_17], %12 {strides = array<i32>} : memref<144x1408xbf16, #tpu.memory_space<vmem>>, vector<16x1408xbf16>,
    %c0_18 = arith.constant 0 : index
    %c67 = arith.constant 67 : index
    %14 = vector.load %arg7[%c0_18, %c67] : memref<16x1664xbf16, #tpu.memory_space<vmem>>, vector<16x1408xbf16>
    %c64 = arith.constant 64 : index
    %c0_19 = arith.constant 0 : index
    %15 = vector.load %arg8[%c64, %c0_19] : memref<144x1408xbf16, #tpu.memory_space<vmem>>, vector<16x1408xbf16>
    tpu.vector_store %arg8[%c64, %c0_19], %14 {strides = array<i32>} : memref<144x1408xbf16, #tpu.memory_space<vmem>>, vector<16x1408xbf16>,
    %c0_20 = arith.constant 0 : index
    %c68 = arith.constant 68 : index
    %16 = vector.load %arg7[%c0_20, %c68] : memref<16x1664xbf16, #tpu.memory_space<vmem>>, vector<16x1408xbf16>
    %c80 = arith.constant 80 : index
    %c0_21 = arith.constant 0 : index
    %17 = vector.load %arg8[%c80, %c0_21] : memref<144x1408xbf16, #tpu.memory_space<vmem>>, vector<16x1408xbf16>
    tpu.vector_store %arg8[%c80, %c0_21], %16 {strides = array<i32>} : memref<144x1408xbf16, #tpu.memory_space<vmem>>, vector<16x1408xbf16>,
    %c0_22 = arith.constant 0 : index
    %c132 = arith.constant 132 : index
    %18 = vector.load %arg7[%c0_22, %c132] : memref<16x1664xbf16, #tpu.memory_space<vmem>>, vector<16x1408xbf16>
    %c96 = arith.constant 96 : index
    %c0_23 = arith.constant 0 : index
    %19 = vector.load %arg8[%c96, %c0_23] : memref<144x1408xbf16, #tpu.memory_space<vmem>>, vector<16x1408xbf16>
    tpu.vector_store %arg8[%c96, %c0_23], %18 {strides = array<i32>} : memref<144x1408xbf16, #tpu.memory_space<vmem>>, vector<16x1408xbf16>,
    %c0_24 = arith.constant 0 : index
    %c133 = arith.constant 133 : index
    %20 = vector.load %arg7[%c0_24, %c133] : memref<16x1664xbf16, #tpu.memory_space<vmem>>, vector<16x1408xbf16>
    %c112 = arith.constant 112 : index
    %c0_25 = arith.constant 0 : index
    %21 = vector.load %arg8[%c112, %c0_25] : memref<144x1408xbf16, #tpu.memory_space<vmem>>, vector<16x1408xbf16>
    tpu.vector_store %arg8[%c112, %c0_25], %20 {strides = array<i32>} : memref<144x1408xbf16, #tpu.memory_space<vmem>>, vector<16x1408xbf16>,
    %c0_26 = arith.constant 0 : index
    %c134 = arith.constant 134 : index
    %22 = vector.load %arg7[%c0_26, %c134] : memref<16x1664xbf16, #tpu.memory_space<vmem>>, vector<16x1408xbf16>
    %c128 = arith.constant 128 : index
    %c0_27 = arith.constant 0 : index
    %23 = vector.load %arg8[%c128, %c0_27] : memref<144x1408xbf16, #tpu.memory_space<vmem>>, vector<16x1408xbf16>
    tpu.vector_store %arg8[%c128, %c0_27], %22 {strides = array<i32>} : memref<144x1408xbf16, #tpu.memory_space<vmem>>, vector<16x1408xbf16>,
    %c0_28 = arith.constant 0 : index
    %c0_29 = arith.constant 0 : index
    %24 = vector.load %arg4[%c0_28, %c0_29] : memref<8x144xbf16, #tpu.memory_space<vmem>>, vector<8x144xbf16>
    %c0_30 = arith.constant 0 : index
    %c0_31 = arith.constant 0 : index
    %25 = vector.load %arg8[%c0_30, %c0_31] : memref<144x1408xbf16, #tpu.memory_space<vmem>>, vector<144x1408xbf16>
    %cst = arith.constant dense<0.000000e+00> : vector<8x1408xf32>
    %26 = tpu.matmul %24, %25, %cst {dimension_numbers = #tpu.dot_dimension_numbers<[1], [0], [0], [1], [0, 0, 1, 1], [], []>} : vector<8x144xbf16>, vector<144x1408xbf16>, vector<8x1408xf32> -> vector<8x1408xf32>
    %c0_32 = arith.constant 0 : index
    %c0_33 = arith.constant 0 : index
    %27 = vector.load %arg5[%c0_32, %c0_33] : memref<8x1xf32, #tpu.memory_space<vmem>>, vector<8x1xf32>
    %28 = vector.broadcast %27 : vector<8x1xf32> to vector<8x1408xf32>
    %29 = arith.addf %26, %28 : vector<8x1408xf32>
    %cst_34 = arith.constant 0.000000e+00 : f32
    %30 = vector.broadcast %cst_34 : f32 to vector<8x1408xf32>
    %31 = arith.maximumf %29, %30 : vector<8x1408xf32>
    %32 = arith.truncf %31 : vector<8x1408xf32> to vector<8x1408xbf16>
    %c0_35 = arith.constant 0 : index
    %c0_36 = arith.constant 0 : index
    %c0_37 = arith.constant 0 : index
    %33 = vector.load %arg6[%c0_35, %c0_36, %c0_37] : memref<1x8x1408xbf16, #tpu.memory_space<vmem>>, vector<1x8x1408xbf16>
    %34 = vector.shape_cast %33 : vector<1x8x1408xbf16> to vector<8x1408xbf16>
    %35 = vector.shape_cast %32 : vector<8x1408xbf16> to vector<1x8x1408xbf16>
    tpu.vector_store %arg6[%c0_35, %c0_36, %c0_37], %35 {strides = array<i32>} : memref<1x8x1408xbf16, #tpu.memory_space<vmem>>, vector<1x8x1408xbf16>,
    return
  }
  func.func @transform_0(%arg0: i32, %arg1: i32) -> (i32, i32, i32) {
    %c0_i32 = arith.constant 0 : i32
    %c0_i32_0 = arith.constant 0 : i32
    return %arg0, %c0_i32, %arg1 : i32, i32, i32
  }
  func.func @transform_1(%arg0: i32, %arg1: i32) -> (i32, i32, i32) {
    %c1_i32 = arith.constant 1 : i32
    %0 = arith.addi %arg1, %c1_i32 : i32
    %c0_i32 = arith.constant 0 : i32
    %c0_i32_0 = arith.constant 0 : i32
    return %arg0, %c0_i32, %0 : i32, i32, i32
  }
  func.func @transform_2(%arg0: i32, %arg1: i32) -> (i32, i32) {
    %c0_i32 = arith.constant 0 : i32
    %c0_i32_0 = arith.constant 0 : i32
    %c0_i32_1 = arith.constant 0 : i32
    return %c0_i32, %c0_i32_0 : i32, i32
  }
  func.func @transform_3(%arg0: i32, %arg1: i32) -> (i32, i32) {
    %c0_i32 = arith.constant 0 : i32
    %c0_i32_0 = arith.constant 0 : i32
    %c0_i32_1 = arith.constant 0 : i32
    return %c0_i32, %c0_i32_0 : i32, i32
  }
  func.func @transform_4(%arg0: i32, %arg1: i32) -> (i32, i32, i32) {
    %c0_i32 = arith.constant 0 : i32
    %c0_i32_0 = arith.constant 0 : i32
    return %arg0, %c0_i32, %arg1 : i32, i32, i32
  }
}

module attributes {stable_mosaic.version = 11 : i64} {
  func.func @kernel(%arg0: i32, %arg1: i32, %arg2: memref<1x8x1280xbf16, #tpu.memory_space<vmem>>, %arg3: memref<1x8x1280xbf16, #tpu.memory_space<vmem>>, %arg4: memref<8x72xbf16, #tpu.memory_space<vmem>>, %arg5: memref<8x1xf32, #tpu.memory_space<vmem>>, %arg6: memref<1x8x1280xbf16, #tpu.memory_space<vmem>>, %arg7: memref<8x1664xbf16, #tpu.memory_space<vmem>>, %arg8: memref<72x1280xbf16, #tpu.memory_space<vmem>>) attributes {dimension_semantics = [#tpu.dimension_semantics<parallel>, #tpu.dimension_semantics<parallel>], iteration_bounds = array<i64: 2, 13>, scalar_prefetch = 0 : i64, scratch_operands = 2 : i64, tpu.core_type = #tpu.core_type<tc>, window_params = [{transform_indices = @transform_0, window_bounds = array<i64: 1, 8, 1280>}, {transform_indices = @transform_1, window_bounds = array<i64: 1, 8, 1280>}, {pipeline_mode = #tpu.pipeline_mode<synchronous>, transform_indices = @transform_2, window_bounds = array<i64: 8, 72>}, {pipeline_mode = #tpu.pipeline_mode<synchronous>, transform_indices = @transform_3, window_bounds = array<i64: 8, 1>}, {transform_indices = @transform_4, window_bounds = array<i64: 1, 8, 1280>}]} {
    %c0 = arith.constant 0 : index
    %c0_0 = arith.constant 0 : index
    %c0_1 = arith.constant 0 : index
    %0 = vector.load %arg2[%c0, %c0_0, %c0_1] : memref<1x8x1280xbf16, #tpu.memory_space<vmem>>, vector<1x8x1280xbf16>
    %1 = vector.shape_cast %0 : vector<1x8x1280xbf16> to vector<8x1280xbf16>
    %c0_2 = arith.constant 0 : index
    %c0_3 = arith.constant 0 : index
    %2 = vector.load %arg7[%c0_2, %c0_3] : memref<8x1664xbf16, #tpu.memory_space<vmem>>, vector<8x1280xbf16>
    tpu.vector_store %arg7[%c0_2, %c0_3], %1 {strides = array<i32>} : memref<8x1664xbf16, #tpu.memory_space<vmem>>, vector<8x1280xbf16>,
    %c0_4 = arith.constant 0 : index
    %c0_5 = arith.constant 0 : index
    %c0_6 = arith.constant 0 : index
    %3 = vector.load %arg3[%c0_4, %c0_5, %c0_6] : memref<1x8x1280xbf16, #tpu.memory_space<vmem>>, vector<1x8x384xbf16>
    %4 = vector.shape_cast %3 : vector<1x8x384xbf16> to vector<8x384xbf16>
    %c0_7 = arith.constant 0 : index
    %c1280 = arith.constant 1280 : index
    %5 = vector.load %arg7[%c0_7, %c1280] : memref<8x1664xbf16, #tpu.memory_space<vmem>>, vector<8x384xbf16>
    tpu.vector_store %arg7[%c0_7, %c1280], %4 {strides = array<i32>} : memref<8x1664xbf16, #tpu.memory_space<vmem>>, vector<8x384xbf16>,
    %c0_8 = arith.constant 0 : index
    %c0_9 = arith.constant 0 : index
    %6 = vector.load %arg7[%c0_8, %c0_9] : memref<8x1664xbf16, #tpu.memory_space<vmem>>, vector<8x1280xbf16>
    %c0_10 = arith.constant 0 : index
    %c0_11 = arith.constant 0 : index
    %7 = vector.load %arg8[%c0_10, %c0_11] : memref<72x1280xbf16, #tpu.memory_space<vmem>>, vector<8x1280xbf16>
    tpu.vector_store %arg8[%c0_10, %c0_11], %6 {strides = array<i32>} : memref<72x1280xbf16, #tpu.memory_space<vmem>>, vector<8x1280xbf16>,
    %c0_12 = arith.constant 0 : index
    %c1 = arith.constant 1 : index
    %8 = vector.load %arg7[%c0_12, %c1] : memref<8x1664xbf16, #tpu.memory_space<vmem>>, vector<8x1280xbf16>
    %c8 = arith.constant 8 : index
    %c0_13 = arith.constant 0 : index
    %9 = vector.load %arg8[%c8, %c0_13] : memref<72x1280xbf16, #tpu.memory_space<vmem>>, vector<8x1280xbf16>
    tpu.vector_store %arg8[%c8, %c0_13], %8 {strides = array<i32>} : memref<72x1280xbf16, #tpu.memory_space<vmem>>, vector<8x1280xbf16>,
    %c0_14 = arith.constant 0 : index
    %c2 = arith.constant 2 : index
    %10 = vector.load %arg7[%c0_14, %c2] : memref<8x1664xbf16, #tpu.memory_space<vmem>>, vector<8x1280xbf16>
    %c16 = arith.constant 16 : index
    %c0_15 = arith.constant 0 : index
    %11 = vector.load %arg8[%c16, %c0_15] : memref<72x1280xbf16, #tpu.memory_space<vmem>>, vector<8x1280xbf16>
    tpu.vector_store %arg8[%c16, %c0_15], %10 {strides = array<i32>} : memref<72x1280xbf16, #tpu.memory_space<vmem>>, vector<8x1280xbf16>,
    %c0_16 = arith.constant 0 : index
    %c130 = arith.constant 130 : index
    %12 = vector.load %arg7[%c0_16, %c130] : memref<8x1664xbf16, #tpu.memory_space<vmem>>, vector<8x1280xbf16>
    %c24 = arith.constant 24 : index
    %c0_17 = arith.constant 0 : index
    %13 = vector.load %arg8[%c24, %c0_17] : memref<72x1280xbf16, #tpu.memory_space<vmem>>, vector<8x1280xbf16>
    tpu.vector_store %arg8[%c24, %c0_17], %12 {strides = array<i32>} : memref<72x1280xbf16, #tpu.memory_space<vmem>>, vector<8x1280xbf16>,
    %c0_18 = arith.constant 0 : index
    %c131 = arith.constant 131 : index
    %14 = vector.load %arg7[%c0_18, %c131] : memref<8x1664xbf16, #tpu.memory_space<vmem>>, vector<8x1280xbf16>
    %c32 = arith.constant 32 : index
    %c0_19 = arith.constant 0 : index
    %15 = vector.load %arg8[%c32, %c0_19] : memref<72x1280xbf16, #tpu.memory_space<vmem>>, vector<8x1280xbf16>
    tpu.vector_store %arg8[%c32, %c0_19], %14 {strides = array<i32>} : memref<72x1280xbf16, #tpu.memory_space<vmem>>, vector<8x1280xbf16>,
    %c0_20 = arith.constant 0 : index
    %c132 = arith.constant 132 : index
    %16 = vector.load %arg7[%c0_20, %c132] : memref<8x1664xbf16, #tpu.memory_space<vmem>>, vector<8x1280xbf16>
    %c40 = arith.constant 40 : index
    %c0_21 = arith.constant 0 : index
    %17 = vector.load %arg8[%c40, %c0_21] : memref<72x1280xbf16, #tpu.memory_space<vmem>>, vector<8x1280xbf16>
    tpu.vector_store %arg8[%c40, %c0_21], %16 {strides = array<i32>} : memref<72x1280xbf16, #tpu.memory_space<vmem>>, vector<8x1280xbf16>,
    %c0_22 = arith.constant 0 : index
    %c260 = arith.constant 260 : index
    %18 = vector.load %arg7[%c0_22, %c260] : memref<8x1664xbf16, #tpu.memory_space<vmem>>, vector<8x1280xbf16>
    %c48 = arith.constant 48 : index
    %c0_23 = arith.constant 0 : index
    %19 = vector.load %arg8[%c48, %c0_23] : memref<72x1280xbf16, #tpu.memory_space<vmem>>, vector<8x1280xbf16>
    tpu.vector_store %arg8[%c48, %c0_23], %18 {strides = array<i32>} : memref<72x1280xbf16, #tpu.memory_space<vmem>>, vector<8x1280xbf16>,
    %c0_24 = arith.constant 0 : index
    %c261 = arith.constant 261 : index
    %20 = vector.load %arg7[%c0_24, %c261] : memref<8x1664xbf16, #tpu.memory_space<vmem>>, vector<8x1280xbf16>
    %c56 = arith.constant 56 : index
    %c0_25 = arith.constant 0 : index
    %21 = vector.load %arg8[%c56, %c0_25] : memref<72x1280xbf16, #tpu.memory_space<vmem>>, vector<8x1280xbf16>
    tpu.vector_store %arg8[%c56, %c0_25], %20 {strides = array<i32>} : memref<72x1280xbf16, #tpu.memory_space<vmem>>, vector<8x1280xbf16>,
    %c0_26 = arith.constant 0 : index
    %c262 = arith.constant 262 : index
    %22 = vector.load %arg7[%c0_26, %c262] : memref<8x1664xbf16, #tpu.memory_space<vmem>>, vector<8x1280xbf16>
    %c64 = arith.constant 64 : index
    %c0_27 = arith.constant 0 : index
    %23 = vector.load %arg8[%c64, %c0_27] : memref<72x1280xbf16, #tpu.memory_space<vmem>>, vector<8x1280xbf16>
    tpu.vector_store %arg8[%c64, %c0_27], %22 {strides = array<i32>} : memref<72x1280xbf16, #tpu.memory_space<vmem>>, vector<8x1280xbf16>,
    %c0_28 = arith.constant 0 : index
    %c0_29 = arith.constant 0 : index
    %24 = vector.load %arg4[%c0_28, %c0_29] : memref<8x72xbf16, #tpu.memory_space<vmem>>, vector<8x72xbf16>
    %c0_30 = arith.constant 0 : index
    %c0_31 = arith.constant 0 : index
    %25 = vector.load %arg8[%c0_30, %c0_31] : memref<72x1280xbf16, #tpu.memory_space<vmem>>, vector<72x1280xbf16>
    %cst = arith.constant dense<0.000000e+00> : vector<8x1280xf32>
    %26 = tpu.matmul %24, %25, %cst {dimension_numbers = #tpu.dot_dimension_numbers<[1], [0], [0], [1], [0, 0, 1, 1], [], []>} : vector<8x72xbf16>, vector<72x1280xbf16>, vector<8x1280xf32> -> vector<8x1280xf32>
    %c0_32 = arith.constant 0 : index
    %c0_33 = arith.constant 0 : index
    %27 = vector.load %arg5[%c0_32, %c0_33] : memref<8x1xf32, #tpu.memory_space<vmem>>, vector<8x1xf32>
    %28 = vector.broadcast %27 : vector<8x1xf32> to vector<8x1280xf32>
    %29 = arith.addf %26, %28 : vector<8x1280xf32>
    %cst_34 = arith.constant 0.000000e+00 : f32
    %30 = vector.broadcast %cst_34 : f32 to vector<8x1280xf32>
    %31 = arith.maximumf %29, %30 : vector<8x1280xf32>
    %32 = arith.truncf %31 : vector<8x1280xf32> to vector<8x1280xbf16>
    %c0_35 = arith.constant 0 : index
    %c0_36 = arith.constant 0 : index
    %c0_37 = arith.constant 0 : index
    %33 = vector.load %arg6[%c0_35, %c0_36, %c0_37] : memref<1x8x1280xbf16, #tpu.memory_space<vmem>>, vector<1x8x1280xbf16>
    %34 = vector.shape_cast %33 : vector<1x8x1280xbf16> to vector<8x1280xbf16>
    %35 = vector.shape_cast %32 : vector<8x1280xbf16> to vector<1x8x1280xbf16>
    tpu.vector_store %arg6[%c0_35, %c0_36, %c0_37], %35 {strides = array<i32>} : memref<1x8x1280xbf16, #tpu.memory_space<vmem>>, vector<1x8x1280xbf16>,
    return
  }
  func.func @transform_0(%arg0: i32, %arg1: i32) -> (i32, i32, i32) {
    %c0_i32 = arith.constant 0 : i32
    %c0_i32_0 = arith.constant 0 : i32
    return %arg0, %c0_i32, %arg1 : i32, i32, i32
  }
  func.func @transform_1(%arg0: i32, %arg1: i32) -> (i32, i32, i32) {
    %c1_i32 = arith.constant 1 : i32
    %0 = arith.addi %arg1, %c1_i32 : i32
    %c0_i32 = arith.constant 0 : i32
    %c0_i32_0 = arith.constant 0 : i32
    return %arg0, %c0_i32, %0 : i32, i32, i32
  }
  func.func @transform_2(%arg0: i32, %arg1: i32) -> (i32, i32) {
    %c0_i32 = arith.constant 0 : i32
    %c0_i32_0 = arith.constant 0 : i32
    %c0_i32_1 = arith.constant 0 : i32
    return %c0_i32, %c0_i32_0 : i32, i32
  }
  func.func @transform_3(%arg0: i32, %arg1: i32) -> (i32, i32) {
    %c0_i32 = arith.constant 0 : i32
    %c0_i32_0 = arith.constant 0 : i32
    %c0_i32_1 = arith.constant 0 : i32
    return %c0_i32, %c0_i32_0 : i32, i32
  }
  func.func @transform_4(%arg0: i32, %arg1: i32) -> (i32, i32, i32) {
    %c0_i32 = arith.constant 0 : i32
    %c0_i32_0 = arith.constant 0 : i32
    return %arg0, %c0_i32, %arg1 : i32, i32, i32
  }
}

module attributes {stable_mosaic.version = 11 : i64} {
  func.func @kernel(%arg0: i32, %arg1: i32, %arg2: memref<1x8x1280xbf16, #tpu.memory_space<vmem>>, %arg3: memref<1x8x1280xbf16, #tpu.memory_space<vmem>>, %arg4: memref<4x72xbf16, #tpu.memory_space<vmem>>, %arg5: memref<4x1xf32, #tpu.memory_space<vmem>>, %arg6: memref<1x4x1280xbf16, #tpu.memory_space<vmem>>, %arg7: memref<8x1664xbf16, #tpu.memory_space<vmem>>, %arg8: memref<72x1280xbf16, #tpu.memory_space<vmem>>) attributes {dimension_semantics = [#tpu.dimension_semantics<parallel>, #tpu.dimension_semantics<parallel>], iteration_bounds = array<i64: 2, 13>, scalar_prefetch = 0 : i64, scratch_operands = 2 : i64, tpu.core_type = #tpu.core_type<tc>, window_params = [{transform_indices = @transform_0, window_bounds = array<i64: 1, 8, 1280>}, {transform_indices = @transform_1, window_bounds = array<i64: 1, 8, 1280>}, {pipeline_mode = #tpu.pipeline_mode<synchronous>, transform_indices = @transform_2, window_bounds = array<i64: 4, 72>}, {pipeline_mode = #tpu.pipeline_mode<synchronous>, transform_indices = @transform_3, window_bounds = array<i64: 4, 1>}, {transform_indices = @transform_4, window_bounds = array<i64: 1, 4, 1280>}]} {
    %c0 = arith.constant 0 : index
    %c0_0 = arith.constant 0 : index
    %c0_1 = arith.constant 0 : index
    %0 = vector.load %arg2[%c0, %c0_0, %c0_1] : memref<1x8x1280xbf16, #tpu.memory_space<vmem>>, vector<1x8x1280xbf16>
    %1 = vector.shape_cast %0 : vector<1x8x1280xbf16> to vector<8x1280xbf16>
    %c0_2 = arith.constant 0 : index
    %c0_3 = arith.constant 0 : index
    %2 = vector.load %arg7[%c0_2, %c0_3] : memref<8x1664xbf16, #tpu.memory_space<vmem>>, vector<8x1280xbf16>
    tpu.vector_store %arg7[%c0_2, %c0_3], %1 {strides = array<i32>} : memref<8x1664xbf16, #tpu.memory_space<vmem>>, vector<8x1280xbf16>,
    %c0_4 = arith.constant 0 : index
    %c0_5 = arith.constant 0 : index
    %c0_6 = arith.constant 0 : index
    %3 = vector.load %arg3[%c0_4, %c0_5, %c0_6] : memref<1x8x1280xbf16, #tpu.memory_space<vmem>>, vector<1x8x384xbf16>
    %4 = vector.shape_cast %3 : vector<1x8x384xbf16> to vector<8x384xbf16>
    %c0_7 = arith.constant 0 : index
    %c1280 = arith.constant 1280 : index
    %5 = vector.load %arg7[%c0_7, %c1280] : memref<8x1664xbf16, #tpu.memory_space<vmem>>, vector<8x384xbf16>
    tpu.vector_store %arg7[%c0_7, %c1280], %4 {strides = array<i32>} : memref<8x1664xbf16, #tpu.memory_space<vmem>>, vector<8x384xbf16>,
    %c0_8 = arith.constant 0 : index
    %c0_9 = arith.constant 0 : index
    %6 = vector.load %arg7[%c0_8, %c0_9] : memref<8x1664xbf16, #tpu.memory_space<vmem>>, vector<8x1280xbf16>
    %c0_10 = arith.constant 0 : index
    %c0_11 = arith.constant 0 : index
    %7 = vector.load %arg8[%c0_10, %c0_11] : memref<72x1280xbf16, #tpu.memory_space<vmem>>, vector<8x1280xbf16>
    tpu.vector_store %arg8[%c0_10, %c0_11], %6 {strides = array<i32>} : memref<72x1280xbf16, #tpu.memory_space<vmem>>, vector<8x1280xbf16>,
    %c0_12 = arith.constant 0 : index
    %c1 = arith.constant 1 : index
    %8 = vector.load %arg7[%c0_12, %c1] : memref<8x1664xbf16, #tpu.memory_space<vmem>>, vector<8x1280xbf16>
    %c8 = arith.constant 8 : index
    %c0_13 = arith.constant 0 : index
    %9 = vector.load %arg8[%c8, %c0_13] : memref<72x1280xbf16, #tpu.memory_space<vmem>>, vector<8x1280xbf16>
    tpu.vector_store %arg8[%c8, %c0_13], %8 {strides = array<i32>} : memref<72x1280xbf16, #tpu.memory_space<vmem>>, vector<8x1280xbf16>,
    %c0_14 = arith.constant 0 : index
    %c2 = arith.constant 2 : index
    %10 = vector.load %arg7[%c0_14, %c2] : memref<8x1664xbf16, #tpu.memory_space<vmem>>, vector<8x1280xbf16>
    %c16 = arith.constant 16 : index
    %c0_15 = arith.constant 0 : index
    %11 = vector.load %arg8[%c16, %c0_15] : memref<72x1280xbf16, #tpu.memory_space<vmem>>, vector<8x1280xbf16>
    tpu.vector_store %arg8[%c16, %c0_15], %10 {strides = array<i32>} : memref<72x1280xbf16, #tpu.memory_space<vmem>>, vector<8x1280xbf16>,
    %c0_16 = arith.constant 0 : index
    %c130 = arith.constant 130 : index
    %12 = vector.load %arg7[%c0_16, %c130] : memref<8x1664xbf16, #tpu.memory_space<vmem>>, vector<8x1280xbf16>
    %c24 = arith.constant 24 : index
    %c0_17 = arith.constant 0 : index
    %13 = vector.load %arg8[%c24, %c0_17] : memref<72x1280xbf16, #tpu.memory_space<vmem>>, vector<8x1280xbf16>
    tpu.vector_store %arg8[%c24, %c0_17], %12 {strides = array<i32>} : memref<72x1280xbf16, #tpu.memory_space<vmem>>, vector<8x1280xbf16>,
    %c0_18 = arith.constant 0 : index
    %c131 = arith.constant 131 : index
    %14 = vector.load %arg7[%c0_18, %c131] : memref<8x1664xbf16, #tpu.memory_space<vmem>>, vector<8x1280xbf16>
    %c32 = arith.constant 32 : index
    %c0_19 = arith.constant 0 : index
    %15 = vector.load %arg8[%c32, %c0_19] : memref<72x1280xbf16, #tpu.memory_space<vmem>>, vector<8x1280xbf16>
    tpu.vector_store %arg8[%c32, %c0_19], %14 {strides = array<i32>} : memref<72x1280xbf16, #tpu.memory_space<vmem>>, vector<8x1280xbf16>,
    %c0_20 = arith.constant 0 : index
    %c132 = arith.constant 132 : index
    %16 = vector.load %arg7[%c0_20, %c132] : memref<8x1664xbf16, #tpu.memory_space<vmem>>, vector<8x1280xbf16>
    %c40 = arith.constant 40 : index
    %c0_21 = arith.constant 0 : index
    %17 = vector.load %arg8[%c40, %c0_21] : memref<72x1280xbf16, #tpu.memory_space<vmem>>, vector<8x1280xbf16>
    tpu.vector_store %arg8[%c40, %c0_21], %16 {strides = array<i32>} : memref<72x1280xbf16, #tpu.memory_space<vmem>>, vector<8x1280xbf16>,
    %c0_22 = arith.constant 0 : index
    %c260 = arith.constant 260 : index
    %18 = vector.load %arg7[%c0_22, %c260] : memref<8x1664xbf16, #tpu.memory_space<vmem>>, vector<8x1280xbf16>
    %c48 = arith.constant 48 : index
    %c0_23 = arith.constant 0 : index
    %19 = vector.load %arg8[%c48, %c0_23] : memref<72x1280xbf16, #tpu.memory_space<vmem>>, vector<8x1280xbf16>
    tpu.vector_store %arg8[%c48, %c0_23], %18 {strides = array<i32>} : memref<72x1280xbf16, #tpu.memory_space<vmem>>, vector<8x1280xbf16>,
    %c0_24 = arith.constant 0 : index
    %c261 = arith.constant 261 : index
    %20 = vector.load %arg7[%c0_24, %c261] : memref<8x1664xbf16, #tpu.memory_space<vmem>>, vector<8x1280xbf16>
    %c56 = arith.constant 56 : index
    %c0_25 = arith.constant 0 : index
    %21 = vector.load %arg8[%c56, %c0_25] : memref<72x1280xbf16, #tpu.memory_space<vmem>>, vector<8x1280xbf16>
    tpu.vector_store %arg8[%c56, %c0_25], %20 {strides = array<i32>} : memref<72x1280xbf16, #tpu.memory_space<vmem>>, vector<8x1280xbf16>,
    %c0_26 = arith.constant 0 : index
    %c262 = arith.constant 262 : index
    %22 = vector.load %arg7[%c0_26, %c262] : memref<8x1664xbf16, #tpu.memory_space<vmem>>, vector<8x1280xbf16>
    %c64 = arith.constant 64 : index
    %c0_27 = arith.constant 0 : index
    %23 = vector.load %arg8[%c64, %c0_27] : memref<72x1280xbf16, #tpu.memory_space<vmem>>, vector<8x1280xbf16>
    tpu.vector_store %arg8[%c64, %c0_27], %22 {strides = array<i32>} : memref<72x1280xbf16, #tpu.memory_space<vmem>>, vector<8x1280xbf16>,
    %c0_28 = arith.constant 0 : index
    %c0_29 = arith.constant 0 : index
    %24 = vector.load %arg4[%c0_28, %c0_29] : memref<4x72xbf16, #tpu.memory_space<vmem>>, vector<4x72xbf16>
    %c0_30 = arith.constant 0 : index
    %c0_31 = arith.constant 0 : index
    %25 = vector.load %arg8[%c0_30, %c0_31] : memref<72x1280xbf16, #tpu.memory_space<vmem>>, vector<72x1280xbf16>
    %cst = arith.constant dense<0.000000e+00> : vector<4x1280xf32>
    %26 = tpu.matmul %24, %25, %cst {dimension_numbers = #tpu.dot_dimension_numbers<[1], [0], [0], [1], [0, 0, 1, 1], [], []>} : vector<4x72xbf16>, vector<72x1280xbf16>, vector<4x1280xf32> -> vector<4x1280xf32>
    %c0_32 = arith.constant 0 : index
    %c0_33 = arith.constant 0 : index
    %27 = vector.load %arg5[%c0_32, %c0_33] : memref<4x1xf32, #tpu.memory_space<vmem>>, vector<4x1xf32>
    %28 = vector.broadcast %27 : vector<4x1xf32> to vector<4x1280xf32>
    %29 = arith.addf %26, %28 : vector<4x1280xf32>
    %cst_34 = arith.constant 0.000000e+00 : f32
    %30 = vector.broadcast %cst_34 : f32 to vector<4x1280xf32>
    %31 = arith.maximumf %29, %30 : vector<4x1280xf32>
    %32 = arith.truncf %31 : vector<4x1280xf32> to vector<4x1280xbf16>
    %c0_35 = arith.constant 0 : index
    %c0_36 = arith.constant 0 : index
    %c0_37 = arith.constant 0 : index
    %33 = vector.load %arg6[%c0_35, %c0_36, %c0_37] : memref<1x4x1280xbf16, #tpu.memory_space<vmem>>, vector<1x4x1280xbf16>
    %34 = vector.shape_cast %33 : vector<1x4x1280xbf16> to vector<4x1280xbf16>
    %35 = vector.shape_cast %32 : vector<4x1280xbf16> to vector<1x4x1280xbf16>
    tpu.vector_store %arg6[%c0_35, %c0_36, %c0_37], %35 {strides = array<i32>} : memref<1x4x1280xbf16, #tpu.memory_space<vmem>>, vector<1x4x1280xbf16>,
    return
  }
  func.func @transform_0(%arg0: i32, %arg1: i32) -> (i32, i32, i32) {
    %c0_i32 = arith.constant 0 : i32
    %c0_i32_0 = arith.constant 0 : i32
    return %arg0, %c0_i32, %arg1 : i32, i32, i32
  }
  func.func @transform_1(%arg0: i32, %arg1: i32) -> (i32, i32, i32) {
    %c1_i32 = arith.constant 1 : i32
    %0 = arith.addi %arg1, %c1_i32 : i32
    %c0_i32 = arith.constant 0 : i32
    %c0_i32_0 = arith.constant 0 : i32
    return %arg0, %c0_i32, %0 : i32, i32, i32
  }
  func.func @transform_2(%arg0: i32, %arg1: i32) -> (i32, i32) {
    %c0_i32 = arith.constant 0 : i32
    %c0_i32_0 = arith.constant 0 : i32
    %c0_i32_1 = arith.constant 0 : i32
    return %c0_i32, %c0_i32_0 : i32, i32
  }
  func.func @transform_3(%arg0: i32, %arg1: i32) -> (i32, i32) {
    %c0_i32 = arith.constant 0 : i32
    %c0_i32_0 = arith.constant 0 : i32
    %c0_i32_1 = arith.constant 0 : i32
    return %c0_i32, %c0_i32_0 : i32, i32
  }
  func.func @transform_4(%arg0: i32, %arg1: i32) -> (i32, i32, i32) {
    %c0_i32 = arith.constant 0 : i32
    %c0_i32_0 = arith.constant 0 : i32
    return %arg0, %c0_i32, %arg1 : i32, i32, i32
  }
}

module attributes {stable_mosaic.version = 11 : i64} {
  func.func @kernel(%arg0: i32, %arg1: i32, %arg2: memref<1x4x1536xbf16, #tpu.memory_space<vmem>>, %arg3: memref<1x4x1536xbf16, #tpu.memory_space<vmem>>, %arg4: memref<4x36xbf16, #tpu.memory_space<vmem>>, %arg5: memref<4x1xf32, #tpu.memory_space<vmem>>, %arg6: memref<1x4x1536xbf16, #tpu.memory_space<vmem>>, %arg7: memref<4x2176xbf16, #tpu.memory_space<vmem>>, %arg8: memref<36x1536xbf16, #tpu.memory_space<vmem>>) attributes {dimension_semantics = [#tpu.dimension_semantics<parallel>, #tpu.dimension_semantics<parallel>], iteration_bounds = array<i64: 2, 43>, scalar_prefetch = 0 : i64, scratch_operands = 2 : i64, tpu.core_type = #tpu.core_type<tc>, window_params = [{transform_indices = @transform_0, window_bounds = array<i64: 1, 4, 1536>}, {transform_indices = @transform_1, window_bounds = array<i64: 1, 4, 1536>}, {pipeline_mode = #tpu.pipeline_mode<synchronous>, transform_indices = @transform_2, window_bounds = array<i64: 4, 36>}, {pipeline_mode = #tpu.pipeline_mode<synchronous>, transform_indices = @transform_3, window_bounds = array<i64: 4, 1>}, {transform_indices = @transform_4, window_bounds = array<i64: 1, 4, 1536>}]} {
    %c0 = arith.constant 0 : index
    %c0_0 = arith.constant 0 : index
    %c0_1 = arith.constant 0 : index
    %0 = vector.load %arg2[%c0, %c0_0, %c0_1] : memref<1x4x1536xbf16, #tpu.memory_space<vmem>>, vector<1x4x1536xbf16>
    %1 = vector.shape_cast %0 : vector<1x4x1536xbf16> to vector<4x1536xbf16>
    %c0_2 = arith.constant 0 : index
    %c0_3 = arith.constant 0 : index
    %2 = vector.load %arg7[%c0_2, %c0_3] : memref<4x2176xbf16, #tpu.memory_space<vmem>>, vector<4x1536xbf16>
    tpu.vector_store %arg7[%c0_2, %c0_3], %1 {strides = array<i32>} : memref<4x2176xbf16, #tpu.memory_space<vmem>>, vector<4x1536xbf16>,
    %c0_4 = arith.constant 0 : index
    %c0_5 = arith.constant 0 : index
    %c0_6 = arith.constant 0 : index
    %3 = vector.load %arg3[%c0_4, %c0_5, %c0_6] : memref<1x4x1536xbf16, #tpu.memory_space<vmem>>, vector<1x4x640xbf16>
    %4 = vector.shape_cast %3 : vector<1x4x640xbf16> to vector<4x640xbf16>
    %c0_7 = arith.constant 0 : index
    %c1536 = arith.constant 1536 : index
    %5 = vector.load %arg7[%c0_7, %c1536] : memref<4x2176xbf16, #tpu.memory_space<vmem>>, vector<4x640xbf16>
    tpu.vector_store %arg7[%c0_7, %c1536], %4 {strides = array<i32>} : memref<4x2176xbf16, #tpu.memory_space<vmem>>, vector<4x640xbf16>,
    %c0_8 = arith.constant 0 : index
    %c0_9 = arith.constant 0 : index
    %6 = vector.load %arg7[%c0_8, %c0_9] : memref<4x2176xbf16, #tpu.memory_space<vmem>>, vector<4x1536xbf16>
    %c0_10 = arith.constant 0 : index
    %c0_11 = arith.constant 0 : index
    %7 = vector.load %arg8[%c0_10, %c0_11] : memref<36x1536xbf16, #tpu.memory_space<vmem>>, vector<4x1536xbf16>
    tpu.vector_store %arg8[%c0_10, %c0_11], %6 {strides = array<i32>} : memref<36x1536xbf16, #tpu.memory_space<vmem>>, vector<4x1536xbf16>,
    %c0_12 = arith.constant 0 : index
    %c1 = arith.constant 1 : index
    %8 = vector.load %arg7[%c0_12, %c1] : memref<4x2176xbf16, #tpu.memory_space<vmem>>, vector<4x1536xbf16>
    %c4 = arith.constant 4 : index
    %c0_13 = arith.constant 0 : index
    %9 = vector.load %arg8[%c4, %c0_13] : memref<36x1536xbf16, #tpu.memory_space<vmem>>, vector<4x1536xbf16>
    tpu.vector_store %arg8[%c4, %c0_13], %8 {strides = array<i32>} : memref<36x1536xbf16, #tpu.memory_space<vmem>>, vector<4x1536xbf16>,
    %c0_14 = arith.constant 0 : index
    %c2 = arith.constant 2 : index
    %10 = vector.load %arg7[%c0_14, %c2] : memref<4x2176xbf16, #tpu.memory_space<vmem>>, vector<4x1536xbf16>
    %c8 = arith.constant 8 : index
    %c0_15 = arith.constant 0 : index
    %11 = vector.load %arg8[%c8, %c0_15] : memref<36x1536xbf16, #tpu.memory_space<vmem>>, vector<4x1536xbf16>
    tpu.vector_store %arg8[%c8, %c0_15], %10 {strides = array<i32>} : memref<36x1536xbf16, #tpu.memory_space<vmem>>, vector<4x1536xbf16>,
    %c0_16 = arith.constant 0 : index
    %c258 = arith.constant 258 : index
    %12 = vector.load %arg7[%c0_16, %c258] : memref<4x2176xbf16, #tpu.memory_space<vmem>>, vector<4x1536xbf16>
    %c12 = arith.constant 12 : index
    %c0_17 = arith.constant 0 : index
    %13 = vector.load %arg8[%c12, %c0_17] : memref<36x1536xbf16, #tpu.memory_space<vmem>>, vector<4x1536xbf16>
    tpu.vector_store %arg8[%c12, %c0_17], %12 {strides = array<i32>} : memref<36x1536xbf16, #tpu.memory_space<vmem>>, vector<4x1536xbf16>,
    %c0_18 = arith.constant 0 : index
    %c259 = arith.constant 259 : index
    %14 = vector.load %arg7[%c0_18, %c259] : memref<4x2176xbf16, #tpu.memory_space<vmem>>, vector<4x1536xbf16>
    %c16 = arith.constant 16 : index
    %c0_19 = arith.constant 0 : index
    %15 = vector.load %arg8[%c16, %c0_19] : memref<36x1536xbf16, #tpu.memory_space<vmem>>, vector<4x1536xbf16>
    tpu.vector_store %arg8[%c16, %c0_19], %14 {strides = array<i32>} : memref<36x1536xbf16, #tpu.memory_space<vmem>>, vector<4x1536xbf16>,
    %c0_20 = arith.constant 0 : index
    %c260 = arith.constant 260 : index
    %16 = vector.load %arg7[%c0_20, %c260] : memref<4x2176xbf16, #tpu.memory_space<vmem>>, vector<4x1536xbf16>
    %c20 = arith.constant 20 : index
    %c0_21 = arith.constant 0 : index
    %17 = vector.load %arg8[%c20, %c0_21] : memref<36x1536xbf16, #tpu.memory_space<vmem>>, vector<4x1536xbf16>
    tpu.vector_store %arg8[%c20, %c0_21], %16 {strides = array<i32>} : memref<36x1536xbf16, #tpu.memory_space<vmem>>, vector<4x1536xbf16>,
    %c0_22 = arith.constant 0 : index
    %c516 = arith.constant 516 : index
    %18 = vector.load %arg7[%c0_22, %c516] : memref<4x2176xbf16, #tpu.memory_space<vmem>>, vector<4x1536xbf16>
    %c24 = arith.constant 24 : index
    %c0_23 = arith.constant 0 : index
    %19 = vector.load %arg8[%c24, %c0_23] : memref<36x1536xbf16, #tpu.memory_space<vmem>>, vector<4x1536xbf16>
    tpu.vector_store %arg8[%c24, %c0_23], %18 {strides = array<i32>} : memref<36x1536xbf16, #tpu.memory_space<vmem>>, vector<4x1536xbf16>,
    %c0_24 = arith.constant 0 : index
    %c517 = arith.constant 517 : index
    %20 = vector.load %arg7[%c0_24, %c517] : memref<4x2176xbf16, #tpu.memory_space<vmem>>, vector<4x1536xbf16>
    %c28 = arith.constant 28 : index
    %c0_25 = arith.constant 0 : index
    %21 = vector.load %arg8[%c28, %c0_25] : memref<36x1536xbf16, #tpu.memory_space<vmem>>, vector<4x1536xbf16>
    tpu.vector_store %arg8[%c28, %c0_25], %20 {strides = array<i32>} : memref<36x1536xbf16, #tpu.memory_space<vmem>>, vector<4x1536xbf16>,
    %c0_26 = arith.constant 0 : index
    %c518 = arith.constant 518 : index
    %22 = vector.load %arg7[%c0_26, %c518] : memref<4x2176xbf16, #tpu.memory_space<vmem>>, vector<4x1536xbf16>
    %c32 = arith.constant 32 : index
    %c0_27 = arith.constant 0 : index
    %23 = vector.load %arg8[%c32, %c0_27] : memref<36x1536xbf16, #tpu.memory_space<vmem>>, vector<4x1536xbf16>
    tpu.vector_store %arg8[%c32, %c0_27], %22 {strides = array<i32>} : memref<36x1536xbf16, #tpu.memory_space<vmem>>, vector<4x1536xbf16>,
    %c0_28 = arith.constant 0 : index
    %c0_29 = arith.constant 0 : index
    %24 = vector.load %arg4[%c0_28, %c0_29] : memref<4x36xbf16, #tpu.memory_space<vmem>>, vector<4x36xbf16>
    %c0_30 = arith.constant 0 : index
    %c0_31 = arith.constant 0 : index
    %25 = vector.load %arg8[%c0_30, %c0_31] : memref<36x1536xbf16, #tpu.memory_space<vmem>>, vector<36x1536xbf16>
    %cst = arith.constant dense<0.000000e+00> : vector<4x1536xf32>
    %26 = tpu.matmul %24, %25, %cst {dimension_numbers = #tpu.dot_dimension_numbers<[1], [0], [0], [1], [0, 0, 1, 1], [], []>} : vector<4x36xbf16>, vector<36x1536xbf16>, vector<4x1536xf32> -> vector<4x1536xf32>
    %c0_32 = arith.constant 0 : index
    %c0_33 = arith.constant 0 : index
    %27 = vector.load %arg5[%c0_32, %c0_33] : memref<4x1xf32, #tpu.memory_space<vmem>>, vector<4x1xf32>
    %28 = vector.broadcast %27 : vector<4x1xf32> to vector<4x1536xf32>
    %29 = arith.addf %26, %28 : vector<4x1536xf32>
    %cst_34 = arith.constant 0.000000e+00 : f32
    %30 = vector.broadcast %cst_34 : f32 to vector<4x1536xf32>
    %31 = arith.maximumf %29, %30 : vector<4x1536xf32>
    %32 = arith.truncf %31 : vector<4x1536xf32> to vector<4x1536xbf16>
    %c0_35 = arith.constant 0 : index
    %c0_36 = arith.constant 0 : index
    %c0_37 = arith.constant 0 : index
    %33 = vector.load %arg6[%c0_35, %c0_36, %c0_37] : memref<1x4x1536xbf16, #tpu.memory_space<vmem>>, vector<1x4x1536xbf16>
    %34 = vector.shape_cast %33 : vector<1x4x1536xbf16> to vector<4x1536xbf16>
    %35 = vector.shape_cast %32 : vector<4x1536xbf16> to vector<1x4x1536xbf16>
    tpu.vector_store %arg6[%c0_35, %c0_36, %c0_37], %35 {strides = array<i32>} : memref<1x4x1536xbf16, #tpu.memory_space<vmem>>, vector<1x4x1536xbf16>,
    return
  }
  func.func @transform_0(%arg0: i32, %arg1: i32) -> (i32, i32, i32) {
    %c0_i32 = arith.constant 0 : i32
    %c0_i32_0 = arith.constant 0 : i32
    return %arg0, %c0_i32, %arg1 : i32, i32, i32
  }
  func.func @transform_1(%arg0: i32, %arg1: i32) -> (i32, i32, i32) {
    %c1_i32 = arith.constant 1 : i32
    %0 = arith.addi %arg1, %c1_i32 : i32
    %c0_i32 = arith.constant 0 : i32
    %c0_i32_0 = arith.constant 0 : i32
    return %arg0, %c0_i32, %0 : i32, i32, i32
  }
  func.func @transform_2(%arg0: i32, %arg1: i32) -> (i32, i32) {
    %c0_i32 = arith.constant 0 : i32
    %c0_i32_0 = arith.constant 0 : i32
    %c0_i32_1 = arith.constant 0 : i32
    return %c0_i32, %c0_i32_0 : i32, i32
  }
  func.func @transform_3(%arg0: i32, %arg1: i32) -> (i32, i32) {
    %c0_i32 = arith.constant 0 : i32
    %c0_i32_0 = arith.constant 0 : i32
    %c0_i32_1 = arith.constant 0 : i32
    return %c0_i32, %c0_i32_0 : i32, i32
  }
  func.func @transform_4(%arg0: i32, %arg1: i32) -> (i32, i32, i32) {
    %c0_i32 = arith.constant 0 : i32
    %c0_i32_0 = arith.constant 0 : i32
    return %arg0, %c0_i32, %arg1 : i32, i32, i32
  }
}

module attributes {stable_mosaic.version = 11 : i64} {
  func.func @kernel(%arg0: i32, %arg1: i32, %arg2: memref<1x4x1024xbf16, #tpu.memory_space<vmem>>, %arg3: memref<1x4xbf16, #tpu.memory_space<vmem>>, %arg4: memref<1x1xf32, #tpu.memory_space<vmem>>, %arg5: memref<1x1x1024xf32, #tpu.memory_space<vmem>>) attributes {dimension_semantics = [#tpu.dimension_semantics<parallel>, #tpu.dimension_semantics<parallel>], iteration_bounds = array<i64: 2, 64>, scalar_prefetch = 0 : i64, scratch_operands = 0 : i64, tpu.core_type = #tpu.core_type<tc>, window_params = [{transform_indices = @transform_0, window_bounds = array<i64: 1, 4, 1024>}, {pipeline_mode = #tpu.pipeline_mode<synchronous>, transform_indices = @transform_1, window_bounds = array<i64: 1, 4>}, {pipeline_mode = #tpu.pipeline_mode<synchronous>, transform_indices = @transform_2, window_bounds = array<i64: 1, 1>}, {transform_indices = @transform_3, window_bounds = array<i64: 1, 1, 1024>}]} {
    %c0 = arith.constant 0 : index
    %c0_0 = arith.constant 0 : index
    %0 = vector.load %arg3[%c0, %c0_0] : memref<1x4xbf16, #tpu.memory_space<vmem>>, vector<1x4xbf16>
    %c0_1 = arith.constant 0 : index
    %c0_2 = arith.constant 0 : index
    %c0_3 = arith.constant 0 : index
    %1 = vector.load %arg2[%c0_1, %c0_2, %c0_3] : memref<1x4x1024xbf16, #tpu.memory_space<vmem>>, vector<1x4x1024xbf16>
    %2 = vector.shape_cast %1 : vector<1x4x1024xbf16> to vector<4x1024xbf16>
    %cst = arith.constant dense<0.000000e+00> : vector<1x1024xf32>
    %3 = tpu.matmul %0, %2, %cst {dimension_numbers = #tpu.dot_dimension_numbers<[1], [0], [0], [1], [0, 0, 1, 1], [], []>} : vector<1x4xbf16>, vector<4x1024xbf16>, vector<1x1024xf32> -> vector<1x1024xf32>
    %c0_4 = arith.constant 0 : index
    %c0_5 = arith.constant 0 : index
    %4 = vector.load %arg4[%c0_4, %c0_5] : memref<1x1xf32, #tpu.memory_space<vmem>>, vector<1x1xf32>
    %5 = vector.broadcast %4 : vector<1x1xf32> to vector<1x1024xf32>
    %6 = arith.addf %3, %5 : vector<1x1024xf32>
    %7 = arith.negf %6 : vector<1x1024xf32>
    %8 = math.exp %7 : vector<1x1024xf32>
    %cst_6 = arith.constant 1.000000e+00 : f32
    %9 = vector.broadcast %cst_6 : f32 to vector<1x1024xf32>
    %10 = arith.addf %9, %8 : vector<1x1024xf32>
    %11 = arith.divf %9, %10 : vector<1x1024xf32>
    %c0_7 = arith.constant 0 : index
    %c0_8 = arith.constant 0 : index
    %c0_9 = arith.constant 0 : index
    %12 = vector.load %arg5[%c0_7, %c0_8, %c0_9] : memref<1x1x1024xf32, #tpu.memory_space<vmem>>, vector<1x1x1024xf32>
    %13 = vector.shape_cast %12 : vector<1x1x1024xf32> to vector<1x1024xf32>
    %14 = vector.shape_cast %11 : vector<1x1024xf32> to vector<1x1x1024xf32>
    tpu.vector_store %arg5[%c0_7, %c0_8, %c0_9], %14 {strides = array<i32>} : memref<1x1x1024xf32, #tpu.memory_space<vmem>>, vector<1x1x1024xf32>,
    return
  }
  func.func @transform_0(%arg0: i32, %arg1: i32) -> (i32, i32, i32) {
    %c0_i32 = arith.constant 0 : i32
    %c0_i32_0 = arith.constant 0 : i32
    return %arg0, %c0_i32, %arg1 : i32, i32, i32
  }
  func.func @transform_1(%arg0: i32, %arg1: i32) -> (i32, i32) {
    %c0_i32 = arith.constant 0 : i32
    %c0_i32_0 = arith.constant 0 : i32
    %c0_i32_1 = arith.constant 0 : i32
    return %c0_i32, %c0_i32_0 : i32, i32
  }
  func.func @transform_2(%arg0: i32, %arg1: i32) -> (i32, i32) {
    %c0_i32 = arith.constant 0 : i32
    %c0_i32_0 = arith.constant 0 : i32
    %c0_i32_1 = arith.constant 0 : i32
    return %c0_i32, %c0_i32_0 : i32, i32
  }
  func.func @transform_3(%arg0: i32, %arg1: i32) -> (i32, i32, i32) {
    %c0_i32 = arith.constant 0 : i32
    %c0_i32_0 = arith.constant 0 : i32
    return %arg0, %c0_i32, %arg1 : i32, i32, i32
  }
}

</mosaic_0001>

<bundles_post_ra>
// kernel: mul.80
= control target key start
LH: loop header
LB: loop body
LE: loop exit
PB: predicated region body
PF: predicated region fallthrough
CT: control target
= control target key end

     0   :  { %vm3_vm0 = vcmask 523264   ;;  %s29_s12 = smov 64   ;;  %vm14_vm1 = vcmask 1048064   ;;  %s64_s0 = inlined_call_operand.vmem [shape: f32[32,64], index: 0, kind: input, shape index: {}]   ;;  %s65_s1 = inlined_call_operand.vmem [shape: f32[2048], index: 1, kind: output, shape index: {}]  }
   0x1   :  { %v25_v0 = vld [vmem:[%s64_s0 + $0x1] ss:$2 sm:$0xff]   ;;  %v2_v1 = vld [vmem:[%s64_s0] ss:$2 sm:$0xff]   ;;  %v23_v2 = vld [vmem:[%s64_s0 + $0x10] ss:$2 sm:$0xff]  }
   0x2   :  { %12 = vrot.lane.b32.xlu0 %v25_v0, %s29_s12  ;;  %4 = vst.msk [vmem:[%s65_s1] sm:$0xff] %vm3_vm0, %v2_v1   ;;  %24 = vst.msk [vmem:[%s65_s1 + $0x8] sm:$0xff] %vm3_vm0, %v23_v2   ;;  %v26_v3 = vld [vmem:[%s64_s0 + $0x11] ss:$2 sm:$0xff]  }
   0x6   :  { %18 = vrot.lane.b32.xlu0 %v26_v3, %s29_s12 }
  0x74   :  { %v13_v4 = vpop.permute.xlu0 %12  }
  0x75   :  { %15 = vst.msk [vmem:[%s65_s1] sm:$0xff] %vm14_vm1, %v13_v4  }
  0x78   :  { %v19_v5 = vpop.permute.xlu0 %18  }
  0x79   :  { %27 = vst.msk [vmem:[%s65_s1 + $0x8] sm:$0xff] %vm14_vm1, %v19_v5  }

// kernel: decoder_forward.14
= control target key start
LH: loop header
LB: loop body
LE: loop exit
PB: predicated region body
PF: predicated region fallthrough
CT: control target
= control target key end

     0   :  { %s1201_s12 = smov 0   ;;  %s1203_s13 = smov 0   ;;  %s1479_s0 = inlined_call_operand.vmem [shape: bf16[2,256], index: 0, kind: input, shape index: {}]   ;;  %s1480_s1 = inlined_call_operand.vmem [shape: bf16[256,2048], index: 1, kind: input, shape index: {}]   ;;  %s1481_s2 = inlined_call_operand.vmem [shape: f32[1,2048], index: 2, kind: input, shape index: {}]   ;;  %s1482_s3 = inlined_call_operand.vmem [shape: bf16[2,2048], index: 3, kind: output, shape index: {}]  }
   0x1   :  { %s1205_s14 = smov 0  }
   0x2 LB: > { %s953_s15 = sadd.s32 4294967295, %s1178_s14   ;;  %s1218_s16 = sadd.s32 1, %s1178_s14   ;;  %s1178_s14 = sphi %s1205_s14, %s1485_s14   ;;  %s1174_s13 = sphi %s1203_s13, %s1484_s13   ;;  %s1170_s12 = sphi %s1201_s12, %s1483_s12  }
   0x3   : > { %s38_s17 = ssub.s32 %s1178_s14, %s1218_s16  ;;  %s41_s18 = sadd.s32 1, %s1174_s13 }
   0x4   : > { %p39_p0 = scmp.eq.s32.totalorder %s38_s17, 0  ;;  %p48_p1 = scmp.ne.s32.totalorder %s1174_s13, %s1170_s12 }
   0x5   : > { %p49_p2 = scmp.eq.s32.totalorder %s1178_s14, 0  ;;  %p956_p4 = scmp.ge.s32.totalorder %s1178_s14, 4 }
   0x6   : > { %s1227_s19 = scalar_select %p39_p0, %s1174_s13, %s41_s18  }
   0x7   : > { %p50_p3 = por %p49_p2, %p48_p1  ;;  %129 = sbr.rel (%p956_p4) target bundleno = 50 (0x32), region = 20 }
   0xe   : > { %132 = sbr.rel (!%p50_p3) target bundleno = 50 (0x32), region = 24  ;;  %s134_s20 = sand.u32 (%p50_p3), 1, %s1174_s13  }
   0xf   : > { %s1034_s21 = sshll.u32 (%p50_p3), %s1178_s14, 4  ;;  %s957_s22 = sshll.u32 (%p50_p3), %s134_s20, 9 }
  0x10   : > { %s1235_s25 = scalar_lea.vmem (%p50_p3), %s1480_s1, %s1034_s21  ;;  %s1240_s26 = scalar_lea.vmem (%p50_p3), [#allocation2], %s957_s22 }
  0x11   : > { %v152_v0 = vld [vmem:[%s1235_s25] sm:$0xff] (%p50_p3)  ;;  %v154_v1 = vld [vmem:[%s1235_s25 + $0x8] sm:$0xff] (%p50_p3) }
  0x12   : > { %v156_v2 = vld [vmem:[%s1235_s25 + $0x40] sm:$0xff] (%p50_p3)  ;;  %153 = vst [vmem:[%s1240_s26] sm:$0xff] (%p50_p3), %v152_v0  ;;  %155 = vst [vmem:[%s1240_s26 + $0x8] sm:$0xff] (%p50_p3), %v154_v1  ;;  %v158_v3 = vld [vmem:[%s1235_s25 + $0x48] sm:$0xff] (%p50_p3) }
  0x13   : > { %157 = vst [vmem:[%s1240_s26 + $0x10] sm:$0xff] (%p50_p3), %v156_v2  ;;  %v160_v4 = vld [vmem:[%s1235_s25 + $0x80] sm:$0xff] (%p50_p3)  ;;  %v162_v5 = vld [vmem:[%s1235_s25 + $0x88] sm:$0xff] (%p50_p3)  ;;  %159 = vst [vmem:[%s1240_s26 + $0x18] sm:$0xff] (%p50_p3), %v158_v3 }
  0x14   : > { %161 = vst [vmem:[%s1240_s26 + $0x20] sm:$0xff] (%p50_p3), %v160_v4  ;;  %163 = vst [vmem:[%s1240_s26 + $0x28] sm:$0xff] (%p50_p3), %v162_v5  ;;  %v164_v6 = vld [vmem:[%s1235_s25 + $0xc0] sm:$0xff] (%p50_p3)  ;;  %v166_v7 = vld [vmem:[%s1235_s25 + $0xc8] sm:$0xff] (%p50_p3) }
  0x15   : > { %v168_v8 = vld [vmem:[%s1235_s25 + $0x100] sm:$0xff]  ;;  %165 = vst [vmem:[%s1240_s26 + $0x30] sm:$0xff] %v164_v6  ;;  %167 = vst [vmem:[%s1240_s26 + $0x38] sm:$0xff] %v166_v7  ;;  %v170_v9 = vld [vmem:[%s1235_s25 + $0x108] sm:$0xff] }
  0x16   : > { %169 = vst [vmem:[%s1240_s26 + $0x40] sm:$0xff] %v168_v8  ;;  %v172_v10 = vld [vmem:[%s1235_s25 + $0x140] sm:$0xff]  ;;  %v174_v11 = vld [vmem:[%s1235_s25 + $0x148] sm:$0xff]  ;;  %171 = vst [vmem:[%s1240_s26 + $0x48] sm:$0xff] %v170_v9 }
  0x17   : > { %173 = vst [vmem:[%s1240_s26 + $0x50] sm:$0xff] %v172_v10  ;;  %175 = vst [vmem:[%s1240_s26 + $0x58] sm:$0xff] %v174_v11  ;;  %v176_v12 = vld [vmem:[%s1235_s25 + $0x180] sm:$0xff]  ;;  %v178_v13 = vld [vmem:[%s1235_s25 + $0x188] sm:$0xff] }
  0x18   : > { %v180_v14 = vld [vmem:[%s1235_s25 + $0x1c0] sm:$0xff]  ;;  %177 = vst [vmem:[%s1240_s26 + $0x60] sm:$0xff] %v176_v12  ;;  %179 = vst [vmem:[%s1240_s26 + $0x68] sm:$0xff] %v178_v13  ;;  %v182_v15 = vld [vmem:[%s1235_s25 + $0x1c8] sm:$0xff] }
  0x19   : > { %181 = vst [vmem:[%s1240_s26 + $0x70] sm:$0xff] %v180_v14  ;;  %v184_v16 = vld [vmem:[%s1235_s25 + $0x200] sm:$0xff]  ;;  %v186_v17 = vld [vmem:[%s1235_s25 + $0x208] sm:$0xff]  ;;  %183 = vst [vmem:[%s1240_s26 + $0x78] sm:$0xff] %v182_v15 }
  0x1a   : > { %185 = vst [vmem:[%s1240_s26 + $0x80] sm:$0xff] %v184_v16  ;;  %187 = vst [vmem:[%s1240_s26 + $0x88] sm:$0xff] %v186_v17  ;;  %v188_v18 = vld [vmem:[%s1235_s25 + $0x240] sm:$0xff]  ;;  %v190_v19 = vld [vmem:[%s1235_s25 + $0x248] sm:$0xff] }
  0x1b   : > { %v192_v20 = vld [vmem:[%s1235_s25 + $0x280] sm:$0xff]  ;;  %189 = vst [vmem:[%s1240_s26 + $0x90] sm:$0xff] %v188_v18  ;;  %191 = vst [vmem:[%s1240_s26 + $0x98] sm:$0xff] %v190_v19  ;;  %v194_v21 = vld [vmem:[%s1235_s25 + $0x288] sm:$0xff] }
  0x1c   : > { %193 = vst [vmem:[%s1240_s26 + $0xa0] sm:$0xff] %v192_v20  ;;  %v196_v22 = vld [vmem:[%s1235_s25 + $0x2c0] sm:$0xff]  ;;  %v198_v23 = vld [vmem:[%s1235_s25 + $0x2c8] sm:$0xff]  ;;  %195 = vst [vmem:[%s1240_s26 + $0xa8] sm:$0xff] %v194_v21 }
  0x1d   : > { %197 = vst [vmem:[%s1240_s26 + $0xb0] sm:$0xff] %v196_v22  ;;  %199 = vst [vmem:[%s1240_s26 + $0xb8] sm:$0xff] %v198_v23  ;;  %v200_v24 = vld [vmem:[%s1235_s25 + $0x300] sm:$0xff]  ;;  %v202_v25 = vld [vmem:[%s1235_s25 + $0x308] sm:$0xff] }
  0x1e   : > { %v204_v26 = vld [vmem:[%s1235_s25 + $0x340] sm:$0xff]  ;;  %201 = vst [vmem:[%s1240_s26 + $0xc0] sm:$0xff] %v200_v24  ;;  %203 = vst [vmem:[%s1240_s26 + $0xc8] sm:$0xff] %v202_v25  ;;  %v206_v27 = vld [vmem:[%s1235_s25 + $0x348] sm:$0xff] }
  0x1f   : > { %205 = vst [vmem:[%s1240_s26 + $0xd0] sm:$0xff] %v204_v26  ;;  %v208_v28 = vld [vmem:[%s1235_s25 + $0x380] sm:$0xff]  ;;  %v210_v29 = vld [vmem:[%s1235_s25 + $0x388] sm:$0xff]  ;;  %207 = vst [vmem:[%s1240_s26 + $0xd8] sm:$0xff] %v206_v27 }
  0x20   : > { %209 = vst [vmem:[%s1240_s26 + $0xe0] sm:$0xff] %v208_v28  ;;  %211 = vst [vmem:[%s1240_s26 + $0xe8] sm:$0xff] %v210_v29  ;;  %v212_v30 = vld [vmem:[%s1235_s25 + $0x3c0] sm:$0xff]  ;;  %v214_v31 = vld [vmem:[%s1235_s25 + $0x3c8] sm:$0xff] }
  0x21   : > { %v216_v32 = vld [vmem:[%s1235_s25 + $0x400] sm:$0xff]  ;;  %213 = vst [vmem:[%s1240_s26 + $0xf0] sm:$0xff] %v212_v30  ;;  %215 = vst [vmem:[%s1240_s26 + $0xf8] sm:$0xff] %v214_v31  ;;  %v218_v33 = vld [vmem:[%s1235_s25 + $0x408] sm:$0xff] }
  0x22   : > { %217 = vst [vmem:[%s1240_s26 + $0x100] sm:$0xff] %v216_v32  ;;  %v220_v34 = vld [vmem:[%s1235_s25 + $0x440] sm:$0xff]  ;;  %v222_v35 = vld [vmem:[%s1235_s25 + $0x448] sm:$0xff]  ;;  %219 = vst [vmem:[%s1240_s26 + $0x108] sm:$0xff] %v218_v33 }
  0x23   : > { %221 = vst [vmem:[%s1240_s26 + $0x110] sm:$0xff] %v220_v34  ;;  %223 = vst [vmem:[%s1240_s26 + $0x118] sm:$0xff] %v222_v35  ;;  %v224_v36 = vld [vmem:[%s1235_s25 + $0x480] sm:$0xff]  ;;  %v226_v37 = vld [vmem:[%s1235_s25 + $0x488] sm:$0xff] }
  0x24   : > { %v228_v38 = vld [vmem:[%s1235_s25 + $0x4c0] sm:$0xff]  ;;  %225 = vst [vmem:[%s1240_s26 + $0x120] sm:$0xff] %v224_v36  ;;  %227 = vst [vmem:[%s1240_s26 + $0x128] sm:$0xff] %v226_v37  ;;  %v230_v39 = vld [vmem:[%s1235_s25 + $0x4c8] sm:$0xff] }
  0x25   : > { %229 = vst [vmem:[%s1240_s26 + $0x130] sm:$0xff] %v228_v38  ;;  %v232_v40 = vld [vmem:[%s1235_s25 + $0x500] sm:$0xff]  ;;  %v234_v41 = vld [vmem:[%s1235_s25 + $0x508] sm:$0xff]  ;;  %231 = vst [vmem:[%s1240_s26 + $0x138] sm:$0xff] %v230_v39 }
  0x26   : > { %233 = vst [vmem:[%s1240_s26 + $0x140] sm:$0xff] %v232_v40  ;;  %235 = vst [vmem:[%s1240_s26 + $0x148] sm:$0xff] %v234_v41  ;;  %v236_v42 = vld [vmem:[%s1235_s25 + $0x540] sm:$0xff]  ;;  %v238_v43 = vld [vmem:[%s1235_s25 + $0x548] sm:$0xff] }
  0x27   : > { %v240_v44 = vld [vmem:[%s1235_s25 + $0x580] sm:$0xff]  ;;  %237 = vst [vmem:[%s1240_s26 + $0x150] sm:$0xff] %v236_v42  ;;  %239 = vst [vmem:[%s1240_s26 + $0x158] sm:$0xff] %v238_v43  ;;  %v242_v45 = vld [vmem:[%s1235_s25 + $0x588] sm:$0xff] }
  0x28   : > { %241 = vst [vmem:[%s1240_s26 + $0x160] sm:$0xff] %v240_v44  ;;  %v244_v46 = vld [vmem:[%s1235_s25 + $0x5c0] sm:$0xff]  ;;  %v246_v47 = vld [vmem:[%s1235_s25 + $0x5c8] sm:$0xff]  ;;  %243 = vst [vmem:[%s1240_s26 + $0x168] sm:$0xff] %v242_v45 }
  0x29   : > { %245 = vst [vmem:[%s1240_s26 + $0x170] sm:$0xff] %v244_v46  ;;  %247 = vst [vmem:[%s1240_s26 + $0x178] sm:$0xff] %v246_v47  ;;  %v248_v48 = vld [vmem:[%s1235_s25 + $0x600] sm:$0xff]  ;;  %v250_v49 = vld [vmem:[%s1235_s25 + $0x608] sm:$0xff] }
  0x2a   : > { %v252_v50 = vld [vmem:[%s1235_s25 + $0x640] sm:$0xff]  ;;  %249 = vst [vmem:[%s1240_s26 + $0x180] sm:$0xff] %v248_v48  ;;  %251 = vst [vmem:[%s1240_s26 + $0x188] sm:$0xff] %v250_v49  ;;  %v254_v51 = vld [vmem:[%s1235_s25 + $0x648] sm:$0xff] }
  0x2b   : > { %253 = vst [vmem:[%s1240_s26 + $0x190] sm:$0xff] %v252_v50  ;;  %v256_v52 = vld [vmem:[%s1235_s25 + $0x680] sm:$0xff]  ;;  %v258_v53 = vld [vmem:[%s1235_s25 + $0x688] sm:$0xff]  ;;  %255 = vst [vmem:[%s1240_s26 + $0x198] sm:$0xff] %v254_v51 }
  0x2c   : > { %257 = vst [vmem:[%s1240_s26 + $0x1a0] sm:$0xff] %v256_v52  ;;  %259 = vst [vmem:[%s1240_s26 + $0x1a8] sm:$0xff] %v258_v53  ;;  %v260_v54 = vld [vmem:[%s1235_s25 + $0x6c0] sm:$0xff]  ;;  %v262_v55 = vld [vmem:[%s1235_s25 + $0x6c8] sm:$0xff] }
  0x2d   : > { %v264_v56 = vld [vmem:[%s1235_s25 + $0x700] sm:$0xff]  ;;  %261 = vst [vmem:[%s1240_s26 + $0x1b0] sm:$0xff] %v260_v54  ;;  %263 = vst [vmem:[%s1240_s26 + $0x1b8] sm:$0xff] %v262_v55  ;;  %v266_v57 = vld [vmem:[%s1235_s25 + $0x708] sm:$0xff] }
  0x2e   : > { %265 = vst [vmem:[%s1240_s26 + $0x1c0] sm:$0xff] %v264_v56  ;;  %v268_v58 = vld [vmem:[%s1235_s25 + $0x740] sm:$0xff]  ;;  %v270_v59 = vld [vmem:[%s1235_s25 + $0x748] sm:$0xff]  ;;  %267 = vst [vmem:[%s1240_s26 + $0x1c8] sm:$0xff] %v266_v57 }
  0x2f   : > { %269 = vst [vmem:[%s1240_s26 + $0x1d0] sm:$0xff] %v268_v58  ;;  %271 = vst [vmem:[%s1240_s26 + $0x1d8] sm:$0xff] %v270_v59  ;;  %v272_v60 = vld [vmem:[%s1235_s25 + $0x780] sm:$0xff]  ;;  %v274_v61 = vld [vmem:[%s1235_s25 + $0x788] sm:$0xff] }
  0x30   : > { %v276_v62 = vld [vmem:[%s1235_s25 + $0x7c0] sm:$0xff]  ;;  %273 = vst [vmem:[%s1240_s26 + $0x1e0] sm:$0xff] %v272_v60  ;;  %275 = vst [vmem:[%s1240_s26 + $0x1e8] sm:$0xff] %v274_v61  ;;  %v278_v63 = vld [vmem:[%s1235_s25 + $0x7c8] sm:$0xff] }
  0x31   : > { %277 = vst [vmem:[%s1240_s26 + $0x1f0] sm:$0xff] %v276_v62  ;;  %279 = vst [vmem:[%s1240_s26 + $0x1f8] sm:$0xff] %v278_v63 }
  0x32 PF: > { %p960_p5 = scmp.ge.s32.totalorder %s1178_s14, 1  ;;  %p292_p6 = scmp.lt.s32.totalorder %s1178_s14, 5 }
  0x34   : > { %p293_p7 = pnand %p960_p5, %p292_p6 }
  0x35   : > { %s299_s27 = sand.u32 (!%p293_p7), 1, %s1170_s12   ;;  %v1373_v0 = vld.sshfl [vmem:[%s1479_s0] sm:$0x11 pattern:$0x75316420] (!%p293_p7)  ;;  %v403_v1 = vlaneseq (!%p293_p7)  ;;  %s962_s5 = sshll.u32 (!%p293_p7), %s953_s15, 2 }
  0x36   : > { %296 = sbr.rel (%p293_p7) target bundleno = 345 (0x159), region = 51  ;;  %s961_s30 = sshll.u32 (!%p293_p7), %s299_s27, 9  ;;  %v1180_v3 = vmov (!%p293_p7), 1966171168   ;;  %v431_v7 = vcombine.high (!%p293_p7), %v1373_v0, %v1373_v0 }
  0x37   : > { %v1375_v2 = vshrl.u32 (!%p293_p7), %v403_v1, 7  ;;  %v433_v4 = vunpack.c.l.s4 (!%p293_p7), %v1180_v3  ;;  %s1377_s4 = scalar_lea.vmem (!%p293_p7), [#allocation2], %s961_s30  ;;  %p327_p8 = scmp.lt.s32.totalorder (!%p293_p7), %s962_s5, 15 }
  0x38   : > { %v1060_v5 = vld [vmem:[%s1377_s4 + $0x4] ss:$16 sps:$4 sm:$0xff] (!%p293_p7)   ;;  %v1062_v6 = vld [vmem:[%s1377_s4 + $0xc] ss:$16 sps:$4 sm:$0xff] (!%p293_p7)   ;;  %v1064_v9 = vld [vmem:[%s1377_s4] ss:$16 sps:$4 sm:$0xff] (!%p293_p7)  }
  0x39   : > { %v434_v8 = vunpack.c.0.s8 (!%p293_p7), %v433_v4  ;;  %768 = vmatprep.subr.bf16.mxu0 (!%p293_p7), %v1060_v5  ;;  %v1065_v10 = vld [vmem:[%s1377_s4 + $0x8] ss:$16 sps:$4 sm:$0xff] (!%p293_p7)   ;;  %809 = vmatprep.subr.bf16.mxu1 (!%p293_p7), %v1062_v6  ;;  %v1066_v11 = vld [vmem:[%s1377_s4 + $0x24] ss:$16 sps:$4 sm:$0xff] (!%p293_p7)   ;;  %v1068_v13 = vld [vmem:[%s1377_s4 + $0x2c] ss:$16 sps:$4 sm:$0xff] (!%p293_p7)  }
  0x3a   : > { %769 = vmatpush1.bf16.msra.mxu0 (!%p293_p7), %v1064_v9  ;;  %810 = vmatpush1.bf16.msra.mxu1 (!%p293_p7), %v1065_v10  ;;  %v1070_v14 = vld [vmem:[%s1377_s4 + $0x20] ss:$16 sps:$4 sm:$0xff] (!%p293_p7)   ;;  %v1071_v15 = vld [vmem:[%s1377_s4 + $0x28] ss:$16 sps:$4 sm:$0xff] (!%p293_p7)   ;;  %v1072_v17 = vld [vmem:[%s1377_s4 + $0x44] ss:$16 sps:$4 sm:$0xff] (!%p293_p7)  }
  0x3b   : > { %v1387_v12 = vsub.s32 (!%p293_p7), %v434_v8, %v1375_v2  ;;  %770 = vmatprep.subr.bf16.mxu0 (!%p293_p7), %v1066_v11  ;;  %811 = vmatprep.subr.bf16.mxu1 (!%p293_p7), %v1068_v13  ;;  %v1074_v18 = vld [vmem:[%s1377_s4 + $0x4c] ss:$16 sps:$4 sm:$0xff] (!%p293_p7)   ;;  %v1076_v19 = vld [vmem:[%s1377_s4 + $0x40] ss:$16 sps:$4 sm:$0xff] (!%p293_p7)   ;;  %v1077_v20 = vld [vmem:[%s1377_s4 + $0x48] ss:$16 sps:$4 sm:$0xff] (!%p293_p7)  }
  0x3c   : > { %v1078_v21 = vld [vmem:[%s1377_s4 + $0x64] ss:$16 sps:$4 sm:$0xff] (!%p293_p7)   ;;  %v1080_v22 = vld [vmem:[%s1377_s4 + $0x6c] ss:$16 sps:$4 sm:$0xff] (!%p293_p7)   ;;  %v1082_v23 = vld [vmem:[%s1377_s4 + $0x60] ss:$16 sps:$4 sm:$0xff] (!%p293_p7)  }
  0x3d   : > { %v445_v16 = vrot.slane %v431_v7, %v1387_v12  ;;  %v1083_v24 = vld [vmem:[%s1377_s4 + $0x68] ss:$16 sps:$4 sm:$0xff]   ;;  %v1084_v25 = vld [vmem:[%s1377_s4 + $0x84] ss:$16 sps:$4 sm:$0xff]   ;;  %v1086_v26 = vld [vmem:[%s1377_s4 + $0x8c] ss:$16 sps:$4 sm:$0xff]   ;;  %v438_v11 = vrot.slane %v1373_v0, %v1387_v12 }
  0x3e   : > { %771 = vmatpush1.bf16.msra.mxu0 %v1070_v14  ;;  %812 = vmatpush1.bf16.msra.mxu1 %v1071_v15  ;;  %v1088_v27 = vld [vmem:[%s1377_s4 + $0x80] ss:$16 sps:$4 sm:$0xff]   ;;  %v1089_v28 = vld [vmem:[%s1377_s4 + $0x88] ss:$16 sps:$4 sm:$0xff]   ;;  %v1090_v29 = vld [vmem:[%s1377_s4 + $0xa4] ss:$16 sps:$4 sm:$0xff]  }
  0x3f   : > { %800 = vmatprep.mubr.bf16.mxu0 %v445_v16  ;;  %841 = vmatprep.mubr.bf16.mxu1 %v445_v16  ;;  %v1092_v30 = vld [vmem:[%s1377_s4 + $0xac] ss:$16 sps:$4 sm:$0xff]   ;;  %v1094_v31 = vld [vmem:[%s1377_s4 + $0xa0] ss:$16 sps:$4 sm:$0xff]   ;;  %v1095_v32 = vld [vmem:[%s1377_s4 + $0xa8] ss:$16 sps:$4 sm:$0xff]  }
  0x40   : > { %772 = vmatprep.subr.bf16.mxu0 %v1072_v17  ;;  %813 = vmatprep.subr.bf16.mxu1 %v1074_v18  ;;  %v1096_v33 = vld [vmem:[%s1377_s4 + $0xc4] ss:$16 sps:$4 sm:$0xff]   ;;  %v1098_v34 = vld [vmem:[%s1377_s4 + $0xcc] ss:$16 sps:$4 sm:$0xff]   ;;  %v1100_v35 = vld [vmem:[%s1377_s4 + $0xc0] ss:$16 sps:$4 sm:$0xff]  }
  0x41   : > { %v1101_v36 = vld [vmem:[%s1377_s4 + $0xc8] ss:$16 sps:$4 sm:$0xff]   ;;  %v1102_v37 = vld [vmem:[%s1377_s4 + $0xe4] ss:$16 sps:$4 sm:$0xff]   ;;  %v1104_v38 = vld [vmem:[%s1377_s4 + $0xec] ss:$16 sps:$4 sm:$0xff]  }
  0x42   : > { %773 = vmatpush1.bf16.msra.mxu0 %v1076_v19  ;;  %814 = vmatpush1.bf16.msra.mxu1 %v1077_v20  ;;  %v1106_v39 = vld [vmem:[%s1377_s4 + $0xe0] ss:$16 sps:$4 sm:$0xff]   ;;  %v1107_v40 = vld [vmem:[%s1377_s4 + $0xe8] ss:$16 sps:$4 sm:$0xff]   ;;  %v1108_v41 = vld [vmem:[%s1377_s4 + $0x104] ss:$16 sps:$4 sm:$0xff]  }
  0x43   : > { %774 = vmatprep.subr.bf16.mxu0 %v1078_v21  ;;  %815 = vmatprep.subr.bf16.mxu1 %v1080_v22  ;;  %v1110_v42 = vld [vmem:[%s1377_s4 + $0x10c] ss:$16 sps:$4 sm:$0xff]   ;;  %v1112_v43 = vld [vmem:[%s1377_s4 + $0x100] ss:$16 sps:$4 sm:$0xff]   ;;  %v1113_v44 = vld [vmem:[%s1377_s4 + $0x108] ss:$16 sps:$4 sm:$0xff]  }
  0x44   : > { %v1114_v45 = vld [vmem:[%s1377_s4 + $0x124] ss:$16 sps:$4 sm:$0xff]   ;;  %v1116_v46 = vld [vmem:[%s1377_s4 + $0x12c] ss:$16 sps:$4 sm:$0xff]   ;;  %v1118_v47 = vld [vmem:[%s1377_s4 + $0x120] ss:$16 sps:$4 sm:$0xff]  }
  0x45   : > { %v1119_v48 = vld [vmem:[%s1377_s4 + $0x128] ss:$16 sps:$4 sm:$0xff]   ;;  %v1120_v49 = vld [vmem:[%s1377_s4 + $0x144] ss:$16 sps:$4 sm:$0xff]   ;;  %v1122_v50 = vld [vmem:[%s1377_s4 + $0x14c] ss:$16 sps:$4 sm:$0xff]  }
  0x46   : > { %775 = vmatpush1.bf16.msra.mxu0 %v1082_v23  ;;  %816 = vmatpush1.bf16.msra.mxu1 %v1083_v24  ;;  %v1124_v51 = vld [vmem:[%s1377_s4 + $0x140] ss:$16 sps:$4 sm:$0xff]   ;;  %v1125_v52 = vld [vmem:[%s1377_s4 + $0x148] ss:$16 sps:$4 sm:$0xff]   ;;  %v1126_v53 = vld [vmem:[%s1377_s4 + $0x164] ss:$16 sps:$4 sm:$0xff]  }
  0x47   : > { %776 = vmatprep.subr.bf16.mxu0 %v1084_v25  ;;  %817 = vmatprep.subr.bf16.mxu1 %v1086_v26  ;;  %v1128_v54 = vld [vmem:[%s1377_s4 + $0x16c] ss:$16 sps:$4 sm:$0xff]   ;;  %v1130_v55 = vld [vmem:[%s1377_s4 + $0x160] ss:$16 sps:$4 sm:$0xff]   ;;  %v1131_v56 = vld [vmem:[%s1377_s4 + $0x168] ss:$16 sps:$4 sm:$0xff]  }
  0x48   : > { %v1132_v57 = vld [vmem:[%s1377_s4 + $0x184] ss:$16 sps:$4 sm:$0xff]   ;;  %v1134_v58 = vld [vmem:[%s1377_s4 + $0x18c] ss:$16 sps:$4 sm:$0xff]   ;;  %v1136_v59 = vld [vmem:[%s1377_s4 + $0x180] ss:$16 sps:$4 sm:$0xff]  }
  0x49   : > { %v1137_v60 = vld [vmem:[%s1377_s4 + $0x188] ss:$16 sps:$4 sm:$0xff]   ;;  %v1138_v61 = vld [vmem:[%s1377_s4 + $0x1a4] ss:$16 sps:$4 sm:$0xff]   ;;  %v1140_v62 = vld [vmem:[%s1377_s4 + $0x1ac] ss:$16 sps:$4 sm:$0xff]  }
  0x4a   : > { %777 = vmatpush1.bf16.msra.mxu0 %v1088_v27  ;;  %818 = vmatpush1.bf16.msra.mxu1 %v1089_v28  ;;  %v1142_v63 = vld [vmem:[%s1377_s4 + $0x1a0] ss:$16 sps:$4 sm:$0xff]   ;;  %v1143_v1 = vld [vmem:[%s1377_s4 + $0x1a8] ss:$16 sps:$4 sm:$0xff]   ;;  %v1144_v3 = vld [vmem:[%s1377_s4 + $0x1c4] ss:$16 sps:$4 sm:$0xff]  }
  0x4b   : > { %778 = vmatprep.subr.bf16.mxu0 %v1090_v29  ;;  %819 = vmatprep.subr.bf16.mxu1 %v1092_v30  ;;  %v1146_v4 = vld [vmem:[%s1377_s4 + $0x1cc] ss:$16 sps:$4 sm:$0xff]   ;;  %v1148_v5 = vld [vmem:[%s1377_s4 + $0x1c0] ss:$16 sps:$4 sm:$0xff]   ;;  %v1149_v6 = vld [vmem:[%s1377_s4 + $0x1c8] ss:$16 sps:$4 sm:$0xff]  }
  0x4c   : > { %v1150_v7 = vld [vmem:[%s1377_s4 + $0x1e4] ss:$16 sps:$4 sm:$0xff]   ;;  %v1152_v8 = vld [vmem:[%s1377_s4 + $0x1ec] ss:$16 sps:$4 sm:$0xff]   ;;  %v1154_v9 = vld [vmem:[%s1377_s4 + $0x1e0] ss:$16 sps:$4 sm:$0xff]  }
  0x4d   : > { %v1155_v10 = vld [vmem:[%s1377_s4 + $0x1e8] ss:$16 sps:$4 sm:$0xff]   ;;  %s1487_s5 = smov (!%p327_p8, %s962_s5), 15  ;;  %v405_v13 = vsub.s32 0, %v1375_v2  ;;  %v413_v14 = vsub.s32 2, %v1375_v2  ;;  %v409_v0 = vsub.s32 1, %v1375_v2 }
  0x4e   : > { %779 = vmatpush1.bf16.msra.mxu0 %v1094_v31  ;;  %820 = vmatpush1.bf16.msra.mxu1 %v1095_v32  ;;  %s329_s8 = scalar_lea.vmem %s1481_s2, %s1487_s5  ;;  %v417_v16 = vsub.s32 3, %v1375_v2  ;;  %s334_s11 = scalar_lea.vmem %s1482_s3, %s1487_s5 }
  0x4f   : > { %780 = vmatprep.subr.bf16.mxu0 %v1096_v33  ;;  %821 = vmatprep.subr.bf16.mxu1 %v1098_v34  ;;  %v401_v15 = vld [vmem:[%s329_s8] sm:$0xf] }
  0x50   : > { %v406_v17 = vrot.slane %v401_v15, %v405_v13  ;;  %v414_v18 = vrot.slane %v401_v15, %v413_v14  ;;  %v410_v19 = vrot.slane %v401_v15, %v409_v0  ;;  %v418_v20 = vrot.slane %v401_v15, %v417_v16 }
  0x52   : > { %781 = vmatpush1.bf16.msra.mxu0 %v1100_v35  ;;  %822 = vmatpush1.bf16.msra.mxu1 %v1101_v36 }
  0x53   : > { %782 = vmatprep.subr.bf16.mxu0 %v1102_v37  ;;  %823 = vmatprep.subr.bf16.mxu1 %v1104_v38 }
  0x56   : > { %783 = vmatpush1.bf16.msra.mxu0 %v1106_v39  ;;  %824 = vmatpush1.bf16.msra.mxu1 %v1107_v40 }
  0x57   : > { %784 = vmatprep.subr.bf16.mxu0 %v1108_v41  ;;  %825 = vmatprep.subr.bf16.mxu1 %v1110_v42 }
  0x5a   : > { %785 = vmatpush1.bf16.msra.mxu0 %v1112_v43  ;;  %826 = vmatpush1.bf16.msra.mxu1 %v1113_v44 }
  0x5b   : > { %786 = vmatprep.subr.bf16.mxu0 %v1114_v45  ;;  %827 = vmatprep.subr.bf16.mxu1 %v1116_v46 }
  0x5e   : > { %787 = vmatpush1.bf16.msra.mxu0 %v1118_v47  ;;  %828 = vmatpush1.bf16.msra.mxu1 %v1119_v48 }
  0x5f   : > { %788 = vmatprep.subr.bf16.mxu0 %v1120_v49  ;;  %829 = vmatprep.subr.bf16.mxu1 %v1122_v50 }
  0x62   : > { %789 = vmatpush1.bf16.msra.mxu0 %v1124_v51  ;;  %830 = vmatpush1.bf16.msra.mxu1 %v1125_v52 }
  0x63   : > { %790 = vmatprep.subr.bf16.mxu0 %v1126_v53  ;;  %831 = vmatprep.subr.bf16.mxu1 %v1128_v54 }
  0x66   : > { %791 = vmatpush1.bf16.msra.mxu0 %v1130_v55  ;;  %832 = vmatpush1.bf16.msra.mxu1 %v1131_v56 }
  0x67   : > { %792 = vmatprep.subr.bf16.mxu0 %v1132_v57  ;;  %833 = vmatprep.subr.bf16.mxu1 %v1134_v58 }
  0x6a   : > { %793 = vmatpush1.bf16.msra.mxu0 %v1136_v59  ;;  %834 = vmatpush1.bf16.msra.mxu1 %v1137_v60 }
  0x6b   : > { %794 = vmatprep.subr.bf16.mxu0 %v1138_v61  ;;  %835 = vmatprep.subr.bf16.mxu1 %v1140_v62 }
  0x6e   : > { %795 = vmatpush1.bf16.msra.mxu0 %v1142_v63  ;;  %836 = vmatpush1.bf16.msra.mxu1 %v1143_v1 }
  0x6f   : > { %796 = vmatprep.subr.bf16.mxu0 %v1144_v3  ;;  %837 = vmatprep.subr.bf16.mxu1 %v1146_v4 }
  0x72   : > { %797 = vmatpush1.bf16.msra.mxu0 %v1148_v5  ;;  %838 = vmatpush1.bf16.msra.mxu1 %v1149_v6 }
  0x73   : > { %798 = vmatprep.subr.bf16.mxu0 %v1150_v7  ;;  %839 = vmatprep.subr.bf16.mxu1 %v1152_v8 }
  0x76   : > { %799 = vmatpush1.bf16.msra.mxu0 %v1154_v9  ;;  %840 = vmatpush1.bf16.msra.mxu1 %v1155_v10 }
  0x79   : > { %801 = vmatmul.mubr.bf16.vlgmr.msra.gmra.mrb[0].mxu0 %v438_v11  ;;  %842 = vmatmul.mubr.bf16.vlgmr.msra.gmra.mrb[0].mxu1 %v438_v11 }
 0x14c   : > { %v802_v21 = vpop.f32.mrb[0].mxu0  ;;  %v843_v22 = vpop.f32.mrb[0].mxu1 }
 0x14d   : > { %v803_v23 = vadd.f32 %v802_v21, %v406_v17  ;;  %v844_v24 = vadd.f32 %v843_v22, %v414_v18  ;;  %v804_v25 = vpop.f32.mrb[1].mxu0  ;;  %v845_v26 = vpop.f32.mrb[1].mxu1 }
 0x14e   : > { %v805_v27 = vadd.f32 %v804_v25, %v410_v19  ;;  %v846_v28 = vadd.f32 %v845_v26, %v418_v20  ;;  %v806_v29 = vpop.f32.mrb[2].mxu0  ;;  %v847_v30 = vpop.f32.mrb[2].mxu1 }
 0x14f   : > { %v850_v31 = vmax.f32 %v803_v23, 0.0  ;;  %v852_v32 = vmax.f32 %v844_v24, 0.0  ;;  %v807_v33 = vpop.f32.mrb[3].mxu0  ;;  %v848_v34 = vpop.f32.mrb[3].mxu1 }
 0x150   : > { %v851_v2 = vmax.f32 %v805_v27, 0.0  ;;  %v853_v35 = vmax.f32 %v846_v28, 0.0 }
 0x152   : > { %v1029_v36 = vpack.c.bf16 %v851_v2, %v850_v31  ;;  %v1030_v37 = vpack.c.bf16 %v853_v35, %v852_v32 }
 0x154   : > { %v870_v38 = vrot.slane %v1029_v36, %v1387_v12  ;;  %v877_v39 = vrot.slane %v1030_v37, %v1387_v12 }
 0x156   : > { %v878_v40 = vcombine.low %v870_v38, %v877_v39 }
 0x158   : > { %1031 = vst.sshfl [vmem:[%s334_s11] sm:$0x55 pattern:$0x73625140] %v878_v40 }
 0x159 PF: > { %p10_p9 = scmp.ge.s32.totalorder %s1218_s16, 6   ;;  %s1483_s12 = smov %s1174_s13 }
 0x15a   : > { %s1484_s13 = smov %s1227_s19  ;;  %s1485_s14 = smov %s1218_s16 }
 0x15b   :  { %12 = sbr.rel (!%p10_p9) target bundleno = 2 (0x2), region = 93 }

// kernel: decoder_forward.15
= control target key start
LH: loop header
LB: loop body
LE: loop exit
PB: predicated region body
PF: predicated region fallthrough
CT: control target
= control target key end

     0   :  { %s1602_s15 = smov 0   ;;  %s1604_s16 = smov 0   ;;  %s1933_s0 = inlined_call_operand.vmem [shape: bf16[2,32,768], index: 0, kind: input, shape index: {}, may-alias: {0,1}]   ;;  %s1934_s1 = inlined_call_operand.vmem [shape: bf16[2,32,768], index: 1, kind: input, shape index: {}, may-alias: {0,1}]   ;;  %s1935_s2 = inlined_call_operand.vmem [shape: bf16[32,288], index: 2, kind: input, shape index: {}]   ;;  %s1936_s3 = inlined_call_operand.vmem [shape: f32[32,1], index: 3, kind: input, shape index: {}]   ;;  %s1937_s4 = inlined_call_operand.vmem [shape: bf16[2,32,384], index: 4, kind: output, shape index: {}]  }
   0x1   :  { %s1606_s17 = smov 0   ;;  %s1608_s18 = smov 0  }
   0x2   :  { %s1610_s19 = smov 0  }
   0x3 LB: > { %s26_s20 = sadd.s32 1, %s1562_s18  ;;  %p42_p1 = scmp.ne.s32.totalorder %s1554_s16, %s1550_s15  ;;  %s1566_s19 = sphi %s1610_s19, %s14_s19   ;;  %s1562_s18 = sphi %s1608_s18, %s1942_s18   ;;  %s1558_s17 = sphi %s1606_s17, %s1941_s17   ;;  %s1554_s16 = sphi %s1604_s16, %s1940_s16   ;;  %s1550_s15 = sphi %s1602_s15, %s1939_s15  }
   0x4   : > { %p28_p0 = scmp.ge.s32.totalorder %s26_s20, 2  ;;  %p43_p2 = scmp.eq.s32.totalorder %s1566_s19, 0 }
   0x5   : > { %s35_s23 = sadd.s32 1, %s1554_s16  ;;  %p1337_p5 = scmp.ge.s32.totalorder %s1566_s19, 2 }
   0x6   : > { %s1944_s20 = smov (%p28_p0, %s26_s20), 0  ;;  %p1633_p3 = por %p43_p2, %p42_p1 }
   0x7   : > { %s30_s22 = ssub.s32 %s1562_s18, %s1944_s20  ;;  %174 = sbr.rel (%p1337_p5) target bundleno = 32 (0x20), region = 24 }
   0x8   : > { %p33_p4 = scmp.eq.s32.totalorder %s30_s22, 0 }
   0xa   : > { %s1641_s24 = scalar_select %p33_p4, %s1554_s16, %s35_s23  }
   0xe   : > { %177 = sbr.rel (!%p1633_p3) target bundleno = 23 (0x17), region = 28  ;;  %s179_s25 = sand.u32 (%p1633_p3), 1, %s1554_s16  }
   0xf   : > { %s1455_s26 = smul.u32 (%p1633_p3), 96, %s1562_s18 }
  0x10   : > { %s1454_s27 = smul.u32 (%p1633_p3), 48, %s179_s25 }
  0x11   : > { %s186_s30 = scalar_lea.vmem (%p1633_p3), %s1933_s0, %s1455_s26 }
  0x12   : > { %v201_v0 = vld [vmem:[%s186_s30] sm:$0xff] (%p1633_p3)  ;;  %v203_v1 = vld [vmem:[%s186_s30 + $0x18] sm:$0xff] (%p1633_p3)  ;;  %v205_v2 = vld [vmem:[%s186_s30 + $0x30] sm:$0xff] (%p1633_p3)  ;;  %s181_s5 = scalar_lea.vmem (%p1633_p3), [#allocation4], %s1454_s27 }
  0x13   : > { %202 = vst [vmem:[%s181_s5] sm:$0xff] (%p1633_p3), %v201_v0  ;;  %204 = vst [vmem:[%s181_s5 + $0xc] sm:$0xff] (%p1633_p3), %v203_v1  ;;  %v207_v3 = vld [vmem:[%s186_s30 + $0x48] sm:$0xff] (%p1633_p3)  ;;  %v1341_v5 = vld [vmem:[%s186_s30 + $0x20] sm:$0xf] (%p1633_p3) }
  0x14   : > { %206 = vst [vmem:[%s181_s5 + $0x18] sm:$0xff] (%p1633_p3), %v205_v2  ;;  %v1339_v4 = vld [vmem:[%s186_s30 + $0x8] sm:$0xf] (%p1633_p3)  ;;  %208 = vst [vmem:[%s181_s5 + $0x24] sm:$0xff] (%p1633_p3), %v207_v3  ;;  %v1343_v6 = vld [vmem:[%s186_s30 + $0x38] sm:$0xf] (%p1633_p3) }
  0x15   : > { %1340 = vst [vmem:[%s181_s5 + $0x8] sm:$0xf] %v1339_v4  ;;  %1342 = vst [vmem:[%s181_s5 + $0x14] sm:$0xf] %v1341_v5  ;;  %v1345_v7 = vld [vmem:[%s186_s30 + $0x50] sm:$0xf] }
  0x16   : > { %1344 = vst [vmem:[%s181_s5 + $0x20] sm:$0xf] %v1343_v6  ;;  %1346 = vst [vmem:[%s181_s5 + $0x2c] sm:$0xf] %v1345_v7 }
  0x17 PF: > { %229 = sbr.rel (!%p1633_p3) target bundleno = 32 (0x20), region = 54  ;;  %s231_s6 = sand.u32 (%p1633_p3), 1, %s1554_s16  }
  0x18   : > { %s1347_s7 = smul.u32 (%p1633_p3), 96, %s1562_s18 }
  0x19   : > { %s1456_s8 = smul.u32 (%p1633_p3), 48, %s231_s6 }
  0x1a   : > { %s1256_s11 = scalar_lea.vmem (%p1633_p3), %s1934_s1, %s1347_s7 }
  0x1b   : > { %v1348_v8 = vld [vmem:[%s1256_s11 + $0xc] sm:$0xff] (%p1633_p3)  ;;  %v1349_v9 = vld [vmem:[%s1256_s11 + $0x24] sm:$0xff] (%p1633_p3)  ;;  %v1350_v10 = vld [vmem:[%s1256_s11 + $0x3c] sm:$0xff] (%p1633_p3)  ;;  %s233_s12 = scalar_lea.vmem (%p1633_p3), [#allocation5], %s1456_s8 }
  0x1c   : > { %255 = vst [vmem:[%s233_s12] sm:$0xff] (%p1633_p3), %v1348_v8  ;;  %257 = vst [vmem:[%s233_s12 + $0xc] sm:$0xff] (%p1633_p3), %v1349_v9  ;;  %v1351_v11 = vld [vmem:[%s1256_s11 + $0x54] sm:$0xff] (%p1633_p3)  ;;  %v1354_v13 = vld [vmem:[%s1256_s11 + $0x2c] sm:$0xf] (%p1633_p3) }
  0x1d   : > { %259 = vst [vmem:[%s233_s12 + $0x18] sm:$0xff] (%p1633_p3), %v1350_v10  ;;  %v1352_v12 = vld [vmem:[%s1256_s11 + $0x14] sm:$0xf] (%p1633_p3)  ;;  %261 = vst [vmem:[%s233_s12 + $0x24] sm:$0xff] (%p1633_p3), %v1351_v11  ;;  %v1356_v14 = vld [vmem:[%s1256_s11 + $0x44] sm:$0xf] (%p1633_p3) }
  0x1e   : > { %1353 = vst [vmem:[%s233_s12 + $0x8] sm:$0xf] %v1352_v12  ;;  %1355 = vst [vmem:[%s233_s12 + $0x14] sm:$0xf] %v1354_v13  ;;  %v1358_v15 = vld [vmem:[%s1256_s11 + $0x5c] sm:$0xf] }
  0x1f   : > { %1357 = vst [vmem:[%s233_s12 + $0x20] sm:$0xf] %v1356_v14  ;;  %1359 = vst [vmem:[%s233_s12 + $0x2c] sm:$0xf] %v1358_v15 }
  0x20 PF: > { %p1360_p6 = scmp.ge.s32.totalorder %s1566_s19, 1  ;;  %p281_p7 = scmp.lt.s32.totalorder %s1566_s19, 3 }
  0x22   : > { %p282_p8 = pnand %p1360_p6, %p281_p7 }
  0x23   : > { %s288_s13 = sand.u32 (!%p282_p8), 1, %s1550_s15   ;;  %s1568_s22 = smov (!%p282_p8), 127   ;;  %v1572_v22 = vmov (!%p282_p8), 0   ;;  %v1760_v25 = vld [vmem:[%s1935_s2 + $0x4] ss:$12 sps:$4 sm:$0xff] (!%p282_p8)   ;;  %vm450_vm0 = vcmask (!%p282_p8), 1039360  }
  0x24   : > { %285 = sbr.rel (%p282_p8) target bundleno = 513 (0x201), region = 80  ;;  %s1569_s23 = smov (!%p282_p8), 126   ;;  %1034 = vmatprep.mubr.bf16.mxu1 (!%p282_p8), %v1572_v22  ;;  %1508 = vset.pattern.permute.xlu0 (!%p282_p8), %v1572_v22  ;;  %vm501_vm1 = vcmask (!%p282_p8), 1031168   ;;  %v888_v36 = vld [vmem:[%s1936_s3] sm:$0xff] (!%p282_p8)  ;;  %v889_v38 = vld [vmem:[%s1936_s3 + $0x8] sm:$0xff] (!%p282_p8)  ;;  %v891_v41 = vld [vmem:[%s1936_s3 + $0x18] sm:$0xff] (!%p282_p8) }
  0x25   : > { %s1661_s14 = smul.u32 (!%p282_p8), 48, %s288_s13  ;;  %s1570_s25 = smov (!%p282_p8), 90   ;;  %1509 = vset.pattern.permute.xlu1 (!%p282_p8), %v1572_v22  ;;  %981 = vmatprep.mubr.bf16.mxu0 (!%p282_p8), %v1760_v25  ;;  %v890_v43 = vld [vmem:[%s1936_s3 + $0x10] sm:$0xff] (!%p282_p8)  ;;  %vm807_vm2 = vcmask (!%p282_p8), 736256   ;;  %vm552_vm3 = vcmask (!%p282_p8), 900096   ;;  %vm942_vm4 = vcmask (!%p282_p8), 261120  }
  0x26   : > { %s1571_s26 = smov (!%p282_p8), 110   ;;  %s1573_s27 = smov (!%p282_p8), 109   ;;  %v1819_v60 = vld [vmem:[%s1935_s2 + $0x8] ss:$12 sps:$4 sm:$0xff] (!%p282_p8)   ;;  %vm603_vm5 = vcmask (!%p282_p8), 891904   ;;  %vm654_vm6 = vcmask (!%p282_p8), 883712  }
  0x27   : > { %s290_s21 = scalar_lea.vmem (!%p282_p8), [#allocation4], %s1661_s14  ;;  %s297_s15 = scalar_lea.vmem (!%p282_p8), [#allocation5], %s1661_s14  ;;  %v1832_v3 = vld [vmem:[%s1935_s2 + $0x20] ss:$12 sps:$4 sm:$0xff] (!%p282_p8)   ;;  %vm705_vm7 = vcmask (!%p282_p8), 752640   ;;  %vm756_vm8 = vcmask (!%p282_p8), 744448  }
  0x28   : > { %v1664_v16 = vld [vmem:[%s290_s21 + $0x4] ss:$12 sps:$4 sm:$0xff] (!%p282_p8)   ;;  %v1666_v17 = vld [vmem:[%s290_s21] ss:$12 sps:$4 sm:$0xff] (!%p282_p8)   ;;  %v1670_v18 = vld [vmem:[%s290_s21 + $0x8] ss:$12 sps:$4 sm:$0xff] (!%p282_p8)  }
  0x29   : > { %436 = vrot.lane.b32.xlu0 (!%p282_p8), %v1664_v16, %s1568_s22  ;;  %949 = vmatprep.subr.bf16.mxu0 (!%p282_p8), %v1664_v16  ;;  %v1675_v19 = vld [vmem:[%s290_s21 + $0x1c] ss:$12 sps:$4 sm:$0xff] (!%p282_p8)   ;;  %v1679_v20 = vld [vmem:[%s290_s21 + $0x18] ss:$12 sps:$4 sm:$0xff] (!%p282_p8)   ;;  %v1684_v21 = vld [vmem:[%s290_s21 + $0x20] ss:$12 sps:$4 sm:$0xff] (!%p282_p8)  }
  0x2a   : > { %434 = vrot.lane.b32.xlu1 (!%p282_p8), %v1666_v17, %s1568_s22  ;;  %950 = vmatpush1.bf16.msra.mxu0 (!%p282_p8), %v1666_v17  ;;  %v1518_v23 = vld [vmem:[%s297_s15] ss:$12 sps:$4 sm:$0xff] (!%p282_p8)   ;;  %v1519_v24 = vld [vmem:[%s297_s15 + $0x18] ss:$12 sps:$4 sm:$0xff] (!%p282_p8)   ;;  %s1574_s28 = smov (!%p282_p8), 108   ;;  %s1575_s29 = smov (!%p282_p8), 92  }
  0x2b   : > { %951 = vmatprep.subr.bf16.mxu0 %v1675_v19  ;;  %s1576_s30 = smov 91   ;;  %p332_p9 = scmp.lt.s32.totalorder %s1558_s17, 1 }
  0x2d   : > { %438 = vrot.lane.b32.xlu0 %v1670_v18, %s1568_s22  ;;  %s1946_s17 = smov (!%p332_p9, %s1558_s17), 1 }
  0x2e   : > { %444 = vrot.lane.b32.xlu1 %v1675_v19, %s1568_s22  ;;  %952 = vmatpush1.bf16.msra.mxu0 %v1679_v20  ;;  %s1458_s5 = smul.u32 48, %s1946_s17 }
  0x30   : > { %s1906_s8 = scalar_lea.vmem %s1937_s4, %s1458_s5 }
  0x31   : > { %446 = vrot.lane.b32.xlu0 %v1684_v21, %s1568_s22 }
  0x32   : > { %442 = vrot.lane.b32.xlu1 %v1679_v20, %s1568_s22 }
  0x35   : > { %487 = vrot.lane.b32.xlu0 %v1664_v16, %s1569_s23 }
  0x36   : > { %489 = vrot.lane.b32.xlu1 %v1670_v18, %s1569_s23 }
  0x39   : > { %485 = vrot.lane.b32.xlu0 %v1666_v17, %s1569_s23 }
  0x3a   : > { %793 = vrot.lane.b32.xlu1 %v1664_v16, %s1570_s25 }
  0x3d   : > { %795 = vrot.lane.b32.xlu0 %v1670_v18, %s1570_s25 }
  0x3e   : > { %791 = vrot.lane.b32.xlu1 %v1666_v17, %s1570_s25 }
  0x41   : > { %495 = vrot.lane.b32.xlu0 %v1675_v19, %s1569_s23 }
  0x42   : > { %497 = vrot.lane.b32.xlu1 %v1684_v21, %s1569_s23 }
  0x45   : > { %493 = vrot.lane.b32.xlu0 %v1679_v20, %s1569_s23 }
  0x46   : > { %801 = vrot.lane.b32.xlu1 %v1675_v19, %s1570_s25 }
  0x49   : > { %803 = vrot.lane.b32.xlu0 %v1684_v21, %s1570_s25 }
  0x4a   : > { %799 = vrot.lane.b32.xlu1 %v1679_v20, %s1570_s25 }
  0x4d   : > { %538 = vrot.lane.b32.xlu0 %v1664_v16, %s1571_s26 }
  0x4e   : > { %540 = vrot.lane.b32.xlu1 %v1670_v18, %s1571_s26 }
  0x51   : > { %536 = vrot.lane.b32.xlu0 %v1666_v17, %s1571_s26 }
  0x52   : > { %591 = vrot.lane.b32.xlu1 %v1670_v18, %s1573_s27 }
  0x55   : > { %593 = vrot.lane.b32.xlu0 %v1518_v23, %s1573_s27 }
  0x56   : > { %546 = vrot.lane.b32.xlu1 %v1675_v19, %s1571_s26 }
  0x59   : > { %548 = vrot.lane.b32.xlu0 %v1684_v21, %s1571_s26 }
  0x5a   : > { %544 = vrot.lane.b32.xlu1 %v1679_v20, %s1571_s26 }
  0x5d   : > { %599 = vrot.lane.b32.xlu0 %v1684_v21, %s1573_s27 }
  0x5e   : > { %601 = vrot.lane.b32.xlu1 %v1519_v24, %s1573_s27 }
  0x61   : > { %589 = vrot.lane.b32.xlu0 %v1664_v16, %s1573_s27 }
  0x62   : > { %587 = vrot.lane.b32.xlu1 %v1666_v17, %s1573_s27 }
  0x65   : > { %642 = vrot.lane.b32.xlu0 %v1670_v18, %s1574_s28 }
  0x66   : > { %644 = vrot.lane.b32.xlu1 %v1518_v23, %s1574_s28 }
  0x69   : > { %440 = vrot.lane.b32.xlu0 %v1518_v23, %s1568_s22 }
  0x6a   : > { %597 = vrot.lane.b32.xlu1 %v1675_v19, %s1573_s27 }
  0x6d   : > { %595 = vrot.lane.b32.xlu0 %v1679_v20, %s1573_s27 }
  0x6e   : > { %650 = vrot.lane.b32.xlu1 %v1684_v21, %s1574_s28 }
  0x71   : > { %652 = vrot.lane.b32.xlu0 %v1519_v24, %s1574_s28 }
  0x72   : > { %448 = vrot.lane.b32.xlu1 %v1519_v24, %s1568_s22 }
  0x75   : > { %640 = vrot.lane.b32.xlu0 %v1664_v16, %s1574_s28 }
  0x76   : > { %638 = vrot.lane.b32.xlu1 %v1666_v17, %s1574_s28 }
  0x79   : > { %693 = vrot.lane.b32.xlu0 %v1670_v18, %s1575_s29 }
  0x7a   : > { %695 = vrot.lane.b32.xlu1 %v1518_v23, %s1575_s29 }
  0x7d   : > { %491 = vrot.lane.b32.xlu0 %v1518_v23, %s1569_s23 }
  0x7e   : > { %648 = vrot.lane.b32.xlu1 %v1675_v19, %s1574_s28 }
  0x81   : > { %646 = vrot.lane.b32.xlu0 %v1679_v20, %s1574_s28 }
  0x82   : > { %701 = vrot.lane.b32.xlu1 %v1684_v21, %s1575_s29 }
  0x85   : > { %703 = vrot.lane.b32.xlu0 %v1519_v24, %s1575_s29 }
  0x86   : > { %499 = vrot.lane.b32.xlu1 %v1519_v24, %s1569_s23 }
  0x89   : > { %691 = vrot.lane.b32.xlu0 %v1664_v16, %s1575_s29 }
  0x8a   : > { %689 = vrot.lane.b32.xlu1 %v1666_v17, %s1575_s29 }
  0x8d   : > { %744 = vrot.lane.b32.xlu0 %v1670_v18, %s1576_s30 }
  0x8e   : > { %746 = vrot.lane.b32.xlu1 %v1518_v23, %s1576_s30 }
  0x91   : > { %542 = vrot.lane.b32.xlu0 %v1518_v23, %s1571_s26 }
  0x92   : > { %699 = vrot.lane.b32.xlu1 %v1675_v19, %s1575_s29 }
  0x95   : > { %697 = vrot.lane.b32.xlu0 %v1679_v20, %s1575_s29 }
  0x96   : > { %752 = vrot.lane.b32.xlu1 %v1684_v21, %s1576_s30 }
  0x99   : > { %754 = vrot.lane.b32.xlu0 %v1519_v24, %s1576_s30 }
  0x9a   : > { %550 = vrot.lane.b32.xlu1 %v1519_v24, %s1571_s26 }
  0x9b   : > { %v437_v26 = vpop.permute.xlu0 %436 }
  0x9c   : > { %v435_v27 = vpop.permute.xlu1 %434 }
  0x9d   : > { %742 = vrot.lane.b32.xlu0 %v1664_v16, %s1576_s30  ;;  %v451_v31 = vsel %vm450_vm0, %v435_v27, %v437_v26 }
  0x9e   : > { %740 = vrot.lane.b32.xlu1 %v1666_v17, %s1576_s30 }
  0x9f   : > { %v1770_v28 = vpop.permute.xlu0 %438 }
  0xa0   : > { %v445_v29 = vpop.permute.xlu1 %444  ;;  %v452_v30 = vsel %vm450_vm0, %v437_v26, %v1770_v28 }
  0xa1   : > { %750 = vrot.lane.b32.xlu0 %v1675_v19, %s1576_s30  ;;  %953 = vmatprep.subr.bf16.mxu0 %v452_v30 }
  0xa2   : > { %748 = vrot.lane.b32.xlu1 %v1679_v20, %s1576_s30  ;;  %954 = vmatpush1.bf16.msra.mxu0 %v451_v31 }
  0xa3   : > { %v1777_v32 = vpop.permute.xlu0 %446 }
  0xa4   : > { %v443_v33 = vpop.permute.xlu1 %442  ;;  %v455_v34 = vsel %vm450_vm0, %v445_v29, %v1777_v32 }
  0xa5   : > { %797 = vrot.lane.b32.xlu0 %v1518_v23, %s1570_s25  ;;  %955 = vmatprep.subr.bf16.mxu0 %v455_v34  ;;  %v454_v35 = vsel %vm450_vm0, %v443_v33, %v445_v29 }
  0xa6   : > { %805 = vrot.lane.b32.xlu1 %v1519_v24, %s1570_s25  ;;  %956 = vmatpush1.bf16.msra.mxu0 %v454_v35 }
  0xa7   : > { %v488_v37 = vpop.permute.xlu0 %487 }
  0xa8   : > { %v1790_v39 = vpop.permute.xlu1 %489 }
  0xa9   : > { %v503_v40 = vsel %vm501_vm1, %v488_v37, %v1790_v39  ;;  %894 = vperm.xlu0 %1508, %v888_v36  }
  0xaa   : > { %957 = vmatprep.subr.bf16.mxu0 %v503_v40  ;;  %899 = vperm.xlu1 %1509, %v889_v38  }
  0xab   : > { %v486_v42 = vpop.permute.xlu0 %485 }
  0xac   : > { %v794_v44 = vpop.permute.xlu1 %793  ;;  %v502_v45 = vsel %vm501_vm1, %v486_v42, %v488_v37 }
  0xad   : > { %958 = vmatpush1.bf16.msra.mxu0 %v502_v45  ;;  %909 = vperm.xlu0 %1508, %v891_v41  }
  0xae   : > { %904 = vperm.xlu1 %1509, %v890_v43  }
  0xaf   : > { %v1801_v46 = vpop.permute.xlu0 %795 }
  0xb0   : > { %v792_v47 = vpop.permute.xlu1 %791  ;;  %v809_v48 = vsel %vm807_vm2, %v794_v44, %v1801_v46 }
  0xb1   : > { %1002 = vmatprep.subr.bf16.mxu1 %v809_v48  ;;  %v808_v49 = vsel %vm807_vm2, %v792_v47, %v794_v44 }
  0xb2   : > { %1003 = vmatpush1.bf16.msra.mxu1 %v808_v49 }
  0xb3   : > { %v496_v50 = vpop.permute.xlu0 %495 }
  0xb4   : > { %v1806_v51 = vpop.permute.xlu1 %497 }
  0xb5   : > { %v506_v52 = vsel %vm501_vm1, %v496_v50, %v1806_v51 }
  0xb6   : > { %959 = vmatprep.subr.bf16.mxu0 %v506_v52 }
  0xb7   : > { %v494_v53 = vpop.permute.xlu0 %493 }
  0xb8   : > { %v802_v54 = vpop.permute.xlu1 %801  ;;  %v505_v55 = vsel %vm501_vm1, %v494_v53, %v496_v50 }
  0xb9   : > { %960 = vmatpush1.bf16.msra.mxu0 %v505_v55 }
  0xbb   : > { %v1811_v56 = vpop.permute.xlu0 %803 }
  0xbc   : > { %v800_v57 = vpop.permute.xlu1 %799  ;;  %v812_v58 = vsel %vm807_vm2, %v802_v54, %v1811_v56 }
  0xbd   : > { %1004 = vmatprep.subr.bf16.mxu1 %v812_v58  ;;  %v811_v59 = vsel %vm807_vm2, %v800_v57, %v802_v54 }
  0xbe   : > { %1005 = vmatpush1.bf16.msra.mxu1 %v811_v59 }
  0xbf   : > { %v539_v61 = vpop.permute.xlu0 %538 }
  0xc0   : > { %v1821_v62 = vpop.permute.xlu1 %540 }
  0xc1   : > { %v554_v63 = vsel %vm552_vm3, %v539_v61, %v1821_v62  ;;  %1376 = vmatmul.mubr.msk.bf16.vlgmr.msra.gmra.mrb[0].mxu1 %vm942_vm4, %v1819_v60 }
  0xc2   : > { %961 = vmatprep.subr.bf16.mxu0 %v554_v63  ;;  %1044 = vmatprep.mubr.bf16.mxu1 %v1572_v22 }
  0xc3   : > { %v537_v0 = vpop.permute.xlu0 %536 }
  0xc4   : > { %v592_v1 = vpop.permute.xlu1 %591  ;;  %v553_v2 = vsel %vm552_vm3, %v537_v0, %v539_v61 }
  0xc5   : > { %962 = vmatpush1.bf16.msra.mxu0 %v553_v2 }
  0xc7   : > { %v594_v4 = vpop.permute.xlu0 %593 }
  0xc8   : > { %v547_v5 = vpop.permute.xlu1 %546  ;;  %v606_v6 = vsel %vm603_vm5, %v592_v1, %v594_v4 }
  0xc9   : > { %1398 = vmatprep.subr.bf16.mxu1 %v606_v6  ;;  %1377 = vmatmul.mubr.msk.bf16.gmra.mrb[4].mxu1 %vm942_vm4, %v1832_v3 }
  0xca   : > { %1399 = vmatpush3.bf16.msra.mxu1 %v1670_v18  ;;  %1087 = vmatprep.mubr.bf16.mxu1 %v1760_v25 }
  0xcb   : > { %v1839_v7 = vpop.permute.xlu0 %548 }
  0xcc   : > { %v545_v8 = vpop.permute.xlu1 %544  ;;  %v557_v9 = vsel %vm552_vm3, %v547_v5, %v1839_v7 }
  0xcd   : > { %963 = vmatprep.subr.bf16.mxu0 %v557_v9  ;;  %v556_v10 = vsel %vm552_vm3, %v545_v8, %v547_v5 }
  0xce   : > { %964 = vmatpush1.bf16.msra.mxu0 %v556_v10  ;;  %v1525_v10 = vld [vmem:[%s1935_s2 + $0x1c] ss:$12 sps:$4 sm:$0xff]  }
  0xcf   : > { %v600_v11 = vpop.permute.xlu0 %599 }
  0xd0   : > { %v602_v12 = vpop.permute.xlu1 %601 }
  0xd1   : > { %v609_v13 = vsel %vm603_vm5, %v600_v11, %v602_v12 }
  0xd2   : > { %1400 = vmatprep.subr.bf16.mxu1 %v609_v13 }
  0xd3   : > { %v590_v14 = vpop.permute.xlu0 %589  ;;  %1401 = vmatpush3.bf16.msra.mxu1 %v1684_v21 }
  0xd4   : > { %v588_v15 = vpop.permute.xlu1 %587  ;;  %v605_v16 = vsel %vm603_vm5, %v590_v14, %v592_v1 }
  0xd5   : > { %965 = vmatprep.subr.bf16.mxu0 %v605_v16  ;;  %v604_v17 = vsel %vm603_vm5, %v588_v15, %v590_v14 }
  0xd6   : > { %966 = vmatpush1.bf16.msra.mxu0 %v604_v17 }
  0xd7   : > { %v643_v18 = vpop.permute.xlu0 %642 }
  0xd8   : > { %v645_v19 = vpop.permute.xlu1 %644 }
  0xd9   : > { %v657_v20 = vsel %vm654_vm6, %v643_v18, %v645_v19 }
  0xda   : > { %1402 = vmatprep.subr.bf16.mxu1 %v657_v20 }
  0xdb   : > { %v441_v22 = vpop.permute.xlu0 %440 }
  0xdc   : > { %v453_v23 = vsel %vm450_vm0, %v1770_v28, %v441_v22  ;;  %v598_v24 = vpop.permute.xlu1 %597 }
  0xdd   : > { %v608_v21 = vsel %vm603_vm5, %v598_v24, %v600_v11  ;;  %1403 = vmatpush3.bf16.msra.mxu1 %v453_v23 }
  0xde   : > { %967 = vmatprep.subr.bf16.mxu0 %v608_v21 }
  0xdf   : > { %v596_v25 = vpop.permute.xlu0 %595 }
  0xe0   : > { %v651_v26 = vpop.permute.xlu1 %650  ;;  %v607_v27 = vsel %vm603_vm5, %v596_v25, %v598_v24 }
  0xe1   : > { %968 = vmatpush1.bf16.msra.mxu0 %v607_v27 }
  0xe3   : > { %v653_v29 = vpop.permute.xlu0 %652 }
  0xe4   : > { %v449_v30 = vpop.permute.xlu1 %448  ;;  %v660_v31 = vsel %vm654_vm6, %v651_v26, %v653_v29 }
  0xe5   : > { %v456_v33 = vsel %vm450_vm0, %v1777_v32, %v449_v30  ;;  %1404 = vmatprep.subr.bf16.mxu1 %v660_v31 }
  0xe6   : > { %1405 = vmatpush3.bf16.msra.mxu1 %v456_v33 }
  0xe7   : > { %v641_v28 = vpop.permute.xlu0 %640 }
  0xe8   : > { %v639_v34 = vpop.permute.xlu1 %638  ;;  %v656_v35 = vsel %vm654_vm6, %v641_v28, %v643_v18  ;;  %v1527_v18 = vld [vmem:[%s1935_s2 + $0x18] ss:$12 sps:$4 sm:$0xff]  }
  0xe9   : > { %969 = vmatprep.subr.bf16.mxu0 %v656_v35  ;;  %v655_v36 = vsel %vm654_vm6, %v639_v34, %v641_v28 }
  0xea   : > { %970 = vmatpush1.bf16.msra.mxu0 %v655_v36 }
  0xeb   : > { %v694_v37 = vpop.permute.xlu0 %693 }
  0xec   : > { %v696_v38 = vpop.permute.xlu1 %695 }
  0xed   : > { %v708_v40 = vsel %vm705_vm7, %v694_v37, %v696_v38 }
  0xee   : > { %1406 = vmatprep.subr.bf16.mxu1 %v708_v40 }
  0xef   : > { %v492_v41 = vpop.permute.xlu0 %491 }
  0xf0   : > { %v504_v32 = vsel %vm501_vm1, %v1790_v39, %v492_v41  ;;  %v649_v42 = vpop.permute.xlu1 %648 }
  0xf1   : > { %v659_v43 = vsel %vm654_vm6, %v649_v42, %v651_v26  ;;  %1407 = vmatpush3.bf16.msra.mxu1 %v504_v32 }
  0xf2   : > { %971 = vmatprep.subr.bf16.mxu0 %v659_v43 }
  0xf3   : > { %v647_v44 = vpop.permute.xlu0 %646 }
  0xf4   : > { %v702_v45 = vpop.permute.xlu1 %701  ;;  %v658_v47 = vsel %vm654_vm6, %v647_v44, %v649_v42 }
  0xf5   : > { %972 = vmatpush1.bf16.msra.mxu0 %v658_v47 }
  0xf7   : > { %v704_v48 = vpop.permute.xlu0 %703 }
  0xf8   : > { %v500_v49 = vpop.permute.xlu1 %499  ;;  %v711_v50 = vsel %vm705_vm7, %v702_v45, %v704_v48 }
  0xf9   : > { %v507_v52 = vsel %vm501_vm1, %v1806_v51, %v500_v49  ;;  %1408 = vmatprep.subr.bf16.mxu1 %v711_v50 }
  0xfa   : > { %1409 = vmatpush3.bf16.msra.mxu1 %v507_v52 }
  0xfb   : > { %v692_v39 = vpop.permute.xlu0 %691 }
  0xfc   : > { %v690_v53 = vpop.permute.xlu1 %689  ;;  %v707_v54 = vsel %vm705_vm7, %v692_v39, %v694_v37 }
  0xfd   : > { %973 = vmatprep.subr.bf16.mxu0 %v707_v54  ;;  %v706_v55 = vsel %vm705_vm7, %v690_v53, %v692_v39 }
  0xfe   : > { %974 = vmatpush1.bf16.msra.mxu0 %v706_v55 }
  0xff   : > { %v745_v57 = vpop.permute.xlu0 %744 }
 0x100   : > { %v747_v58 = vpop.permute.xlu1 %746 }
 0x101   : > { %v759_v59 = vsel %vm756_vm8, %v745_v57, %v747_v58 }
 0x102   : > { %1410 = vmatprep.subr.bf16.mxu1 %v759_v59 }
 0x103   : > { %v543_v61 = vpop.permute.xlu0 %542 }
 0x104   : > { %v555_v51 = vsel %vm552_vm3, %v1821_v62, %v543_v61  ;;  %v700_v63 = vpop.permute.xlu1 %699  ;;  %v1522_v62 = vld [vmem:[%s1935_s2] ss:$12 sps:$4 sm:$0xff]  }
 0x105   : > { %v710_v0 = vsel %vm705_vm7, %v700_v63, %v702_v45  ;;  %1411 = vmatpush3.bf16.msra.mxu1 %v555_v51 }
 0x106   : > { %975 = vmatprep.subr.bf16.mxu0 %v710_v0 }
 0x107   : > { %v698_v1 = vpop.permute.xlu0 %697 }
 0x108   : > { %v753_v2 = vpop.permute.xlu1 %752  ;;  %v709_v4 = vsel %vm705_vm7, %v698_v1, %v700_v63 }
 0x109   : > { %976 = vmatpush1.bf16.msra.mxu0 %v709_v4 }
 0x10b   : > { %v755_v5 = vpop.permute.xlu0 %754 }
 0x10c   : > { %v551_v6 = vpop.permute.xlu1 %550  ;;  %v762_v8 = vsel %vm756_vm8, %v753_v2, %v755_v5 }
 0x10d   : > { %v558_v9 = vsel %vm552_vm3, %v1839_v7, %v551_v6  ;;  %1412 = vmatprep.subr.bf16.mxu1 %v762_v8 }
 0x10e   : > { %1413 = vmatpush3.bf16.msra.mxu1 %v558_v9 }
 0x10f   : > { %v743_v11 = vpop.permute.xlu0 %742 }
 0x110   : > { %v741_v12 = vpop.permute.xlu1 %740  ;;  %v758_v13 = vsel %vm756_vm8, %v743_v11, %v745_v57 }
 0x111   : > { %977 = vmatprep.subr.bf16.mxu0 %v758_v13  ;;  %1088 = vmatmul.mubr.bf16.vlgmr.msra.gmra.mrb[8].mxu1 %v1522_v62  ;;  %v757_v14 = vsel %vm756_vm8, %v741_v12, %v743_v11 }
 0x112   : > { %978 = vmatpush1.bf16.msra.mxu0 %v757_v14  ;;  %1095 = vmatprep.mubr.bf16.mxu1 %v1525_v10 }
 0x113   : > { %v751_v7 = vpop.permute.xlu0 %750 }
 0x114   : > { %v749_v15 = vpop.permute.xlu1 %748  ;;  %v761_v16 = vsel %vm756_vm8, %v751_v7, %v753_v2 }
 0x115   : > { %979 = vmatprep.subr.bf16.mxu0 %v761_v16  ;;  %v760_v17 = vsel %vm756_vm8, %v749_v15, %v751_v7 }
 0x116   : > { %980 = vmatpush1.bf16.msra.mxu0 %v760_v17 }
 0x117   : > { %v798_v19 = vpop.permute.xlu0 %797 }
 0x118   : > { %v806_v20 = vpop.permute.xlu1 %805  ;;  %v810_v22 = vsel %vm807_vm2, %v1801_v46, %v798_v19 }
 0x119   : > { %982 = vmatmul.mubr.bf16.vlgmr.msra.gmra.mrb[0].mxu0 %v1522_v62  ;;  %1096 = vmatmul.mubr.bf16.gmra.mrb[12].mxu1 %v1527_v18  ;;  %v813_v23 = vsel %vm807_vm2, %v1811_v56, %v806_v20 }
 0x11a   : > { %1430 = vmatprep.subr.bf16.mxu1 %v810_v22  ;;  %991 = vmatprep.mubr.bf16.mxu0 %v1525_v10 }
 0x11b   : > { %1431 = vmatpush3.bf16.msra.mxu1 %v810_v22  ;;  %1434 = vmatprep.mubr.msk.bf16.mxu1 %vm942_vm4, %v1819_v60 }
 0x11c   : > { %1432 = vmatprep.subr.bf16.mxu1 %v813_v23 }
 0x11f   : > { %1433 = vmatpush3.bf16.msra.mxu1 %v813_v23 }
 0x121   : > { %992 = vmatmul.mubr.bf16.gmra.mrb[4].mxu0 %v1527_v18 }
 0x122   : > { %1435 = vmatmul.mubr.msk.bf16.vlgmr.msra.gmra.mrb[16].mxu1 %vm942_vm4, %v1832_v3 }
 0x128   : > { %v895_v35 = vpop.permute.xlu0 %894 }
 0x129   : > { %v900_v3 = vpop.permute.xlu1 %899 }
 0x12c   : > { %v910_v61 = vpop.permute.xlu0 %909 }
 0x12d   : > { %v905_v55 = vpop.permute.xlu1 %904 }
 0x194   : > { %v1036_v24 = vpop.f32.mrb[0].mxu1 }
 0x195   : > { %v1038_v46 = vpop.f32.mrb[1].mxu1 }
 0x196   : > { %v1040_v21 = vpop.f32.mrb[2].mxu1 }
 0x197   : > { %v1042_v25 = vpop.f32.mrb[3].mxu1 }
 0x19c   : > { %v1046_v26 = vpop.f32.mrb[4].mxu1 }
 0x19d   : > { %v1048_v27 = vpop.f32.mrb[5].mxu1 }
 0x19e   : > { %v1897_v29 = vpop.f32.mrb[6].mxu1 }
 0x19f   : > { %v1899_v56 = vpop.f32.mrb[7].mxu1 }
 0x1e4   : > { %v1414_v30 = vpop.f32.mrb[8].mxu1 }
 0x1e5   : > { %v1415_v60 = vpop.f32.mrb[9].mxu1 }
 0x1e6   : > { %v1416_v31 = vadd.f32 %v1415_v60, %v1414_v30  ;;  %v1417_v33 = vpop.f32.mrb[10].mxu1 }
 0x1e7   : > { %v1418_v28 = vpop.f32.mrb[11].mxu1 }
 0x1e8   : > { %v1419_v34 = vadd.f32 %v1418_v28, %v1417_v33  ;;  %v1090_v6 = vadd.f32 %v1416_v31, %v895_v35 }
 0x1ea   : > { %v1093_v17 = vadd.f32 %v1419_v34, %v900_v3 }
 0x1ec   : > { %v983_v36 = vpop.f32.mrb[0].mxu0  ;;  %v1420_v37 = vpop.f32.mrb[12].mxu1 }
 0x1ed   : > { %v984_v38 = vadd.f32 %v983_v36, %v895_v35  ;;  %v985_v40 = vpop.f32.mrb[1].mxu0  ;;  %v1421_v41 = vpop.f32.mrb[13].mxu1 }
 0x1ee   : > { %v986_v32 = vadd.f32 %v985_v40, %v895_v35  ;;  %v987_v42 = vpop.f32.mrb[2].mxu0  ;;  %v1422_v43 = vadd.f32 %v1421_v41, %v1420_v37  ;;  %v1423_v44 = vpop.f32.mrb[14].mxu1 }
 0x1ef   : > { %v1037_v45 = vadd.f32 %v1036_v24, %v984_v38  ;;  %v988_v47 = vadd.f32 %v987_v42, %v900_v3  ;;  %v989_v48 = vpop.f32.mrb[3].mxu0  ;;  %v1424_v49 = vpop.f32.mrb[15].mxu1 }
 0x1f0   : > { %v1039_v50 = vadd.f32 %v1038_v46, %v986_v32  ;;  %v990_v52 = vadd.f32 %v989_v48, %v900_v3  ;;  %v1425_v39 = vadd.f32 %v1424_v49, %v1423_v44  ;;  %v1098_v0 = vadd.f32 %v1422_v43, %v905_v55 }
 0x1f1   : > { %v1153_v53 = vmax.f32 %v1037_v45, 0.0  ;;  %v1041_v54 = vadd.f32 %v1040_v21, %v988_v47 }
 0x1f2   : > { %v1154_v57 = vmax.f32 %v1039_v50, 0.0  ;;  %v1043_v58 = vadd.f32 %v1042_v25, %v990_v52  ;;  %v1101_v11 = vadd.f32 %v1425_v39, %v910_v61 }
 0x1f3   : > { %v1156_v59 = vmax.f32 %v1041_v54, 0.0 }
 0x1f4   : > { %v1390_v51 = vpack.c.bf16 %v1154_v57, %v1153_v53  ;;  %v1157_v63 = vmax.f32 %v1043_v58, 0.0  ;;  %v993_v1 = vpop.f32.mrb[4].mxu0 }
 0x1f5   : > { %v1436_v2 = vpop.f32.mrb[16].mxu1  ;;  %v994_v4 = vadd.f32 %v993_v1, %v905_v55  ;;  %v995_v5 = vpop.f32.mrb[5].mxu0 }
 0x1f6   : > { %1205 = vst [vmem:[%s1906_s8] sm:$0xff] %v1390_v51  ;;  %v1392_v8 = vpack.c.bf16 %v1157_v63, %v1156_v59  ;;  %v1147_v9 = vadd.f32 %v1436_v2, %v1098_v0  ;;  %v996_v62 = vadd.f32 %v995_v5, %v905_v55  ;;  %v1138_v10 = vpop.f32.mrb[17].mxu1  ;;  %v997_v12 = vpop.f32.mrb[6].mxu0 }
 0x1f7   : > { %v1047_v13 = vadd.f32 %v1046_v26, %v994_v4  ;;  %v1139_v14 = vadd.f32 %v1138_v10, %v1090_v6  ;;  %v998_v7 = vadd.f32 %v997_v12, %v910_v61  ;;  %v1437_v15 = vpop.f32.mrb[18].mxu1  ;;  %v999_v16 = vpop.f32.mrb[7].mxu0 }
 0x1f8   : > { %1207 = vst [vmem:[%s1906_s8 + $0xc] sm:$0xff] %v1392_v8  ;;  %v1161_v18 = vmax.f32 %v1147_v9, 0.0  ;;  %v1049_v19 = vadd.f32 %v1048_v27, %v996_v62  ;;  %v1150_v20 = vadd.f32 %v1437_v15, %v1101_v11  ;;  %v1000_v22 = vadd.f32 %v999_v16, %v910_v61  ;;  %v1141_v23 = vpop.f32.mrb[19].mxu1 }
 0x1f9   : > { %v1159_v24 = vmax.f32 %v1047_v13, 0.0  ;;  %v1155_v46 = vmax.f32 %v1139_v14, 0.0  ;;  %v1051_v21 = vadd.f32 %v1897_v29, %v998_v7  ;;  %v1142_v25 = vadd.f32 %v1141_v23, %v1093_v17 }
 0x1fa   : > { %v1395_v26 = vpack.c.bf16 %v1161_v18, %v1161_v18  ;;  %v1160_v30 = vmax.f32 %v1049_v19, 0.0  ;;  %v1164_v60 = vmax.f32 %v1150_v20, 0.0  ;;  %v1053_v31 = vadd.f32 %v1899_v56, %v1000_v22 }
 0x1fb   : > { %v1391_v33 = vpack.c.bf16 %v1155_v46, %v1155_v46  ;;  %v1162_v27 = vmax.f32 %v1051_v21, 0.0  ;;  %v1158_v28 = vmax.f32 %v1142_v25, 0.0 }
 0x1fc   : > { %1210 = vst [vmem:[%s1906_s8 + $0x20] sm:$0xf] %v1395_v26  ;;  %v1394_v34 = vpack.c.bf16 %v1160_v30, %v1159_v24  ;;  %v1397_v35 = vpack.c.bf16 %v1164_v60, %v1164_v60  ;;  %v1163_v3 = vmax.f32 %v1053_v31, 0.0 }
 0x1fd   : > { %1206 = vst [vmem:[%s1906_s8 + $0x8] sm:$0xf] %v1391_v33  ;;  %v1393_v36 = vpack.c.bf16 %v1158_v28, %v1158_v28 }
 0x1fe   : > { %1209 = vst [vmem:[%s1906_s8 + $0x18] sm:$0xff] %v1394_v34  ;;  %1212 = vst [vmem:[%s1906_s8 + $0x2c] sm:$0xf] %v1397_v35  ;;  %v1396_v29 = vpack.c.bf16 %v1163_v3, %v1162_v27 }
 0x1ff   : > { %1208 = vst [vmem:[%s1906_s8 + $0x14] sm:$0xf] %v1393_v36 }
 0x200   : > { %1211 = vst [vmem:[%s1906_s8 + $0x24] sm:$0xff] %v1396_v29 }
 0x201 PF: > { %s14_s19 = sadd.s32 1, %s1566_s19   ;;  %s1939_s15 = smov %s1554_s16 }
 0x202   : > { %p11_p10 = scmp.ge.s32.totalorder %s14_s19, 4   ;;  %s1940_s16 = smov %s1641_s24 }
 0x203   : > { %s1941_s17 = smov %s1562_s18  ;;  %s1942_s18 = smov %s1944_s20 }
 0x204   :  { %13 = sbr.rel (!%p11_p10) target bundleno = 3 (0x3), region = 143 }

// kernel: decoder_forward.18
= control target key start
LH: loop header
LB: loop body
LE: loop exit
PB: predicated region body
PF: predicated region fallthrough
CT: control target
= control target key end

     0   :  { %s3087_s15 = smov 0   ;;  %s3089_s16 = smov 0   ;;  %s4166_s0 = inlined_call_operand.vmem [shape: bf16[2,32,2304], index: 0, kind: input, shape index: {}, may-alias: {0,1}]   ;;  %s4167_s1 = inlined_call_operand.vmem [shape: bf16[2,32,2304], index: 1, kind: input, shape index: {}, may-alias: {0,1}]   ;;  %s4168_s2 = inlined_call_operand.vmem [shape: bf16[32,288], index: 2, kind: input, shape index: {}]   ;;  %s4169_s3 = inlined_call_operand.vmem [shape: f32[32,1], index: 3, kind: input, shape index: {}]   ;;  %s4170_s4 = inlined_call_operand.vmem [shape: bf16[2,32,1152], index: 4, kind: output, shape index: {}]  }
   0x1   :  { %s3091_s17 = smov 0   ;;  %s3093_s18 = smov 0  }
   0x2   :  { %s3095_s19 = smov 0  }
   0x3 LB: > { %s26_s20 = sadd.s32 1, %s3047_s18  ;;  %p42_p1 = scmp.ne.s32.totalorder %s3039_s16, %s3035_s15  ;;  %s3051_s19 = sphi %s3095_s19, %s14_s19   ;;  %s3047_s18 = sphi %s3093_s18, %s4175_s18   ;;  %s3043_s17 = sphi %s3091_s17, %s4174_s17   ;;  %s3039_s16 = sphi %s3089_s16, %s4173_s16   ;;  %s3035_s15 = sphi %s3087_s15, %s4172_s15  }
   0x4   : > { %p28_p0 = scmp.ge.s32.totalorder %s26_s20, 2  ;;  %p43_p2 = scmp.eq.s32.totalorder %s3051_s19, 0 }
   0x5   : > { %s35_s23 = sadd.s32 1, %s3039_s16  ;;  %p2699_p5 = scmp.ge.s32.totalorder %s3051_s19, 2 }
   0x6   : > { %s4177_s20 = smov (%p28_p0, %s26_s20), 0  ;;  %p3118_p3 = por %p43_p2, %p42_p1 }
   0x7   : > { %s30_s22 = ssub.s32 %s3047_s18, %s4177_s20  ;;  %174 = sbr.rel (%p2699_p5) target bundleno = 44 (0x2c), region = 24 }
   0x8   : > { %p33_p4 = scmp.eq.s32.totalorder %s30_s22, 0 }
   0xa   : > { %s3126_s24 = scalar_select %p33_p4, %s3039_s16, %s35_s23  }
   0xe   : > { %177 = sbr.rel (!%p3118_p3) target bundleno = 29 (0x1d), region = 28  ;;  %s179_s25 = sand.u32 (%p3118_p3), 1, %s3039_s16  }
   0xf   : > { %s2919_s26 = smul.u32 (%p3118_p3), 288, %s3047_s18 }
  0x10   : > { %s2918_s27 = smul.u32 (%p3118_p3), 144, %s179_s25 }
  0x11   : > { %s3136_s30 = scalar_lea.vmem (%p3118_p3), %s4166_s0, %s2919_s26 }
  0x12   : > { %v201_v0 = vld [vmem:[%s3136_s30] sm:$0xff] (%p3118_p3)  ;;  %v203_v1 = vld [vmem:[%s3136_s30 + $0x8] sm:$0xff] (%p3118_p3)  ;;  %v205_v2 = vld [vmem:[%s3136_s30 + $0x10] sm:$0xff] (%p3118_p3)  ;;  %s3141_s5 = scalar_lea.vmem (%p3118_p3), [#allocation4], %s2918_s27 }
  0x13   : > { %202 = vst [vmem:[%s3141_s5] sm:$0xff] (%p3118_p3), %v201_v0  ;;  %204 = vst [vmem:[%s3141_s5 + $0x8] sm:$0xff] (%p3118_p3), %v203_v1  ;;  %v207_v3 = vld [vmem:[%s3136_s30 + $0x18] sm:$0xff] (%p3118_p3)  ;;  %v209_v4 = vld [vmem:[%s3136_s30 + $0x48] sm:$0xff] (%p3118_p3) }
  0x14   : > { %206 = vst [vmem:[%s3141_s5 + $0x10] sm:$0xff] (%p3118_p3), %v205_v2  ;;  %v211_v5 = vld [vmem:[%s3136_s30 + $0x50] sm:$0xff] (%p3118_p3)  ;;  %208 = vst [vmem:[%s3141_s5 + $0x18] sm:$0xff] (%p3118_p3), %v207_v3  ;;  %v213_v6 = vld [vmem:[%s3136_s30 + $0x58] sm:$0xff] (%p3118_p3) }
  0x15   : > { %210 = vst [vmem:[%s3141_s5 + $0x24] sm:$0xff] %v209_v4  ;;  %212 = vst [vmem:[%s3141_s5 + $0x2c] sm:$0xff] %v211_v5  ;;  %v215_v7 = vld [vmem:[%s3136_s30 + $0x60] sm:$0xff]  ;;  %v217_v8 = vld [vmem:[%s3136_s30 + $0x90] sm:$0xff] }
  0x16   : > { %214 = vst [vmem:[%s3141_s5 + $0x34] sm:$0xff] %v213_v6  ;;  %216 = vst [vmem:[%s3141_s5 + $0x3c] sm:$0xff] %v215_v7  ;;  %v219_v9 = vld [vmem:[%s3136_s30 + $0x98] sm:$0xff]  ;;  %v221_v10 = vld [vmem:[%s3136_s30 + $0xa0] sm:$0xff] }
  0x17   : > { %218 = vst [vmem:[%s3141_s5 + $0x48] sm:$0xff] %v217_v8  ;;  %v223_v11 = vld [vmem:[%s3136_s30 + $0xa8] sm:$0xff]  ;;  %220 = vst [vmem:[%s3141_s5 + $0x50] sm:$0xff] %v219_v9  ;;  %v225_v12 = vld [vmem:[%s3136_s30 + $0xd8] sm:$0xff] }
  0x18   : > { %222 = vst [vmem:[%s3141_s5 + $0x58] sm:$0xff] %v221_v10  ;;  %224 = vst [vmem:[%s3141_s5 + $0x60] sm:$0xff] %v223_v11  ;;  %v227_v13 = vld [vmem:[%s3136_s30 + $0xe0] sm:$0xff]  ;;  %v229_v14 = vld [vmem:[%s3136_s30 + $0xe8] sm:$0xff] }
  0x19   : > { %226 = vst [vmem:[%s3141_s5 + $0x6c] sm:$0xff] %v225_v12  ;;  %228 = vst [vmem:[%s3141_s5 + $0x74] sm:$0xff] %v227_v13  ;;  %v231_v15 = vld [vmem:[%s3136_s30 + $0xf0] sm:$0xff]  ;;  %v2701_v16 = vld [vmem:[%s3136_s30 + $0x20] sm:$0xf] }
  0x1a   : > { %230 = vst [vmem:[%s3141_s5 + $0x7c] sm:$0xff] %v229_v14  ;;  %v2703_v17 = vld [vmem:[%s3136_s30 + $0x68] sm:$0xf]  ;;  %232 = vst [vmem:[%s3141_s5 + $0x84] sm:$0xff] %v231_v15  ;;  %v2705_v18 = vld [vmem:[%s3136_s30 + $0xb0] sm:$0xf] }
  0x1b   : > { %2702 = vst [vmem:[%s3141_s5 + $0x20] sm:$0xf] %v2701_v16  ;;  %2704 = vst [vmem:[%s3141_s5 + $0x44] sm:$0xf] %v2703_v17  ;;  %v2707_v19 = vld [vmem:[%s3136_s30 + $0xf8] sm:$0xf] }
  0x1c   : > { %2706 = vst [vmem:[%s3141_s5 + $0x68] sm:$0xf] %v2705_v18  ;;  %2708 = vst [vmem:[%s3141_s5 + $0x8c] sm:$0xf] %v2707_v19 }
  0x1d PF: > { %253 = sbr.rel (!%p3118_p3) target bundleno = 44 (0x2c), region = 54  ;;  %s255_s6 = sand.u32 (%p3118_p3), 1, %s3039_s16  }
  0x1e   : > { %s2709_s7 = smul.u32 (%p3118_p3), 288, %s3047_s18 }
  0x1f   : > { %s2920_s8 = smul.u32 (%p3118_p3), 144, %s255_s6 }
  0x20   : > { %s3187_s11 = scalar_lea.vmem (%p3118_p3), %s4167_s1, %s2709_s7 }
  0x21   : > { %v2710_v20 = vld [vmem:[%s3187_s11 + $0x24] sm:$0xff] (%p3118_p3)  ;;  %v2711_v21 = vld [vmem:[%s3187_s11 + $0x2c] sm:$0xff] (%p3118_p3)  ;;  %v2712_v22 = vld [vmem:[%s3187_s11 + $0x34] sm:$0xff] (%p3118_p3)  ;;  %s3192_s12 = scalar_lea.vmem (%p3118_p3), [#allocation5], %s2920_s8 }
  0x22   : > { %279 = vst [vmem:[%s3192_s12] sm:$0xff] (%p3118_p3), %v2710_v20  ;;  %281 = vst [vmem:[%s3192_s12 + $0x8] sm:$0xff] (%p3118_p3), %v2711_v21  ;;  %v2713_v23 = vld [vmem:[%s3187_s11 + $0x3c] sm:$0xff] (%p3118_p3)  ;;  %v2714_v24 = vld [vmem:[%s3187_s11 + $0x6c] sm:$0xff] (%p3118_p3) }
  0x23   : > { %283 = vst [vmem:[%s3192_s12 + $0x10] sm:$0xff] (%p3118_p3), %v2712_v22  ;;  %v2715_v25 = vld [vmem:[%s3187_s11 + $0x74] sm:$0xff] (%p3118_p3)  ;;  %285 = vst [vmem:[%s3192_s12 + $0x18] sm:$0xff] (%p3118_p3), %v2713_v23  ;;  %v2716_v26 = vld [vmem:[%s3187_s11 + $0x7c] sm:$0xff] (%p3118_p3) }
  0x24   : > { %287 = vst [vmem:[%s3192_s12 + $0x24] sm:$0xff] %v2714_v24  ;;  %289 = vst [vmem:[%s3192_s12 + $0x2c] sm:$0xff] %v2715_v25  ;;  %v2717_v27 = vld [vmem:[%s3187_s11 + $0x84] sm:$0xff]  ;;  %v2718_v28 = vld [vmem:[%s3187_s11 + $0xb4] sm:$0xff] }
  0x25   : > { %291 = vst [vmem:[%s3192_s12 + $0x34] sm:$0xff] %v2716_v26  ;;  %293 = vst [vmem:[%s3192_s12 + $0x3c] sm:$0xff] %v2717_v27  ;;  %v2719_v29 = vld [vmem:[%s3187_s11 + $0xbc] sm:$0xff]  ;;  %v2720_v30 = vld [vmem:[%s3187_s11 + $0xc4] sm:$0xff] }
  0x26   : > { %295 = vst [vmem:[%s3192_s12 + $0x48] sm:$0xff] %v2718_v28  ;;  %v2721_v31 = vld [vmem:[%s3187_s11 + $0xcc] sm:$0xff]  ;;  %297 = vst [vmem:[%s3192_s12 + $0x50] sm:$0xff] %v2719_v29  ;;  %v2722_v32 = vld [vmem:[%s3187_s11 + $0xfc] sm:$0xff] }
  0x27   : > { %299 = vst [vmem:[%s3192_s12 + $0x58] sm:$0xff] %v2720_v30  ;;  %301 = vst [vmem:[%s3192_s12 + $0x60] sm:$0xff] %v2721_v31  ;;  %v2723_v33 = vld [vmem:[%s3187_s11 + $0x104] sm:$0xff]  ;;  %v2724_v34 = vld [vmem:[%s3187_s11 + $0x10c] sm:$0xff] }
  0x28   : > { %303 = vst [vmem:[%s3192_s12 + $0x6c] sm:$0xff] %v2722_v32  ;;  %305 = vst [vmem:[%s3192_s12 + $0x74] sm:$0xff] %v2723_v33  ;;  %v2725_v35 = vld [vmem:[%s3187_s11 + $0x114] sm:$0xff]  ;;  %v2726_v36 = vld [vmem:[%s3187_s11 + $0x44] sm:$0xf] }
  0x29   : > { %307 = vst [vmem:[%s3192_s12 + $0x7c] sm:$0xff] %v2724_v34  ;;  %v2728_v37 = vld [vmem:[%s3187_s11 + $0x8c] sm:$0xf]  ;;  %309 = vst [vmem:[%s3192_s12 + $0x84] sm:$0xff] %v2725_v35  ;;  %v2730_v38 = vld [vmem:[%s3187_s11 + $0xd4] sm:$0xf] }
  0x2a   : > { %2727 = vst [vmem:[%s3192_s12 + $0x20] sm:$0xf] %v2726_v36  ;;  %2729 = vst [vmem:[%s3192_s12 + $0x44] sm:$0xf] %v2728_v37  ;;  %v2732_v39 = vld [vmem:[%s3187_s11 + $0x11c] sm:$0xf] }
  0x2b   : > { %2731 = vst [vmem:[%s3192_s12 + $0x68] sm:$0xf] %v2730_v38  ;;  %2733 = vst [vmem:[%s3192_s12 + $0x8c] sm:$0xf] %v2732_v39 }
  0x2c PF: > { %p2734_p6 = scmp.ge.s32.totalorder %s3051_s19, 1  ;;  %p329_p7 = scmp.lt.s32.totalorder %s3051_s19, 3 }
  0x2e   : > { %p330_p8 = pnand %p2734_p6, %p329_p7 }
  0x2f   : > { %s336_s13 = sand.u32 (!%p330_p8), 1, %s3035_s15   ;;  %s3053_s22 = smov (!%p330_p8), 58   ;;  %v3055_v46 = vmov (!%p330_p8), 0   ;;  %vm1599_vm0 = vcmask (!%p330_p8), 474112   ;;  %vm654_vm1 = vcmask (!%p330_p8), 1039360   ;;  %vm1878_vm2 = vcmask (!%p330_p8), 261120  }
  0x30   : > { %333 = sbr.rel (%p330_p8) target bundleno = 719 (0x2cf), region = 80  ;;  %s3054_s15 = smov (!%p330_p8), 127   ;;  %1970 = vmatprep.mubr.bf16.mxu1 (!%p330_p8), %v3055_v46  ;;  %2972 = vset.pattern.permute.xlu0 (!%p330_p8), %v3055_v46  ;;  %v3420_v63 = vld [vmem:[%s4168_s2 + $0x4] ss:$12 sps:$4 sm:$0xff] (!%p330_p8)   ;;  %v3432_v4 = vld [vmem:[%s4168_s2 + $0x8] ss:$12 sps:$4 sm:$0xff] (!%p330_p8)  }
  0x31   : > { %s3234_s14 = smul.u32 (!%p330_p8), 144, %s336_s13  ;;  %2973 = vset.pattern.permute.xlu1 (!%p330_p8), %v3055_v46  ;;  %s3056_s23 = smov (!%p330_p8), 126   ;;  %1917 = vmatprep.mubr.bf16.mxu0 (!%p330_p8), %v3420_v63  ;;  %vm789_vm3 = vcmask (!%p330_p8), 1031168   ;;  %v3469_v16 = vld [vmem:[%s4168_s2 + $0x20] ss:$12 sps:$4 sm:$0xff] (!%p330_p8)   ;;  %vm924_vm4 = vcmask (!%p330_p8), 769024  }
  0x32   : > { %s3057_s25 = smov (!%p330_p8), 94   ;;  %s3058_s26 = smov (!%p330_p8), 93   ;;  %vm1059_vm5 = vcmask (!%p330_p8), 760832   ;;  %vm1194_vm6 = vcmask (!%p330_p8), 752640   ;;  %vm1329_vm7 = vcmask (!%p330_p8), 490496   ;;  %vm1464_vm8 = vcmask (!%p330_p8), 482304  }
  0x33   : > { %s3237_s21 = scalar_lea.vmem (!%p330_p8), [#allocation4], %s3234_s14  ;;  %s3059_s27 = smov (!%p330_p8), 92  }
  0x34   : > { %v3240_v40 = vld [vmem:[%s3237_s21 + $0x4] ss:$36 sps:$4 sm:$0xff] (!%p330_p8)   ;;  %v3254_v43 = vld [vmem:[%s3237_s21 + $0x4c] ss:$36 sps:$4 sm:$0xff] (!%p330_p8)   ;;  %v3309_v49 = vld [vmem:[%s3237_s21 + $0x54] ss:$36 sps:$4 sm:$0xff] (!%p330_p8)  }
  0x35   : > { %v3243_v41 = vld [vmem:[%s3237_s21] ss:$36 sps:$4 sm:$0xff] (!%p330_p8)   ;;  %1561 = vrot.lane.b32.xlu0 (!%p330_p8), %v3240_v40, %s3053_s22  ;;  %v3248_v42 = vld [vmem:[%s3237_s21 + $0x8] ss:$36 sps:$4 sm:$0xff] (!%p330_p8)   ;;  %1885 = vmatprep.subr.bf16.mxu0 (!%p330_p8), %v3240_v40  ;;  %v3269_v45 = vld [vmem:[%s3237_s21 + $0x50] ss:$36 sps:$4 sm:$0xff] (!%p330_p8)  }
  0x36   : > { %1559 = vrot.lane.b32.xlu1 (!%p330_p8), %v3243_v41, %s3053_s22  ;;  %1886 = vmatpush1.bf16.msra.mxu0 (!%p330_p8), %v3243_v41  ;;  %v3258_v44 = vld [vmem:[%s3237_s21 + $0x48] ss:$36 sps:$4 sm:$0xff] (!%p330_p8)   ;;  %v3298_v48 = vld [vmem:[%s3237_s21 + $0x10] ss:$36 sps:$4 sm:$0xff] (!%p330_p8)   ;;  %v3314_v50 = vld [vmem:[%s3237_s21 + $0x58] ss:$36 sps:$4 sm:$0xff] (!%p330_p8)  }
  0x37   : > { %1887 = vmatprep.subr.bf16.mxu0 %v3254_v43  ;;  %v3293_v47 = vld [vmem:[%s3237_s21 + $0xc] ss:$36 sps:$4 sm:$0xff]   ;;  %s3060_s28 = smov 60   ;;  %s3061_s29 = smov 59   ;;  %v3464_v15 = vld [vmem:[%s3237_s21 + $0x14] ss:$36 sps:$4 sm:$0xff]  }
  0x38   : > { %s345_s8 = scalar_lea.vmem [#allocation5], %s3234_s14  ;;  %v3474_v17 = vld [vmem:[%s3237_s21 + $0x18] ss:$36 sps:$4 sm:$0xff]   ;;  %v3499_v27 = vld [vmem:[%s3237_s21 + $0x60] ss:$36 sps:$4 sm:$0xff]   ;;  %p380_p9 = scmp.lt.s32.totalorder %s3043_s17, 1 }
  0x39   : > { %1563 = vrot.lane.b32.xlu0 %v3248_v42, %s3053_s22  ;;  %v3494_v26 = vld [vmem:[%s3237_s21 + $0x5c] ss:$36 sps:$4 sm:$0xff]  }
  0x3a   : > { %616 = vrot.lane.b32.xlu1 %v3240_v40, %s3054_s15  ;;  %1888 = vmatpush1.bf16.msra.mxu0 %v3258_v44  ;;  %s4179_s17 = smov (!%p380_p9, %s3043_s17), 1 }
  0x3b   : > { %s2922_s11 = smul.u32 144, %s4179_s17 }
  0x3d   : > { %618 = vrot.lane.b32.xlu0 %v3248_v42, %s3054_s15  ;;  %s4091_s17 = scalar_lea.vmem %s4170_s4, %s2922_s11 }
  0x3e   : > { %1581 = vrot.lane.b32.xlu1 %v3254_v43, %s3053_s22 }
  0x41   : > { %1583 = vrot.lane.b32.xlu0 %v3269_v45, %s3053_s22 }
  0x42   : > { %614 = vrot.lane.b32.xlu1 %v3243_v41, %s3054_s15 }
  0x45   : > { %1579 = vrot.lane.b32.xlu0 %v3258_v44, %s3053_s22 }
  0x46   : > { %636 = vrot.lane.b32.xlu1 %v3254_v43, %s3054_s15 }
  0x49   : > { %638 = vrot.lane.b32.xlu0 %v3269_v45, %s3054_s15 }
  0x4a   : > { %634 = vrot.lane.b32.xlu1 %v3258_v44, %s3054_s15 }
  0x4d   : > { %751 = vrot.lane.b32.xlu0 %v3240_v40, %s3056_s23 }
  0x4e   : > { %753 = vrot.lane.b32.xlu1 %v3248_v42, %s3056_s23 }
  0x51   : > { %749 = vrot.lane.b32.xlu0 %v3243_v41, %s3056_s23 }
  0x52   : > { %620 = vrot.lane.b32.xlu1 %v3293_v47, %s3054_s15 }
  0x55   : > { %622 = vrot.lane.b32.xlu0 %v3298_v48, %s3054_s15 }
  0x56   : > { %771 = vrot.lane.b32.xlu1 %v3254_v43, %s3056_s23 }
  0x59   : > { %773 = vrot.lane.b32.xlu0 %v3269_v45, %s3056_s23 }
  0x5a   : > { %769 = vrot.lane.b32.xlu1 %v3258_v44, %s3056_s23 }
  0x5d   : > { %640 = vrot.lane.b32.xlu0 %v3309_v49, %s3054_s15 }
  0x5e   : > { %642 = vrot.lane.b32.xlu1 %v3314_v50, %s3054_s15 }
  0x61   : > { %886 = vrot.lane.b32.xlu0 %v3240_v40, %s3057_s25 }
  0x62   : > { %888 = vrot.lane.b32.xlu1 %v3248_v42, %s3057_s25 }
  0x65   : > { %884 = vrot.lane.b32.xlu0 %v3243_v41, %s3057_s25 }
  0x66   : > { %755 = vrot.lane.b32.xlu1 %v3293_v47, %s3056_s23 }
  0x69   : > { %757 = vrot.lane.b32.xlu0 %v3298_v48, %s3056_s23 }
  0x6a   : > { %906 = vrot.lane.b32.xlu1 %v3254_v43, %s3057_s25 }
  0x6d   : > { %908 = vrot.lane.b32.xlu0 %v3269_v45, %s3057_s25 }
  0x6e   : > { %904 = vrot.lane.b32.xlu1 %v3258_v44, %s3057_s25 }
  0x71   : > { %775 = vrot.lane.b32.xlu0 %v3309_v49, %s3056_s23 }
  0x72   : > { %777 = vrot.lane.b32.xlu1 %v3314_v50, %s3056_s23 }
  0x75   : > { %1021 = vrot.lane.b32.xlu0 %v3240_v40, %s3058_s26 }
  0x76   : > { %1023 = vrot.lane.b32.xlu1 %v3248_v42, %s3058_s26 }
  0x79   : > { %1019 = vrot.lane.b32.xlu0 %v3243_v41, %s3058_s26 }
  0x7a   : > { %890 = vrot.lane.b32.xlu1 %v3293_v47, %s3057_s25 }
  0x7d   : > { %892 = vrot.lane.b32.xlu0 %v3298_v48, %s3057_s25 }
  0x7e   : > { %1041 = vrot.lane.b32.xlu1 %v3254_v43, %s3058_s26 }
  0x81   : > { %1043 = vrot.lane.b32.xlu0 %v3269_v45, %s3058_s26 }
  0x82   : > { %1039 = vrot.lane.b32.xlu1 %v3258_v44, %s3058_s26 }
  0x85   : > { %910 = vrot.lane.b32.xlu0 %v3309_v49, %s3057_s25 }
  0x86   : > { %912 = vrot.lane.b32.xlu1 %v3314_v50, %s3057_s25 }
  0x89   : > { %1156 = vrot.lane.b32.xlu0 %v3240_v40, %s3059_s27 }
  0x8a   : > { %1158 = vrot.lane.b32.xlu1 %v3248_v42, %s3059_s27 }
  0x8d   : > { %1154 = vrot.lane.b32.xlu0 %v3243_v41, %s3059_s27 }
  0x8e   : > { %1025 = vrot.lane.b32.xlu1 %v3293_v47, %s3058_s26 }
  0x91   : > { %1027 = vrot.lane.b32.xlu0 %v3298_v48, %s3058_s26 }
  0x92   : > { %1176 = vrot.lane.b32.xlu1 %v3254_v43, %s3059_s27 }
  0x95   : > { %1178 = vrot.lane.b32.xlu0 %v3269_v45, %s3059_s27 }
  0x96   : > { %1174 = vrot.lane.b32.xlu1 %v3258_v44, %s3059_s27 }
  0x99   : > { %1045 = vrot.lane.b32.xlu0 %v3309_v49, %s3058_s26 }
  0x9a   : > { %1047 = vrot.lane.b32.xlu1 %v3314_v50, %s3058_s26 }
  0x9d   : > { %1291 = vrot.lane.b32.xlu0 %v3240_v40, %s3060_s28 }
  0x9e   : > { %1293 = vrot.lane.b32.xlu1 %v3248_v42, %s3060_s28 }
  0xa1   : > { %1289 = vrot.lane.b32.xlu0 %v3243_v41, %s3060_s28 }
  0xa2   : > { %1160 = vrot.lane.b32.xlu1 %v3293_v47, %s3059_s27 }
  0xa5   : > { %1162 = vrot.lane.b32.xlu0 %v3298_v48, %s3059_s27 }
  0xa6   : > { %1311 = vrot.lane.b32.xlu1 %v3254_v43, %s3060_s28 }
  0xa7   : > { %v1562_v51 = vpop.permute.xlu0 %1561 }
  0xa8   : > { %v1560_v52 = vpop.permute.xlu1 %1559 }
  0xa9   : > { %1313 = vrot.lane.b32.xlu0 %v3269_v45, %s3060_s28  ;;  %v1600_v56 = vsel %vm1599_vm0, %v1560_v52, %v1562_v51 }
  0xaa   : > { %1309 = vrot.lane.b32.xlu1 %v3258_v44, %s3060_s28 }
  0xab   : > { %v3396_v53 = vpop.permute.xlu0 %1563 }
  0xac   : > { %v617_v54 = vpop.permute.xlu1 %616  ;;  %v1601_v55 = vsel %vm1599_vm0, %v1562_v51, %v3396_v53 }
  0xad   : > { %1938 = vmatprep.subr.bf16.mxu1 %v1601_v55  ;;  %1180 = vrot.lane.b32.xlu0 %v3309_v49, %s3059_s27 }
  0xae   : > { %1182 = vrot.lane.b32.xlu1 %v3314_v50, %s3059_s27  ;;  %1939 = vmatpush1.bf16.msra.mxu1 %v1600_v56 }
  0xaf   : > { %v3405_v57 = vpop.permute.xlu0 %618 }
  0xb0   : > { %v1582_v58 = vpop.permute.xlu1 %1581  ;;  %v656_v59 = vsel %vm654_vm1, %v617_v54, %v3405_v57 }
  0xb1   : > { %1426 = vrot.lane.b32.xlu0 %v3240_v40, %s3061_s29  ;;  %1889 = vmatprep.subr.bf16.mxu0 %v656_v59 }
  0xb2   : > { %1428 = vrot.lane.b32.xlu1 %v3248_v42, %s3061_s29 }
  0xb3   : > { %v3413_v60 = vpop.permute.xlu0 %1583 }
  0xb4   : > { %v615_v61 = vpop.permute.xlu1 %614  ;;  %v1610_v62 = vsel %vm1599_vm0, %v1582_v58, %v3413_v60 }
  0xb5   : > { %1424 = vrot.lane.b32.xlu0 %v3243_v41, %s3061_s29  ;;  %v655_v0 = vsel %vm654_vm1, %v615_v61, %v617_v54  ;;  %1940 = vmatprep.subr.bf16.mxu1 %v1610_v62  ;;  %v3554_v61 = vld [vmem:[%s3237_s21 + $0x1c] ss:$36 sps:$4 sm:$0xff]  }
  0xb6   : > { %1295 = vrot.lane.b32.xlu1 %v3293_v47, %s3060_s28  ;;  %1890 = vmatpush1.bf16.msra.mxu0 %v655_v0  ;;  %v3559_v62 = vld [vmem:[%s3237_s21 + $0x20] ss:$36 sps:$4 sm:$0xff]  }
  0xb7   : > { %v1580_v1 = vpop.permute.xlu0 %1579 }
  0xb8   : > { %v637_v2 = vpop.permute.xlu1 %636  ;;  %v1609_v3 = vsel %vm1599_vm0, %v1580_v1, %v1582_v58 }
  0xb9   : > { %1297 = vrot.lane.b32.xlu0 %v3298_v48, %s3060_s28  ;;  %1941 = vmatpush1.bf16.msra.mxu1 %v1609_v3 }
  0xba   : > { %1446 = vrot.lane.b32.xlu1 %v3254_v43, %s3061_s29  ;;  %1991 = vmatprep.subr.bf16.mxu1 %v3293_v47 }
  0xbb   : > { %v639_v5 = vpop.permute.xlu0 %638 }
  0xbc   : > { %v635_v6 = vpop.permute.xlu1 %634  ;;  %v665_v7 = vsel %vm654_vm1, %v637_v2, %v639_v5  ;;  %2762 = vmatmul.mubr.msk.bf16.vlgmr.msra.gmra.mrb[0].mxu1 %vm1878_vm2, %v3432_v4 }
  0xbd   : > { %1448 = vrot.lane.b32.xlu0 %v3269_v45, %s3061_s29  ;;  %1891 = vmatprep.subr.bf16.mxu0 %v665_v7  ;;  %v664_v8 = vsel %vm654_vm1, %v635_v6, %v637_v2 }
  0xbe   : > { %1444 = vrot.lane.b32.xlu1 %v3258_v44, %s3061_s29  ;;  %1892 = vmatpush1.bf16.msra.mxu0 %v664_v8 }
  0xbf   : > { %v752_v9 = vpop.permute.xlu0 %751  ;;  %1992 = vmatpush1.bf16.msra.mxu1 %v3248_v42  ;;  %1980 = vmatprep.mubr.bf16.mxu1 %v3055_v46 }
  0xc0   : > { %v3449_v10 = vpop.permute.xlu1 %753  ;;  %1993 = vmatprep.subr.bf16.mxu1 %v3309_v49 }
  0xc1   : > { %1315 = vrot.lane.b32.xlu0 %v3309_v49, %s3060_s28  ;;  %v791_v11 = vsel %vm789_vm3, %v752_v9, %v3449_v10 }
  0xc2   : > { %1317 = vrot.lane.b32.xlu1 %v3314_v50, %s3060_s28  ;;  %1893 = vmatprep.subr.bf16.mxu0 %v791_v11 }
  0xc3   : > { %v750_v12 = vpop.permute.xlu0 %749  ;;  %1994 = vmatpush1.bf16.msra.mxu1 %v3269_v45 }
  0xc4   : > { %v621_v13 = vpop.permute.xlu1 %620  ;;  %v790_v14 = vsel %vm789_vm3, %v750_v12, %v752_v9  ;;  %2763 = vmatmul.mubr.msk.bf16.gmra.mrb[4].mxu1 %vm1878_vm2, %v3469_v16  ;;  %v3575_v9 = vld [vmem:[%s3237_s21 + $0x64] ss:$36 sps:$4 sm:$0xff]  }
  0xc5   : > { %1430 = vrot.lane.b32.xlu0 %v3293_v47, %s3061_s29  ;;  %1894 = vmatpush1.bf16.msra.mxu0 %v790_v14  ;;  %v657_v21 = vsel %vm654_vm1, %v3405_v57, %v621_v13 }
  0xc6   : > { %1432 = vrot.lane.b32.xlu1 %v3298_v48, %s3061_s29  ;;  %2023 = vmatprep.mubr.bf16.mxu1 %v3420_v63 }
  0xc7   : > { %v3476_v18 = vpop.permute.xlu0 %622 }
  0xc8   : > { %v772_v19 = vpop.permute.xlu1 %771  ;;  %v658_v20 = vsel %vm654_vm1, %v621_v13, %v3476_v18 }
  0xc9   : > { %624 = vrot.lane.b32.xlu0 %v3464_v15, %s3054_s15  ;;  %1995 = vmatprep.subr.bf16.mxu1 %v658_v20 }
  0xca   : > { %626 = vrot.lane.b32.xlu1 %v3474_v17, %s3054_s15  ;;  %1996 = vmatpush1.bf16.msra.mxu1 %v657_v21 }
  0xcb   : > { %v774_v22 = vpop.permute.xlu0 %773 }
  0xcc   : > { %v770_v23 = vpop.permute.xlu1 %769  ;;  %v800_v24 = vsel %vm789_vm3, %v772_v19, %v774_v22 }
  0xcd   : > { %1450 = vrot.lane.b32.xlu0 %v3309_v49, %s3061_s29  ;;  %1895 = vmatprep.subr.bf16.mxu0 %v800_v24  ;;  %v799_v25 = vsel %vm789_vm3, %v770_v23, %v772_v19 }
  0xce   : > { %1452 = vrot.lane.b32.xlu1 %v3314_v50, %s3061_s29  ;;  %1896 = vmatpush1.bf16.msra.mxu0 %v799_v25 }
  0xcf   : > { %v641_v28 = vpop.permute.xlu0 %640 }
  0xd0   : > { %v3501_v29 = vpop.permute.xlu1 %642  ;;  %v666_v30 = vsel %vm654_vm1, %v639_v5, %v641_v28 }
  0xd1   : > { %644 = vrot.lane.b32.xlu0 %v3494_v26, %s3054_s15  ;;  %v667_v31 = vsel %vm654_vm1, %v641_v28, %v3501_v29 }
  0xd2   : > { %646 = vrot.lane.b32.xlu1 %v3499_v27, %s3054_s15  ;;  %1997 = vmatprep.subr.bf16.mxu1 %v667_v31 }
  0xd3   : > { %1998 = vmatpush1.bf16.msra.mxu1 %v666_v30  ;;  %v887_v32 = vpop.permute.xlu0 %886 }
  0xd4   : > { %v889_v33 = vpop.permute.xlu1 %888 }
  0xd5   : > { %759 = vrot.lane.b32.xlu0 %v3464_v15, %s3056_s23  ;;  %v926_v34 = vsel %vm924_vm4, %v887_v32, %v889_v33 }
  0xd6   : > { %761 = vrot.lane.b32.xlu1 %v3474_v17, %s3056_s23  ;;  %1897 = vmatprep.subr.bf16.mxu0 %v926_v34 }
  0xd7   : > { %v885_v35 = vpop.permute.xlu0 %884 }
  0xd8   : > { %v756_v36 = vpop.permute.xlu1 %755  ;;  %v925_v37 = vsel %vm924_vm4, %v885_v35, %v887_v32 }
  0xd9   : > { %1565 = vrot.lane.b32.xlu0 %v3293_v47, %s3053_s22  ;;  %1898 = vmatpush1.bf16.msra.mxu0 %v925_v37  ;;  %v792_v41 = vsel %vm789_vm3, %v3449_v10, %v756_v36  ;;  %v3580_v10 = vld [vmem:[%s3237_s21 + $0x68] ss:$36 sps:$4 sm:$0xff]  }
  0xda   : > { %1567 = vrot.lane.b32.xlu1 %v3298_v48, %s3053_s22 }
  0xdb   : > { %v3520_v38 = vpop.permute.xlu0 %757 }
  0xdc   : > { %v907_v39 = vpop.permute.xlu1 %906  ;;  %v793_v40 = vsel %vm789_vm3, %v756_v36, %v3520_v38 }
  0xdd   : > { %779 = vrot.lane.b32.xlu0 %v3494_v26, %s3056_s23  ;;  %1999 = vmatprep.subr.bf16.mxu1 %v793_v40 }
  0xde   : > { %781 = vrot.lane.b32.xlu1 %v3499_v27, %s3056_s23  ;;  %2000 = vmatpush1.bf16.msra.mxu1 %v792_v41 }
  0xdf   : > { %v909_v42 = vpop.permute.xlu0 %908 }
  0xe0   : > { %v905_v43 = vpop.permute.xlu1 %904  ;;  %v935_v44 = vsel %vm924_vm4, %v907_v39, %v909_v42 }
  0xe1   : > { %1585 = vrot.lane.b32.xlu0 %v3309_v49, %s3053_s22  ;;  %1899 = vmatprep.subr.bf16.mxu0 %v935_v44  ;;  %v934_v45 = vsel %vm924_vm4, %v905_v43, %v907_v39 }
  0xe2   : > { %1587 = vrot.lane.b32.xlu1 %v3314_v50, %s3053_s22  ;;  %1900 = vmatpush1.bf16.msra.mxu0 %v934_v45 }
  0xe3   : > { %v776_v47 = vpop.permute.xlu0 %775 }
  0xe4   : > { %v3536_v51 = vpop.permute.xlu1 %777  ;;  %v801_v52 = vsel %vm789_vm3, %v774_v22, %v776_v47 }
  0xe5   : > { %894 = vrot.lane.b32.xlu0 %v3464_v15, %s3057_s25  ;;  %v802_v54 = vsel %vm789_vm3, %v776_v47, %v3536_v51 }
  0xe6   : > { %896 = vrot.lane.b32.xlu1 %v3474_v17, %s3057_s25  ;;  %2001 = vmatprep.subr.bf16.mxu1 %v802_v54 }
  0xe7   : > { %2002 = vmatpush1.bf16.msra.mxu1 %v801_v52  ;;  %v1022_v49 = vpop.permute.xlu0 %1021 }
  0xe8   : > { %v1024_v55 = vpop.permute.xlu1 %1023 }
  0xe9   : > { %914 = vrot.lane.b32.xlu0 %v3494_v26, %s3057_s25  ;;  %v1061_v56 = vsel %vm1059_vm5, %v1022_v49, %v1024_v55 }
  0xea   : > { %916 = vrot.lane.b32.xlu1 %v3499_v27, %s3057_s25  ;;  %1901 = vmatprep.subr.bf16.mxu0 %v1061_v56 }
  0xeb   : > { %v1020_v57 = vpop.permute.xlu0 %1019 }
  0xec   : > { %v891_v58 = vpop.permute.xlu1 %890  ;;  %v1060_v59 = vsel %vm1059_vm5, %v1020_v57, %v1022_v49 }
  0xed   : > { %1029 = vrot.lane.b32.xlu0 %v3464_v15, %s3058_s26  ;;  %1902 = vmatpush1.bf16.msra.mxu0 %v1060_v59  ;;  %v927_v3 = vsel %vm924_vm4, %v889_v33, %v891_v58 }
  0xee   : > { %1031 = vrot.lane.b32.xlu1 %v3474_v17, %s3058_s26 }
  0xef   : > { %v3561_v0 = vpop.permute.xlu0 %892 }
  0xf0   : > { %v1042_v1 = vpop.permute.xlu1 %1041  ;;  %v928_v2 = vsel %vm924_vm4, %v891_v58, %v3561_v0 }
  0xf1   : > { %628 = vrot.lane.b32.xlu0 %v3554_v61, %s3054_s15  ;;  %2003 = vmatprep.subr.bf16.mxu1 %v928_v2 }
  0xf2   : > { %630 = vrot.lane.b32.xlu1 %v3559_v62, %s3054_s15  ;;  %2004 = vmatpush1.bf16.msra.mxu1 %v927_v3 }
  0xf3   : > { %v1044_v5 = vpop.permute.xlu0 %1043 }
  0xf4   : > { %v1040_v6 = vpop.permute.xlu1 %1039  ;;  %v1070_v7 = vsel %vm1059_vm5, %v1042_v1, %v1044_v5 }
  0xf5   : > { %1049 = vrot.lane.b32.xlu0 %v3494_v26, %s3058_s26  ;;  %1903 = vmatprep.subr.bf16.mxu0 %v1070_v7  ;;  %v1069_v8 = vsel %vm1059_vm5, %v1040_v6, %v1042_v1 }
  0xf6   : > { %1051 = vrot.lane.b32.xlu1 %v3499_v27, %s3058_s26  ;;  %1904 = vmatpush1.bf16.msra.mxu0 %v1069_v8 }
  0xf7   : > { %v911_v11 = vpop.permute.xlu0 %910 }
  0xf8   : > { %v3582_v12 = vpop.permute.xlu1 %912  ;;  %v936_v13 = vsel %vm924_vm4, %v909_v42, %v911_v11 }
  0xf9   : > { %648 = vrot.lane.b32.xlu0 %v3575_v9, %s3054_s15  ;;  %v937_v14 = vsel %vm924_vm4, %v911_v11, %v3582_v12 }
  0xfa   : > { %650 = vrot.lane.b32.xlu1 %v3580_v10, %s3054_s15  ;;  %2005 = vmatprep.subr.bf16.mxu1 %v937_v14 }
  0xfb   : > { %2006 = vmatpush1.bf16.msra.mxu1 %v936_v13  ;;  %v1157_v19 = vpop.permute.xlu0 %1156 }
  0xfc   : > { %v1159_v20 = vpop.permute.xlu1 %1158 }
  0xfd   : > { %1164 = vrot.lane.b32.xlu0 %v3464_v15, %s3059_s27  ;;  %v1196_v21 = vsel %vm1194_vm6, %v1157_v19, %v1159_v20 }
  0xfe   : > { %1166 = vrot.lane.b32.xlu1 %v3474_v17, %s3059_s27  ;;  %1905 = vmatprep.subr.bf16.mxu0 %v1196_v21 }
  0xff   : > { %v1155_v22 = vpop.permute.xlu0 %1154 }
 0x100   : > { %v1026_v23 = vpop.permute.xlu1 %1025  ;;  %v1195_v24 = vsel %vm1194_vm6, %v1155_v22, %v1157_v19 }
 0x101   : > { %763 = vrot.lane.b32.xlu0 %v3554_v61, %s3056_s23  ;;  %1906 = vmatpush1.bf16.msra.mxu0 %v1195_v24  ;;  %v1062_v31 = vsel %vm1059_vm5, %v1024_v55, %v1026_v23 }
 0x102   : > { %765 = vrot.lane.b32.xlu1 %v3559_v62, %s3056_s23 }
 0x103   : > { %v3601_v25 = vpop.permute.xlu0 %1027 }
 0x104   : > { %v1177_v28 = vpop.permute.xlu1 %1176  ;;  %v1063_v30 = vsel %vm1059_vm5, %v1026_v23, %v3601_v25 }
 0x105   : > { %1184 = vrot.lane.b32.xlu0 %v3494_v26, %s3059_s27  ;;  %2007 = vmatprep.subr.bf16.mxu1 %v1063_v30 }
 0x106   : > { %1186 = vrot.lane.b32.xlu1 %v3499_v27, %s3059_s27  ;;  %2008 = vmatpush1.bf16.msra.mxu1 %v1062_v31  ;;  %v3685_v31 = vld [vmem:[%s4168_s2] ss:$12 sps:$4 sm:$0xff]  }
 0x107   : > { %v1179_v32 = vpop.permute.xlu0 %1178 }
 0x108   : > { %v1175_v33 = vpop.permute.xlu1 %1174  ;;  %v1205_v34 = vsel %vm1194_vm6, %v1177_v28, %v1179_v32 }
 0x109   : > { %783 = vrot.lane.b32.xlu0 %v3575_v9, %s3056_s23  ;;  %1907 = vmatprep.subr.bf16.mxu0 %v1205_v34  ;;  %v1204_v35 = vsel %vm1194_vm6, %v1175_v33, %v1177_v28 }
 0x10a   : > { %785 = vrot.lane.b32.xlu1 %v3580_v10, %s3056_s23  ;;  %1908 = vmatpush1.bf16.msra.mxu0 %v1204_v35 }
 0x10b   : > { %v1046_v36 = vpop.permute.xlu0 %1045 }
 0x10c   : > { %v3616_v37 = vpop.permute.xlu1 %1047  ;;  %v1071_v39 = vsel %vm1059_vm5, %v1044_v5, %v1046_v36 }
 0x10d   : > { %1299 = vrot.lane.b32.xlu0 %v3464_v15, %s3060_s28  ;;  %v1072_v40 = vsel %vm1059_vm5, %v1046_v36, %v3616_v37  ;;  %v3703_v36 = vld [vmem:[%s4168_s2 + $0x1c] ss:$12 sps:$4 sm:$0xff]  }
 0x10e   : > { %1301 = vrot.lane.b32.xlu1 %v3474_v17, %s3060_s28  ;;  %2009 = vmatprep.subr.bf16.mxu1 %v1072_v40 }
 0x10f   : > { %2010 = vmatpush1.bf16.msra.mxu1 %v1071_v39  ;;  %v1292_v41 = vpop.permute.xlu0 %1291 }
 0x110   : > { %v1294_v42 = vpop.permute.xlu1 %1293 }
 0x111   : > { %898 = vrot.lane.b32.xlu0 %v3554_v61, %s3057_s25  ;;  %v1331_v43 = vsel %vm1329_vm7, %v1292_v41, %v1294_v42 }
 0x112   : > { %900 = vrot.lane.b32.xlu1 %v3559_v62, %s3057_s25  ;;  %1909 = vmatprep.subr.bf16.mxu0 %v1331_v43 }
 0x113   : > { %v1290_v44 = vpop.permute.xlu0 %1289 }
 0x114   : > { %v1161_v45 = vpop.permute.xlu1 %1160  ;;  %v1330_v47 = vsel %vm1329_vm7, %v1290_v44, %v1292_v41 }
 0x115   : > { %1319 = vrot.lane.b32.xlu0 %v3494_v26, %s3060_s28  ;;  %1910 = vmatpush1.bf16.msra.mxu0 %v1330_v47  ;;  %v1197_v55 = vsel %vm1194_vm6, %v1159_v20, %v1161_v45 }
 0x116   : > { %1321 = vrot.lane.b32.xlu1 %v3499_v27, %s3060_s28 }
 0x117   : > { %v3635_v52 = vpop.permute.xlu0 %1162 }
 0x118   : > { %v1312_v54 = vpop.permute.xlu1 %1311  ;;  %v1198_v49 = vsel %vm1194_vm6, %v1161_v45, %v3635_v52 }
 0x119   : > { %918 = vrot.lane.b32.xlu0 %v3575_v9, %s3057_s25  ;;  %2011 = vmatprep.subr.bf16.mxu1 %v1198_v49  ;;  %v3750_v49 = vld [vmem:[%s345_s8 + $0x48] ss:$36 sps:$4 sm:$0xff]  }
 0x11a   : > { %920 = vrot.lane.b32.xlu1 %v3580_v10, %s3057_s25  ;;  %2012 = vmatpush1.bf16.msra.mxu1 %v1197_v55 }
 0x11b   : > { %v1314_v56 = vpop.permute.xlu0 %1313 }
 0x11c   : > { %v1310_v57 = vpop.permute.xlu1 %1309  ;;  %v1340_v58 = vsel %vm1329_vm7, %v1312_v54, %v1314_v56 }
 0x11d   : > { %1434 = vrot.lane.b32.xlu0 %v3464_v15, %s3061_s29  ;;  %1911 = vmatprep.subr.bf16.mxu0 %v1340_v58  ;;  %v1339_v59 = vsel %vm1329_vm7, %v1310_v57, %v1312_v54 }
 0x11e   : > { %1436 = vrot.lane.b32.xlu1 %v3474_v17, %s3061_s29  ;;  %1912 = vmatpush1.bf16.msra.mxu0 %v1339_v59 }
 0x11f   : > { %v1181_v1 = vpop.permute.xlu0 %1180 }
 0x120   : > { %v3650_v2 = vpop.permute.xlu1 %1182  ;;  %v1206_v3 = vsel %vm1194_vm6, %v1179_v32, %v1181_v1 }
 0x121   : > { %1033 = vrot.lane.b32.xlu0 %v3554_v61, %s3058_s26  ;;  %v1207_v5 = vsel %vm1194_vm6, %v1181_v1, %v3650_v2 }
 0x122   : > { %1035 = vrot.lane.b32.xlu1 %v3559_v62, %s3058_s26  ;;  %2013 = vmatprep.subr.bf16.mxu1 %v1207_v5 }
 0x123   : > { %2014 = vmatpush1.bf16.msra.mxu1 %v1206_v3  ;;  %v1427_v6 = vpop.permute.xlu0 %1426 }
 0x124   : > { %v1429_v7 = vpop.permute.xlu1 %1428 }
 0x125   : > { %1454 = vrot.lane.b32.xlu0 %v3494_v26, %s3061_s29  ;;  %v1466_v8 = vsel %vm1464_vm8, %v1427_v6, %v1429_v7 }
 0x126   : > { %1456 = vrot.lane.b32.xlu1 %v3499_v27, %s3061_s29  ;;  %1913 = vmatprep.subr.bf16.mxu0 %v1466_v8 }
 0x127   : > { %v1425_v11 = vpop.permute.xlu0 %1424 }
 0x128   : > { %v1296_v13 = vpop.permute.xlu1 %1295  ;;  %v1465_v14 = vsel %vm1464_vm8, %v1425_v11, %v1427_v6 }
 0x129   : > { %1053 = vrot.lane.b32.xlu0 %v3575_v9, %s3058_s26  ;;  %1914 = vmatpush1.bf16.msra.mxu0 %v1465_v14  ;;  %v1332_v22 = vsel %vm1329_vm7, %v1294_v42, %v1296_v13  ;;  %v3721_v42 = vld [vmem:[%s4168_s2 + $0x18] ss:$12 sps:$4 sm:$0xff]  }
 0x12a   : > { %1055 = vrot.lane.b32.xlu1 %v3580_v10, %s3058_s26 }
 0x12b   : > { %v3669_v19 = vpop.permute.xlu0 %1297 }
 0x12c   : > { %v1447_v20 = vpop.permute.xlu1 %1446  ;;  %v1333_v21 = vsel %vm1329_vm7, %v1296_v13, %v3669_v19 }
 0x12d   : > { %1168 = vrot.lane.b32.xlu0 %v3554_v61, %s3059_s27  ;;  %2015 = vmatprep.subr.bf16.mxu1 %v1333_v21 }
 0x12e   : > { %1170 = vrot.lane.b32.xlu1 %v3559_v62, %s3059_s27  ;;  %2016 = vmatpush1.bf16.msra.mxu1 %v1332_v22 }
 0x12f   : > { %v1449_v23 = vpop.permute.xlu0 %1448 }
 0x130   : > { %v1445_v24 = vpop.permute.xlu1 %1444  ;;  %v1475_v28 = vsel %vm1464_vm8, %v1447_v20, %v1449_v23 }
 0x131   : > { %1188 = vrot.lane.b32.xlu0 %v3575_v9, %s3059_s27  ;;  %1915 = vmatprep.subr.bf16.mxu0 %v1475_v28  ;;  %v1474_v30 = vsel %vm1464_vm8, %v1445_v24, %v1447_v20 }
 0x132   : > { %1190 = vrot.lane.b32.xlu1 %v3580_v10, %s3059_s27  ;;  %1916 = vmatpush1.bf16.msra.mxu0 %v1474_v30 }
 0x133   : > { %v1316_v32 = vpop.permute.xlu0 %1315  ;;  %2097 = vmatprep.subr.bf16.mxu0 %v3464_v15 }
 0x134   : > { %v1341_v33 = vsel %vm1329_vm7, %v1314_v56, %v1316_v32  ;;  %v3691_v34 = vpop.permute.xlu1 %1317 }
 0x135   : > { %1569 = vrot.lane.b32.xlu0 %v3464_v15, %s3053_s22  ;;  %v1342_v35 = vsel %vm1329_vm7, %v1316_v32, %v3691_v34  ;;  %1918 = vmatmul.mubr.bf16.vlgmr.msra.gmra.mrb[0].mxu0 %v3685_v31 }
 0x136   : > { %1571 = vrot.lane.b32.xlu1 %v3474_v17, %s3053_s22  ;;  %2017 = vmatprep.subr.bf16.mxu1 %v1342_v35 }
 0x137   : > { %2018 = vmatpush1.bf16.msra.mxu1 %v1341_v33  ;;  %2098 = vmatpush1.bf16.msra.mxu0 %v3298_v48  ;;  %v1431_v39 = vpop.permute.xlu0 %1430 }
 0x138   : > { %v1467_v15 = vsel %vm1464_vm8, %v1429_v7, %v1431_v39  ;;  %v3707_v40 = vpop.permute.xlu1 %1432  ;;  %2099 = vmatprep.subr.bf16.mxu0 %v3494_v26  ;;  %1927 = vmatprep.mubr.bf16.mxu0 %v3703_v36 }
 0x139   : > { %1303 = vrot.lane.b32.xlu0 %v3554_v61, %s3060_s28  ;;  %v1468_v41 = vsel %vm1464_vm8, %v1431_v39, %v3707_v40 }
 0x13a   : > { %1305 = vrot.lane.b32.xlu1 %v3559_v62, %s3060_s28  ;;  %2019 = vmatprep.subr.bf16.mxu1 %v1468_v41 }
 0x13b   : > { %2020 = vmatpush1.bf16.msra.mxu1 %v1467_v15  ;;  %2100 = vmatpush1.bf16.msra.mxu0 %v3314_v50  ;;  %v625_v48 = vpop.permute.xlu0 %624  ;;  %v3733_v50 = vld [vmem:[%s345_s8] ss:$36 sps:$4 sm:$0xff]  }
 0x13c   : > { %v659_v43 = vsel %vm654_vm1, %v3476_v18, %v625_v48  ;;  %v3725_v44 = vpop.permute.xlu1 %626 }
 0x13d   : > { %1589 = vrot.lane.b32.xlu0 %v3494_v26, %s3053_s22  ;;  %v660_v45 = vsel %vm654_vm1, %v625_v48, %v3725_v44  ;;  %1928 = vmatmul.mubr.bf16.gmra.mrb[4].mxu0 %v3721_v42 }
 0x13e   : > { %1591 = vrot.lane.b32.xlu1 %v3499_v27, %s3053_s22  ;;  %2101 = vmatprep.subr.bf16.mxu0 %v660_v45 }
 0x13f   : > { %2102 = vmatpush1.bf16.msra.mxu0 %v659_v43  ;;  %v1451_v18 = vpop.permute.xlu0 %1450  ;;  %2129 = vmatprep.mubr.bf16.mxu0 %v3420_v63 }
 0x140   : > { %v1476_v47 = vsel %vm1464_vm8, %v1449_v23, %v1451_v18  ;;  %v3740_v54 = vpop.permute.xlu1 %1452 }
 0x141   : > { %1037 = vrot.lane.b32.xlu0 %v3733_v50, %s3058_s26  ;;  %v1477_v26 = vsel %vm1464_vm8, %v1451_v18, %v3740_v54 }
 0x142   : > { %1323 = vrot.lane.b32.xlu1 %v3575_v9, %s3060_s28  ;;  %2021 = vmatprep.subr.bf16.mxu1 %v1477_v26  ;;  %v1824_v26 = vld [vmem:[%s4169_s3] sm:$0xff] }
 0x143   : > { %2022 = vmatpush1.bf16.msra.mxu1 %v1476_v47  ;;  %v645_v55 = vpop.permute.xlu0 %644 }
 0x144   : > { %v668_v56 = vsel %vm654_vm1, %v3501_v29, %v645_v55  ;;  %v3754_v57 = vpop.permute.xlu1 %646 }
 0x145   : > { %1325 = vrot.lane.b32.xlu0 %v3580_v10, %s3060_s28  ;;  %v669_v58 = vsel %vm654_vm1, %v645_v55, %v3754_v57 }
 0x146   : > { %1057 = vrot.lane.b32.xlu1 %v3750_v49, %s3058_s26  ;;  %2103 = vmatprep.subr.bf16.mxu0 %v669_v58 }
 0x147   : > { %2104 = vmatpush1.bf16.msra.mxu0 %v668_v56  ;;  %v760_v59 = vpop.permute.xlu0 %759  ;;  %2024 = vmatmul.mubr.bf16.vlgmr.msra.gmra.mrb[8].mxu1 %v3685_v31 }
 0x148   : > { %v794_v1 = vsel %vm789_vm3, %v3520_v38, %v760_v59  ;;  %v3765_v29 = vpop.permute.xlu1 %761  ;;  %2033 = vmatprep.mubr.bf16.mxu1 %v3703_v36 }
 0x149   : > { %1438 = vrot.lane.b32.xlu0 %v3554_v61, %s3061_s29  ;;  %v795_v3 = vsel %vm789_vm3, %v760_v59, %v3765_v29  ;;  %v1826_v59 = vld [vmem:[%s4169_s3 + $0x10] sm:$0xff] }
 0x14a   : > { %1440 = vrot.lane.b32.xlu1 %v3559_v62, %s3061_s29  ;;  %2105 = vmatprep.subr.bf16.mxu0 %v795_v3 }
 0x14b   : > { %2106 = vmatpush1.bf16.msra.mxu0 %v794_v1  ;;  %v1566_v5 = vpop.permute.xlu0 %1565 }
 0x14c   : > { %v1602_v6 = vsel %vm1599_vm0, %v3396_v53, %v1566_v5  ;;  %v3776_v38 = vpop.permute.xlu1 %1567 }
 0x14d   : > { %1172 = vrot.lane.b32.xlu0 %v3733_v50, %s3059_s27  ;;  %v1603_v7 = vsel %vm1599_vm0, %v1566_v5, %v3776_v38 }
 0x14e   : > { %1458 = vrot.lane.b32.xlu1 %v3575_v9, %s3061_s29  ;;  %2044 = vmatprep.subr.bf16.mxu1 %v1603_v7 }
 0x14f   : > { %2045 = vmatpush1.bf16.msra.mxu1 %v1602_v6  ;;  %v780_v8 = vpop.permute.xlu0 %779 }
 0x150   : > { %v803_v11 = vsel %vm789_vm3, %v3536_v51, %v780_v8  ;;  %v3786_v13 = vpop.permute.xlu1 %781  ;;  %2034 = vmatmul.mubr.bf16.gmra.mrb[12].mxu1 %v3721_v42 }
 0x151   : > { %1460 = vrot.lane.b32.xlu0 %v3580_v10, %s3061_s29  ;;  %v804_v53 = vsel %vm789_vm3, %v780_v8, %v3786_v13  ;;  %2076 = vmatprep.mubr.bf16.mxu1 %v3055_v46 }
 0x152   : > { %632 = vrot.lane.b32.xlu1 %v3733_v50, %s3054_s15  ;;  %2107 = vmatprep.subr.bf16.mxu0 %v804_v53 }
 0x153   : > { %2108 = vmatpush1.bf16.msra.mxu0 %v803_v11  ;;  %v1586_v14 = vpop.permute.xlu0 %1585 }
 0x154   : > { %v1611_v51 = vsel %vm1599_vm0, %v3413_v60, %v1586_v14  ;;  %v3798_v20 = vpop.permute.xlu1 %1587 }
 0x155   : > { %1192 = vrot.lane.b32.xlu0 %v3750_v49, %s3059_s27  ;;  %v1612_v21 = vsel %vm1599_vm0, %v1586_v14, %v3798_v20 }
 0x156   : > { %652 = vrot.lane.b32.xlu1 %v3750_v49, %s3054_s15  ;;  %2046 = vmatprep.subr.bf16.mxu1 %v1612_v21 }
 0x157   : > { %2047 = vmatpush1.bf16.msra.mxu1 %v1611_v51  ;;  %v895_v22 = vpop.permute.xlu0 %894 }
 0x158   : > { %v929_v23 = vsel %vm924_vm4, %v3561_v0, %v895_v22  ;;  %v3808_v24 = vpop.permute.xlu1 %896  ;;  %2203 = vmatprep.subr.bf16.mxu1 %v3554_v61 }
 0x159   : > { %1307 = vrot.lane.b32.xlu0 %v3733_v50, %s3060_s28  ;;  %v930_v60 = vsel %vm924_vm4, %v895_v22, %v3808_v24 }
 0x15a   : > { %767 = vrot.lane.b32.xlu1 %v3733_v50, %s3056_s23  ;;  %2109 = vmatprep.subr.bf16.mxu0 %v930_v60 }
 0x15b   : > { %2110 = vmatpush1.bf16.msra.mxu0 %v929_v23  ;;  %v915_v28 = vpop.permute.xlu0 %914  ;;  %2764 = vmatmul.mubr.msk.bf16.vlgmr.msra.gmra.mrb[8].mxu1 %vm1878_vm2, %v3432_v4 }
 0x15c   : > { %v938_v0 = vsel %vm924_vm4, %v3582_v12, %v915_v28  ;;  %v3821_v30 = vpop.permute.xlu1 %916  ;;  %2204 = vmatpush1.bf16.msra.mxu1 %v3474_v17  ;;  %2086 = vmatprep.mubr.bf16.mxu1 %v3055_v46 }
 0x15d   : > { %1327 = vrot.lane.b32.xlu0 %v3750_v49, %s3060_s28  ;;  %v939_v32 = vsel %vm924_vm4, %v915_v28, %v3821_v30  ;;  %2205 = vmatprep.subr.bf16.mxu1 %v3575_v9 }
 0x15e   : > { %1573 = vrot.lane.b32.xlu1 %v3554_v61, %s3053_s22  ;;  %2111 = vmatprep.subr.bf16.mxu0 %v939_v32 }
 0x15f   : > { %2112 = vmatpush1.bf16.msra.mxu0 %v938_v0  ;;  %v1030_v4 = vpop.permute.xlu0 %1029 }
 0x160   : > { %v1064_v12 = vsel %vm1059_vm5, %v3601_v25, %v1030_v4  ;;  %v3834_v17 = vpop.permute.xlu1 %1031  ;;  %2206 = vmatpush1.bf16.msra.mxu1 %v3499_v27 }
 0x161   : > { %1575 = vrot.lane.b32.xlu0 %v3559_v62, %s3053_s22  ;;  %v1065_v33 = vsel %vm1059_vm5, %v1030_v4, %v3834_v17 }
 0x162   : > { %787 = vrot.lane.b32.xlu1 %v3750_v49, %s3056_s23  ;;  %2113 = vmatprep.subr.bf16.mxu0 %v1065_v33 }
 0x163   : > { %2114 = vmatpush1.bf16.msra.mxu0 %v1064_v12  ;;  %v629_v61 = vpop.permute.xlu0 %628  ;;  %2765 = vmatmul.mubr.msk.bf16.gmra.mrb[12].mxu1 %vm1878_vm2, %v3469_v16 }
 0x164   : > { %v661_v25 = vsel %vm654_vm1, %v3725_v44, %v629_v61  ;;  %v3847_v35 = vpop.permute.xlu1 %630  ;;  %2235 = vmatprep.mubr.bf16.mxu1 %v3420_v63 }
 0x165   : > { %1442 = vrot.lane.b32.xlu0 %v3733_v50, %s3061_s29  ;;  %v662_v27 = vsel %vm654_vm1, %v629_v61, %v3847_v35 }
 0x166   : > { %1593 = vrot.lane.b32.xlu1 %v3575_v9, %s3053_s22  ;;  %2207 = vmatprep.subr.bf16.mxu1 %v662_v27 }
 0x167   : > { %2208 = vmatpush1.bf16.msra.mxu1 %v661_v25  ;;  %v1050_v39 = vpop.permute.xlu0 %1049 }
 0x168   : > { %v1073_v15 = vsel %vm1059_vm5, %v3616_v37, %v1050_v39  ;;  %v3858_v41 = vpop.permute.xlu1 %1051 }
 0x169   : > { %1595 = vrot.lane.b32.xlu0 %v3580_v10, %s3053_s22  ;;  %v1074_v63 = vsel %vm1059_vm5, %v1050_v39, %v3858_v41 }
 0x16a   : > { %902 = vrot.lane.b32.xlu1 %v3733_v50, %s3057_s25  ;;  %2115 = vmatprep.subr.bf16.mxu0 %v1074_v63 }
 0x16b   : > { %2116 = vmatpush1.bf16.msra.mxu0 %v1073_v15  ;;  %v649_v9 = vpop.permute.xlu0 %648 }
 0x16c   : > { %v670_v48 = vsel %vm654_vm1, %v3754_v57, %v649_v9  ;;  %v3868_v43 = vpop.permute.xlu1 %650 }
 0x16d   : > { %1462 = vrot.lane.b32.xlu0 %v3750_v49, %s3061_s29  ;;  %v671_v37 = vsel %vm654_vm1, %v649_v9, %v3868_v43 }
 0x16e   : > { %922 = vrot.lane.b32.xlu1 %v3750_v49, %s3057_s25  ;;  %2209 = vmatprep.subr.bf16.mxu1 %v671_v37 }
 0x16f   : > { %2210 = vmatpush1.bf16.msra.mxu1 %v670_v48  ;;  %v1165_v44 = vpop.permute.xlu0 %1164 }
 0x170   : > { %v1199_v45 = vsel %vm1194_vm6, %v3635_v52, %v1165_v44  ;;  %v3878_v18 = vpop.permute.xlu1 %1166  ;;  %v1825_v52 = vld [vmem:[%s4169_s3 + $0x8] sm:$0xff] }
 0x171   : > { %1577 = vrot.lane.b32.xlu0 %v3733_v50, %s3053_s22  ;;  %v1200_v47 = vsel %vm1194_vm6, %v1165_v44, %v3878_v18 }
 0x172   : > { %1597 = vrot.lane.b32.xlu1 %v3750_v49, %s3053_s22  ;;  %2117 = vmatprep.subr.bf16.mxu0 %v1200_v47  ;;  %v1827_v49 = vld [vmem:[%s4169_s3 + $0x18] sm:$0xff] }
 0x173   : > { %2118 = vmatpush1.bf16.msra.mxu0 %v1199_v45  ;;  %v764_v55 = vpop.permute.xlu0 %763 }
 0x174   : > { %v796_v50 = vsel %vm789_vm3, %v3765_v29, %v764_v55  ;;  %v3894_v56 = vpop.permute.xlu1 %765 }
 0x175   : > { %v797_v57 = vsel %vm789_vm3, %v764_v55, %v3894_v56  ;;  %1830 = vperm.xlu0 %2972, %v1824_v26  }
 0x176   : > { %2211 = vmatprep.subr.bf16.mxu1 %v797_v57  ;;  %1835 = vperm.xlu1 %2973, %v1825_v52  }
 0x177   : > { %2212 = vmatpush1.bf16.msra.mxu1 %v796_v50  ;;  %v1185_v58 = vpop.permute.xlu0 %1184 }
 0x178   : > { %v1208_v1 = vsel %vm1194_vm6, %v3650_v2, %v1185_v58  ;;  %v3906_v29 = vpop.permute.xlu1 %1186 }
 0x179   : > { %v1209_v3 = vsel %vm1194_vm6, %v1185_v58, %v3906_v29  ;;  %1845 = vperm.xlu0 %2972, %v1827_v49  }
 0x17a   : > { %2119 = vmatprep.subr.bf16.mxu0 %v1209_v3  ;;  %1840 = vperm.xlu1 %2973, %v1826_v59  }
 0x17b   : > { %2120 = vmatpush1.bf16.msra.mxu0 %v1208_v1  ;;  %v784_v5 = vpop.permute.xlu0 %783 }
 0x17c   : > { %v805_v6 = vsel %vm789_vm3, %v3786_v13, %v784_v5  ;;  %v3912_v7 = vpop.permute.xlu1 %785 }
 0x17d   : > { %v806_v8 = vsel %vm789_vm3, %v784_v5, %v3912_v7 }
 0x17e   : > { %2213 = vmatprep.subr.bf16.mxu1 %v806_v8 }
 0x17f   : > { %2214 = vmatpush1.bf16.msra.mxu1 %v805_v6  ;;  %v1300_v2 = vpop.permute.xlu0 %1299 }
 0x180   : > { %v1334_v11 = vsel %vm1329_vm7, %v3669_v19, %v1300_v2  ;;  %v3918_v53 = vpop.permute.xlu1 %1301 }
 0x181   : > { %v1335_v14 = vsel %vm1329_vm7, %v1300_v2, %v3918_v53 }
 0x182   : > { %2121 = vmatprep.subr.bf16.mxu0 %v1335_v14 }
 0x183   : > { %2122 = vmatpush1.bf16.msra.mxu0 %v1334_v11  ;;  %v899_v51 = vpop.permute.xlu0 %898 }
 0x184   : > { %v931_v13 = vsel %vm924_vm4, %v3808_v24, %v899_v51  ;;  %v3924_v21 = vpop.permute.xlu1 %900 }
 0x185   : > { %v932_v22 = vsel %vm924_vm4, %v899_v51, %v3924_v21 }
 0x186   : > { %2215 = vmatprep.subr.bf16.mxu1 %v932_v22 }
 0x187   : > { %2216 = vmatpush1.bf16.msra.mxu1 %v931_v13  ;;  %v1320_v23 = vpop.permute.xlu0 %1319 }
 0x188   : > { %v1343_v19 = vsel %vm1329_vm7, %v3691_v34, %v1320_v23  ;;  %v3930_v60 = vpop.permute.xlu1 %1321 }
 0x189   : > { %v1344_v28 = vsel %vm1329_vm7, %v1320_v23, %v3930_v60 }
 0x18a   : > { %2123 = vmatprep.subr.bf16.mxu0 %v1344_v28 }
 0x18b   : > { %2124 = vmatpush1.bf16.msra.mxu0 %v1343_v19  ;;  %v919_v0 = vpop.permute.xlu0 %918 }
 0x18c   : > { %v940_v24 = vsel %vm924_vm4, %v3821_v30, %v919_v0  ;;  %v3936_v32 = vpop.permute.xlu1 %920 }
 0x18d   : > { %v941_v4 = vsel %vm924_vm4, %v919_v0, %v3936_v32 }
 0x18e   : > { %2217 = vmatprep.subr.bf16.mxu1 %v941_v4 }
 0x18f   : > { %2218 = vmatpush1.bf16.msra.mxu1 %v940_v24  ;;  %v1435_v12 = vpop.permute.xlu0 %1434  ;;  %v3940_v34 = vpop.f32.mrb[0].mxu1  ;;  %v4006_v24 = vld [vmem:[%s4168_s2 + $0x8] ss:$12 sps:$4 sm:$0xff]  }
 0x190   : > { %v1469_v33 = vsel %vm1464_vm8, %v3707_v40, %v1435_v12  ;;  %v3944_v61 = vpop.permute.xlu1 %1436  ;;  %v3946_v25 = vpop.f32.mrb[1].mxu1 }
 0x191   : > { %v1470_v30 = vsel %vm1464_vm8, %v1435_v12, %v3944_v61  ;;  %v3950_v27 = vpop.f32.mrb[2].mxu1 }
 0x192   : > { %2125 = vmatprep.subr.bf16.mxu0 %v1470_v30  ;;  %v3952_v15 = vpop.f32.mrb[3].mxu1 }
 0x193   : > { %2126 = vmatpush1.bf16.msra.mxu0 %v1469_v33  ;;  %v1034_v39 = vpop.permute.xlu0 %1033 }
 0x194   : > { %v1066_v63 = vsel %vm1059_vm5, %v3834_v17, %v1034_v39  ;;  %v1036_v9 = vpop.permute.xlu1 %1035 }
 0x195   : > { %v1067_v40 = vsel %vm1059_vm5, %v1034_v39, %v1036_v9 }
 0x196   : > { %2219 = vmatprep.subr.bf16.mxu1 %v1067_v40  ;;  %v3011_v40 = vld [vmem:[%s4168_s2 + $0x4] ss:$12 sps:$4 sm:$0xff]  }
 0x197   : > { %2220 = vmatpush1.bf16.msra.mxu1 %v1066_v63  ;;  %v1455_v48 = vpop.permute.xlu0 %1454  ;;  %v3963_v47 = vpop.f32.mrb[4].mxu1 }
 0x198   : > { %v1478_v37 = vsel %vm1464_vm8, %v3740_v54, %v1455_v48  ;;  %v3959_v44 = vpop.permute.xlu1 %1456  ;;  %v3965_v17 = vpop.f32.mrb[5].mxu1 }
 0x199   : > { %v1479_v45 = vsel %vm1464_vm8, %v1455_v48, %v3959_v44  ;;  %v3969_v50 = vpop.f32.mrb[6].mxu1 }
 0x19a   : > { %2127 = vmatprep.subr.bf16.mxu0 %v1479_v45  ;;  %v3972_v57 = vpop.f32.mrb[7].mxu1 }
 0x19b   : > { %2128 = vmatpush1.bf16.msra.mxu0 %v1478_v37  ;;  %v1054_v26 = vpop.permute.xlu0 %1053 }
 0x19c   : > { %v1075_v55 = vsel %vm1059_vm5, %v3858_v41, %v1054_v26  ;;  %v1056_v52 = vpop.permute.xlu1 %1055 }
 0x19d   : > { %v1076_v54 = vsel %vm1059_vm5, %v1054_v26, %v1056_v52 }
 0x19e   : > { %2221 = vmatprep.subr.bf16.mxu1 %v1076_v54  ;;  %2130 = vmatmul.mubr.bf16.vlgmr.msra.gmra.mrb[8].mxu0 %v3685_v31 }
 0x19f   : > { %2222 = vmatpush1.bf16.msra.mxu1 %v1075_v55  ;;  %v1169_v49 = vpop.permute.xlu0 %1168  ;;  %2139 = vmatprep.mubr.bf16.mxu0 %v3703_v36 }
 0x1a0   : > { %v1201_v58 = vsel %vm1194_vm6, %v3878_v18, %v1169_v49  ;;  %v1171_v59 = vpop.permute.xlu1 %1170 }
 0x1a1   : > { %v1202_v41 = vsel %vm1194_vm6, %v1169_v49, %v1171_v59 }
 0x1a2   : > { %2223 = vmatprep.subr.bf16.mxu1 %v1202_v41 }
 0x1a3   : > { %2224 = vmatpush1.bf16.msra.mxu1 %v1201_v58  ;;  %v1189_v1 = vpop.permute.xlu0 %1188 }
 0x1a4   : > { %v1210_v3 = vsel %vm1194_vm6, %v3906_v29, %v1189_v1  ;;  %v3981_v5 = vpop.permute.xlu1 %1190 }
 0x1a5   : > { %v1211_v6 = vsel %vm1194_vm6, %v1189_v1, %v3981_v5 }
 0x1a6   : > { %2225 = vmatprep.subr.bf16.mxu1 %v1211_v6  ;;  %2140 = vmatmul.mubr.bf16.gmra.mrb[12].mxu0 %v3721_v42 }
 0x1a7   : > { %2226 = vmatpush1.bf16.msra.mxu1 %v1210_v3  ;;  %v1570_v8 = vpop.permute.xlu0 %1569  ;;  %2182 = vmatprep.mubr.bf16.mxu0 %v3055_v46 }
 0x1a8   : > { %v1604_v18 = vsel %vm1599_vm0, %v3776_v38, %v1570_v8  ;;  %v3989_v2 = vpop.permute.xlu1 %1571 }
 0x1a9   : > { %v1605_v29 = vsel %vm1599_vm0, %v1570_v8, %v3989_v2 }
 0x1aa   : > { %2150 = vmatprep.subr.bf16.mxu0 %v1605_v29 }
 0x1ab   : > { %2151 = vmatpush1.bf16.msra.mxu0 %v1604_v18  ;;  %v1304_v11 = vpop.permute.xlu0 %1303 }
 0x1ac   : > { %v1336_v14 = vsel %vm1329_vm7, %v3918_v53, %v1304_v11  ;;  %v1306_v51 = vpop.permute.xlu1 %1305 }
 0x1ad   : > { %v1337_v13 = vsel %vm1329_vm7, %v1304_v11, %v1306_v51 }
 0x1ae   : > { %2227 = vmatprep.subr.bf16.mxu1 %v1337_v13 }
 0x1af   : > { %2228 = vmatpush1.bf16.msra.mxu1 %v1336_v14  ;;  %v1590_v22 = vpop.permute.xlu0 %1589 }
 0x1b0   : > { %v1613_v38 = vsel %vm1599_vm0, %v3798_v20, %v1590_v22  ;;  %v3998_v23 = vpop.permute.xlu1 %1591 }
 0x1b1   : > { %v1614_v19 = vsel %vm1599_vm0, %v1590_v22, %v3998_v23 }
 0x1b2   : > { %2152 = vmatprep.subr.bf16.mxu0 %v1614_v19 }
 0x1b3   : > { %2153 = vmatpush1.bf16.msra.mxu0 %v1613_v38  ;;  %v1038_v28 = vpop.permute.xlu0 %1037 }
 0x1b4   : > { %v1324_v0 = vpop.permute.xlu1 %1323  ;;  %v1068_v53 = vsel %vm1059_vm5, %v1036_v9, %v1038_v28 }
 0x1b5   : > { %2814 = vmatprep.subr.bf16.mxu0 %v1068_v53  ;;  %v1345_v33 = vsel %vm1329_vm7, %v3930_v60, %v1324_v0 }
 0x1b6   : > { %2766 = vmatmul.mubr.msk.bf16.vlgmr.msra.gmra.mrb[8].mxu0 %vm1878_vm2, %v4006_v24 }
 0x1b7   : > { %v1326_v20 = vpop.permute.xlu0 %1325  ;;  %2815 = vmatpush3.bf16.msra.mxu0 %v3559_v62  ;;  %2192 = vmatprep.mubr.bf16.mxu0 %v3055_v46 }
 0x1b8   : > { %v1058_v4 = vpop.permute.xlu1 %1057  ;;  %v1346_v12 = vsel %vm1329_vm7, %v1324_v0, %v1326_v20 }
 0x1b9   : > { %2229 = vmatprep.subr.bf16.mxu1 %v1346_v12  ;;  %v1077_v30 = vsel %vm1059_vm5, %v1056_v52, %v1058_v4 }
 0x1ba   : > { %2816 = vmatprep.subr.bf16.mxu0 %v1077_v30  ;;  %2230 = vmatpush1.bf16.msra.mxu1 %v1345_v33 }
 0x1bb   : > { %v1439_v39 = vpop.permute.xlu0 %1438  ;;  %2817 = vmatpush3.bf16.msra.mxu0 %v3580_v10 }
 0x1bc   : > { %v1471_v63 = vsel %vm1464_vm8, %v3944_v61, %v1439_v39  ;;  %v1441_v62 = vpop.permute.xlu1 %1440 }
 0x1bd   : > { %v1472_v9 = vsel %vm1464_vm8, %v1439_v39, %v1441_v62 }
 0x1be   : > { %2231 = vmatprep.subr.bf16.mxu1 %v1472_v9  ;;  %2767 = vmatmul.mubr.msk.bf16.gmra.mrb[12].mxu0 %vm1878_vm2, %v3469_v16 }
 0x1bf   : > { %2232 = vmatpush1.bf16.msra.mxu1 %v1471_v63  ;;  %v1173_v60 = vpop.permute.xlu0 %1172  ;;  %2341 = vmatprep.mubr.bf16.mxu0 %v3011_v40 }
 0x1c0   : > { %v1459_v48 = vpop.permute.xlu1 %1458  ;;  %v1203_v10 = vsel %vm1194_vm6, %v1171_v59, %v1173_v60 }
 0x1c1   : > { %2818 = vmatprep.subr.bf16.mxu0 %v1203_v10  ;;  %v1480_v26 = vsel %vm1464_vm8, %v3959_v44, %v1459_v48 }
 0x1c3   : > { %v1461_v37 = vpop.permute.xlu0 %1460 }
 0x1c4   : > { %v633_v61 = vpop.permute.xlu1 %632  ;;  %v1481_v45 = vsel %vm1464_vm8, %v1459_v48, %v1461_v37 }
 0x1c5   : > { %v663_v16 = vsel %vm654_vm1, %v3847_v35, %v633_v61  ;;  %2233 = vmatprep.subr.bf16.mxu1 %v1481_v45 }
 0x1c6   : > { %2819 = vmatpush3.bf16.msra.mxu0 %v663_v16  ;;  %2234 = vmatpush1.bf16.msra.mxu1 %v1480_v26 }
 0x1c7   : > { %v1193_v55 = vpop.permute.xlu0 %1192 }
 0x1c8   : > { %v653_v52 = vpop.permute.xlu1 %652  ;;  %v1212_v54 = vsel %vm1194_vm6, %v3981_v5, %v1193_v55 }
 0x1c9   : > { %v672_v49 = vsel %vm654_vm1, %v3868_v43, %v653_v52  ;;  %2820 = vmatprep.subr.bf16.mxu0 %v1212_v54  ;;  %2236 = vmatmul.mubr.bf16.vlgmr.msra.gmra.mrb[16].mxu1 %v3685_v31 }
 0x1ca   : > { %2821 = vmatpush3.bf16.msra.mxu0 %v672_v49  ;;  %2245 = vmatprep.mubr.bf16.mxu1 %v3703_v36 }
 0x1cb   : > { %v1308_v44 = vpop.permute.xlu0 %1307 }
 0x1cc   : > { %v768_v58 = vpop.permute.xlu1 %767  ;;  %v1338_v35 = vsel %vm1329_vm7, %v1306_v51, %v1308_v44 }
 0x1cd   : > { %v798_v59 = vsel %vm789_vm3, %v3894_v56, %v768_v58  ;;  %2822 = vmatprep.subr.bf16.mxu0 %v1338_v35 }
 0x1ce   : > { %2823 = vmatpush3.bf16.msra.mxu0 %v798_v59 }
 0x1cf   : > { %v1328_v41 = vpop.permute.xlu0 %1327 }
 0x1d0   : > { %v1574_v1 = vpop.permute.xlu1 %1573  ;;  %v1347_v3 = vsel %vm1329_vm7, %v1326_v20, %v1328_v41 }
 0x1d1   : > { %2824 = vmatprep.subr.bf16.mxu0 %v1347_v3  ;;  %2246 = vmatmul.mubr.bf16.gmra.mrb[20].mxu1 %v3721_v42  ;;  %v1606_v8 = vsel %vm1599_vm0, %v3989_v2, %v1574_v1 }
 0x1d2   : > { %2288 = vmatprep.mubr.bf16.mxu1 %v3055_v46 }
 0x1d3   : > { %v1576_v43 = vpop.permute.xlu0 %1575 }
 0x1d4   : > { %v788_v5 = vpop.permute.xlu1 %787  ;;  %v1607_v6 = vsel %vm1599_vm0, %v1574_v1, %v1576_v43 }
 0x1d5   : > { %v807_v56 = vsel %vm789_vm3, %v3912_v7, %v788_v5  ;;  %2256 = vmatprep.subr.bf16.mxu1 %v1607_v6 }
 0x1d6   : > { %2825 = vmatpush3.bf16.msra.mxu0 %v807_v56  ;;  %2257 = vmatpush1.bf16.msra.mxu1 %v1606_v8 }
 0x1d7   : > { %v1443_v18 = vpop.permute.xlu0 %1442 }
 0x1d8   : > { %v1594_v29 = vpop.permute.xlu1 %1593  ;;  %v1473_v11 = vsel %vm1464_vm8, %v1441_v62, %v1443_v18 }
 0x1d9   : > { %2826 = vmatprep.subr.bf16.mxu0 %v1473_v11  ;;  %v1615_v22 = vsel %vm1599_vm0, %v3998_v23, %v1594_v29 }
 0x1db   : > { %v1596_v14 = vpop.permute.xlu0 %1595 }
 0x1dc   : > { %v903_v51 = vpop.permute.xlu1 %902  ;;  %v1616_v13 = vsel %vm1599_vm0, %v1594_v29, %v1596_v14 }
 0x1dd   : > { %v933_v2 = vsel %vm924_vm4, %v3924_v21, %v903_v51  ;;  %2258 = vmatprep.subr.bf16.mxu1 %v1616_v13 }
 0x1de   : > { %2827 = vmatpush3.bf16.msra.mxu0 %v933_v2  ;;  %2259 = vmatpush1.bf16.msra.mxu1 %v1615_v22 }
 0x1df   : > { %v1463_v7 = vpop.permute.xlu0 %1462 }
 0x1e0   : > { %v923_v38 = vpop.permute.xlu1 %922  ;;  %v1482_v19 = vsel %vm1464_vm8, %v1461_v37, %v1463_v7 }
 0x1e1   : > { %v942_v28 = vsel %vm924_vm4, %v3936_v32, %v923_v38  ;;  %2768 = vmatmul.mubr.msk.bf16.vlgmr.msra.gmra.mrb[16].mxu1 %vm1878_vm2, %v4006_v24  ;;  %2828 = vmatprep.subr.bf16.mxu0 %v1482_v19  ;;  %v3012_v32 = vld [vmem:[%s4168_s2 + $0x20] ss:$12 sps:$4 sm:$0xff]  }
 0x1e2   : > { %2829 = vmatpush3.bf16.msra.mxu0 %v942_v28  ;;  %2298 = vmatprep.mubr.bf16.mxu1 %v3055_v46 }
 0x1e3   : > { %v1578_v23 = vpop.permute.xlu0 %1577 }
 0x1e4   : > { %v1598_v21 = vpop.permute.xlu1 %1597  ;;  %v1608_v0 = vsel %vm1599_vm0, %v1576_v43, %v1578_v23 }
 0x1e5   : > { %2846 = vmatprep.subr.bf16.mxu1 %v1608_v0  ;;  %2342 = vmatmul.mubr.bf16.vlgmr.msra.gmra.mrb[16].mxu0 %v3685_v31  ;;  %v1617_v53 = vsel %vm1599_vm0, %v1596_v14, %v1598_v21 }
 0x1e6   : > { %2847 = vmatpush3.bf16.msra.mxu1 %v1608_v0  ;;  %2349 = vmatprep.mubr.bf16.mxu0 %v3703_v36 }
 0x1e7   : > { %2848 = vmatprep.subr.bf16.mxu1 %v1617_v53 }
 0x1e9   : > { %2769 = vmatmul.mubr.msk.bf16.gmra.mrb[20].mxu1 %vm1878_vm2, %v3012_v32 }
 0x1ea   : > { %2849 = vmatpush3.bf16.msra.mxu1 %v1617_v53  ;;  %2850 = vmatprep.mubr.msk.bf16.mxu1 %vm1878_vm2, %v4006_v24 }
 0x1ed   : > { %2350 = vmatmul.mubr.bf16.gmra.mrb[20].mxu0 %v3721_v42 }
 0x1f1   : > { %2851 = vmatmul.mubr.msk.bf16.vlgmr.msra.gmra.mrb[24].mxu1 %vm1878_vm2, %v3012_v32 }
 0x1f4   : > { %v4073_v46 = vpop.permute.xlu0 %1830 }
 0x1f5   : > { %v4076_v36 = vpop.permute.xlu1 %1835 }
 0x1f8   : > { %v4093_v61 = vpop.permute.xlu0 %1845 }
 0x1f9   : > { %v4086_v48 = vpop.permute.xlu1 %1840 }
 0x208   : > { %v1919_v31 = vpop.f32.mrb[0].mxu0 }
 0x209   : > { %v1921_v20 = vpop.f32.mrb[1].mxu0  ;;  %v1920_v4 = vadd.f32 %v1919_v31, %v4073_v46 }
 0x20a   : > { %v1923_v12 = vpop.f32.mrb[2].mxu0  ;;  %v1922_v33 = vadd.f32 %v1921_v20, %v4073_v46 }
 0x20b   : > { %v1973_v24 = vadd.f32 %v3940_v34, %v1920_v4  ;;  %v1925_v30 = vpop.f32.mrb[3].mxu0  ;;  %v1924_v42 = vadd.f32 %v1923_v12, %v4076_v36 }
 0x20c   : > { %v1975_v39 = vadd.f32 %v3946_v25, %v1922_v33  ;;  %v1926_v63 = vadd.f32 %v1925_v30, %v4076_v36 }
 0x20d   : > { %v2407_v62 = vmax.f32 %v1973_v24, 0.0  ;;  %v1977_v9 = vadd.f32 %v3950_v27, %v1924_v42 }
 0x20e   : > { %v2408_v60 = vmax.f32 %v1975_v39, 0.0  ;;  %v1979_v40 = vadd.f32 %v3952_v15, %v1926_v63 }
 0x20f   : > { %v2416_v34 = vmax.f32 %v1977_v9, 0.0 }
 0x210   : > { %v2794_v10 = vpack.c.bf16 %v2408_v60, %v2407_v62  ;;  %v2417_v25 = vmax.f32 %v1979_v40, 0.0  ;;  %v1929_v37 = vpop.f32.mrb[4].mxu0 }
 0x211   : > { %v1931_v45 = vpop.f32.mrb[5].mxu0  ;;  %v1930_v27 = vadd.f32 %v1929_v37, %v4086_v48 }
 0x212   : > { %2555 = vst [vmem:[%s4091_s17] sm:$0xff] %v2794_v10  ;;  %v2799_v15 = vpack.c.bf16 %v2417_v25, %v2416_v34  ;;  %v1933_v26 = vpop.f32.mrb[6].mxu0  ;;  %v1932_v16 = vadd.f32 %v1931_v45, %v4086_v48 }
 0x213   : > { %v1983_v55 = vadd.f32 %v3963_v47, %v1930_v27  ;;  %v1935_v52 = vpop.f32.mrb[7].mxu0  ;;  %v1934_v54 = vadd.f32 %v1933_v26, %v4093_v61 }
 0x214   : > { %2560 = vst [vmem:[%s4091_s17 + $0x24] sm:$0xff] %v2799_v15  ;;  %v1985_v49 = vadd.f32 %v3965_v17, %v1932_v16  ;;  %v1936_v44 = vadd.f32 %v1935_v52, %v4093_v61 }
 0x215   : > { %v2425_v58 = vmax.f32 %v1983_v55, 0.0  ;;  %v1987_v35 = vadd.f32 %v3969_v50, %v1934_v54 }
 0x216   : > { %v2426_v59 = vmax.f32 %v1985_v49, 0.0  ;;  %v1989_v41 = vadd.f32 %v3972_v57, %v1936_v44 }
 0x217   : > { %v2434_v1 = vmax.f32 %v1987_v35, 0.0 }
 0x218   : > { %v2804_v3 = vpack.c.bf16 %v2426_v59, %v2425_v58  ;;  %v2435_v43 = vmax.f32 %v1989_v41, 0.0 }
 0x21a   : > { %2565 = vst [vmem:[%s4091_s17 + $0x48] sm:$0xff] %v2804_v3  ;;  %v2809_v47 = vpack.c.bf16 %v2435_v43, %v2434_v1 }
 0x21c   : > { %2570 = vst [vmem:[%s4091_s17 + $0x6c] sm:$0xff] %v2809_v47 }
 0x22e   : > { %v2078_v5 = vpop.f32.mrb[8].mxu1 }
 0x22f   : > { %v2870_v6 = vadd.f32 %v2078_v5, %v4073_v46  ;;  %v2080_v8 = vpop.f32.mrb[9].mxu1 }
 0x230   : > { %v2871_v17 = vadd.f32 %v2080_v8, %v4073_v46  ;;  %v2082_v56 = vpop.f32.mrb[10].mxu1 }
 0x231   : > { %v2409_v18 = vmax.f32 %v2870_v6, 0.0  ;;  %v2872_v50 = vadd.f32 %v2082_v56, %v4076_v36  ;;  %v2084_v29 = vpop.f32.mrb[11].mxu1 }
 0x232   : > { %v2410_v57 = vmax.f32 %v2871_v17, 0.0  ;;  %v2873_v11 = vadd.f32 %v2084_v29, %v4076_v36 }
 0x233   : > { %v2418_v14 = vmax.f32 %v2872_v50, 0.0 }
 0x234   : > { %v2795_v51 = vpack.c.bf16 %v2410_v57, %v2409_v18  ;;  %v2419_v13 = vmax.f32 %v2873_v11, 0.0 }
 0x236   : > { %2556 = vst [vmem:[%s4091_s17 + $0x8] sm:$0xff] %v2795_v51  ;;  %v2800_v22 = vpack.c.bf16 %v2419_v13, %v2418_v14  ;;  %v2088_v2 = vpop.f32.mrb[12].mxu1 }
 0x237   : > { %v2874_v7 = vadd.f32 %v2088_v2, %v4086_v48  ;;  %v2090_v38 = vpop.f32.mrb[13].mxu1 }
 0x238   : > { %2561 = vst [vmem:[%s4091_s17 + $0x2c] sm:$0xff] %v2800_v22  ;;  %v2875_v19 = vadd.f32 %v2090_v38, %v4086_v48  ;;  %v2092_v28 = vpop.f32.mrb[14].mxu1 }
 0x239   : > { %v2427_v23 = vmax.f32 %v2874_v7, 0.0  ;;  %v2876_v21 = vadd.f32 %v2092_v28, %v4093_v61  ;;  %v2094_v0 = vpop.f32.mrb[15].mxu1 }
 0x23a   : > { %v2428_v53 = vmax.f32 %v2875_v19, 0.0  ;;  %v2877_v32 = vadd.f32 %v2094_v0, %v4093_v61 }
 0x23b   : > { %v2436_v31 = vmax.f32 %v2876_v21, 0.0 }
 0x23c   : > { %v2805_v20 = vpack.c.bf16 %v2428_v53, %v2427_v23  ;;  %v2437_v4 = vmax.f32 %v2877_v32, 0.0 }
 0x23e   : > { %2566 = vst [vmem:[%s4091_s17 + $0x50] sm:$0xff] %v2805_v20  ;;  %v2810_v12 = vpack.c.bf16 %v2437_v4, %v2436_v31 }
 0x240   : > { %2571 = vst [vmem:[%s4091_s17 + $0x74] sm:$0xff] %v2810_v12 }
 0x289   : > { %v2184_v33 = vpop.f32.mrb[8].mxu0 }
 0x28a   : > { %v2878_v24 = vadd.f32 %v2184_v33, %v4073_v46  ;;  %v2186_v30 = vpop.f32.mrb[9].mxu0 }
 0x28b   : > { %v2879_v42 = vadd.f32 %v2186_v30, %v4073_v46  ;;  %v2188_v39 = vpop.f32.mrb[10].mxu0 }
 0x28c   : > { %v2411_v63 = vmax.f32 %v2878_v24, 0.0  ;;  %v2880_v62 = vadd.f32 %v2188_v39, %v4076_v36  ;;  %v2190_v9 = vpop.f32.mrb[11].mxu0 }
 0x28d   : > { %v2412_v60 = vmax.f32 %v2879_v42, 0.0  ;;  %v2881_v40 = vadd.f32 %v2190_v9, %v4076_v36 }
 0x28e   : > { %v2420_v34 = vmax.f32 %v2880_v62, 0.0 }
 0x28f   : > { %v2796_v10 = vpack.c.bf16 %v2412_v60, %v2411_v63  ;;  %v2421_v25 = vmax.f32 %v2881_v40, 0.0 }
 0x291   : > { %2557 = vst [vmem:[%s4091_s17 + $0x10] sm:$0xff] %v2796_v10  ;;  %v2801_v37 = vpack.c.bf16 %v2421_v25, %v2420_v34  ;;  %v2194_v45 = vpop.f32.mrb[12].mxu0 }
 0x292   : > { %v2882_v27 = vadd.f32 %v2194_v45, %v4086_v48  ;;  %v2196_v15 = vpop.f32.mrb[13].mxu0 }
 0x293   : > { %2562 = vst [vmem:[%s4091_s17 + $0x34] sm:$0xff] %v2801_v37  ;;  %v2883_v26 = vadd.f32 %v2196_v15, %v4086_v48  ;;  %v2198_v16 = vpop.f32.mrb[14].mxu0 }
 0x294   : > { %v2429_v55 = vmax.f32 %v2882_v27, 0.0  ;;  %v2884_v52 = vadd.f32 %v2198_v16, %v4093_v61  ;;  %v2200_v54 = vpop.f32.mrb[15].mxu0 }
 0x295   : > { %v2430_v49 = vmax.f32 %v2883_v26, 0.0  ;;  %v2885_v44 = vadd.f32 %v2200_v54, %v4093_v61 }
 0x296   : > { %v2438_v58 = vmax.f32 %v2884_v52, 0.0 }
 0x297   : > { %v2806_v35 = vpack.c.bf16 %v2430_v49, %v2429_v55  ;;  %v2439_v59 = vmax.f32 %v2885_v44, 0.0 }
 0x299   : > { %2567 = vst [vmem:[%s4091_s17 + $0x58] sm:$0xff] %v2806_v35  ;;  %v2811_v41 = vpack.c.bf16 %v2439_v59, %v2438_v58 }
 0x29b   : > { %2572 = vst [vmem:[%s4091_s17 + $0x7c] sm:$0xff] %v2811_v41 }
 0x2b4   : > { %v2290_v1 = vpop.f32.mrb[16].mxu1 }
 0x2b5   : > { %v2886_v3 = vadd.f32 %v2290_v1, %v4073_v46  ;;  %v2292_v43 = vpop.f32.mrb[17].mxu1 }
 0x2b6   : > { %v2887_v47 = vadd.f32 %v2292_v43, %v4073_v46  ;;  %v2294_v5 = vpop.f32.mrb[18].mxu1 }
 0x2b7   : > { %v2413_v6 = vmax.f32 %v2886_v3, 0.0  ;;  %v2888_v8 = vadd.f32 %v2294_v5, %v4076_v36  ;;  %v2296_v17 = vpop.f32.mrb[19].mxu1 }
 0x2b8   : > { %v2414_v56 = vmax.f32 %v2887_v47, 0.0  ;;  %v2889_v18 = vadd.f32 %v2296_v17, %v4076_v36  ;;  %v2830_v50 = vpop.f32.mrb[16].mxu0 }
 0x2b9   : > { %v2422_v29 = vmax.f32 %v2888_v8, 0.0  ;;  %v2831_v57 = vpop.f32.mrb[17].mxu0 }
 0x2ba   : > { %v2797_v11 = vpack.c.bf16 %v2414_v56, %v2413_v6  ;;  %v2423_v14 = vmax.f32 %v2889_v18, 0.0  ;;  %v2832_v51 = vadd.f32 %v2831_v57, %v2830_v50  ;;  %v2833_v13 = vpop.f32.mrb[18].mxu0 }
 0x2bb   : > { %v2834_v22 = vpop.f32.mrb[19].mxu0 }
 0x2bc   : > { %2558 = vst [vmem:[%s4091_s17 + $0x18] sm:$0xff] %v2797_v11  ;;  %v2802_v2 = vpack.c.bf16 %v2423_v14, %v2422_v29  ;;  %v2300_v7 = vpop.f32.mrb[20].mxu1  ;;  %v2835_v38 = vadd.f32 %v2834_v22, %v2833_v13  ;;  %v2344_v34 = vadd.f32 %v2832_v51, %v4073_v46 }
 0x2bd   : > { %v2890_v19 = vadd.f32 %v2300_v7, %v4086_v48  ;;  %v2302_v28 = vpop.f32.mrb[21].mxu1 }
 0x2be   : > { %2563 = vst [vmem:[%s4091_s17 + $0x3c] sm:$0xff] %v2802_v2  ;;  %v2891_v23 = vadd.f32 %v2302_v28, %v4086_v48  ;;  %v2304_v21 = vpop.f32.mrb[22].mxu1  ;;  %v2347_v15 = vadd.f32 %v2835_v38, %v4076_v36 }
 0x2bf   : > { %v2431_v0 = vmax.f32 %v2890_v19, 0.0  ;;  %v2892_v53 = vadd.f32 %v2304_v21, %v4093_v61  ;;  %v2306_v32 = vpop.f32.mrb[23].mxu1 }
 0x2c0   : > { %v2432_v31 = vmax.f32 %v2891_v23, 0.0  ;;  %v2893_v20 = vadd.f32 %v2306_v32, %v4093_v61  ;;  %v2836_v4 = vpop.f32.mrb[20].mxu0 }
 0x2c1   : > { %v2440_v12 = vmax.f32 %v2892_v53, 0.0  ;;  %v2837_v33 = vpop.f32.mrb[21].mxu0 }
 0x2c2   : > { %v2807_v24 = vpack.c.bf16 %v2432_v31, %v2431_v0  ;;  %v2441_v30 = vmax.f32 %v2893_v20, 0.0  ;;  %v2838_v42 = vadd.f32 %v2837_v33, %v2836_v4  ;;  %v2839_v39 = vpop.f32.mrb[22].mxu0 }
 0x2c3   : > { %v2840_v63 = vpop.f32.mrb[23].mxu0 }
 0x2c4   : > { %2568 = vst [vmem:[%s4091_s17 + $0x60] sm:$0xff] %v2807_v24  ;;  %v2812_v62 = vpack.c.bf16 %v2441_v30, %v2440_v12  ;;  %v2841_v9 = vadd.f32 %v2840_v63, %v2839_v39  ;;  %v2352_v60 = vadd.f32 %v2838_v42, %v4086_v48  ;;  %v2852_v40 = vpop.f32.mrb[24].mxu1 }
 0x2c5   : > { %v2392_v10 = vpop.f32.mrb[25].mxu1 }
 0x2c6   : > { %2573 = vst [vmem:[%s4091_s17 + $0x84] sm:$0xff] %v2812_v62  ;;  %v2401_v25 = vadd.f32 %v2852_v40, %v2352_v60  ;;  %v2393_v37 = vadd.f32 %v2392_v10, %v2344_v34  ;;  %v2355_v45 = vadd.f32 %v2841_v9, %v4093_v61  ;;  %v2853_v27 = vpop.f32.mrb[26].mxu1 }
 0x2c7   : > { %v2395_v26 = vpop.f32.mrb[27].mxu1 }
 0x2c8   : > { %v2433_v16 = vmax.f32 %v2401_v25, 0.0  ;;  %v2415_v55 = vmax.f32 %v2393_v37, 0.0  ;;  %v2404_v48 = vadd.f32 %v2853_v27, %v2355_v45  ;;  %v2396_v52 = vadd.f32 %v2395_v26, %v2347_v15 }
 0x2ca   : > { %v2808_v54 = vpack.c.bf16 %v2433_v16, %v2433_v16  ;;  %v2798_v46 = vpack.c.bf16 %v2415_v55, %v2415_v55  ;;  %v2442_v49 = vmax.f32 %v2404_v48, 0.0  ;;  %v2424_v44 = vmax.f32 %v2396_v52, 0.0 }
 0x2cc   : > { %2569 = vst [vmem:[%s4091_s17 + $0x68] sm:$0xf] %v2808_v54  ;;  %2559 = vst [vmem:[%s4091_s17 + $0x20] sm:$0xf] %v2798_v46  ;;  %v2813_v58 = vpack.c.bf16 %v2442_v49, %v2442_v49  ;;  %v2803_v35 = vpack.c.bf16 %v2424_v44, %v2424_v44 }
 0x2ce   : > { %2574 = vst [vmem:[%s4091_s17 + $0x8c] sm:$0xf] %v2813_v58  ;;  %2564 = vst [vmem:[%s4091_s17 + $0x44] sm:$0xf] %v2803_v35 }
 0x2cf PF: > { %s14_s19 = sadd.s32 1, %s3051_s19   ;;  %s4172_s15 = smov %s3039_s16 }
 0x2d0   : > { %p11_p10 = scmp.ge.s32.totalorder %s14_s19, 4   ;;  %s4173_s16 = smov %s3126_s24 }
 0x2d1   : > { %s4174_s17 = smov %s3047_s18  ;;  %s4175_s18 = smov %s4177_s20 }
 0x2d2   :  { %13 = sbr.rel (!%p11_p10) target bundleno = 3 (0x3), region = 143 }

// kernel: decoder_forward.20
= control target key start
LH: loop header
LB: loop body
LE: loop exit
PB: predicated region body
PF: predicated region fallthrough
CT: control target
= control target key end

     0   :  { %s2804_s15 = smov 0   ;;  %s2806_s16 = smov 0   ;;  %s3831_s0 = inlined_call_operand.vmem [shape: bf16[2,32,2304], index: 0, kind: input, shape index: {}, may-alias: {0,1}]   ;;  %s3832_s1 = inlined_call_operand.vmem [shape: bf16[2,32,2304], index: 1, kind: input, shape index: {}, may-alias: {0,1}]   ;;  %s3833_s2 = inlined_call_operand.vmem [shape: bf16[16,288], index: 2, kind: input, shape index: {}]   ;;  %s3834_s3 = inlined_call_operand.vmem [shape: f32[16,1], index: 3, kind: input, shape index: {}]   ;;  %s3835_s4 = inlined_call_operand.vmem [shape: bf16[2,16,1152], index: 4, kind: output, shape index: {}]  }
   0x1   :  { %s2808_s17 = smov 0   ;;  %s2810_s18 = smov 0  }
   0x2   :  { %s2812_s19 = smov 0  }
   0x3 LB: > { %s26_s20 = sadd.s32 1, %s2762_s18  ;;  %p42_p1 = scmp.ne.s32.totalorder %s2754_s16, %s2750_s15  ;;  %s2766_s19 = sphi %s2812_s19, %s14_s19   ;;  %s2762_s18 = sphi %s2810_s18, %s3840_s18   ;;  %s2758_s17 = sphi %s2808_s17, %s3839_s17   ;;  %s2754_s16 = sphi %s2806_s16, %s3838_s16   ;;  %s2750_s15 = sphi %s2804_s15, %s3837_s15  }
   0x4   : > { %p28_p0 = scmp.ge.s32.totalorder %s26_s20, 2  ;;  %p43_p2 = scmp.eq.s32.totalorder %s2766_s19, 0 }
   0x5   : > { %s35_s23 = sadd.s32 1, %s2754_s16  ;;  %p2485_p5 = scmp.ge.s32.totalorder %s2766_s19, 2 }
   0x6   : > { %s3842_s20 = smov (%p28_p0, %s26_s20), 0  ;;  %p2835_p3 = por %p43_p2, %p42_p1 }
   0x7   : > { %s30_s22 = ssub.s32 %s2762_s18, %s3842_s20  ;;  %174 = sbr.rel (%p2485_p5) target bundleno = 44 (0x2c), region = 24 }
   0x8   : > { %p33_p4 = scmp.eq.s32.totalorder %s30_s22, 0 }
   0xa   : > { %s2843_s24 = scalar_select %p33_p4, %s2754_s16, %s35_s23  }
   0xe   : > { %177 = sbr.rel (!%p2835_p3) target bundleno = 29 (0x1d), region = 28  ;;  %s179_s25 = sand.u32 (%p2835_p3), 1, %s2754_s16  }
   0xf   : > { %s2638_s26 = smul.u32 (%p2835_p3), 288, %s2762_s18 }
  0x10   : > { %s2637_s27 = smul.u32 (%p2835_p3), 144, %s179_s25 }
  0x11   : > { %s2853_s30 = scalar_lea.vmem (%p2835_p3), %s3831_s0, %s2638_s26 }
  0x12   : > { %v201_v0 = vld [vmem:[%s2853_s30] sm:$0xff] (%p2835_p3)  ;;  %v203_v1 = vld [vmem:[%s2853_s30 + $0x8] sm:$0xff] (%p2835_p3)  ;;  %v205_v2 = vld [vmem:[%s2853_s30 + $0x10] sm:$0xff] (%p2835_p3)  ;;  %s2858_s5 = scalar_lea.vmem (%p2835_p3), [#allocation4], %s2637_s27 }
  0x13   : > { %202 = vst [vmem:[%s2858_s5] sm:$0xff] (%p2835_p3), %v201_v0  ;;  %204 = vst [vmem:[%s2858_s5 + $0x8] sm:$0xff] (%p2835_p3), %v203_v1  ;;  %v207_v3 = vld [vmem:[%s2853_s30 + $0x18] sm:$0xff] (%p2835_p3)  ;;  %v209_v4 = vld [vmem:[%s2853_s30 + $0x48] sm:$0xff] (%p2835_p3) }
  0x14   : > { %206 = vst [vmem:[%s2858_s5 + $0x10] sm:$0xff] (%p2835_p3), %v205_v2  ;;  %v211_v5 = vld [vmem:[%s2853_s30 + $0x50] sm:$0xff] (%p2835_p3)  ;;  %208 = vst [vmem:[%s2858_s5 + $0x18] sm:$0xff] (%p2835_p3), %v207_v3  ;;  %v213_v6 = vld [vmem:[%s2853_s30 + $0x58] sm:$0xff] (%p2835_p3) }
  0x15   : > { %210 = vst [vmem:[%s2858_s5 + $0x24] sm:$0xff] %v209_v4  ;;  %212 = vst [vmem:[%s2858_s5 + $0x2c] sm:$0xff] %v211_v5  ;;  %v215_v7 = vld [vmem:[%s2853_s30 + $0x60] sm:$0xff]  ;;  %v217_v8 = vld [vmem:[%s2853_s30 + $0x90] sm:$0xff] }
  0x16   : > { %214 = vst [vmem:[%s2858_s5 + $0x34] sm:$0xff] %v213_v6  ;;  %216 = vst [vmem:[%s2858_s5 + $0x3c] sm:$0xff] %v215_v7  ;;  %v219_v9 = vld [vmem:[%s2853_s30 + $0x98] sm:$0xff]  ;;  %v221_v10 = vld [vmem:[%s2853_s30 + $0xa0] sm:$0xff] }
  0x17   : > { %218 = vst [vmem:[%s2858_s5 + $0x48] sm:$0xff] %v217_v8  ;;  %v223_v11 = vld [vmem:[%s2853_s30 + $0xa8] sm:$0xff]  ;;  %220 = vst [vmem:[%s2858_s5 + $0x50] sm:$0xff] %v219_v9  ;;  %v225_v12 = vld [vmem:[%s2853_s30 + $0xd8] sm:$0xff] }
  0x18   : > { %222 = vst [vmem:[%s2858_s5 + $0x58] sm:$0xff] %v221_v10  ;;  %224 = vst [vmem:[%s2858_s5 + $0x60] sm:$0xff] %v223_v11  ;;  %v227_v13 = vld [vmem:[%s2853_s30 + $0xe0] sm:$0xff]  ;;  %v229_v14 = vld [vmem:[%s2853_s30 + $0xe8] sm:$0xff] }
  0x19   : > { %226 = vst [vmem:[%s2858_s5 + $0x6c] sm:$0xff] %v225_v12  ;;  %228 = vst [vmem:[%s2858_s5 + $0x74] sm:$0xff] %v227_v13  ;;  %v231_v15 = vld [vmem:[%s2853_s30 + $0xf0] sm:$0xff]  ;;  %v2487_v16 = vld [vmem:[%s2853_s30 + $0x20] sm:$0xf] }
  0x1a   : > { %230 = vst [vmem:[%s2858_s5 + $0x7c] sm:$0xff] %v229_v14  ;;  %v2489_v17 = vld [vmem:[%s2853_s30 + $0x68] sm:$0xf]  ;;  %232 = vst [vmem:[%s2858_s5 + $0x84] sm:$0xff] %v231_v15  ;;  %v2491_v18 = vld [vmem:[%s2853_s30 + $0xb0] sm:$0xf] }
  0x1b   : > { %2488 = vst [vmem:[%s2858_s5 + $0x20] sm:$0xf] %v2487_v16  ;;  %2490 = vst [vmem:[%s2858_s5 + $0x44] sm:$0xf] %v2489_v17  ;;  %v2493_v19 = vld [vmem:[%s2853_s30 + $0xf8] sm:$0xf] }
  0x1c   : > { %2492 = vst [vmem:[%s2858_s5 + $0x68] sm:$0xf] %v2491_v18  ;;  %2494 = vst [vmem:[%s2858_s5 + $0x8c] sm:$0xf] %v2493_v19 }
  0x1d PF: > { %253 = sbr.rel (!%p2835_p3) target bundleno = 44 (0x2c), region = 54  ;;  %s255_s6 = sand.u32 (%p2835_p3), 1, %s2754_s16  }
  0x1e   : > { %s2495_s7 = smul.u32 (%p2835_p3), 288, %s2762_s18 }
  0x1f   : > { %s2639_s8 = smul.u32 (%p2835_p3), 144, %s255_s6 }
  0x20   : > { %s2904_s11 = scalar_lea.vmem (%p2835_p3), %s3832_s1, %s2495_s7 }
  0x21   : > { %v2496_v20 = vld [vmem:[%s2904_s11 + $0x24] sm:$0xff] (%p2835_p3)  ;;  %v2497_v21 = vld [vmem:[%s2904_s11 + $0x2c] sm:$0xff] (%p2835_p3)  ;;  %v2498_v22 = vld [vmem:[%s2904_s11 + $0x34] sm:$0xff] (%p2835_p3)  ;;  %s2909_s12 = scalar_lea.vmem (%p2835_p3), [#allocation5], %s2639_s8 }
  0x22   : > { %279 = vst [vmem:[%s2909_s12] sm:$0xff] (%p2835_p3), %v2496_v20  ;;  %281 = vst [vmem:[%s2909_s12 + $0x8] sm:$0xff] (%p2835_p3), %v2497_v21  ;;  %v2499_v23 = vld [vmem:[%s2904_s11 + $0x3c] sm:$0xff] (%p2835_p3)  ;;  %v2500_v24 = vld [vmem:[%s2904_s11 + $0x6c] sm:$0xff] (%p2835_p3) }
  0x23   : > { %283 = vst [vmem:[%s2909_s12 + $0x10] sm:$0xff] (%p2835_p3), %v2498_v22  ;;  %v2501_v25 = vld [vmem:[%s2904_s11 + $0x74] sm:$0xff] (%p2835_p3)  ;;  %285 = vst [vmem:[%s2909_s12 + $0x18] sm:$0xff] (%p2835_p3), %v2499_v23  ;;  %v2502_v26 = vld [vmem:[%s2904_s11 + $0x7c] sm:$0xff] (%p2835_p3) }
  0x24   : > { %287 = vst [vmem:[%s2909_s12 + $0x24] sm:$0xff] %v2500_v24  ;;  %289 = vst [vmem:[%s2909_s12 + $0x2c] sm:$0xff] %v2501_v25  ;;  %v2503_v27 = vld [vmem:[%s2904_s11 + $0x84] sm:$0xff]  ;;  %v2504_v28 = vld [vmem:[%s2904_s11 + $0xb4] sm:$0xff] }
  0x25   : > { %291 = vst [vmem:[%s2909_s12 + $0x34] sm:$0xff] %v2502_v26  ;;  %293 = vst [vmem:[%s2909_s12 + $0x3c] sm:$0xff] %v2503_v27  ;;  %v2505_v29 = vld [vmem:[%s2904_s11 + $0xbc] sm:$0xff]  ;;  %v2506_v30 = vld [vmem:[%s2904_s11 + $0xc4] sm:$0xff] }
  0x26   : > { %295 = vst [vmem:[%s2909_s12 + $0x48] sm:$0xff] %v2504_v28  ;;  %v2507_v31 = vld [vmem:[%s2904_s11 + $0xcc] sm:$0xff]  ;;  %297 = vst [vmem:[%s2909_s12 + $0x50] sm:$0xff] %v2505_v29  ;;  %v2508_v32 = vld [vmem:[%s2904_s11 + $0xfc] sm:$0xff] }
  0x27   : > { %299 = vst [vmem:[%s2909_s12 + $0x58] sm:$0xff] %v2506_v30  ;;  %301 = vst [vmem:[%s2909_s12 + $0x60] sm:$0xff] %v2507_v31  ;;  %v2509_v33 = vld [vmem:[%s2904_s11 + $0x104] sm:$0xff]  ;;  %v2510_v34 = vld [vmem:[%s2904_s11 + $0x10c] sm:$0xff] }
  0x28   : > { %303 = vst [vmem:[%s2909_s12 + $0x6c] sm:$0xff] %v2508_v32  ;;  %305 = vst [vmem:[%s2909_s12 + $0x74] sm:$0xff] %v2509_v33  ;;  %v2511_v35 = vld [vmem:[%s2904_s11 + $0x114] sm:$0xff]  ;;  %v2512_v36 = vld [vmem:[%s2904_s11 + $0x44] sm:$0xf] }
  0x29   : > { %307 = vst [vmem:[%s2909_s12 + $0x7c] sm:$0xff] %v2510_v34  ;;  %v2514_v37 = vld [vmem:[%s2904_s11 + $0x8c] sm:$0xf]  ;;  %309 = vst [vmem:[%s2909_s12 + $0x84] sm:$0xff] %v2511_v35  ;;  %v2516_v38 = vld [vmem:[%s2904_s11 + $0xd4] sm:$0xf] }
  0x2a   : > { %2513 = vst [vmem:[%s2909_s12 + $0x20] sm:$0xf] %v2512_v36  ;;  %2515 = vst [vmem:[%s2909_s12 + $0x44] sm:$0xf] %v2514_v37  ;;  %v2518_v39 = vld [vmem:[%s2904_s11 + $0x11c] sm:$0xf] }
  0x2b   : > { %2517 = vst [vmem:[%s2909_s12 + $0x68] sm:$0xf] %v2516_v38  ;;  %2519 = vst [vmem:[%s2909_s12 + $0x8c] sm:$0xf] %v2518_v39 }
  0x2c PF: > { %p2520_p6 = scmp.ge.s32.totalorder %s2766_s19, 1  ;;  %p329_p7 = scmp.lt.s32.totalorder %s2766_s19, 3 }
  0x2e   : > { %p330_p8 = pnand %p2520_p6, %p329_p7 }
  0x2f   : > { %s336_s13 = sand.u32 (!%p330_p8), 1, %s2750_s15   ;;  %s2768_s22 = smov (!%p330_p8), 127   ;;  %v2770_v46 = vmov (!%p330_p8), 0   ;;  %vm654_vm0 = vcmask (!%p330_p8), 1039360   ;;  %vm1599_vm1 = vcmask (!%p330_p8), 474112   ;;  %vm789_vm2 = vcmask (!%p330_p8), 1031168  }
  0x30   : > { %333 = sbr.rel (%p330_p8) target bundleno = 713 (0x2c9), region = 80  ;;  %s2769_s15 = smov (!%p330_p8), 58   ;;  %1926 = vmatprep.mubr.bf16.mxu1 (!%p330_p8), %v2770_v46  ;;  %2693 = vset.pattern.permute.xlu0 (!%p330_p8), %v2770_v46  ;;  %v3129_v60 = vld [vmem:[%s3833_s2 + $0x4] ss:$12 sps:$4 sm:$0xff] (!%p330_p8)   ;;  %v3161_v8 = vld [vmem:[%s3833_s2 + $0x8] ss:$12 sps:$4 sm:$0xff] (!%p330_p8)  }
  0x31   : > { %s2951_s14 = smul.u32 (!%p330_p8), 144, %s336_s13  ;;  %2694 = vset.pattern.permute.xlu1 (!%p330_p8), %v2770_v46  ;;  %s2771_s23 = smov (!%p330_p8), 126   ;;  %1883 = vmatprep.mubr.bf16.mxu0 (!%p330_p8), %v3129_v60  ;;  %vm1847_vm3 = vcmask (!%p330_p8), 261120   ;;  %vm924_vm4 = vcmask (!%p330_p8), 769024   ;;  %vm1059_vm5 = vcmask (!%p330_p8), 760832   ;;  %vm1194_vm6 = vcmask (!%p330_p8), 752640  }
  0x32   : > { %s2772_s25 = smov (!%p330_p8), 94   ;;  %s2773_s26 = smov (!%p330_p8), 93   ;;  %vm1329_vm7 = vcmask (!%p330_p8), 490496   ;;  %vm1464_vm8 = vcmask (!%p330_p8), 482304   ;;  %vm2778_vm9 = vmmov (!%p330_p8), 0  }
  0x33   : > { %s2954_s21 = scalar_lea.vmem (!%p330_p8), [#allocation4], %s2951_s14  ;;  %s2774_s27 = smov (!%p330_p8), 92  }
  0x34   : > { %v2957_v40 = vld [vmem:[%s2954_s21 + $0x4] ss:$36 sps:$4 sm:$0xff] (!%p330_p8)   ;;  %v2971_v43 = vld [vmem:[%s2954_s21 + $0x4c] ss:$36 sps:$4 sm:$0xff] (!%p330_p8)   ;;  %v3036_v49 = vld [vmem:[%s2954_s21 + $0x54] ss:$36 sps:$4 sm:$0xff] (!%p330_p8)  }
  0x35   : > { %v2960_v41 = vld [vmem:[%s2954_s21] ss:$36 sps:$4 sm:$0xff] (!%p330_p8)   ;;  %616 = vrot.lane.b32.xlu0 (!%p330_p8), %v2957_v40, %s2768_s22  ;;  %v2965_v42 = vld [vmem:[%s2954_s21 + $0x8] ss:$36 sps:$4 sm:$0xff] (!%p330_p8)   ;;  %1851 = vmatprep.subr.bf16.mxu0 (!%p330_p8), %v2957_v40  ;;  %v2988_v45 = vld [vmem:[%s2954_s21 + $0x50] ss:$36 sps:$4 sm:$0xff] (!%p330_p8)  }
  0x36   : > { %614 = vrot.lane.b32.xlu1 (!%p330_p8), %v2960_v41, %s2768_s22  ;;  %1852 = vmatpush1.bf16.msra.mxu0 (!%p330_p8), %v2960_v41  ;;  %v2975_v44 = vld [vmem:[%s2954_s21 + $0x48] ss:$36 sps:$4 sm:$0xff] (!%p330_p8)   ;;  %v3025_v48 = vld [vmem:[%s2954_s21 + $0x10] ss:$36 sps:$4 sm:$0xff] (!%p330_p8)   ;;  %v3041_v50 = vld [vmem:[%s2954_s21 + $0x58] ss:$36 sps:$4 sm:$0xff] (!%p330_p8)  }
  0x37   : > { %1853 = vmatprep.subr.bf16.mxu0 %v2971_v43  ;;  %v3020_v47 = vld [vmem:[%s2954_s21 + $0xc] ss:$36 sps:$4 sm:$0xff]   ;;  %s2775_s28 = smov 60   ;;  %s2776_s29 = smov 59   ;;  %v3173_v12 = vld [vmem:[%s2954_s21 + $0x14] ss:$36 sps:$4 sm:$0xff]  }
  0x38   : > { %s345_s6 = scalar_lea.vmem [#allocation5], %s2951_s14  ;;  %v3180_v13 = vld [vmem:[%s2954_s21 + $0x18] ss:$36 sps:$4 sm:$0xff]   ;;  %v3204_v22 = vld [vmem:[%s2954_s21 + $0x60] ss:$36 sps:$4 sm:$0xff]   ;;  %p380_p9 = scmp.lt.s32.totalorder %s2758_s17, 1 }
  0x39   : > { %618 = vrot.lane.b32.xlu0 %v2965_v42, %s2768_s22  ;;  %v3199_v21 = vld [vmem:[%s2954_s21 + $0x5c] ss:$36 sps:$4 sm:$0xff]  }
  0x3a   : > { %1561 = vrot.lane.b32.xlu1 %v2957_v40, %s2769_s15  ;;  %1854 = vmatpush1.bf16.msra.mxu0 %v2975_v44  ;;  %s3844_s17 = smov (!%p380_p9, %s2758_s17), 1 }
  0x3d   : > { %1563 = vrot.lane.b32.xlu0 %v2965_v42, %s2769_s15 }
  0x3e   : > { %1559 = vrot.lane.b32.xlu1 %v2960_v41, %s2769_s15 }
  0x41   : > { %636 = vrot.lane.b32.xlu0 %v2971_v43, %s2768_s22 }
  0x42   : > { %638 = vrot.lane.b32.xlu1 %v2988_v45, %s2768_s22 }
  0x45   : > { %634 = vrot.lane.b32.xlu0 %v2975_v44, %s2768_s22 }
  0x46   : > { %1581 = vrot.lane.b32.xlu1 %v2971_v43, %s2769_s15 }
  0x49   : > { %1583 = vrot.lane.b32.xlu0 %v2988_v45, %s2769_s15 }
  0x4a   : > { %1579 = vrot.lane.b32.xlu1 %v2975_v44, %s2769_s15 }
  0x4d   : > { %751 = vrot.lane.b32.xlu0 %v2957_v40, %s2771_s23 }
  0x4e   : > { %753 = vrot.lane.b32.xlu1 %v2965_v42, %s2771_s23 }
  0x51   : > { %749 = vrot.lane.b32.xlu0 %v2960_v41, %s2771_s23 }
  0x52   : > { %771 = vrot.lane.b32.xlu1 %v2971_v43, %s2771_s23 }
  0x55   : > { %773 = vrot.lane.b32.xlu0 %v2988_v45, %s2771_s23 }
  0x56   : > { %769 = vrot.lane.b32.xlu1 %v2975_v44, %s2771_s23 }
  0x59   : > { %886 = vrot.lane.b32.xlu0 %v2957_v40, %s2772_s25 }
  0x5a   : > { %888 = vrot.lane.b32.xlu1 %v2965_v42, %s2772_s25 }
  0x5d   : > { %620 = vrot.lane.b32.xlu0 %v3020_v47, %s2768_s22 }
  0x5e   : > { %622 = vrot.lane.b32.xlu1 %v3025_v48, %s2768_s22 }
  0x61   : > { %884 = vrot.lane.b32.xlu0 %v2960_v41, %s2772_s25 }
  0x62   : > { %906 = vrot.lane.b32.xlu1 %v2971_v43, %s2772_s25 }
  0x65   : > { %908 = vrot.lane.b32.xlu0 %v2988_v45, %s2772_s25 }
  0x66   : > { %640 = vrot.lane.b32.xlu1 %v3036_v49, %s2768_s22 }
  0x69   : > { %642 = vrot.lane.b32.xlu0 %v3041_v50, %s2768_s22 }
  0x6a   : > { %904 = vrot.lane.b32.xlu1 %v2975_v44, %s2772_s25 }
  0x6d   : > { %1021 = vrot.lane.b32.xlu0 %v2957_v40, %s2773_s26 }
  0x6e   : > { %1023 = vrot.lane.b32.xlu1 %v2965_v42, %s2773_s26 }
  0x71   : > { %755 = vrot.lane.b32.xlu0 %v3020_v47, %s2771_s23 }
  0x72   : > { %757 = vrot.lane.b32.xlu1 %v3025_v48, %s2771_s23 }
  0x75   : > { %1019 = vrot.lane.b32.xlu0 %v2960_v41, %s2773_s26 }
  0x76   : > { %1041 = vrot.lane.b32.xlu1 %v2971_v43, %s2773_s26 }
  0x79   : > { %1043 = vrot.lane.b32.xlu0 %v2988_v45, %s2773_s26 }
  0x7a   : > { %775 = vrot.lane.b32.xlu1 %v3036_v49, %s2771_s23 }
  0x7d   : > { %777 = vrot.lane.b32.xlu0 %v3041_v50, %s2771_s23 }
  0x7e   : > { %1039 = vrot.lane.b32.xlu1 %v2975_v44, %s2773_s26 }
  0x81   : > { %1156 = vrot.lane.b32.xlu0 %v2957_v40, %s2774_s27 }
  0x82   : > { %1158 = vrot.lane.b32.xlu1 %v2965_v42, %s2774_s27 }
  0x85   : > { %890 = vrot.lane.b32.xlu0 %v3020_v47, %s2772_s25 }
  0x86   : > { %892 = vrot.lane.b32.xlu1 %v3025_v48, %s2772_s25 }
  0x89   : > { %1154 = vrot.lane.b32.xlu0 %v2960_v41, %s2774_s27 }
  0x8a   : > { %1176 = vrot.lane.b32.xlu1 %v2971_v43, %s2774_s27 }
  0x8d   : > { %1178 = vrot.lane.b32.xlu0 %v2988_v45, %s2774_s27 }
  0x8e   : > { %910 = vrot.lane.b32.xlu1 %v3036_v49, %s2772_s25 }
  0x91   : > { %912 = vrot.lane.b32.xlu0 %v3041_v50, %s2772_s25 }
  0x92   : > { %1174 = vrot.lane.b32.xlu1 %v2975_v44, %s2774_s27 }
  0x95   : > { %1291 = vrot.lane.b32.xlu0 %v2957_v40, %s2775_s28 }
  0x96   : > { %1293 = vrot.lane.b32.xlu1 %v2965_v42, %s2775_s28 }
  0x99   : > { %1025 = vrot.lane.b32.xlu0 %v3020_v47, %s2773_s26 }
  0x9a   : > { %1027 = vrot.lane.b32.xlu1 %v3025_v48, %s2773_s26 }
  0x9d   : > { %1289 = vrot.lane.b32.xlu0 %v2960_v41, %s2775_s28 }
  0x9e   : > { %1311 = vrot.lane.b32.xlu1 %v2971_v43, %s2775_s28 }
  0xa1   : > { %1313 = vrot.lane.b32.xlu0 %v2988_v45, %s2775_s28 }
  0xa2   : > { %1045 = vrot.lane.b32.xlu1 %v3036_v49, %s2773_s26 }
  0xa5   : > { %1047 = vrot.lane.b32.xlu0 %v3041_v50, %s2773_s26 }
  0xa6   : > { %1309 = vrot.lane.b32.xlu1 %v2975_v44, %s2775_s28 }
  0xa7   : > { %v617_v51 = vpop.permute.xlu0 %616 }
  0xa8   : > { %v615_v52 = vpop.permute.xlu1 %614 }
  0xa9   : > { %1426 = vrot.lane.b32.xlu0 %v2957_v40, %s2776_s29  ;;  %v655_v56 = vsel %vm654_vm0, %v615_v52, %v617_v51 }
  0xaa   : > { %1428 = vrot.lane.b32.xlu1 %v2965_v42, %s2776_s29 }
  0xab   : > { %v3113_v53 = vpop.permute.xlu0 %618 }
  0xac   : > { %v1562_v54 = vpop.permute.xlu1 %1561  ;;  %v656_v55 = vsel %vm654_vm0, %v617_v51, %v3113_v53 }
  0xad   : > { %1160 = vrot.lane.b32.xlu0 %v3020_v47, %s2774_s27  ;;  %1855 = vmatprep.subr.bf16.mxu0 %v656_v55 }
  0xae   : > { %1162 = vrot.lane.b32.xlu1 %v3025_v48, %s2774_s27  ;;  %1856 = vmatpush1.bf16.msra.mxu0 %v655_v56 }
  0xaf   : > { %v3122_v57 = vpop.permute.xlu0 %1563 }
  0xb0   : > { %v1560_v58 = vpop.permute.xlu1 %1559  ;;  %v1601_v59 = vsel %vm1599_vm1, %v1562_v54, %v3122_v57 }
  0xb1   : > { %1424 = vrot.lane.b32.xlu0 %v2960_v41, %s2776_s29  ;;  %1894 = vmatprep.subr.bf16.mxu1 %v1601_v59  ;;  %v1600_v61 = vsel %vm1599_vm1, %v1560_v58, %v1562_v54  ;;  %v3278_v58 = vld [vmem:[%s2954_s21 + $0x1c] ss:$36 sps:$4 sm:$0xff]  }
  0xb2   : > { %1446 = vrot.lane.b32.xlu1 %v2971_v43, %s2776_s29  ;;  %1895 = vmatpush1.bf16.msra.mxu1 %v1600_v61  ;;  %v3283_v59 = vld [vmem:[%s2954_s21 + $0x20] ss:$36 sps:$4 sm:$0xff]  }
  0xb3   : > { %v637_v62 = vpop.permute.xlu0 %636 }
  0xb4   : > { %v3137_v63 = vpop.permute.xlu1 %638 }
  0xb5   : > { %1448 = vrot.lane.b32.xlu0 %v2988_v45, %s2776_s29  ;;  %v665_v0 = vsel %vm654_vm0, %v637_v62, %v3137_v63 }
  0xb6   : > { %1180 = vrot.lane.b32.xlu1 %v3036_v49, %s2774_s27  ;;  %1857 = vmatprep.subr.bf16.mxu0 %v665_v0 }
  0xb7   : > { %v635_v1 = vpop.permute.xlu0 %634 }
  0xb8   : > { %v1582_v2 = vpop.permute.xlu1 %1581  ;;  %v664_v3 = vsel %vm654_vm0, %v635_v1, %v637_v62 }
  0xb9   : > { %1182 = vrot.lane.b32.xlu0 %v3041_v50, %s2774_s27  ;;  %1858 = vmatpush1.bf16.msra.mxu0 %v664_v3 }
  0xba   : > { %1444 = vrot.lane.b32.xlu1 %v2975_v44, %s2776_s29 }
  0xbb   : > { %v3150_v4 = vpop.permute.xlu0 %1583 }
  0xbc   : > { %v1580_v5 = vpop.permute.xlu1 %1579  ;;  %v1610_v6 = vsel %vm1599_vm1, %v1582_v2, %v3150_v4 }
  0xbd   : > { %1295 = vrot.lane.b32.xlu0 %v3020_v47, %s2775_s28  ;;  %1896 = vmatprep.subr.bf16.mxu1 %v1610_v6  ;;  %v1609_v7 = vsel %vm1599_vm1, %v1580_v5, %v1582_v2  ;;  %v3303_v6 = vld [vmem:[%s2954_s21 + $0x64] ss:$36 sps:$4 sm:$0xff]  }
  0xbe   : > { %1297 = vrot.lane.b32.xlu1 %v3025_v48, %s2775_s28  ;;  %1897 = vmatpush1.bf16.msra.mxu1 %v1609_v7  ;;  %v3308_v7 = vld [vmem:[%s2954_s21 + $0x68] ss:$36 sps:$4 sm:$0xff]  }
  0xbf   : > { %v752_v9 = vpop.permute.xlu0 %751  ;;  %1937 = vmatprep.subr.bf16.mxu1 %v3020_v47 }
  0xc0   : > { %v3166_v10 = vpop.permute.xlu1 %753 }
  0xc1   : > { %1315 = vrot.lane.b32.xlu0 %v3036_v49, %s2775_s28  ;;  %v791_v11 = vsel %vm789_vm2, %v752_v9, %v3166_v10  ;;  %2545 = vmatmul.mubr.msk.bf16.vlgmr.msra.gmra.mrb[0].mxu1 %vm1847_vm3, %v3161_v8 }
  0xc2   : > { %1317 = vrot.lane.b32.xlu1 %v3041_v50, %s2775_s28  ;;  %1859 = vmatprep.subr.bf16.mxu0 %v791_v11 }
  0xc3   : > { %v750_v14 = vpop.permute.xlu0 %749  ;;  %1938 = vmatpush1.bf16.msra.mxu1 %v2965_v42  ;;  %1969 = vmatprep.mubr.bf16.mxu1 %v3129_v60 }
  0xc4   : > { %v772_v15 = vpop.permute.xlu1 %771  ;;  %v790_v16 = vsel %vm789_vm2, %v750_v14, %v752_v9  ;;  %1939 = vmatprep.subr.bf16.mxu1 %v3036_v49 }
  0xc5   : > { %624 = vrot.lane.b32.xlu0 %v3173_v12, %s2768_s22  ;;  %1860 = vmatpush1.bf16.msra.mxu0 %v790_v16 }
  0xc6   : > { %626 = vrot.lane.b32.xlu1 %v3180_v13, %s2768_s22 }
  0xc7   : > { %v3190_v17 = vpop.permute.xlu0 %773  ;;  %1940 = vmatpush1.bf16.msra.mxu1 %v2988_v45 }
  0xc8   : > { %v770_v18 = vpop.permute.xlu1 %769  ;;  %v800_v19 = vsel %vm789_vm2, %v772_v15, %v3190_v17 }
  0xc9   : > { %1430 = vrot.lane.b32.xlu0 %v3020_v47, %s2776_s29  ;;  %1861 = vmatprep.subr.bf16.mxu0 %v800_v19  ;;  %v799_v20 = vsel %vm789_vm2, %v770_v18, %v772_v15 }
  0xca   : > { %1432 = vrot.lane.b32.xlu1 %v3025_v48, %s2776_s29  ;;  %1862 = vmatpush1.bf16.msra.mxu0 %v799_v20 }
  0xcb   : > { %v887_v23 = vpop.permute.xlu0 %886 }
  0xcc   : > { %v3206_v24 = vpop.permute.xlu1 %888 }
  0xcd   : > { %644 = vrot.lane.b32.xlu0 %v3199_v21, %s2768_s22  ;;  %v926_v25 = vsel %vm924_vm4, %v887_v23, %v3206_v24 }
  0xce   : > { %646 = vrot.lane.b32.xlu1 %v3204_v22, %s2768_s22  ;;  %1863 = vmatprep.subr.bf16.mxu0 %v926_v25 }
  0xcf   : > { %v621_v26 = vpop.permute.xlu0 %620 }
  0xd0   : > { %v3214_v27 = vpop.permute.xlu1 %622  ;;  %v657_v28 = vsel %vm654_vm0, %v3113_v53, %v621_v26 }
  0xd1   : > { %1450 = vrot.lane.b32.xlu0 %v3036_v49, %s2776_s29  ;;  %v658_v29 = vsel %vm654_vm0, %v621_v26, %v3214_v27 }
  0xd2   : > { %1452 = vrot.lane.b32.xlu1 %v3041_v50, %s2776_s29  ;;  %1941 = vmatprep.subr.bf16.mxu1 %v658_v29 }
  0xd3   : > { %1942 = vmatpush1.bf16.msra.mxu1 %v657_v28  ;;  %v885_v30 = vpop.permute.xlu0 %884 }
  0xd4   : > { %v907_v31 = vpop.permute.xlu1 %906  ;;  %v925_v32 = vsel %vm924_vm4, %v885_v30, %v887_v23 }
  0xd5   : > { %759 = vrot.lane.b32.xlu0 %v3173_v12, %s2771_s23  ;;  %1864 = vmatpush1.bf16.msra.mxu0 %v925_v32 }
  0xd6   : > { %761 = vrot.lane.b32.xlu1 %v3180_v13, %s2771_s23 }
  0xd7   : > { %v3229_v33 = vpop.permute.xlu0 %908 }
  0xd8   : > { %v641_v34 = vpop.permute.xlu1 %640  ;;  %v935_v35 = vsel %vm924_vm4, %v907_v31, %v3229_v33 }
  0xd9   : > { %779 = vrot.lane.b32.xlu0 %v3199_v21, %s2771_s23  ;;  %1865 = vmatprep.subr.bf16.mxu0 %v935_v35  ;;  %v666_v40 = vsel %vm654_vm0, %v3137_v63, %v641_v34 }
  0xda   : > { %781 = vrot.lane.b32.xlu1 %v3204_v22, %s2771_s23 }
  0xdb   : > { %v3237_v36 = vpop.permute.xlu0 %642 }
  0xdc   : > { %v905_v37 = vpop.permute.xlu1 %904  ;;  %v667_v38 = vsel %vm654_vm0, %v641_v34, %v3237_v36 }
  0xdd   : > { %1565 = vrot.lane.b32.xlu0 %v3020_v47, %s2769_s15  ;;  %v934_v39 = vsel %vm924_vm4, %v905_v37, %v907_v31  ;;  %1943 = vmatprep.subr.bf16.mxu1 %v667_v38 }
  0xde   : > { %1567 = vrot.lane.b32.xlu1 %v3025_v48, %s2769_s15  ;;  %1866 = vmatpush1.bf16.msra.mxu0 %v934_v39 }
  0xdf   : > { %1944 = vmatpush1.bf16.msra.mxu1 %v666_v40  ;;  %v1022_v41 = vpop.permute.xlu0 %1021 }
  0xe0   : > { %v3248_v42 = vpop.permute.xlu1 %1023 }
  0xe1   : > { %894 = vrot.lane.b32.xlu0 %v3173_v12, %s2772_s25  ;;  %v1061_v43 = vsel %vm1059_vm5, %v1022_v41, %v3248_v42 }
  0xe2   : > { %896 = vrot.lane.b32.xlu1 %v3180_v13, %s2772_s25  ;;  %1867 = vmatprep.subr.bf16.mxu0 %v1061_v43 }
  0xe3   : > { %v756_v44 = vpop.permute.xlu0 %755 }
  0xe4   : > { %v3256_v45 = vpop.permute.xlu1 %757  ;;  %v792_v47 = vsel %vm789_vm2, %v3166_v10, %v756_v44 }
  0xe5   : > { %1585 = vrot.lane.b32.xlu0 %v3036_v49, %s2769_s15  ;;  %v793_v51 = vsel %vm789_vm2, %v756_v44, %v3256_v45 }
  0xe6   : > { %1587 = vrot.lane.b32.xlu1 %v3041_v50, %s2769_s15  ;;  %1945 = vmatprep.subr.bf16.mxu1 %v793_v51 }
  0xe7   : > { %1946 = vmatpush1.bf16.msra.mxu1 %v792_v47  ;;  %v1020_v52 = vpop.permute.xlu0 %1019 }
  0xe8   : > { %v1042_v53 = vpop.permute.xlu1 %1041  ;;  %v1060_v54 = vsel %vm1059_vm5, %v1020_v52, %v1022_v41 }
  0xe9   : > { %914 = vrot.lane.b32.xlu0 %v3199_v21, %s2772_s25  ;;  %1868 = vmatpush1.bf16.msra.mxu0 %v1060_v54 }
  0xea   : > { %916 = vrot.lane.b32.xlu1 %v3204_v22, %s2772_s25 }
  0xeb   : > { %v3271_v49 = vpop.permute.xlu0 %1043 }
  0xec   : > { %v776_v55 = vpop.permute.xlu1 %775  ;;  %v1070_v56 = vsel %vm1059_vm5, %v1042_v53, %v3271_v49 }
  0xed   : > { %1029 = vrot.lane.b32.xlu0 %v3173_v12, %s2773_s26  ;;  %1869 = vmatprep.subr.bf16.mxu0 %v1070_v56  ;;  %v801_v1 = vsel %vm789_vm2, %v3190_v17, %v776_v55 }
  0xee   : > { %1031 = vrot.lane.b32.xlu1 %v3180_v13, %s2773_s26 }
  0xef   : > { %v3285_v61 = vpop.permute.xlu0 %777 }
  0xf0   : > { %v1040_v62 = vpop.permute.xlu1 %1039  ;;  %v802_v63 = vsel %vm789_vm2, %v776_v55, %v3285_v61 }
  0xf1   : > { %628 = vrot.lane.b32.xlu0 %v3278_v58, %s2768_s22  ;;  %v1069_v0 = vsel %vm1059_vm5, %v1040_v62, %v1042_v53  ;;  %1947 = vmatprep.subr.bf16.mxu1 %v802_v63 }
  0xf2   : > { %630 = vrot.lane.b32.xlu1 %v3283_v59, %s2768_s22  ;;  %1870 = vmatpush1.bf16.msra.mxu0 %v1069_v0 }
  0xf3   : > { %1948 = vmatpush1.bf16.msra.mxu1 %v801_v1  ;;  %v1157_v2 = vpop.permute.xlu0 %1156 }
  0xf4   : > { %v3296_v3 = vpop.permute.xlu1 %1158 }
  0xf5   : > { %1049 = vrot.lane.b32.xlu0 %v3199_v21, %s2773_s26  ;;  %v1196_v5 = vsel %vm1194_vm6, %v1157_v2, %v3296_v3 }
  0xf6   : > { %1051 = vrot.lane.b32.xlu1 %v3204_v22, %s2773_s26  ;;  %1871 = vmatprep.subr.bf16.mxu0 %v1196_v5 }
  0xf7   : > { %v891_v9 = vpop.permute.xlu0 %890 }
  0xf8   : > { %v3310_v10 = vpop.permute.xlu1 %892  ;;  %v927_v11 = vsel %vm924_vm4, %v3206_v24, %v891_v9 }
  0xf9   : > { %648 = vrot.lane.b32.xlu0 %v3303_v6, %s2768_s22  ;;  %v928_v14 = vsel %vm924_vm4, %v891_v9, %v3310_v10 }
  0xfa   : > { %650 = vrot.lane.b32.xlu1 %v3308_v7, %s2768_s22  ;;  %1949 = vmatprep.subr.bf16.mxu1 %v928_v14 }
  0xfb   : > { %1950 = vmatpush1.bf16.msra.mxu1 %v927_v11  ;;  %v1155_v15 = vpop.permute.xlu0 %1154 }
  0xfc   : > { %v1177_v16 = vpop.permute.xlu1 %1176  ;;  %v1195_v17 = vsel %vm1194_vm6, %v1155_v15, %v1157_v2 }
  0xfd   : > { %1164 = vrot.lane.b32.xlu0 %v3173_v12, %s2774_s27  ;;  %1872 = vmatpush1.bf16.msra.mxu0 %v1195_v17  ;;  %v3427_v17 = vld [vmem:[%s3833_s2] ss:$12 sps:$4 sm:$0xff]  }
  0xfe   : > { %1166 = vrot.lane.b32.xlu1 %v3180_v13, %s2774_s27 }
  0xff   : > { %v3325_v18 = vpop.permute.xlu0 %1178 }
 0x100   : > { %v911_v19 = vpop.permute.xlu1 %910  ;;  %v1205_v20 = vsel %vm1194_vm6, %v1177_v16, %v3325_v18 }
 0x101   : > { %763 = vrot.lane.b32.xlu0 %v3278_v58, %s2771_s23  ;;  %1873 = vmatprep.subr.bf16.mxu0 %v1205_v20  ;;  %v936_v28 = vsel %vm924_vm4, %v3229_v33, %v911_v19 }
 0x102   : > { %765 = vrot.lane.b32.xlu1 %v3283_v59, %s2771_s23 }
 0x103   : > { %v3333_v23 = vpop.permute.xlu0 %912 }
 0x104   : > { %v1175_v24 = vpop.permute.xlu1 %1174  ;;  %v937_v25 = vsel %vm924_vm4, %v911_v19, %v3333_v23 }
 0x105   : > { %1184 = vrot.lane.b32.xlu0 %v3199_v21, %s2774_s27  ;;  %v1204_v26 = vsel %vm1194_vm6, %v1175_v24, %v1177_v16  ;;  %1951 = vmatprep.subr.bf16.mxu1 %v937_v25 }
 0x106   : > { %1186 = vrot.lane.b32.xlu1 %v3204_v22, %s2774_s27  ;;  %1874 = vmatpush1.bf16.msra.mxu0 %v1204_v26 }
 0x107   : > { %1952 = vmatpush1.bf16.msra.mxu1 %v936_v28  ;;  %v1292_v29 = vpop.permute.xlu0 %1291 }
 0x108   : > { %v3344_v30 = vpop.permute.xlu1 %1293 }
 0x109   : > { %783 = vrot.lane.b32.xlu0 %v3303_v6, %s2771_s23  ;;  %v1331_v31 = vsel %vm1329_vm7, %v1292_v29, %v3344_v30 }
 0x10a   : > { %785 = vrot.lane.b32.xlu1 %v3308_v7, %s2771_s23  ;;  %1875 = vmatprep.subr.bf16.mxu0 %v1331_v31 }
 0x10b   : > { %v1026_v32 = vpop.permute.xlu0 %1025 }
 0x10c   : > { %v3352_v34 = vpop.permute.xlu1 %1027  ;;  %v1062_v33 = vsel %vm1059_vm5, %v3248_v42, %v1026_v32 }
 0x10d   : > { %1299 = vrot.lane.b32.xlu0 %v3173_v12, %s2775_s28  ;;  %v1063_v35 = vsel %vm1059_vm5, %v1026_v32, %v3352_v34  ;;  %v3469_v32 = vld [vmem:[%s345_s6] ss:$36 sps:$4 sm:$0xff]  }
 0x10e   : > { %1301 = vrot.lane.b32.xlu1 %v3180_v13, %s2775_s28  ;;  %1953 = vmatprep.subr.bf16.mxu1 %v1063_v35 }
 0x10f   : > { %1954 = vmatpush1.bf16.msra.mxu1 %v1062_v33  ;;  %v1290_v37 = vpop.permute.xlu0 %1289 }
 0x110   : > { %v1312_v38 = vpop.permute.xlu1 %1311  ;;  %v1330_v39 = vsel %vm1329_vm7, %v1290_v37, %v1292_v29  ;;  %v3485_v37 = vld [vmem:[%s345_s6 + $0x48] ss:$36 sps:$4 sm:$0xff]  }
 0x111   : > { %898 = vrot.lane.b32.xlu0 %v3278_v58, %s2772_s25  ;;  %1876 = vmatpush1.bf16.msra.mxu0 %v1330_v39 }
 0x112   : > { %900 = vrot.lane.b32.xlu1 %v3283_v59, %s2772_s25 }
 0x113   : > { %v3367_v40 = vpop.permute.xlu0 %1313 }
 0x114   : > { %v1046_v41 = vpop.permute.xlu1 %1045  ;;  %v1340_v42 = vsel %vm1329_vm7, %v1312_v38, %v3367_v40 }
 0x115   : > { %1319 = vrot.lane.b32.xlu0 %v3199_v21, %s2775_s28  ;;  %1877 = vmatprep.subr.bf16.mxu0 %v1340_v42  ;;  %v1071_v52 = vsel %vm1059_vm5, %v3271_v49, %v1046_v41 }
 0x116   : > { %1321 = vrot.lane.b32.xlu1 %v3204_v22, %s2775_s28 }
 0x117   : > { %v3375_v43 = vpop.permute.xlu0 %1047 }
 0x118   : > { %v1310_v44 = vpop.permute.xlu1 %1309  ;;  %v1072_v47 = vsel %vm1059_vm5, %v1046_v41, %v3375_v43 }
 0x119   : > { %918 = vrot.lane.b32.xlu0 %v3303_v6, %s2772_s25  ;;  %v1339_v51 = vsel %vm1329_vm7, %v1310_v44, %v1312_v38  ;;  %1955 = vmatprep.subr.bf16.mxu1 %v1072_v47 }
 0x11a   : > { %920 = vrot.lane.b32.xlu1 %v3308_v7, %s2772_s25  ;;  %1878 = vmatpush1.bf16.msra.mxu0 %v1339_v51 }
 0x11b   : > { %1956 = vmatpush1.bf16.msra.mxu1 %v1071_v52  ;;  %v1427_v53 = vpop.permute.xlu0 %1426 }
 0x11c   : > { %v3386_v54 = vpop.permute.xlu1 %1428 }
 0x11d   : > { %1434 = vrot.lane.b32.xlu0 %v3173_v12, %s2776_s29  ;;  %v1466_v55 = vsel %vm1464_vm8, %v1427_v53, %v3386_v54 }
 0x11e   : > { %1436 = vrot.lane.b32.xlu1 %v3180_v13, %s2776_s29  ;;  %1879 = vmatprep.subr.bf16.mxu0 %v1466_v55 }
 0x11f   : > { %v1161_v56 = vpop.permute.xlu0 %1160 }
 0x120   : > { %v3394_v62 = vpop.permute.xlu1 %1162  ;;  %v1197_v49 = vsel %vm1194_vm6, %v3296_v3, %v1161_v56 }
 0x121   : > { %1033 = vrot.lane.b32.xlu0 %v3278_v58, %s2773_s26  ;;  %v1198_v63 = vsel %vm1194_vm6, %v1161_v56, %v3394_v62 }
 0x122   : > { %1035 = vrot.lane.b32.xlu1 %v3283_v59, %s2773_s26  ;;  %1957 = vmatprep.subr.bf16.mxu1 %v1198_v63 }
 0x123   : > { %1958 = vmatpush1.bf16.msra.mxu1 %v1197_v49  ;;  %v1425_v0 = vpop.permute.xlu0 %1424 }
 0x124   : > { %v1447_v1 = vpop.permute.xlu1 %1446  ;;  %v1465_v2 = vsel %vm1464_vm8, %v1425_v0, %v1427_v53 }
 0x125   : > { %1454 = vrot.lane.b32.xlu0 %v3199_v21, %s2776_s29  ;;  %1880 = vmatpush1.bf16.msra.mxu0 %v1465_v2 }
 0x126   : > { %1456 = vrot.lane.b32.xlu1 %v3204_v22, %s2776_s29 }
 0x127   : > { %v3409_v3 = vpop.permute.xlu0 %1448 }
 0x128   : > { %v1181_v5 = vpop.permute.xlu1 %1180  ;;  %v1475_v9 = vsel %vm1464_vm8, %v1447_v1, %v3409_v3 }
 0x129   : > { %1053 = vrot.lane.b32.xlu0 %v3303_v6, %s2773_s26  ;;  %1881 = vmatprep.subr.bf16.mxu0 %v1475_v9  ;;  %v1206_v19 = vsel %vm1194_vm6, %v3325_v18, %v1181_v5 }
 0x12a   : > { %1055 = vrot.lane.b32.xlu1 %v3308_v7, %s2773_s26 }
 0x12b   : > { %v3417_v11 = vpop.permute.xlu0 %1182 }
 0x12c   : > { %v1445_v14 = vpop.permute.xlu1 %1444  ;;  %v1207_v15 = vsel %vm1194_vm6, %v1181_v5, %v3417_v11 }
 0x12d   : > { %1569 = vrot.lane.b32.xlu0 %v3173_v12, %s2769_s15  ;;  %v1474_v16 = vsel %vm1464_vm8, %v1445_v14, %v1447_v1  ;;  %1959 = vmatprep.subr.bf16.mxu1 %v1207_v15 }
 0x12e   : > { %1571 = vrot.lane.b32.xlu1 %v3180_v13, %s2769_s15  ;;  %1882 = vmatpush1.bf16.msra.mxu0 %v1474_v16 }
 0x12f   : > { %1960 = vmatpush1.bf16.msra.mxu1 %v1206_v19  ;;  %v1296_v20 = vpop.permute.xlu0 %1295  ;;  %2023 = vmatprep.subr.bf16.mxu0 %v3173_v12 }
 0x130   : > { %v1332_v24 = vsel %vm1329_vm7, %v3344_v30, %v1296_v20  ;;  %v3436_v25 = vpop.permute.xlu1 %1297 }
 0x131   : > { %1168 = vrot.lane.b32.xlu0 %v3278_v58, %s2774_s27  ;;  %v1333_v26 = vsel %vm1329_vm7, %v1296_v20, %v3436_v25  ;;  %1884 = vmatmul.mubr.bf16.vlgmr.msra.gmra.mrb[0].mxu0 %v3427_v17 }
 0x132   : > { %1170 = vrot.lane.b32.xlu1 %v3283_v59, %s2774_s27  ;;  %1961 = vmatprep.subr.bf16.mxu1 %v1333_v26 }
 0x133   : > { %1962 = vmatpush1.bf16.msra.mxu1 %v1332_v24  ;;  %2024 = vmatpush1.bf16.msra.mxu0 %v3025_v48  ;;  %v1316_v12 = vpop.permute.xlu0 %1315 }
 0x134   : > { %v1341_v18 = vsel %vm1329_vm7, %v3367_v40, %v1316_v12  ;;  %v3448_v28 = vpop.permute.xlu1 %1317  ;;  %2025 = vmatprep.subr.bf16.mxu0 %v3199_v21  ;;  %2055 = vmatprep.mubr.bf16.mxu0 %v3129_v60 }
 0x135   : > { %1589 = vrot.lane.b32.xlu0 %v3199_v21, %s2769_s15  ;;  %v1342_v29 = vsel %vm1329_vm7, %v1316_v12, %v3448_v28 }
 0x136   : > { %1591 = vrot.lane.b32.xlu1 %v3204_v22, %s2769_s15  ;;  %1963 = vmatprep.subr.bf16.mxu1 %v1342_v29 }
 0x137   : > { %1964 = vmatpush1.bf16.msra.mxu1 %v1341_v18  ;;  %2026 = vmatpush1.bf16.msra.mxu0 %v3041_v50  ;;  %v625_v48 = vpop.permute.xlu0 %624 }
 0x138   : > { %v659_v30 = vsel %vm654_vm0, %v3214_v27, %v625_v48  ;;  %v3461_v31 = vpop.permute.xlu1 %626 }
 0x139   : > { %1188 = vrot.lane.b32.xlu0 %v3303_v6, %s2774_s27  ;;  %v660_v21 = vsel %vm654_vm0, %v625_v48, %v3461_v31 }
 0x13a   : > { %1190 = vrot.lane.b32.xlu1 %v3308_v7, %s2774_s27  ;;  %2027 = vmatprep.subr.bf16.mxu0 %v660_v21 }
 0x13b   : > { %2028 = vmatpush1.bf16.msra.mxu0 %v659_v30  ;;  %v1431_v50 = vpop.permute.xlu0 %1430 }
 0x13c   : > { %v1467_v27 = vsel %vm1464_vm8, %v3386_v54, %v1431_v50  ;;  %v3475_v33 = vpop.permute.xlu1 %1432 }
 0x13d   : > { %1037 = vrot.lane.b32.xlu0 %v3469_v32, %s2773_s26  ;;  %v1468_v35 = vsel %vm1464_vm8, %v1431_v50, %v3475_v33 }
 0x13e   : > { %1303 = vrot.lane.b32.xlu1 %v3278_v58, %s2775_s28  ;;  %1965 = vmatprep.subr.bf16.mxu1 %v1468_v35 }
 0x13f   : > { %1966 = vmatpush1.bf16.msra.mxu1 %v1467_v27  ;;  %v645_v38 = vpop.permute.xlu0 %644 }
 0x140   : > { %v668_v39 = vsel %vm654_vm0, %v3237_v36, %v645_v38  ;;  %v3489_v40 = vpop.permute.xlu1 %646 }
 0x141   : > { %1305 = vrot.lane.b32.xlu0 %v3283_v59, %s2775_s28  ;;  %v669_v41 = vsel %vm654_vm0, %v645_v38, %v3489_v40 }
 0x142   : > { %1057 = vrot.lane.b32.xlu1 %v3485_v37, %s2773_s26  ;;  %2029 = vmatprep.subr.bf16.mxu0 %v669_v41 }
 0x143   : > { %2030 = vmatpush1.bf16.msra.mxu0 %v668_v39  ;;  %v1451_v42 = vpop.permute.xlu0 %1450  ;;  %v1820_v39 = vld [vmem:[%s3834_s3] sm:$0xff] }
 0x144   : > { %v1476_v44 = vsel %vm1464_vm8, %v3409_v3, %v1451_v42  ;;  %v3499_v47 = vpop.permute.xlu1 %1452 }
 0x145   : > { %1323 = vrot.lane.b32.xlu0 %v3303_v6, %s2775_s28  ;;  %v1477_v36 = vsel %vm1464_vm8, %v1451_v42, %v3499_v47 }
 0x146   : > { %1325 = vrot.lane.b32.xlu1 %v3308_v7, %s2775_s28  ;;  %1967 = vmatprep.subr.bf16.mxu1 %v1477_v36 }
 0x147   : > { %1968 = vmatpush1.bf16.msra.mxu1 %v1476_v44  ;;  %v760_v51 = vpop.permute.xlu0 %759 }
 0x148   : > { %v794_v52 = vsel %vm789_vm2, %v3256_v45, %v760_v51  ;;  %v3509_v53 = vpop.permute.xlu1 %761 }
 0x149   : > { %1172 = vrot.lane.b32.xlu0 %v3469_v32, %s2774_s27  ;;  %v795_v54 = vsel %vm789_vm2, %v760_v51, %v3509_v53 }
 0x14a   : > { %632 = vrot.lane.b32.xlu1 %v3469_v32, %s2768_s22  ;;  %2031 = vmatprep.subr.bf16.mxu0 %v795_v54 }
 0x14b   : > { %2032 = vmatpush1.bf16.msra.mxu0 %v794_v52  ;;  %v780_v55 = vpop.permute.xlu0 %779  ;;  %1970 = vmatmul.mubr.bf16.vlgmr.msra.gmra.mrb[4].mxu1 %v3427_v17 }
 0x14c   : > { %v803_v56 = vsel %vm789_vm2, %v3285_v61, %v780_v55  ;;  %v3520_v45 = vpop.permute.xlu1 %781  ;;  %2012 = vmatprep.mubr.bf16.mxu1 %v2770_v46 }
 0x14d   : > { %1438 = vrot.lane.b32.xlu0 %v3278_v58, %s2776_s29  ;;  %v804_v49 = vsel %vm789_vm2, %v780_v55, %v3520_v45 }
 0x14e   : > { %1440 = vrot.lane.b32.xlu1 %v3283_v59, %s2776_s29  ;;  %2033 = vmatprep.subr.bf16.mxu0 %v804_v49 }
 0x14f   : > { %2034 = vmatpush1.bf16.msra.mxu0 %v803_v56  ;;  %v1566_v63 = vpop.permute.xlu0 %1565 }
 0x150   : > { %v1602_v0 = vsel %vm1599_vm1, %v3122_v57, %v1566_v63  ;;  %v3531_v61 = vpop.permute.xlu1 %1567 }
 0x151   : > { %1192 = vrot.lane.b32.xlu0 %v3485_v37, %s2774_s27  ;;  %v1603_v1 = vsel %vm1599_vm1, %v1566_v63, %v3531_v61 }
 0x152   : > { %652 = vrot.lane.b32.xlu1 %v3485_v37, %s2768_s22  ;;  %1980 = vmatprep.subr.bf16.mxu1 %v1603_v1 }
 0x153   : > { %1981 = vmatpush1.bf16.msra.mxu1 %v1602_v0  ;;  %v895_v2 = vpop.permute.xlu0 %894 }
 0x154   : > { %v929_v3 = vsel %vm924_vm4, %v3310_v10, %v895_v2  ;;  %v3541_v5 = vpop.permute.xlu1 %896 }
 0x155   : > { %1458 = vrot.lane.b32.xlu0 %v3303_v6, %s2776_s29  ;;  %v930_v57 = vsel %vm924_vm4, %v895_v2, %v3541_v5 }
 0x156   : > { %1460 = vrot.lane.b32.xlu1 %v3308_v7, %s2776_s29  ;;  %2035 = vmatprep.subr.bf16.mxu0 %v930_v57 }
 0x157   : > { %2036 = vmatpush1.bf16.msra.mxu0 %v929_v3  ;;  %v1586_v9 = vpop.permute.xlu0 %1585 }
 0x158   : > { %v1611_v14 = vsel %vm1599_vm1, %v3150_v4, %v1586_v9  ;;  %v3551_v15 = vpop.permute.xlu1 %1587 }
 0x159   : > { %1307 = vrot.lane.b32.xlu0 %v3469_v32, %s2775_s28  ;;  %v1612_v10 = vsel %vm1599_vm1, %v1586_v9, %v3551_v15 }
 0x15a   : > { %767 = vrot.lane.b32.xlu1 %v3469_v32, %s2771_s23  ;;  %1982 = vmatprep.subr.bf16.mxu1 %v1612_v10 }
 0x15b   : > { %1983 = vmatpush1.bf16.msra.mxu1 %v1611_v14  ;;  %v915_v16 = vpop.permute.xlu0 %914 }
 0x15c   : > { %v938_v19 = vsel %vm924_vm4, %v3333_v23, %v915_v16  ;;  %v3561_v20 = vpop.permute.xlu1 %916  ;;  %2109 = vmatprep.subr.bf16.mxu1 %v3278_v58 }
 0x15d   : > { %1327 = vrot.lane.b32.xlu0 %v3485_v37, %s2775_s28  ;;  %v939_v4 = vsel %vm924_vm4, %v915_v16, %v3561_v20 }
 0x15e   : > { %787 = vrot.lane.b32.xlu1 %v3485_v37, %s2771_s23  ;;  %2037 = vmatprep.subr.bf16.mxu0 %v939_v4 }
 0x15f   : > { %2546 = vmatmul.mubr.msk.bf16.vlgmr.msra.gmra.mrb[4].mxu1 %vm1847_vm3, %v3161_v8  ;;  %2038 = vmatpush1.bf16.msra.mxu0 %v938_v19  ;;  %v1030_v24 = vpop.permute.xlu0 %1029 }
 0x160   : > { %2110 = vmatpush1.bf16.msra.mxu1 %v3180_v13  ;;  %v1064_v23 = vsel %vm1059_vm5, %v3352_v34, %v1030_v24  ;;  %v3575_v26 = vpop.permute.xlu1 %1031  ;;  %2141 = vmatprep.mubr.bf16.mxu1 %v3129_v60 }
 0x161   : > { %1573 = vrot.lane.b32.xlu0 %v3278_v58, %s2769_s15  ;;  %v1065_v12 = vsel %vm1059_vm5, %v1030_v24, %v3575_v26  ;;  %2111 = vmatprep.subr.bf16.mxu1 %v3303_v6 }
 0x162   : > { %1575 = vrot.lane.b32.xlu1 %v3283_v59, %s2769_s15  ;;  %2039 = vmatprep.subr.bf16.mxu0 %v1065_v12 }
 0x163   : > { %2040 = vmatpush1.bf16.msra.mxu0 %v1064_v23  ;;  %v629_v13 = vpop.permute.xlu0 %628 }
 0x164   : > { %2112 = vmatpush1.bf16.msra.mxu1 %v3204_v22  ;;  %v3586_v34 = vpop.permute.xlu1 %630  ;;  %v661_v18 = vsel %vm654_vm0, %v3461_v31, %v629_v13 }
 0x165   : > { %1442 = vrot.lane.b32.xlu0 %v3469_v32, %s2776_s29  ;;  %v662_v58 = vsel %vm654_vm0, %v629_v13, %v3586_v34 }
 0x166   : > { %902 = vrot.lane.b32.xlu1 %v3469_v32, %s2772_s25  ;;  %2113 = vmatprep.subr.bf16.mxu1 %v662_v58 }
 0x167   : > { %v1050_v29 = vpop.permute.xlu0 %1049 }
 0x168   : > { %2114 = vmatpush1.bf16.msra.mxu1 %v661_v18  ;;  %v1073_v22 = vsel %vm1059_vm5, %v3375_v43, %v1050_v29  ;;  %v3598_v48 = vpop.permute.xlu1 %1051 }
 0x169   : > { %1593 = vrot.lane.b32.xlu0 %v3303_v6, %s2769_s15  ;;  %v1074_v30 = vsel %vm1059_vm5, %v1050_v29, %v3598_v48 }
 0x16a   : > { %1595 = vrot.lane.b32.xlu1 %v3308_v7, %s2769_s15  ;;  %2041 = vmatprep.subr.bf16.mxu0 %v1074_v30 }
 0x16b   : > { %2042 = vmatpush1.bf16.msra.mxu0 %v1073_v22  ;;  %v649_v31 = vpop.permute.xlu0 %648 }
 0x16c   : > { %v670_v21 = vsel %vm654_vm0, %v3489_v40, %v649_v31  ;;  %v3608_v50 = vpop.permute.xlu1 %650 }
 0x16d   : > { %1462 = vrot.lane.b32.xlu0 %v3485_v37, %s2776_s29  ;;  %v671_v6 = vsel %vm654_vm0, %v649_v31, %v3608_v50 }
 0x16e   : > { %922 = vrot.lane.b32.xlu1 %v3485_v37, %s2772_s25  ;;  %2115 = vmatprep.subr.bf16.mxu1 %v671_v6 }
 0x16f   : > { %2116 = vmatpush1.bf16.msra.mxu1 %v670_v21  ;;  %v1165_v43 = vpop.permute.xlu0 %1164 }
 0x170   : > { %v1199_v27 = vsel %vm1194_vm6, %v3394_v62, %v1165_v43  ;;  %v3618_v35 = vpop.permute.xlu1 %1166  ;;  %v1821_v62 = vld [vmem:[%s3834_s3 + $0x8] sm:$0xff] }
 0x171   : > { %1577 = vrot.lane.b32.xlu0 %v3469_v32, %s2769_s15  ;;  %v1200_v38 = vsel %vm1194_vm6, %v1165_v43, %v3618_v35 }
 0x172   : > { %1597 = vrot.lane.b32.xlu1 %v3485_v37, %s2769_s15  ;;  %2043 = vmatprep.subr.bf16.mxu0 %v1200_v38  ;;  %s2641_s15 = smul.u32 72, %s3844_s17 }
 0x173   : > { %2044 = vmatpush1.bf16.msra.mxu0 %v1199_v27  ;;  %v764_v40 = vpop.permute.xlu0 %763 }
 0x174   : > { %v796_v32 = vsel %vm789_vm2, %v3509_v53, %v764_v40  ;;  %v3634_v41 = vpop.permute.xlu1 %765  ;;  %s3790_s26 = scalar_lea.vmem %s3835_s4, %s2641_s15 }
 0x175   : > { %v797_v42 = vsel %vm789_vm2, %v764_v40, %v3634_v41  ;;  %1824 = vperm.xlu0 %2693, %v1820_v39  }
 0x176   : > { %2117 = vmatprep.subr.bf16.mxu1 %v797_v42  ;;  %1829 = vperm.xlu1 %2694, %v1821_v62  }
 0x177   : > { %2118 = vmatpush1.bf16.msra.mxu1 %v796_v32  ;;  %v1185_v37 = vpop.permute.xlu0 %1184 }
 0x178   : > { %v1208_v44 = vsel %vm1194_vm6, %v3417_v11, %v1185_v37  ;;  %v3640_v36 = vpop.permute.xlu1 %1186 }
 0x179   : > { %v1209_v51 = vsel %vm1194_vm6, %v1185_v37, %v3640_v36 }
 0x17a   : > { %2045 = vmatprep.subr.bf16.mxu0 %v1209_v51 }
 0x17b   : > { %2046 = vmatpush1.bf16.msra.mxu0 %v1208_v44  ;;  %v784_v52 = vpop.permute.xlu0 %783 }
 0x17c   : > { %v805_v53 = vsel %vm789_vm2, %v3520_v45, %v784_v52  ;;  %v3646_v54 = vpop.permute.xlu1 %785 }
 0x17d   : > { %v806_v55 = vsel %vm789_vm2, %v784_v52, %v3646_v54 }
 0x17e   : > { %2119 = vmatprep.subr.bf16.mxu1 %v806_v55 }
 0x17f   : > { %2120 = vmatpush1.bf16.msra.mxu1 %v805_v53  ;;  %v1300_v56 = vpop.permute.xlu0 %1299 }
 0x180   : > { %v1334_v11 = vsel %vm1329_vm7, %v3436_v25, %v1300_v56  ;;  %v3652_v49 = vpop.permute.xlu1 %1301 }
 0x181   : > { %v1335_v63 = vsel %vm1329_vm7, %v1300_v56, %v3652_v49 }
 0x182   : > { %2047 = vmatprep.subr.bf16.mxu0 %v1335_v63 }
 0x183   : > { %2048 = vmatpush1.bf16.msra.mxu0 %v1334_v11  ;;  %v899_v0 = vpop.permute.xlu0 %898 }
 0x184   : > { %v931_v45 = vsel %vm924_vm4, %v3541_v5, %v899_v0  ;;  %v3658_v1 = vpop.permute.xlu1 %900 }
 0x185   : > { %v932_v2 = vsel %vm924_vm4, %v899_v0, %v3658_v1 }
 0x186   : > { %2121 = vmatprep.subr.bf16.mxu1 %v932_v2 }
 0x187   : > { %2122 = vmatpush1.bf16.msra.mxu1 %v931_v45  ;;  %v1320_v3 = vpop.permute.xlu0 %1319 }
 0x188   : > { %v1343_v25 = vsel %vm1329_vm7, %v3448_v28, %v1320_v3  ;;  %v3664_v57 = vpop.permute.xlu1 %1321 }
 0x189   : > { %v1344_v9 = vsel %vm1329_vm7, %v1320_v3, %v3664_v57 }
 0x18a   : > { %2049 = vmatprep.subr.bf16.mxu0 %v1344_v9 }
 0x18b   : > { %2050 = vmatpush1.bf16.msra.mxu0 %v1343_v25  ;;  %v919_v14 = vpop.permute.xlu0 %918 }
 0x18c   : > { %v940_v5 = vsel %vm924_vm4, %v3561_v20, %v919_v14  ;;  %v3670_v10 = vpop.permute.xlu1 %920 }
 0x18d   : > { %v941_v16 = vsel %vm924_vm4, %v919_v14, %v3670_v10 }
 0x18e   : > { %2123 = vmatprep.subr.bf16.mxu1 %v941_v16 }
 0x18f   : > { %2124 = vmatpush1.bf16.msra.mxu1 %v940_v5  ;;  %v1435_v19 = vpop.permute.xlu0 %1434 }
 0x190   : > { %v1469_v28 = vsel %vm1464_vm8, %v3475_v33, %v1435_v19  ;;  %v3676_v4 = vpop.permute.xlu1 %1436 }
 0x191   : > { %v1470_v24 = vsel %vm1464_vm8, %v1435_v19, %v3676_v4 }
 0x192   : > { %2051 = vmatprep.subr.bf16.mxu0 %v1470_v24 }
 0x193   : > { %2052 = vmatpush1.bf16.msra.mxu0 %v1469_v28  ;;  %v1034_v23 = vpop.permute.xlu0 %1033 }
 0x194   : > { %v1066_v20 = vsel %vm1059_vm5, %v3575_v26, %v1034_v23  ;;  %v1036_v12 = vpop.permute.xlu1 %1035  ;;  %v3682_v13 = vpop.f32.mrb[0].mxu1 }
 0x195   : > { %v1067_v18 = vsel %vm1059_vm5, %v1034_v23, %v1036_v12  ;;  %v3685_v58 = vpop.f32.mrb[1].mxu1 }
 0x196   : > { %2125 = vmatprep.subr.bf16.mxu1 %v1067_v18  ;;  %v3687_v33 = vpop.f32.mrb[2].mxu1 }
 0x197   : > { %2126 = vmatpush1.bf16.msra.mxu1 %v1066_v20  ;;  %v1455_v29 = vpop.permute.xlu0 %1454  ;;  %v3689_v22 = vpop.f32.mrb[3].mxu1 }
 0x198   : > { %v1478_v30 = vsel %vm1464_vm8, %v3499_v47, %v1455_v29  ;;  %v3693_v31 = vpop.permute.xlu1 %1456 }
 0x199   : > { %v1479_v26 = vsel %vm1464_vm8, %v1455_v29, %v3693_v31 }
 0x19a   : > { %2053 = vmatprep.subr.bf16.mxu0 %v1479_v26 }
 0x19b   : > { %2054 = vmatpush1.bf16.msra.mxu0 %v1478_v30  ;;  %v1054_v21 = vpop.permute.xlu0 %1053 }
 0x19c   : > { %v1075_v6 = vsel %vm1059_vm5, %v3598_v48, %v1054_v21  ;;  %v1056_v43 = vpop.permute.xlu1 %1055 }
 0x19d   : > { %v1076_v27 = vsel %vm1059_vm5, %v1054_v21, %v1056_v43 }
 0x19e   : > { %2127 = vmatprep.subr.bf16.mxu1 %v1076_v27  ;;  %2056 = vmatmul.mubr.bf16.vlgmr.msra.gmra.mrb[4].mxu0 %v3427_v17 }
 0x19f   : > { %2128 = vmatpush1.bf16.msra.mxu1 %v1075_v6  ;;  %v1570_v38 = vpop.permute.xlu0 %1569  ;;  %2098 = vmatprep.mubr.bf16.mxu0 %v2770_v46 }
 0x1a0   : > { %v1604_v47 = vsel %vm1599_vm1, %v3531_v61, %v1570_v38  ;;  %v3704_v39 = vpop.permute.xlu1 %1571 }
 0x1a1   : > { %v1605_v40 = vsel %vm1599_vm1, %v1570_v38, %v3704_v39 }
 0x1a2   : > { %2066 = vmatprep.subr.bf16.mxu0 %v1605_v40 }
 0x1a3   : > { %2067 = vmatpush1.bf16.msra.mxu0 %v1604_v47  ;;  %v1169_v48 = vpop.permute.xlu0 %1168 }
 0x1a4   : > { %v1201_v62 = vsel %vm1194_vm6, %v3618_v35, %v1169_v48  ;;  %v1171_v32 = vpop.permute.xlu1 %1170 }
 0x1a5   : > { %v1202_v42 = vsel %vm1194_vm6, %v1169_v48, %v1171_v32 }
 0x1a6   : > { %2129 = vmatprep.subr.bf16.mxu1 %v1202_v42 }
 0x1a7   : > { %2130 = vmatpush1.bf16.msra.mxu1 %v1201_v62  ;;  %v1590_v37 = vpop.permute.xlu0 %1589 }
 0x1a8   : > { %v1613_v61 = vsel %vm1599_vm1, %v3551_v15, %v1590_v37  ;;  %v3713_v44 = vpop.permute.xlu1 %1591 }
 0x1a9   : > { %v1614_v51 = vsel %vm1599_vm1, %v1590_v37, %v3713_v44 }
 0x1aa   : > { %2068 = vmatprep.subr.bf16.mxu0 %v1614_v51  ;;  %v2777_v51 = vmov 0.0  }
 0x1ab   : > { %2069 = vmatpush1.bf16.msra.mxu0 %v1613_v61  ;;  %v1189_v52 = vpop.permute.xlu0 %1188 }
 0x1ac   : > { %v1210_v35 = vsel %vm1194_vm6, %v3640_v36, %v1189_v52  ;;  %v1191_v53 = vpop.permute.xlu1 %1190 }
 0x1ad   : > { %v1211_v55 = vsel %vm1194_vm6, %v1189_v52, %v1191_v53 }
 0x1ae   : > { %2131 = vmatprep.subr.bf16.mxu1 %v1211_v55  ;;  %2547 = vmatmul.mubr.msk.bf16.vlgmr.msra.gmra.mrb[4].mxu0 %vm1847_vm3, %v3161_v8 }
 0x1af   : > { %2132 = vmatpush1.bf16.msra.mxu1 %v1210_v35  ;;  %v1038_v15 = vpop.permute.xlu0 %1037  ;;  %2227 = vmatprep.mubr.bf16.mxu0 %v3129_v60 }
 0x1b0   : > { %v1304_v56 = vpop.permute.xlu1 %1303  ;;  %v1068_v11 = vsel %vm1059_vm5, %v1036_v12, %v1038_v15 }
 0x1b1   : > { %2572 = vmatprep.subr.bf16.mxu0 %v1068_v11  ;;  %v1336_v45 = vsel %vm1329_vm7, %v3652_v49, %v1304_v56 }
 0x1b2   : > { %2573 = vmatpush3.bf16.msra.mxu0 %v3283_v59 }
 0x1b3   : > { %v1306_v63 = vpop.permute.xlu0 %1305 }
 0x1b4   : > { %v1058_v0 = vpop.permute.xlu1 %1057  ;;  %v1337_v36 = vsel %vm1329_vm7, %v1304_v56, %v1306_v63 }
 0x1b5   : > { %2133 = vmatprep.subr.bf16.mxu1 %v1337_v36  ;;  %v1077_v8 = vsel %vm1059_vm5, %v1056_v43, %v1058_v0 }
 0x1b6   : > { %2574 = vmatprep.subr.bf16.mxu0 %v1077_v8  ;;  %2134 = vmatpush1.bf16.msra.mxu1 %v1336_v45 }
 0x1b7   : > { %v1324_v2 = vpop.permute.xlu0 %1323  ;;  %2575 = vmatpush3.bf16.msra.mxu0 %v3308_v7 }
 0x1b8   : > { %v1345_v60 = vsel %vm1329_vm7, %v3664_v57, %v1324_v2  ;;  %v1326_v3 = vpop.permute.xlu1 %1325 }
 0x1b9   : > { %v1346_v59 = vsel %vm1329_vm7, %v1324_v2, %v1326_v3 }
 0x1ba   : > { %2135 = vmatprep.subr.bf16.mxu1 %v1346_v59 }
 0x1bb   : > { %2136 = vmatpush1.bf16.msra.mxu1 %v1345_v60  ;;  %v1173_v25 = vpop.permute.xlu0 %1172 }
 0x1bc   : > { %v633_v9 = vpop.permute.xlu1 %632  ;;  %v1203_v49 = vsel %vm1194_vm6, %v1171_v32, %v1173_v25 }
 0x1bd   : > { %v663_v14 = vsel %vm654_vm0, %v3586_v34, %v633_v9  ;;  %2576 = vmatprep.subr.bf16.mxu0 %v1203_v49 }
 0x1be   : > { %2577 = vmatpush3.bf16.msra.mxu0 %v663_v14 }
 0x1bf   : > { %v1439_v5 = vpop.permute.xlu0 %1438 }
 0x1c0   : > { %v1471_v7 = vsel %vm1464_vm8, %v3676_v4, %v1439_v5  ;;  %v1441_v16 = vpop.permute.xlu1 %1440 }
 0x1c1   : > { %v1472_v57 = vsel %vm1464_vm8, %v1439_v5, %v1441_v16 }
 0x1c2   : > { %2137 = vmatprep.subr.bf16.mxu1 %v1472_v57 }
 0x1c3   : > { %2138 = vmatpush1.bf16.msra.mxu1 %v1471_v7  ;;  %v1193_v19 = vpop.permute.xlu0 %1192 }
 0x1c4   : > { %v653_v28 = vpop.permute.xlu1 %652  ;;  %v1212_v24 = vsel %vm1194_vm6, %v1191_v53, %v1193_v19 }
 0x1c5   : > { %v672_v23 = vsel %vm654_vm0, %v3608_v50, %v653_v28  ;;  %2578 = vmatprep.subr.bf16.mxu0 %v1212_v24 }
 0x1c6   : > { %2579 = vmatpush3.bf16.msra.mxu0 %v672_v23 }
 0x1c7   : > { %v1459_v34 = vpop.permute.xlu0 %1458 }
 0x1c8   : > { %v1480_v20 = vsel %vm1464_vm8, %v3693_v31, %v1459_v34  ;;  %v1461_v12 = vpop.permute.xlu1 %1460 }
 0x1c9   : > { %v1481_v4 = vsel %vm1464_vm8, %v1459_v34, %v1461_v12 }
 0x1ca   : > { %2139 = vmatprep.subr.bf16.mxu1 %v1481_v4 }
 0x1cb   : > { %2140 = vmatpush1.bf16.msra.mxu1 %v1480_v20  ;;  %v1308_v18 = vpop.permute.xlu0 %1307 }
 0x1cc   : > { %v768_v29 = vpop.permute.xlu1 %767  ;;  %v1338_v30 = vsel %vm1329_vm7, %v1306_v63, %v1308_v18 }
 0x1cd   : > { %v798_v26 = vsel %vm789_vm2, %v3634_v41, %v768_v29  ;;  %2580 = vmatprep.subr.bf16.mxu0 %v1338_v30 }
 0x1ce   : > { %2581 = vmatpush3.bf16.msra.mxu0 %v798_v26  ;;  %2142 = vmatmul.mubr.bf16.vlgmr.msra.gmra.mrb[8].mxu1 %v3427_v17 }
 0x1cf   : > { %v1328_v50 = vpop.permute.xlu0 %1327  ;;  %2184 = vmatprep.mubr.bf16.mxu1 %v2770_v46 }
 0x1d0   : > { %v788_v31 = vpop.permute.xlu1 %787  ;;  %v1347_v21 = vsel %vm1329_vm7, %v1326_v3, %v1328_v50 }
 0x1d1   : > { %v807_v6 = vsel %vm789_vm2, %v3646_v54, %v788_v31  ;;  %2582 = vmatprep.subr.bf16.mxu0 %v1347_v21 }
 0x1d2   : > { %2583 = vmatpush3.bf16.msra.mxu0 %v807_v6 }
 0x1d3   : > { %v1574_v43 = vpop.permute.xlu0 %1573 }
 0x1d4   : > { %v1606_v27 = vsel %vm1599_vm1, %v3704_v39, %v1574_v43  ;;  %v1576_v41 = vpop.permute.xlu1 %1575 }
 0x1d5   : > { %v1607_v38 = vsel %vm1599_vm1, %v1574_v43, %v1576_v41 }
 0x1d6   : > { %2152 = vmatprep.subr.bf16.mxu1 %v1607_v38 }
 0x1d7   : > { %2153 = vmatpush1.bf16.msra.mxu1 %v1606_v27  ;;  %v1443_v47 = vpop.permute.xlu0 %1442 }
 0x1d8   : > { %v903_v40 = vpop.permute.xlu1 %902  ;;  %v1473_v46 = vsel %vm1464_vm8, %v1441_v16, %v1443_v47 }
 0x1d9   : > { %v933_v48 = vsel %vm924_vm4, %v3658_v1, %v903_v40  ;;  %2584 = vmatprep.subr.bf16.mxu0 %v1473_v46 }
 0x1da   : > { %2585 = vmatpush3.bf16.msra.mxu0 %v933_v48 }
 0x1db   : > { %v1594_v54 = vpop.permute.xlu0 %1593 }
 0x1dc   : > { %v1615_v62 = vsel %vm1599_vm1, %v3713_v44, %v1594_v54  ;;  %v1596_v32 = vpop.permute.xlu1 %1595  ;;  %v2727_v44 = vld [vmem:[%s3833_s2 + $0x8] ss:$12 sps:$4 sm:$0xff]  }
 0x1dd   : > { %v1616_v39 = vsel %vm1599_vm1, %v1594_v54, %v1596_v32 }
 0x1de   : > { %2154 = vmatprep.subr.bf16.mxu1 %v1616_v39 }
 0x1df   : > { %2155 = vmatpush1.bf16.msra.mxu1 %v1615_v62  ;;  %v1463_v42 = vpop.permute.xlu0 %1462 }
 0x1e0   : > { %v923_v37 = vpop.permute.xlu1 %922  ;;  %v1482_v61 = vsel %vm1464_vm8, %v1461_v12, %v1463_v42  ;;  %2597 = vmatprep.subr.bf16.mxu1 %v2777_v51 }
 0x1e1   : > { %v942_v1 = vsel %vm924_vm4, %v3670_v10, %v923_v37  ;;  %2586 = vmatprep.subr.bf16.mxu0 %v1482_v61 }
 0x1e2   : > { %2548 = vmatmul.mubr.msk.bf16.vlgmr.msra.gmra.mrb[8].mxu1 %vm1847_vm3, %v2727_v44  ;;  %2587 = vmatpush3.bf16.msra.mxu0 %v942_v1 }
 0x1e3   : > { %v1578_v52 = vpop.permute.xlu0 %1577  ;;  %2601 = vmatprep.mubr.msk.bf16.mxu1 %vm2778_vm9, %v2777_v51 }
 0x1e4   : > { %v1608_v35 = vsel %vm1599_vm1, %v1576_v41, %v1578_v52  ;;  %v1598_v53 = vpop.permute.xlu1 %1597 }
 0x1e5   : > { %2228 = vmatmul.mubr.bf16.vlgmr.msra.gmra.mrb[8].mxu0 %v3427_v17  ;;  %2598 = vmatpush3.bf16.msra.mxu1 %v1608_v35  ;;  %v1617_v10 = vsel %vm1599_vm1, %v1596_v32, %v1598_v53 }
 0x1e6   : > { %2599 = vmatprep.subr.bf16.mxu1 %v2777_v51 }
 0x1e9   : > { %2600 = vmatpush3.bf16.msra.mxu1 %v1617_v10 }
 0x1ec   : > { %2602 = vmatmul.mubr.msk.bf16.vlgmr.msra.gmra.mrb[12].mxu1 %vm1847_vm3, %v2727_v44 }
 0x1f4   : > { %v3774_v55 = vpop.permute.xlu0 %1824 }
 0x1f5   : > { %v3777_v56 = vpop.permute.xlu1 %1829 }
 0x204   : > { %v1885_v15 = vpop.f32.mrb[0].mxu0 }
 0x205   : > { %v1887_v11 = vpop.f32.mrb[1].mxu0  ;;  %v1886_v63 = vadd.f32 %v1885_v15, %v3774_v55 }
 0x206   : > { %v1889_v0 = vpop.f32.mrb[2].mxu0  ;;  %v1888_v17 = vadd.f32 %v1887_v11, %v3774_v55 }
 0x207   : > { %v1929_v36 = vadd.f32 %v3682_v13, %v1886_v63  ;;  %v1891_v45 = vpop.f32.mrb[3].mxu0  ;;  %v1890_v8 = vadd.f32 %v1889_v0, %v3777_v56 }
 0x208   : > { %v1931_v2 = vadd.f32 %v3685_v58, %v1888_v17  ;;  %v1892_v60 = vadd.f32 %v1891_v45, %v3777_v56 }
 0x209   : > { %v2277_v3 = vmax.f32 %v1929_v36, 0.0  ;;  %v1933_v59 = vadd.f32 %v3687_v33, %v1890_v8 }
 0x20a   : > { %v2278_v25 = vmax.f32 %v1931_v2, 0.0  ;;  %v1935_v9 = vadd.f32 %v3689_v22, %v1892_v60 }
 0x20b   : > { %v2286_v13 = vmax.f32 %v1933_v59, 0.0 }
 0x20c   : > { %v2562_v49 = vpack.c.bf16 %v2278_v25, %v2277_v3  ;;  %v2287_v14 = vmax.f32 %v1935_v9, 0.0 }
 0x20e   : > { %2351 = vst [vmem:[%s3790_s26] sm:$0xff] %v2562_v49  ;;  %v2567_v58 = vpack.c.bf16 %v2287_v14, %v2286_v13 }
 0x210   : > { %2356 = vst [vmem:[%s3790_s26 + $0x24] sm:$0xff] %v2567_v58 }
 0x232   : > { %v2014_v5 = vpop.f32.mrb[4].mxu1 }
 0x233   : > { %v2613_v33 = vadd.f32 %v2014_v5, %v3774_v55  ;;  %v2016_v7 = vpop.f32.mrb[5].mxu1 }
 0x234   : > { %v2614_v22 = vadd.f32 %v2016_v7, %v3774_v55  ;;  %v2018_v16 = vpop.f32.mrb[6].mxu1 }
 0x235   : > { %v2279_v57 = vmax.f32 %v2613_v33, 0.0  ;;  %v2615_v19 = vadd.f32 %v2018_v16, %v3777_v56  ;;  %v2020_v28 = vpop.f32.mrb[7].mxu1 }
 0x236   : > { %v2280_v24 = vmax.f32 %v2614_v22, 0.0  ;;  %v2616_v23 = vadd.f32 %v2020_v28, %v3777_v56 }
 0x237   : > { %v2288_v34 = vmax.f32 %v2615_v19, 0.0 }
 0x238   : > { %v2563_v20 = vpack.c.bf16 %v2280_v24, %v2279_v57  ;;  %v2289_v12 = vmax.f32 %v2616_v23, 0.0 }
 0x23a   : > { %2352 = vst [vmem:[%s3790_s26 + $0x8] sm:$0xff] %v2563_v20  ;;  %v2568_v4 = vpack.c.bf16 %v2289_v12, %v2288_v34 }
 0x23c   : > { %2357 = vst [vmem:[%s3790_s26 + $0x2c] sm:$0xff] %v2568_v4 }
 0x281   : > { %v2100_v18 = vpop.f32.mrb[4].mxu0 }
 0x282   : > { %v2617_v29 = vadd.f32 %v2100_v18, %v3774_v55  ;;  %v2102_v30 = vpop.f32.mrb[5].mxu0 }
 0x283   : > { %v2618_v26 = vadd.f32 %v2102_v30, %v3774_v55  ;;  %v2104_v50 = vpop.f32.mrb[6].mxu0 }
 0x284   : > { %v2281_v31 = vmax.f32 %v2617_v29, 0.0  ;;  %v2619_v21 = vadd.f32 %v2104_v50, %v3777_v56  ;;  %v2106_v6 = vpop.f32.mrb[7].mxu0 }
 0x285   : > { %v2282_v43 = vmax.f32 %v2618_v26, 0.0  ;;  %v2620_v27 = vadd.f32 %v2106_v6, %v3777_v56 }
 0x286   : > { %v2290_v41 = vmax.f32 %v2619_v21, 0.0 }
 0x287   : > { %v2564_v38 = vpack.c.bf16 %v2282_v43, %v2281_v31  ;;  %v2291_v47 = vmax.f32 %v2620_v27, 0.0 }
 0x289   : > { %2353 = vst [vmem:[%s3790_s26 + $0x10] sm:$0xff] %v2564_v38  ;;  %v2569_v40 = vpack.c.bf16 %v2291_v47, %v2290_v41 }
 0x28b   : > { %2358 = vst [vmem:[%s3790_s26 + $0x34] sm:$0xff] %v2569_v40 }
 0x2b5   : > { %v2186_v46 = vpop.f32.mrb[8].mxu1 }
 0x2b6   : > { %v2621_v48 = vadd.f32 %v2186_v46, %v3774_v55  ;;  %v2188_v54 = vpop.f32.mrb[9].mxu1 }
 0x2b7   : > { %v2622_v62 = vadd.f32 %v2188_v54, %v3774_v55  ;;  %v2190_v32 = vpop.f32.mrb[10].mxu1 }
 0x2b8   : > { %v2283_v39 = vmax.f32 %v2621_v48, 0.0  ;;  %v2623_v42 = vadd.f32 %v2190_v32, %v3777_v56  ;;  %v2192_v37 = vpop.f32.mrb[11].mxu1  ;;  %v2588_v61 = vpop.f32.mrb[8].mxu0 }
 0x2b9   : > { %v2284_v51 = vmax.f32 %v2622_v62, 0.0  ;;  %v2624_v1 = vadd.f32 %v2192_v37, %v3777_v56  ;;  %v2589_v44 = vpop.f32.mrb[9].mxu0 }
 0x2ba   : > { %v2292_v52 = vmax.f32 %v2623_v42, 0.0  ;;  %v2590_v35 = vadd.f32 %v2589_v44, %v2588_v61  ;;  %v2591_v53 = vpop.f32.mrb[10].mxu0 }
 0x2bb   : > { %v2565_v10 = vpack.c.bf16 %v2284_v51, %v2283_v39  ;;  %v2293_v15 = vmax.f32 %v2624_v1, 0.0  ;;  %v2592_v11 = vpop.f32.mrb[11].mxu0 }
 0x2bc   : > { %v2593_v63 = vadd.f32 %v2592_v11, %v2591_v53  ;;  %v2230_v0 = vadd.f32 %v2590_v35, %v3774_v55 }
 0x2bd   : > { %2354 = vst [vmem:[%s3790_s26 + $0x18] sm:$0xff] %v2565_v10  ;;  %v2570_v17 = vpack.c.bf16 %v2293_v15, %v2292_v52 }
 0x2be   : > { %v2233_v2 = vadd.f32 %v2593_v63, %v3777_v56 }
 0x2bf   : > { %2359 = vst [vmem:[%s3790_s26 + $0x3c] sm:$0xff] %v2570_v17  ;;  %v2270_v36 = vpop.f32.mrb[12].mxu1 }
 0x2c0   : > { %v2271_v45 = vadd.f32 %v2270_v36, %v2230_v0  ;;  %v2603_v8 = vpop.f32.mrb[13].mxu1 }
 0x2c1   : > { %v2273_v60 = vpop.f32.mrb[14].mxu1 }
 0x2c2   : > { %v2285_v3 = vmax.f32 %v2271_v45, 0.0  ;;  %v2274_v59 = vadd.f32 %v2273_v60, %v2233_v2  ;;  %v2604_v25 = vpop.f32.mrb[15].mxu1 }
 0x2c4   : > { %v2566_v9 = vpack.c.bf16 %v2285_v3, %v2285_v3  ;;  %v2294_v13 = vmax.f32 %v2274_v59, 0.0 }
 0x2c6   : > { %2355 = vst [vmem:[%s3790_s26 + $0x20] sm:$0xf] %v2566_v9  ;;  %v2571_v49 = vpack.c.bf16 %v2294_v13, %v2294_v13 }
 0x2c8   : > { %2360 = vst [vmem:[%s3790_s26 + $0x44] sm:$0xf] %v2571_v49 }
 0x2c9 PF: > { %s14_s19 = sadd.s32 1, %s2766_s19   ;;  %s3837_s15 = smov %s2754_s16 }
 0x2ca   : > { %p11_p10 = scmp.ge.s32.totalorder %s14_s19, 4   ;;  %s3838_s16 = smov %s2843_s24 }
 0x2cb   : > { %s3839_s17 = smov %s2762_s18  ;;  %s3840_s18 = smov %s3842_s20 }
 0x2cc   :  { %13 = sbr.rel (!%p11_p10) target bundleno = 3 (0x3), region = 143 }

// kernel: decoder_forward.21
= control target key start
LH: loop header
LB: loop body
LE: loop exit
PB: predicated region body
PF: predicated region fallthrough
CT: control target
= control target key end

     0   :  { %s2062_s15 = smov 0   ;;  %s2064_s16 = smov 0   ;;  %s2666_s0 = inlined_call_operand.vmem [shape: bf16[2,16,5632], index: 0, kind: input, shape index: {}, may-alias: {0,1}]   ;;  %s2667_s1 = inlined_call_operand.vmem [shape: bf16[2,16,5632], index: 1, kind: input, shape index: {}, may-alias: {0,1}]   ;;  %s2668_s2 = inlined_call_operand.vmem [shape: bf16[16,144], index: 2, kind: input, shape index: {}]   ;;  %s2669_s3 = inlined_call_operand.vmem [shape: f32[16,1], index: 3, kind: input, shape index: {}]   ;;  %s2670_s4 = inlined_call_operand.vmem [shape: bf16[2,16,4224], index: 4, kind: output, shape index: {}]  }
   0x1   :  { %s2066_s17 = smov 0   ;;  %s2068_s18 = smov 0  }
   0x2   :  { %s2070_s19 = smov 0   ;;  %s2072_s20 = smov 0  }
   0x3   :  { %s2074_s21 = smov 0   ;;  %s2076_s22 = smov 0  }
   0x4   :  { %s2078_s23 = smov 0  }
   0x5 LB: > { %s1768_s24 = sadd.s32 4294967295, %s2026_s23   ;;  %s23_s25 = sadd.s32 1, %s2018_s21  ;;  %s2026_s23 = sphi %s2078_s23, %s14_s23   ;;  %s2022_s22 = sphi %s2076_s22, %s2681_s22   ;;  %s2018_s21 = sphi %s2074_s21, %s2680_s21   ;;  %s2014_s20 = sphi %s2072_s20, %s2679_s20   ;;  %s2010_s19 = sphi %s2070_s19, %s2678_s19   ;;  %s2006_s18 = sphi %s2068_s18, %s2677_s18   ;;  %s2002_s17 = sphi %s2066_s17, %s2676_s17   ;;  %s1998_s16 = sphi %s2064_s16, %s2675_s16   ;;  %s1994_s15 = sphi %s2062_s15, %s2674_s15  }
   0x6   : > { %p24_p0 = scmp.ge.s32.totalorder %s23_s25, 3  ;;  %s26_s26 = sadd.s32 1, %s2022_s22 }
   0x7   : > { %s35_s27 = sadd.s32 1, %s2006_s18  ;;  %p42_p1 = scmp.ne.s32.totalorder %s2006_s18, %s2002_s17 }
   0x8   : > { %s2113_s28 = scalar_select %p24_p0, 0, %s23_s25  }
   0x9   : > { %s2683_s26 = smov (!%p24_p0, %s26_s26), %s2022_s22  ;;  %p43_p2 = scmp.eq.s32.totalorder %s2026_s23, 0 }
   0xa   : > { %s31_s29 = ssub.s32 %s2018_s21, %s2113_s28  ;;  %p28_p3 = scmp.ge.s32.totalorder %s2683_s26, 2 }
   0xb   : > { %s59_s30 = sadd.s32 1, %s2113_s28  ;;  %p2125_p4 = por %p43_p2, %p42_p1 }
   0xc   : > { %s61_s6 = ssub.s32 %s23_s25, %s59_s30  ;;  %s2685_s26 = smov (%p28_p3, %s2683_s26), 0 }
   0xd   : > { %s65_s7 = sadd.s32 1, %s1998_s16  ;;  %p72_p5 = scmp.ne.s32.totalorder %s1998_s16, %s1994_s15 }
   0xe   : > { %s30_s8 = ssub.s32 %s2022_s22, %s2685_s26  ;;  %p146_p6 = scmp.eq.s32.totalorder %s1768_s24, 5 }
   0xf   : > { %s32_s9 = sor.u32 %s31_s29, %s30_s8  ;;  %s62_s10 = sor.u32 %s61_s6, %s30_s8 }
  0x10   : > { %p33_p7 = scmp.eq.s32.totalorder %s32_s9, 0  ;;  %p63_p8 = scmp.eq.s32.totalorder %s62_s10, 0 }
  0x11   : > { %p2138_p9 = por %p72_p5, %p43_p2  ;;  %p2145_p10 = por %p146_p6, %p42_p1 }
  0x12   : > { %s2150_s13 = scalar_select %p33_p7, %s2006_s18, %s35_s27  }
  0x13   : > { %s2153_s14 = scalar_select %p63_p8, %s1998_s16, %s65_s7  }
  0x14   : > { %p1771_p11 = scmp.ge.s32.totalorder %s2026_s23, 6 }
  0x16   : > { %174 = sbr.rel (%p1771_p11) target bundleno = 59 (0x3b), region = 24 }
  0x1d   : > { %177 = sbr.rel (!%p2125_p4) target bundleno = 44 (0x2c), region = 28  ;;  %s179_s24 = sand.u32 (%p2125_p4), 1, %s2006_s18  }
  0x1e   : > { %s182_s25 = smul.u32 (%p2125_p4), 11, %s2018_s21 }
  0x1f   : > { %s1845_s29 = smul.u32 (%p2125_p4), 88, %s179_s24 }
  0x20   : > { %s1846_s30 = smul.u32 (%p2125_p4), 88, %s2022_s22 }
  0x21   : > { %s181_s10 = scalar_lea.vmem (%p2125_p4), [#allocation4], %s1845_s29 }
  0x22   : > { %s184_s6 = sadd.s32 (%p2125_p4), %s1846_s30, %s182_s25 }
  0x23   : > { %s1772_s8 = sshll.u32 (%p2125_p4), %s184_s6, 2 }
  0x24   : > { %s186_s7 = scalar_lea.vmem %s2666_s0, %s1772_s8 }
  0x25   : > { %v201_v0 = vld [vmem:[%s186_s7] sm:$0xff]  ;;  %v203_v1 = vld [vmem:[%s186_s7 + $0x8] sm:$0xff]  ;;  %v205_v2 = vld [vmem:[%s186_s7 + $0x10] sm:$0xff] }
  0x26   : > { %202 = vst [vmem:[%s181_s10] sm:$0xff] %v201_v0  ;;  %204 = vst [vmem:[%s181_s10 + $0x8] sm:$0xff] %v203_v1  ;;  %v207_v3 = vld [vmem:[%s186_s7 + $0x18] sm:$0xff]  ;;  %v209_v4 = vld [vmem:[%s186_s7 + $0x20] sm:$0xff] }
  0x27   : > { %206 = vst [vmem:[%s181_s10 + $0x10] sm:$0xff] %v205_v2  ;;  %v211_v5 = vld [vmem:[%s186_s7 + $0xb0] sm:$0xff]  ;;  %208 = vst [vmem:[%s181_s10 + $0x18] sm:$0xff] %v207_v3  ;;  %v213_v6 = vld [vmem:[%s186_s7 + $0xb8] sm:$0xff] }
  0x28   : > { %210 = vst [vmem:[%s181_s10 + $0x20] sm:$0xff] %v209_v4  ;;  %212 = vst [vmem:[%s181_s10 + $0x2c] sm:$0xff] %v211_v5  ;;  %v215_v7 = vld [vmem:[%s186_s7 + $0xc0] sm:$0xff]  ;;  %v217_v8 = vld [vmem:[%s186_s7 + $0xc8] sm:$0xff] }
  0x29   : > { %214 = vst [vmem:[%s181_s10 + $0x34] sm:$0xff] %v213_v6  ;;  %216 = vst [vmem:[%s181_s10 + $0x3c] sm:$0xff] %v215_v7  ;;  %v219_v9 = vld [vmem:[%s186_s7 + $0xd0] sm:$0xff]  ;;  %v1773_v10 = vld [vmem:[%s186_s7 + $0x28] sm:$0xf] }
  0x2a   : > { %218 = vst [vmem:[%s181_s10 + $0x44] sm:$0xff] %v217_v8  ;;  %v1775_v11 = vld [vmem:[%s186_s7 + $0xd8] sm:$0xf]  ;;  %220 = vst [vmem:[%s181_s10 + $0x4c] sm:$0xff] %v219_v9 }
  0x2b   : > { %1774 = vst [vmem:[%s181_s10 + $0x28] sm:$0xf] %v1773_v10  ;;  %1776 = vst [vmem:[%s181_s10 + $0x54] sm:$0xf] %v1775_v11 }
  0x2c PF: > { %237 = sbr.rel (!%p2138_p9) target bundleno = 59 (0x3b), region = 54  ;;  %s239_s5 = sand.u32 (%p2138_p9), 1, %s1998_s16  }
  0x2d   : > { %s1680_s24 = smul.u32 (%p2138_p9), 11, %s2018_s21 }
  0x2e   : > { %s1847_s25 = smul.u32 (%p2138_p9), 88, %s239_s5 }
  0x2f   : > { %s1681_s29 = smul.u32 (%p2138_p9), 88, %s2022_s22 }
  0x30   : > { %s241_s7 = scalar_lea.vmem (%p2138_p9), [#allocation5], %s1847_s25 }
  0x31   : > { %s1682_s30 = sadd.s32 (%p2138_p9), %s1681_s29, %s1680_s24 }
  0x32   : > { %s1777_s6 = sshll.u32 (%p2138_p9), %s1682_s30, 2 }
  0x33   : > { %s1684_s27 = scalar_lea.vmem %s2667_s1, %s1777_s6 }
  0x34   : > { %v1778_v12 = vld [vmem:[%s1684_s27 + $0x2c] sm:$0xff]  ;;  %v1779_v13 = vld [vmem:[%s1684_s27 + $0x34] sm:$0xff]  ;;  %v1780_v14 = vld [vmem:[%s1684_s27 + $0x3c] sm:$0xff] }
  0x35   : > { %263 = vst [vmem:[%s241_s7] sm:$0xff] %v1778_v12  ;;  %265 = vst [vmem:[%s241_s7 + $0x8] sm:$0xff] %v1779_v13  ;;  %v1781_v15 = vld [vmem:[%s1684_s27 + $0x44] sm:$0xff]  ;;  %v1782_v16 = vld [vmem:[%s1684_s27 + $0x4c] sm:$0xff] }
  0x36   : > { %267 = vst [vmem:[%s241_s7 + $0x10] sm:$0xff] %v1780_v14  ;;  %v1783_v17 = vld [vmem:[%s1684_s27 + $0xdc] sm:$0xff]  ;;  %269 = vst [vmem:[%s241_s7 + $0x18] sm:$0xff] %v1781_v15  ;;  %v1784_v18 = vld [vmem:[%s1684_s27 + $0xe4] sm:$0xff] }
  0x37   : > { %271 = vst [vmem:[%s241_s7 + $0x20] sm:$0xff] %v1782_v16  ;;  %273 = vst [vmem:[%s241_s7 + $0x2c] sm:$0xff] %v1783_v17  ;;  %v1785_v19 = vld [vmem:[%s1684_s27 + $0xec] sm:$0xff]  ;;  %v1786_v20 = vld [vmem:[%s1684_s27 + $0xf4] sm:$0xff] }
  0x38   : > { %275 = vst [vmem:[%s241_s7 + $0x34] sm:$0xff] %v1784_v18  ;;  %277 = vst [vmem:[%s241_s7 + $0x3c] sm:$0xff] %v1785_v19  ;;  %v1787_v21 = vld [vmem:[%s1684_s27 + $0xfc] sm:$0xff]  ;;  %v1788_v22 = vld [vmem:[%s1684_s27 + $0x54] sm:$0xf] }
  0x39   : > { %279 = vst [vmem:[%s241_s7 + $0x44] sm:$0xff] %v1786_v20  ;;  %v1790_v23 = vld [vmem:[%s1684_s27 + $0x104] sm:$0xf]  ;;  %281 = vst [vmem:[%s241_s7 + $0x4c] sm:$0xff] %v1787_v21 }
  0x3a   : > { %1789 = vst [vmem:[%s241_s7 + $0x28] sm:$0xf] %v1788_v22  ;;  %1791 = vst [vmem:[%s241_s7 + $0x54] sm:$0xf] %v1790_v23 }
  0x3b PF: > { %p1792_p12 = scmp.ge.s32.totalorder %s2026_s23, 1  ;;  %p297_p13 = scmp.lt.s32.totalorder %s2026_s23, 7 }
  0x3d   : > { %p298_p0 = pnand %p1792_p12, %p297_p13 }
  0x3e   : > { %s304_s11 = sand.u32 (!%p298_p0), 1, %s2002_s17   ;;  %s2028_s24 = smov (!%p298_p0), 127   ;;  %v2236_v30 = vld [vmem:[%s2668_s2 + $0x4] ss:$8 sps:$4 sm:$0xff] (!%p298_p0)   ;;  %vm1237_vm0 = vcmask (!%p298_p0), 130048   ;;  %vm507_vm1 = vcmask (!%p298_p0), 1039360  }
  0x3f   : > { %301 = sbr.rel (%p298_p0) target bundleno = 606 (0x25e), region = 80  ;;  %s2029_s17 = smov (!%p298_p0), 126   ;;  %1808 = vmatprep.mubr.msk.bf16.mxu0 (!%p298_p0), %vm1237_vm0, %v2236_v30  ;;  %1809 = vmatprep.mubr.msk.bf16.mxu1 (!%p298_p0), %vm1237_vm0, %v2236_v30  ;;  %vm589_vm2 = vcmask (!%p298_p0), 1031168   ;;  %vm671_vm3 = vcmask (!%p298_p0), 506880   ;;  %v2036_v54 = vmov (!%p298_p0), 0   ;;  %vm753_vm4 = vcmask (!%p298_p0), 498688  }
  0x40   : > { %s2175_s10 = smul.u32 (!%p298_p0), 88, %s304_s11  ;;  %s311_s25 = sand.u32 (!%p298_p0), 1, %s1994_s15   ;;  %1933 = vset.pattern.permute.xlu1 (!%p298_p0), %v2036_v54  ;;  %1932 = vset.pattern.permute.xlu0 (!%p298_p0), %v2036_v54  ;;  %vm835_vm5 = vcmask (!%p298_p0), 490496   ;;  %vm917_vm6 = vcmask (!%p298_p0), 1014784   ;;  %vm999_vm7 = vcmask (!%p298_p0), 1006592   ;;  %vm1081_vm8 = vcmask (!%p298_p0), 998400  }
  0x41   : > { %s2198_s29 = smul.u32 (!%p298_p0), 88, %s311_s25  ;;  %s2030_s6 = smov (!%p298_p0), 62  }
  0x42   : > { %s2178_s5 = scalar_lea.vmem (!%p298_p0), [#allocation4], %s2175_s10  ;;  %s2031_s15 = smov (!%p298_p0), 61  }
  0x43   : > { %v1934_v24 = vld [vmem:[%s2178_s5 + $0x4] ss:$44 sps:$4 sm:$0xff] (!%p298_p0)   ;;  %v1936_v25 = vld [vmem:[%s2178_s5] ss:$44 sps:$4 sm:$0xff] (!%p298_p0)   ;;  %v1937_v26 = vld [vmem:[%s2178_s5 + $0x8] ss:$44 sps:$4 sm:$0xff] (!%p298_p0)  }
  0x44   : > { %485 = vrot.lane.b32.xlu0 (!%p298_p0), %v1934_v24, %s2028_s24  ;;  %v1939_v27 = vld [vmem:[%s2178_s5 + $0xc] ss:$44 sps:$4 sm:$0xff] (!%p298_p0)   ;;  %1241 = vmatprep.subr.bf16.mxu0 (!%p298_p0), %v1934_v24  ;;  %v2188_v28 = vld [vmem:[%s2178_s5 + $0x10] ss:$44 sps:$4 sm:$0xff] (!%p298_p0)   ;;  %s313_s30 = scalar_lea.vmem (!%p298_p0), [#allocation5], %s2198_s29  ;;  %s2032_s8 = smov (!%p298_p0), 60  }
  0x45   : > { %483 = vrot.lane.b32.xlu1 (!%p298_p0), %v1936_v25, %s2028_s24  ;;  %1242 = vmatpush1.bf16.msra.mxu0 (!%p298_p0), %v1936_v25  ;;  %s2033_s9 = smov (!%p298_p0), 124   ;;  %v2225_v29 = vld [vmem:[%s2178_s5 + $0x14] ss:$44 sps:$4 sm:$0xff] (!%p298_p0)   ;;  %s2034_s27 = smov (!%p298_p0), 123   ;;  %v2255_v31 = vld [vmem:[%s2178_s5 + $0x18] ss:$44 sps:$4 sm:$0xff] (!%p298_p0)  }
  0x46   : > { %1284 = vmatprep.subr.bf16.mxu1 %v1939_v27  ;;  %s2035_s25 = smov 122   ;;  %v2260_v32 = vld [vmem:[%s2178_s5 + $0x1c] ss:$44 sps:$4 sm:$0xff]   ;;  %v2265_v33 = vld [vmem:[%s2178_s5 + $0x20] ss:$44 sps:$4 sm:$0xff]  }
  0x47   : > { %1285 = vmatpush1.bf16.msra.mxu1 %v1937_v26  ;;  %v2310_v40 = vld [vmem:[%s2178_s5 + $0x24] ss:$44 sps:$4 sm:$0xff]   ;;  %v2349_v60 = vld [vmem:[%s2178_s5 + $0x28] ss:$44 sps:$4 sm:$0xff]  }
  0x48   : > { %487 = vrot.lane.b32.xlu0 %v1937_v26, %s2028_s24  ;;  %v2360_v1 = vld [vmem:[%s313_s30] ss:$44 sps:$4 sm:$0xff]  }
  0x49   : > { %489 = vrot.lane.b32.xlu1 %v1939_v27, %s2028_s24 }
  0x4c   : > { %491 = vrot.lane.b32.xlu0 %v2188_v28, %s2028_s24 }
  0x4d   : > { %567 = vrot.lane.b32.xlu1 %v1934_v24, %s2029_s17 }
  0x50   : > { %569 = vrot.lane.b32.xlu0 %v1937_v26, %s2029_s17 }
  0x51   : > { %565 = vrot.lane.b32.xlu1 %v1936_v25, %s2029_s17 }
  0x54   : > { %571 = vrot.lane.b32.xlu0 %v1939_v27, %s2029_s17 }
  0x55   : > { %573 = vrot.lane.b32.xlu1 %v2188_v28, %s2029_s17 }
  0x58   : > { %649 = vrot.lane.b32.xlu0 %v1934_v24, %s2030_s6 }
  0x59   : > { %651 = vrot.lane.b32.xlu1 %v1937_v26, %s2030_s6 }
  0x5c   : > { %647 = vrot.lane.b32.xlu0 %v1936_v25, %s2030_s6 }
  0x5d   : > { %653 = vrot.lane.b32.xlu1 %v1939_v27, %s2030_s6 }
  0x60   : > { %655 = vrot.lane.b32.xlu0 %v2188_v28, %s2030_s6 }
  0x61   : > { %731 = vrot.lane.b32.xlu1 %v1934_v24, %s2031_s15 }
  0x64   : > { %733 = vrot.lane.b32.xlu0 %v1937_v26, %s2031_s15 }
  0x65   : > { %729 = vrot.lane.b32.xlu1 %v1936_v25, %s2031_s15 }
  0x68   : > { %735 = vrot.lane.b32.xlu0 %v1939_v27, %s2031_s15 }
  0x69   : > { %737 = vrot.lane.b32.xlu1 %v2188_v28, %s2031_s15 }
  0x6c   : > { %813 = vrot.lane.b32.xlu0 %v1934_v24, %s2032_s8 }
  0x6d   : > { %815 = vrot.lane.b32.xlu1 %v1937_v26, %s2032_s8 }
  0x70   : > { %811 = vrot.lane.b32.xlu0 %v1936_v25, %s2032_s8 }
  0x71   : > { %817 = vrot.lane.b32.xlu1 %v1939_v27, %s2032_s8 }
  0x74   : > { %819 = vrot.lane.b32.xlu0 %v2188_v28, %s2032_s8 }
  0x75   : > { %895 = vrot.lane.b32.xlu1 %v1937_v26, %s2033_s9 }
  0x78   : > { %897 = vrot.lane.b32.xlu0 %v1939_v27, %s2033_s9 }
  0x79   : > { %893 = vrot.lane.b32.xlu1 %v1934_v24, %s2033_s9 }
  0x7c   : > { %899 = vrot.lane.b32.xlu0 %v2188_v28, %s2033_s9 }
  0x7d   : > { %901 = vrot.lane.b32.xlu1 %v2225_v29, %s2033_s9 }
  0x80   : > { %977 = vrot.lane.b32.xlu0 %v1937_v26, %s2034_s27 }
  0x81   : > { %979 = vrot.lane.b32.xlu1 %v1939_v27, %s2034_s27 }
  0x84   : > { %975 = vrot.lane.b32.xlu0 %v1934_v24, %s2034_s27 }
  0x85   : > { %981 = vrot.lane.b32.xlu1 %v2188_v28, %s2034_s27 }
  0x88   : > { %983 = vrot.lane.b32.xlu0 %v2225_v29, %s2034_s27 }
  0x89   : > { %1059 = vrot.lane.b32.xlu1 %v1937_v26, %s2035_s25 }
  0x8c   : > { %1061 = vrot.lane.b32.xlu0 %v1939_v27, %s2035_s25 }
  0x8d   : > { %1057 = vrot.lane.b32.xlu1 %v1934_v24, %s2035_s25 }
  0x90   : > { %1063 = vrot.lane.b32.xlu0 %v2188_v28, %s2035_s25 }
  0x91   : > { %1065 = vrot.lane.b32.xlu1 %v2225_v29, %s2035_s25 }
  0x94   : > { %493 = vrot.lane.b32.xlu0 %v2225_v29, %s2028_s24 }
  0x95   : > { %495 = vrot.lane.b32.xlu1 %v2255_v31, %s2028_s24 }
  0x98   : > { %497 = vrot.lane.b32.xlu0 %v2260_v32, %s2028_s24 }
  0x99   : > { %499 = vrot.lane.b32.xlu1 %v2265_v33, %s2028_s24 }
  0x9c   : > { %575 = vrot.lane.b32.xlu0 %v2225_v29, %s2029_s17 }
  0x9d   : > { %577 = vrot.lane.b32.xlu1 %v2255_v31, %s2029_s17 }
  0xa0   : > { %579 = vrot.lane.b32.xlu0 %v2260_v32, %s2029_s17 }
  0xa1   : > { %581 = vrot.lane.b32.xlu1 %v2265_v33, %s2029_s17 }
  0xa4   : > { %657 = vrot.lane.b32.xlu0 %v2225_v29, %s2030_s6 }
  0xa5   : > { %659 = vrot.lane.b32.xlu1 %v2255_v31, %s2030_s6 }
  0xa8   : > { %661 = vrot.lane.b32.xlu0 %v2260_v32, %s2030_s6 }
  0xa9   : > { %663 = vrot.lane.b32.xlu1 %v2265_v33, %s2030_s6 }
  0xac   : > { %739 = vrot.lane.b32.xlu0 %v2225_v29, %s2031_s15 }
  0xad   : > { %741 = vrot.lane.b32.xlu1 %v2255_v31, %s2031_s15 }
  0xb0   : > { %743 = vrot.lane.b32.xlu0 %v2260_v32, %s2031_s15 }
  0xb1   : > { %745 = vrot.lane.b32.xlu1 %v2265_v33, %s2031_s15 }
  0xb4   : > { %821 = vrot.lane.b32.xlu0 %v2225_v29, %s2032_s8 }
  0xb5   : > { %823 = vrot.lane.b32.xlu1 %v2255_v31, %s2032_s8 }
  0xb6   : > { %v486_v34 = vpop.permute.xlu0 %485 }
  0xb7   : > { %v484_v35 = vpop.permute.xlu1 %483 }
  0xb8   : > { %825 = vrot.lane.b32.xlu0 %v2260_v32, %s2032_s8  ;;  %v508_v39 = vsel %vm507_vm1, %v484_v35, %v486_v34 }
  0xb9   : > { %827 = vrot.lane.b32.xlu1 %v2265_v33, %s2032_s8 }
  0xba   : > { %v488_v36 = vpop.permute.xlu0 %487 }
  0xbb   : > { %v490_v37 = vpop.permute.xlu1 %489  ;;  %v509_v38 = vsel %vm507_vm1, %v486_v34, %v488_v36  ;;  %v1952_v34 = vld [vmem:[%s313_s30 + $0x4] ss:$44 sps:$4 sm:$0xff]  }
  0xbc   : > { %903 = vrot.lane.b32.xlu0 %v2255_v31, %s2033_s9  ;;  %1243 = vmatprep.subr.bf16.mxu0 %v509_v38  ;;  %v510_v44 = vsel %vm507_vm1, %v488_v36, %v490_v37 }
  0xbd   : > { %905 = vrot.lane.b32.xlu1 %v2260_v32, %s2033_s9  ;;  %1244 = vmatpush1.bf16.msra.mxu0 %v508_v39 }
  0xbe   : > { %v2312_v41 = vpop.permute.xlu0 %491 }
  0xbf   : > { %v568_v42 = vpop.permute.xlu1 %567  ;;  %v511_v43 = vsel %vm507_vm1, %v490_v37, %v2312_v41 }
  0xc0   : > { %907 = vrot.lane.b32.xlu0 %v2265_v33, %s2033_s9  ;;  %1286 = vmatprep.subr.bf16.mxu1 %v511_v43 }
  0xc1   : > { %909 = vrot.lane.b32.xlu1 %v2310_v40, %s2033_s9  ;;  %1287 = vmatpush1.bf16.msra.mxu1 %v510_v44 }
  0xc2   : > { %v570_v45 = vpop.permute.xlu0 %569 }
  0xc3   : > { %v566_v46 = vpop.permute.xlu1 %565  ;;  %v591_v47 = vsel %vm589_vm2, %v568_v42, %v570_v45 }
  0xc4   : > { %985 = vrot.lane.b32.xlu0 %v2255_v31, %s2034_s27  ;;  %1245 = vmatprep.subr.bf16.mxu0 %v591_v47  ;;  %v590_v48 = vsel %vm589_vm2, %v566_v46, %v568_v42 }
  0xc5   : > { %987 = vrot.lane.b32.xlu1 %v2260_v32, %s2034_s27  ;;  %1246 = vmatpush1.bf16.msra.mxu0 %v590_v48 }
  0xc6   : > { %v572_v49 = vpop.permute.xlu0 %571 }
  0xc7   : > { %v2327_v50 = vpop.permute.xlu1 %573  ;;  %v592_v51 = vsel %vm589_vm2, %v570_v45, %v572_v49 }
  0xc8   : > { %989 = vrot.lane.b32.xlu0 %v2265_v33, %s2034_s27  ;;  %v593_v52 = vsel %vm589_vm2, %v572_v49, %v2327_v50 }
  0xc9   : > { %991 = vrot.lane.b32.xlu1 %v2310_v40, %s2034_s27  ;;  %1288 = vmatprep.subr.bf16.mxu1 %v593_v52  ;;  %v2439_v52 = vld [vmem:[%s2668_s2] ss:$8 sps:$4 sm:$0xff]  }
  0xca   : > { %1289 = vmatpush1.bf16.msra.mxu1 %v592_v51  ;;  %v650_v53 = vpop.permute.xlu0 %649 }
  0xcb   : > { %v652_v55 = vpop.permute.xlu1 %651 }
  0xcc   : > { %1067 = vrot.lane.b32.xlu0 %v2255_v31, %s2035_s25  ;;  %v673_v56 = vsel %vm671_vm3, %v650_v53, %v652_v55 }
  0xcd   : > { %1069 = vrot.lane.b32.xlu1 %v2260_v32, %s2035_s25  ;;  %1247 = vmatprep.subr.bf16.mxu0 %v673_v56 }
  0xce   : > { %v648_v57 = vpop.permute.xlu0 %647 }
  0xcf   : > { %v654_v58 = vpop.permute.xlu1 %653  ;;  %v672_v59 = vsel %vm671_vm3, %v648_v57, %v650_v53  ;;  %v1216_v53 = vld [vmem:[%s2669_s3] sm:$0xff] }
  0xd0   : > { %1071 = vrot.lane.b32.xlu0 %v2265_v33, %s2035_s25  ;;  %1248 = vmatpush1.bf16.msra.mxu0 %v672_v59  ;;  %v674_v0 = vsel %vm671_vm3, %v652_v55, %v654_v58  ;;  %v1217_v59 = vld [vmem:[%s2669_s3 + $0x8] sm:$0xff] }
  0xd1   : > { %1073 = vrot.lane.b32.xlu1 %v2310_v40, %s2035_s25 }
  0xd2   : > { %v2351_v61 = vpop.permute.xlu0 %655 }
  0xd3   : > { %v732_v62 = vpop.permute.xlu1 %731  ;;  %v675_v63 = vsel %vm671_vm3, %v654_v58, %v2351_v61 }
  0xd4   : > { %501 = vrot.lane.b32.xlu0 %v2310_v40, %s2028_s24  ;;  %1290 = vmatprep.subr.bf16.mxu1 %v675_v63 }
  0xd5   : > { %503 = vrot.lane.b32.xlu1 %v2349_v60, %s2028_s24  ;;  %1291 = vmatpush1.bf16.msra.mxu1 %v674_v0 }
  0xd6   : > { %v734_v2 = vpop.permute.xlu0 %733 }
  0xd7   : > { %v730_v3 = vpop.permute.xlu1 %729  ;;  %v755_v4 = vsel %vm753_vm4, %v732_v62, %v734_v2 }
  0xd8   : > { %505 = vrot.lane.b32.xlu0 %v2360_v1, %s2028_s24  ;;  %1249 = vmatprep.subr.bf16.mxu0 %v755_v4  ;;  %v754_v5 = vsel %vm753_vm4, %v730_v3, %v732_v62 }
  0xd9   : > { %583 = vrot.lane.b32.xlu1 %v2310_v40, %s2029_s17  ;;  %1250 = vmatpush1.bf16.msra.mxu0 %v754_v5 }
  0xda   : > { %v736_v6 = vpop.permute.xlu0 %735 }
  0xdb   : > { %v2370_v7 = vpop.permute.xlu1 %737  ;;  %v756_v8 = vsel %vm753_vm4, %v734_v2, %v736_v6 }
  0xdc   : > { %585 = vrot.lane.b32.xlu0 %v2349_v60, %s2029_s17  ;;  %v757_v9 = vsel %vm753_vm4, %v736_v6, %v2370_v7 }
  0xdd   : > { %587 = vrot.lane.b32.xlu1 %v2360_v1, %s2029_s17  ;;  %1292 = vmatprep.subr.bf16.mxu1 %v757_v9 }
  0xde   : > { %1293 = vmatpush1.bf16.msra.mxu1 %v756_v8  ;;  %v814_v10 = vpop.permute.xlu0 %813 }
  0xdf   : > { %v816_v11 = vpop.permute.xlu1 %815 }
  0xe0   : > { %665 = vrot.lane.b32.xlu0 %v2310_v40, %s2030_s6  ;;  %v837_v12 = vsel %vm835_vm5, %v814_v10, %v816_v11 }
  0xe1   : > { %667 = vrot.lane.b32.xlu1 %v2349_v60, %s2030_s6  ;;  %1251 = vmatprep.subr.bf16.mxu0 %v837_v12 }
  0xe2   : > { %v812_v13 = vpop.permute.xlu0 %811 }
  0xe3   : > { %v818_v14 = vpop.permute.xlu1 %817  ;;  %v836_v15 = vsel %vm835_vm5, %v812_v13, %v814_v10 }
  0xe4   : > { %669 = vrot.lane.b32.xlu0 %v2360_v1, %s2030_s6  ;;  %1252 = vmatpush1.bf16.msra.mxu0 %v836_v15  ;;  %v838_v19 = vsel %vm835_vm5, %v816_v11, %v818_v14 }
  0xe5   : > { %747 = vrot.lane.b32.xlu1 %v2310_v40, %s2031_s15 }
  0xe6   : > { %v2389_v16 = vpop.permute.xlu0 %819 }
  0xe7   : > { %v896_v17 = vpop.permute.xlu1 %895  ;;  %v839_v18 = vsel %vm835_vm5, %v818_v14, %v2389_v16 }
  0xe8   : > { %749 = vrot.lane.b32.xlu0 %v2349_v60, %s2031_s15  ;;  %1294 = vmatprep.subr.bf16.mxu1 %v839_v18 }
  0xe9   : > { %751 = vrot.lane.b32.xlu1 %v2360_v1, %s2031_s15  ;;  %1295 = vmatpush1.bf16.msra.mxu1 %v838_v19  ;;  %s2590_s15 = scalar_lea.vmem [#allocation6], %s2175_s10  ;;  %s1606_s10 = smul.u32 (%p2145_p10), 11, %s2010_s19 }
  0xea   : > { %v898_v20 = vpop.permute.xlu0 %897 }
  0xeb   : > { %v894_v21 = vpop.permute.xlu1 %893  ;;  %v919_v22 = vsel %vm917_vm6, %v896_v17, %v898_v20 }
  0xec   : > { %829 = vrot.lane.b32.xlu0 %v2310_v40, %s2032_s8  ;;  %1253 = vmatprep.subr.bf16.mxu0 %v919_v22  ;;  %v918_v23 = vsel %vm917_vm6, %v894_v21, %v896_v17 }
  0xed   : > { %831 = vrot.lane.b32.xlu1 %v2349_v60, %s2032_s8  ;;  %1254 = vmatpush1.bf16.msra.mxu0 %v918_v23 }
  0xee   : > { %v900_v24 = vpop.permute.xlu0 %899 }
  0xef   : > { %v2404_v25 = vpop.permute.xlu1 %901  ;;  %v920_v26 = vsel %vm917_vm6, %v898_v20, %v900_v24 }
  0xf0   : > { %833 = vrot.lane.b32.xlu0 %v2360_v1, %s2032_s8  ;;  %v921_v27 = vsel %vm917_vm6, %v900_v24, %v2404_v25  ;;  %s1850_s8 = smul.u32 (%p2145_p10), 66, %s2014_s20 }
  0xf1   : > { %911 = vrot.lane.b32.xlu1 %v2349_v60, %s2033_s9  ;;  %1296 = vmatprep.subr.bf16.mxu1 %v921_v27 }
  0xf2   : > { %1297 = vmatpush1.bf16.msra.mxu1 %v920_v26  ;;  %v978_v35 = vpop.permute.xlu0 %977  ;;  %s1608_s12 = sadd.s32 (%p2145_p10), %s1850_s8, %s1606_s10 }
  0xf3   : > { %v980_v36 = vpop.permute.xlu1 %979 }
  0xf4   : > { %913 = vrot.lane.b32.xlu0 %v2360_v1, %s2033_s9  ;;  %v1001_v37 = vsel %vm999_vm7, %v978_v35, %v980_v36 }
  0xf5   : > { %915 = vrot.lane.b32.xlu1 %v1952_v34, %s2033_s9  ;;  %1255 = vmatprep.subr.bf16.mxu0 %v1001_v37  ;;  %s1826_s9 = sshll.u32 (%p2145_p10), %s1608_s12, 2 }
  0xf6   : > { %v976_v38 = vpop.permute.xlu0 %975  ;;  %s1610_s11 = scalar_lea.vmem (%p2145_p10), %s2670_s4, %s1826_s9 }
  0xf7   : > { %v982_v39 = vpop.permute.xlu1 %981  ;;  %v1000_v42 = vsel %vm999_vm7, %v976_v38, %v978_v35 }
  0xf8   : > { %993 = vrot.lane.b32.xlu0 %v2349_v60, %s2034_s27  ;;  %1256 = vmatpush1.bf16.msra.mxu0 %v1000_v42  ;;  %v1002_v46 = vsel %vm999_vm7, %v980_v36, %v982_v39 }
  0xf9   : > { %995 = vrot.lane.b32.xlu1 %v2360_v1, %s2034_s27 }
  0xfa   : > { %v2424_v43 = vpop.permute.xlu0 %983 }
  0xfb   : > { %v1060_v44 = vpop.permute.xlu1 %1059  ;;  %v1003_v45 = vsel %vm999_vm7, %v982_v39, %v2424_v43 }
  0xfc   : > { %997 = vrot.lane.b32.xlu0 %v1952_v34, %s2034_s27  ;;  %1298 = vmatprep.subr.bf16.mxu1 %v1003_v45 }
  0xfd   : > { %1075 = vrot.lane.b32.xlu1 %v2349_v60, %s2035_s25  ;;  %1299 = vmatpush1.bf16.msra.mxu1 %v1002_v46 }
  0xfe   : > { %v1062_v47 = vpop.permute.xlu0 %1061 }
  0xff   : > { %v1058_v48 = vpop.permute.xlu1 %1057  ;;  %v1083_v49 = vsel %vm1081_vm8, %v1060_v44, %v1062_v47 }
 0x100   : > { %1077 = vrot.lane.b32.xlu0 %v2360_v1, %s2035_s25  ;;  %1257 = vmatprep.subr.bf16.mxu0 %v1083_v49  ;;  %v1082_v51 = vsel %vm1081_vm8, %v1058_v48, %v1060_v44 }
 0x101   : > { %1079 = vrot.lane.b32.xlu1 %v1952_v34, %s2035_s25  ;;  %1258 = vmatpush1.bf16.msra.mxu0 %v1082_v51 }
 0x102   : > { %v1064_v55 = vpop.permute.xlu0 %1063  ;;  %1327 = vmatprep.subr.bf16.mxu0 %v2225_v29 }
 0x103   : > { %v2446_v56 = vpop.permute.xlu1 %1065  ;;  %v1084_v57 = vsel %vm1081_vm8, %v1062_v47, %v1064_v55 }
 0x104   : > { %v1085_v58 = vsel %vm1081_vm8, %v1064_v55, %v2446_v56  ;;  %1274 = vmatmul.mubr.bf16.vlgmr.msra.gmra.mrb[0].mxu0 %v2439_v52  ;;  %1220 = vperm.xlu0 %1932, %v1216_v53  }
 0x105   : > { %1300 = vmatprep.subr.bf16.mxu1 %v1085_v58  ;;  %1328 = vmatpush1.bf16.msra.mxu0 %v2188_v28 }
 0x106   : > { %1301 = vmatpush1.bf16.msra.mxu1 %v1084_v57  ;;  %v494_v62 = vpop.permute.xlu0 %493  ;;  %1810 = vmatprep.mubr.msk.bf16.mxu0 %vm1237_vm0, %v2236_v30 }
 0x107   : > { %v512_v29 = vsel %vm507_vm1, %v2312_v41, %v494_v62  ;;  %v496_v63 = vpop.permute.xlu1 %495  ;;  %1370 = vmatprep.subr.bf16.mxu1 %v2260_v32  ;;  %1225 = vperm.xlu1 %1933, %v1217_v59  }
 0x108   : > { %v513_v0 = vsel %vm507_vm1, %v494_v62, %v496_v63 }
 0x109   : > { %1329 = vmatprep.subr.bf16.mxu0 %v513_v0  ;;  %1317 = vmatmul.mubr.bf16.vlgmr.msra.gmra.mrb[0].mxu1 %v2439_v52 }
 0x10a   : > { %1330 = vmatpush1.bf16.msra.mxu0 %v512_v29  ;;  %1371 = vmatpush1.bf16.msra.mxu1 %v2255_v31  ;;  %v498_v28 = vpop.permute.xlu0 %497 }
 0x10b   : > { %v514_v1 = vsel %vm507_vm1, %v496_v63, %v498_v28  ;;  %v2465_v2 = vpop.permute.xlu1 %499  ;;  %1811 = vmatprep.mubr.msk.bf16.mxu1 %vm1237_vm0, %v2236_v30 }
 0x10c   : > { %v515_v32 = vsel %vm507_vm1, %v498_v28, %v2465_v2 }
 0x10d   : > { %1372 = vmatprep.subr.bf16.mxu1 %v515_v32 }
 0x10e   : > { %1373 = vmatpush1.bf16.msra.mxu1 %v514_v1  ;;  %v576_v41 = vpop.permute.xlu0 %575 }
 0x10f   : > { %v594_v3 = vsel %vm589_vm2, %v2327_v50, %v576_v41  ;;  %v578_v4 = vpop.permute.xlu1 %577 }
 0x110   : > { %v595_v31 = vsel %vm589_vm2, %v576_v41, %v578_v4 }
 0x111   : > { %1331 = vmatprep.subr.bf16.mxu0 %v595_v31 }
 0x112   : > { %1332 = vmatpush1.bf16.msra.mxu0 %v594_v3  ;;  %v580_v5 = vpop.permute.xlu0 %579 }
 0x113   : > { %v596_v6 = vsel %vm589_vm2, %v578_v4, %v580_v5  ;;  %v2475_v8 = vpop.permute.xlu1 %581 }
 0x114   : > { %v597_v9 = vsel %vm589_vm2, %v580_v5, %v2475_v8 }
 0x115   : > { %1374 = vmatprep.subr.bf16.mxu1 %v597_v9 }
 0x116   : > { %1375 = vmatpush1.bf16.msra.mxu1 %v596_v6  ;;  %v658_v10 = vpop.permute.xlu0 %657 }
 0x117   : > { %v676_v11 = vsel %vm671_vm3, %v2351_v61, %v658_v10  ;;  %v660_v50 = vpop.permute.xlu1 %659 }
 0x118   : > { %v677_v12 = vsel %vm671_vm3, %v658_v10, %v660_v50 }
 0x119   : > { %1333 = vmatprep.subr.bf16.mxu0 %v677_v12 }
 0x11a   : > { %1334 = vmatpush1.bf16.msra.mxu0 %v676_v11  ;;  %v662_v13 = vpop.permute.xlu0 %661 }
 0x11b   : > { %v678_v14 = vsel %vm671_vm3, %v660_v50, %v662_v13  ;;  %v2483_v15 = vpop.permute.xlu1 %663 }
 0x11c   : > { %v679_v17 = vsel %vm671_vm3, %v662_v13, %v2483_v15 }
 0x11d   : > { %1376 = vmatprep.subr.bf16.mxu1 %v679_v17 }
 0x11e   : > { %1377 = vmatpush1.bf16.msra.mxu1 %v678_v14  ;;  %v740_v18 = vpop.permute.xlu0 %739 }
 0x11f   : > { %v758_v19 = vsel %vm753_vm4, %v2370_v7, %v740_v18  ;;  %v742_v61 = vpop.permute.xlu1 %741 }
 0x120   : > { %v759_v20 = vsel %vm753_vm4, %v740_v18, %v742_v61 }
 0x121   : > { %1335 = vmatprep.subr.bf16.mxu0 %v759_v20 }
 0x122   : > { %1336 = vmatpush1.bf16.msra.mxu0 %v758_v19  ;;  %v744_v21 = vpop.permute.xlu0 %743 }
 0x123   : > { %v760_v22 = vsel %vm753_vm4, %v742_v61, %v744_v21  ;;  %v2491_v23 = vpop.permute.xlu1 %745 }
 0x124   : > { %v761_v24 = vsel %vm753_vm4, %v744_v21, %v2491_v23 }
 0x125   : > { %1378 = vmatprep.subr.bf16.mxu1 %v761_v24 }
 0x126   : > { %1379 = vmatpush1.bf16.msra.mxu1 %v760_v22  ;;  %v822_v26 = vpop.permute.xlu0 %821 }
 0x127   : > { %v840_v27 = vsel %vm835_vm5, %v2389_v16, %v822_v26  ;;  %v824_v7 = vpop.permute.xlu1 %823 }
 0x128   : > { %v841_v34 = vsel %vm835_vm5, %v822_v26, %v824_v7 }
 0x129   : > { %1337 = vmatprep.subr.bf16.mxu0 %v841_v34 }
 0x12a   : > { %1338 = vmatpush1.bf16.msra.mxu0 %v840_v27  ;;  %v826_v35 = vpop.permute.xlu0 %825 }
 0x12b   : > { %v842_v36 = vsel %vm835_vm5, %v824_v7, %v826_v35  ;;  %v2499_v37 = vpop.permute.xlu1 %827 }
 0x12c   : > { %v843_v38 = vsel %vm835_vm5, %v826_v35, %v2499_v37 }
 0x12d   : > { %1380 = vmatprep.subr.bf16.mxu1 %v843_v38 }
 0x12e   : > { %1381 = vmatpush1.bf16.msra.mxu1 %v842_v36  ;;  %v904_v39 = vpop.permute.xlu0 %903 }
 0x12f   : > { %v922_v42 = vsel %vm917_vm6, %v2404_v25, %v904_v39  ;;  %v906_v16 = vpop.permute.xlu1 %905 }
 0x130   : > { %v923_v44 = vsel %vm917_vm6, %v904_v39, %v906_v16 }
 0x131   : > { %1339 = vmatprep.subr.bf16.mxu0 %v923_v44 }
 0x132   : > { %1340 = vmatpush1.bf16.msra.mxu0 %v922_v42  ;;  %v908_v45 = vpop.permute.xlu0 %907 }
 0x133   : > { %v924_v46 = vsel %vm917_vm6, %v906_v16, %v908_v45  ;;  %v2507_v47 = vpop.permute.xlu1 %909 }
 0x134   : > { %v925_v48 = vsel %vm917_vm6, %v908_v45, %v2507_v47 }
 0x135   : > { %1382 = vmatprep.subr.bf16.mxu1 %v925_v48 }
 0x136   : > { %1383 = vmatpush1.bf16.msra.mxu1 %v924_v46  ;;  %v986_v49 = vpop.permute.xlu0 %985 }
 0x137   : > { %v1004_v51 = vsel %vm999_vm7, %v2424_v43, %v986_v49  ;;  %v988_v25 = vpop.permute.xlu1 %987 }
 0x138   : > { %v1005_v53 = vsel %vm999_vm7, %v986_v49, %v988_v25 }
 0x139   : > { %1341 = vmatprep.subr.bf16.mxu0 %v1005_v53 }
 0x13a   : > { %1342 = vmatpush1.bf16.msra.mxu0 %v1004_v51  ;;  %v990_v55 = vpop.permute.xlu0 %989 }
 0x13b   : > { %v1006_v57 = vsel %vm999_vm7, %v988_v25, %v990_v55  ;;  %v2515_v58 = vpop.permute.xlu1 %991 }
 0x13c   : > { %v1007_v59 = vsel %vm999_vm7, %v990_v55, %v2515_v58 }
 0x13d   : > { %1384 = vmatprep.subr.bf16.mxu1 %v1007_v59 }
 0x13e   : > { %1385 = vmatpush1.bf16.msra.mxu1 %v1006_v57  ;;  %v1068_v62 = vpop.permute.xlu0 %1067 }
 0x13f   : > { %v1086_v29 = vsel %vm1081_vm8, %v2446_v56, %v1068_v62  ;;  %v1070_v43 = vpop.permute.xlu1 %1069 }
 0x140   : > { %v1087_v63 = vsel %vm1081_vm8, %v1068_v62, %v1070_v43 }
 0x141   : > { %1343 = vmatprep.subr.bf16.mxu0 %v1087_v63 }
 0x142   : > { %1344 = vmatpush1.bf16.msra.mxu0 %v1086_v29  ;;  %v1072_v0 = vpop.permute.xlu0 %1071 }
 0x143   : > { %v1088_v28 = vsel %vm1081_vm8, %v1070_v43, %v1072_v0  ;;  %v2523_v1 = vpop.permute.xlu1 %1073  ;;  %1413 = vmatprep.subr.bf16.mxu0 %v2310_v40 }
 0x144   : > { %v1089_v32 = vsel %vm1081_vm8, %v1072_v0, %v2523_v1 }
 0x145   : > { %1386 = vmatprep.subr.bf16.mxu1 %v1089_v32  ;;  %1360 = vmatmul.mubr.bf16.vlgmr.msra.gmra.mrb[4].mxu0 %v2439_v52 }
 0x146   : > { %1387 = vmatpush1.bf16.msra.mxu1 %v1088_v28  ;;  %1414 = vmatpush1.bf16.msra.mxu0 %v2265_v33  ;;  %v502_v56 = vpop.permute.xlu0 %501 }
 0x147   : > { %v516_v41 = vsel %vm507_vm1, %v2465_v2, %v502_v56  ;;  %v504_v3 = vpop.permute.xlu1 %503  ;;  %1456 = vmatprep.subr.bf16.mxu1 %v2036_v54  ;;  %1812 = vmatprep.mubr.msk.bf16.mxu0 %vm1237_vm0, %v2236_v30 }
 0x148   : > { %v517_v40 = vsel %vm507_vm1, %v502_v56, %v504_v3 }
 0x149   : > { %1415 = vmatprep.subr.bf16.mxu0 %v517_v40  ;;  %1403 = vmatmul.mubr.bf16.vlgmr.msra.gmra.mrb[4].mxu1 %v2439_v52 }
 0x14a   : > { %1416 = vmatpush1.bf16.msra.mxu0 %v516_v41  ;;  %1457 = vmatpush1.bf16.msra.mxu1 %v2349_v60  ;;  %v506_v4 = vpop.permute.xlu0 %505 }
 0x14b   : > { %v518_v33 = vsel %vm507_vm1, %v504_v3, %v506_v4  ;;  %v584_v31 = vpop.permute.xlu1 %583  ;;  %1458 = vmatprep.subr.bf16.mxu1 %v2036_v54  ;;  %1813 = vmatprep.mubr.msk.bf16.mxu1 %vm1237_vm0, %v2236_v30 }
 0x14c   : > { %v598_v9 = vsel %vm589_vm2, %v2475_v8, %v584_v31 }
 0x14e   : > { %1459 = vmatpush1.bf16.msra.mxu1 %v518_v33  ;;  %v586_v2 = vpop.permute.xlu0 %585 }
 0x14f   : > { %v588_v5 = vpop.permute.xlu1 %587  ;;  %v599_v6 = vsel %vm589_vm2, %v584_v31, %v586_v2  ;;  %1460 = vmatprep.subr.bf16.mxu1 %v2036_v54 }
 0x150   : > { %v600_v60 = vsel %vm589_vm2, %v586_v2, %v588_v5  ;;  %1417 = vmatprep.subr.bf16.mxu0 %v599_v6 }
 0x151   : > { %1418 = vmatpush1.bf16.msra.mxu0 %v598_v9 }
 0x152   : > { %1461 = vmatpush1.bf16.msra.mxu1 %v600_v60  ;;  %v666_v10 = vpop.permute.xlu0 %665 }
 0x153   : > { %v680_v11 = vsel %vm671_vm3, %v2483_v15, %v666_v10  ;;  %v668_v30 = vpop.permute.xlu1 %667  ;;  %1462 = vmatprep.subr.bf16.mxu1 %v2036_v54 }
 0x154   : > { %v681_v50 = vsel %vm671_vm3, %v666_v10, %v668_v30 }
 0x155   : > { %1419 = vmatprep.subr.bf16.mxu0 %v681_v50 }
 0x156   : > { %1420 = vmatpush1.bf16.msra.mxu0 %v680_v11  ;;  %v670_v12 = vpop.permute.xlu0 %669 }
 0x157   : > { %v682_v13 = vsel %vm671_vm3, %v668_v30, %v670_v12  ;;  %v748_v8 = vpop.permute.xlu1 %747 }
 0x158   : > { %1463 = vmatpush1.bf16.msra.mxu1 %v682_v13  ;;  %v762_v15 = vsel %vm753_vm4, %v2491_v23, %v748_v8 }
 0x159   : > { %1464 = vmatprep.subr.bf16.mxu1 %v2036_v54 }
 0x15a   : > { %v750_v14 = vpop.permute.xlu0 %749 }
 0x15b   : > { %v752_v17 = vpop.permute.xlu1 %751  ;;  %v763_v18 = vsel %vm753_vm4, %v748_v8, %v750_v14 }
 0x15c   : > { %v764_v19 = vsel %vm753_vm4, %v750_v14, %v752_v17  ;;  %1421 = vmatprep.subr.bf16.mxu0 %v763_v18 }
 0x15d   : > { %1465 = vmatpush1.bf16.msra.mxu1 %v764_v19  ;;  %1422 = vmatpush1.bf16.msra.mxu0 %v762_v15 }
 0x15e   : > { %v830_v61 = vpop.permute.xlu0 %829  ;;  %1466 = vmatprep.subr.bf16.mxu1 %v2036_v54 }
 0x15f   : > { %v844_v20 = vsel %vm835_vm5, %v2499_v37, %v830_v61  ;;  %v832_v21 = vpop.permute.xlu1 %831 }
 0x160   : > { %v845_v22 = vsel %vm835_vm5, %v830_v61, %v832_v21 }
 0x161   : > { %1423 = vmatprep.subr.bf16.mxu0 %v845_v22 }
 0x162   : > { %1424 = vmatpush1.bf16.msra.mxu0 %v844_v20  ;;  %v834_v24 = vpop.permute.xlu0 %833 }
 0x163   : > { %v846_v26 = vsel %vm835_vm5, %v832_v21, %v834_v24  ;;  %v912_v23 = vpop.permute.xlu1 %911 }
 0x164   : > { %1467 = vmatpush1.bf16.msra.mxu1 %v846_v26  ;;  %v926_v35 = vsel %vm917_vm6, %v2507_v47, %v912_v23 }
 0x165   : > { %1468 = vmatprep.subr.bf16.mxu1 %v2036_v54 }
 0x166   : > { %v914_v27 = vpop.permute.xlu0 %913 }
 0x167   : > { %v916_v7 = vpop.permute.xlu1 %915  ;;  %v927_v34 = vsel %vm917_vm6, %v912_v23, %v914_v27 }
 0x168   : > { %v928_v36 = vsel %vm917_vm6, %v914_v27, %v916_v7  ;;  %1425 = vmatprep.subr.bf16.mxu0 %v927_v34 }
 0x169   : > { %1469 = vmatpush1.bf16.msra.mxu1 %v928_v36  ;;  %1426 = vmatpush1.bf16.msra.mxu0 %v926_v35 }
 0x16a   : > { %v994_v37 = vpop.permute.xlu0 %993  ;;  %1470 = vmatprep.subr.bf16.mxu1 %v2036_v54 }
 0x16b   : > { %v1008_v38 = vsel %vm999_vm7, %v2515_v58, %v994_v37  ;;  %v996_v39 = vpop.permute.xlu1 %995 }
 0x16c   : > { %v1009_v42 = vsel %vm999_vm7, %v994_v37, %v996_v39 }
 0x16d   : > { %1427 = vmatprep.subr.bf16.mxu0 %v1009_v42 }
 0x16e   : > { %1428 = vmatpush1.bf16.msra.mxu0 %v1008_v38  ;;  %v998_v16 = vpop.permute.xlu0 %997 }
 0x16f   : > { %v1010_v44 = vsel %vm999_vm7, %v996_v39, %v998_v16  ;;  %v1076_v45 = vpop.permute.xlu1 %1075 }
 0x170   : > { %1471 = vmatpush1.bf16.msra.mxu1 %v1010_v44  ;;  %v1090_v49 = vsel %vm1081_vm8, %v2523_v1, %v1076_v45 }
 0x171   : > { %1472 = vmatprep.subr.bf16.mxu1 %v2036_v54 }
 0x172   : > { %v1078_v46 = vpop.permute.xlu0 %1077 }
 0x173   : > { %v1080_v47 = vpop.permute.xlu1 %1079  ;;  %v1091_v48 = vsel %vm1081_vm8, %v1076_v45, %v1078_v46 }
 0x174   : > { %v1092_v51 = vsel %vm1081_vm8, %v1078_v46, %v1080_v47  ;;  %1429 = vmatprep.subr.bf16.mxu0 %v1091_v48 }
 0x175   : > { %1473 = vmatpush1.bf16.msra.mxu1 %v1092_v51  ;;  %1430 = vmatpush1.bf16.msra.mxu0 %v1090_v49 }
 0x178   : > { %1489 = vmatmul.mubr.bf16.vlgmr.msra.gmra.mrb[8].mxu1 %v2439_v52  ;;  %1446 = vmatmul.mubr.bf16.vlgmr.msra.gmra.mrb[8].mxu0 %v2439_v52 }
 0x183   : > { %v2579_v25 = vpop.permute.xlu0 %1220 }
 0x186   : > { %v2581_v54 = vpop.permute.xlu1 %1225 }
 0x1d7   : > { %v1275_v53 = vpop.f32.mrb[0].mxu0 }
 0x1d8   : > { %v1277_v55 = vpop.f32.mrb[1].mxu0  ;;  %v1276_v57 = vadd.f32 %v1275_v53, %v2579_v25 }
 0x1d9   : > { %v1279_v58 = vpop.f32.mrb[2].mxu0  ;;  %v1278_v59 = vadd.f32 %v1277_v55, %v2579_v25 }
 0x1da   : > { %v1497_v62 = vmax.f32 %v1276_v57, 0.0  ;;  %v1280_v29 = vadd.f32 %v1279_v58, %v2581_v54  ;;  %v1281_v43 = vpop.f32.mrb[3].mxu0 }
 0x1db   : > { %v1498_v63 = vmax.f32 %v1278_v59, 0.0  ;;  %v1282_v0 = vadd.f32 %v1281_v43, %v2581_v54 }
 0x1dc   : > { %v1318_v52 = vpop.f32.mrb[0].mxu1  ;;  %v1508_v28 = vmax.f32 %v1280_v29, 0.0 }
 0x1dd   : > { %v1320_v1 = vpop.f32.mrb[1].mxu1  ;;  %v1319_v32 = vadd.f32 %v1318_v52, %v2579_v25  ;;  %v1833_v56 = vpack.c.bf16 %v1498_v63, %v1497_v62  ;;  %v1509_v41 = vmax.f32 %v1282_v0, 0.0 }
 0x1de   : > { %v1321_v3 = vadd.f32 %v1320_v1, %v2579_v25  ;;  %v1322_v40 = vpop.f32.mrb[2].mxu1 }
 0x1df   : > { %v1499_v4 = vmax.f32 %v1319_v32, 0.0  ;;  %1587 = vst [vmem:[%s2590_s15] sm:$0xff] %v1833_v56  ;;  %v1839_v33 = vpack.c.bf16 %v1509_v41, %v1508_v28  ;;  %v1323_v31 = vadd.f32 %v1322_v40, %v2581_v54  ;;  %v1324_v2 = vpop.f32.mrb[3].mxu1 }
 0x1e0   : > { %v1500_v5 = vmax.f32 %v1321_v3, 0.0  ;;  %v1325_v6 = vadd.f32 %v1324_v2, %v2581_v54 }
 0x1e1   : > { %1593 = vst [vmem:[%s2590_s15 + $0x2c] sm:$0xff] %v1839_v33  ;;  %v1510_v9 = vmax.f32 %v1323_v31, 0.0 }
 0x1e2   : > { %v1834_v60 = vpack.c.bf16 %v1500_v5, %v1499_v4  ;;  %v1511_v10 = vmax.f32 %v1325_v6, 0.0 }
 0x1e4   : > { %1588 = vst [vmem:[%s2590_s15 + $0x8] sm:$0xff] %v1834_v60  ;;  %v1840_v11 = vpack.c.bf16 %v1511_v10, %v1510_v9 }
 0x1e6   : > { %1594 = vst [vmem:[%s2590_s15 + $0x34] sm:$0xff] %v1840_v11 }
 0x1e8   : > { %v1635_v2 = vld [vmem:[%s2590_s15 + $0x2c] sm:$0xff] (%p2145_p10) }
 0x1e9   : > { %1636 = vst [vmem:[%s1610_s11 + $0x84] sm:$0xff] (%p2145_p10), %v1635_v2 }
 0x1eb   : > { %v1627_v40 = vld [vmem:[%s2590_s15 + $0x8] sm:$0xff] (%p2145_p10) }
 0x1ec   : > { %1628 = vst [vmem:[%s1610_s11 + $0x8] sm:$0xff] (%p2145_p10), %v1627_v40 }
 0x1ed   : > { %v1637_v5 = vld [vmem:[%s2590_s15 + $0x34] sm:$0xff] (%p2145_p10) }
 0x1ee   : > { %1638 = vst [vmem:[%s1610_s11 + $0x8c] sm:$0xff] (%p2145_p10), %v1637_v5 }
 0x218   : > { %v1361_v30 = vpop.f32.mrb[4].mxu0 }
 0x219   : > { %v1362_v50 = vadd.f32 %v1361_v30, %v2579_v25  ;;  %v1363_v12 = vpop.f32.mrb[5].mxu0 }
 0x21a   : > { %v1364_v13 = vadd.f32 %v1363_v12, %v2579_v25  ;;  %v1365_v8 = vpop.f32.mrb[6].mxu0 }
 0x21b   : > { %v1501_v14 = vmax.f32 %v1362_v50, 0.0  ;;  %v1366_v17 = vadd.f32 %v1365_v8, %v2581_v54  ;;  %v1367_v18 = vpop.f32.mrb[7].mxu0 }
 0x21c   : > { %v1502_v15 = vmax.f32 %v1364_v13, 0.0  ;;  %v1404_v19 = vpop.f32.mrb[4].mxu1  ;;  %v1368_v61 = vadd.f32 %v1367_v18, %v2581_v54 }
 0x21d   : > { %v1405_v20 = vadd.f32 %v1404_v19, %v2579_v25  ;;  %v1512_v21 = vmax.f32 %v1366_v17, 0.0  ;;  %v1406_v22 = vpop.f32.mrb[5].mxu1 }
 0x21e   : > { %v1835_v24 = vpack.c.bf16 %v1502_v15, %v1501_v14  ;;  %v1407_v26 = vadd.f32 %v1406_v22, %v2579_v25  ;;  %v1513_v23 = vmax.f32 %v1368_v61, 0.0  ;;  %v1408_v27 = vpop.f32.mrb[6].mxu1 }
 0x21f   : > { %v1503_v7 = vmax.f32 %v1405_v20, 0.0  ;;  %v1409_v34 = vadd.f32 %v1408_v27, %v2581_v54  ;;  %v1410_v35 = vpop.f32.mrb[7].mxu1 }
 0x220   : > { %1589 = vst [vmem:[%s2590_s15 + $0x10] sm:$0xff] %v1835_v24  ;;  %v1504_v36 = vmax.f32 %v1407_v26, 0.0  ;;  %v1841_v37 = vpack.c.bf16 %v1513_v23, %v1512_v21  ;;  %v1411_v38 = vadd.f32 %v1410_v35, %v2581_v54 }
 0x221   : > { %v1514_v39 = vmax.f32 %v1409_v34, 0.0 }
 0x222   : > { %v1836_v42 = vpack.c.bf16 %v1504_v36, %v1503_v7  ;;  %1595 = vst [vmem:[%s2590_s15 + $0x3c] sm:$0xff] %v1841_v37  ;;  %v1515_v16 = vmax.f32 %v1411_v38, 0.0 }
 0x224   : > { %1590 = vst [vmem:[%s2590_s15 + $0x18] sm:$0xff] %v1836_v42  ;;  %v1842_v44 = vpack.c.bf16 %v1515_v16, %v1514_v39 }
 0x226   : > { %1596 = vst [vmem:[%s2590_s15 + $0x44] sm:$0xff] %v1842_v44 }
 0x227   : > { %v1629_v4 = vld [vmem:[%s2590_s15 + $0x10] sm:$0xff] (%p2145_p10) }
 0x228   : > { %1630 = vst [vmem:[%s1610_s11 + $0x10] sm:$0xff] (%p2145_p10), %v1629_v4 }
 0x229   : > { %v1639_v6 = vld [vmem:[%s2590_s15 + $0x3c] sm:$0xff] (%p2145_p10) }
 0x22a   : > { %1640 = vst [vmem:[%s1610_s11 + $0x94] sm:$0xff] (%p2145_p10), %v1639_v6 }
 0x22b   : > { %v1631_v33 = vld [vmem:[%s2590_s15 + $0x18] sm:$0xff] (%p2145_p10) }
 0x22c   : > { %1632 = vst [vmem:[%s1610_s11 + $0x18] sm:$0xff] (%p2145_p10), %v1631_v33 }
 0x22d   : > { %v1641_v9 = vld [vmem:[%s2590_s15 + $0x44] sm:$0xff] (%p2145_p10) }
 0x22e   : > { %1642 = vst [vmem:[%s1610_s11 + $0x9c] sm:$0xff] (%p2145_p10), %v1641_v9 }
 0x24b   : > { %v1490_v45 = vpop.f32.mrb[8].mxu1  ;;  %v1447_v46 = vpop.f32.mrb[8].mxu0 }
 0x24c   : > { %v1491_v47 = vadd.f32 %v1490_v45, %v2579_v25  ;;  %v1448_v48 = vadd.f32 %v1447_v46, %v2579_v25  ;;  %v1492_v49 = vpop.f32.mrb[9].mxu1  ;;  %v1449_v51 = vpop.f32.mrb[9].mxu0 }
 0x24d   : > { %v1450_v53 = vadd.f32 %v1449_v51, %v2579_v25  ;;  %v1493_v55 = vpop.f32.mrb[10].mxu1  ;;  %v1451_v57 = vpop.f32.mrb[10].mxu0 }
 0x24e   : > { %v1507_v58 = vmax.f32 %v1491_v47, 0.0  ;;  %v1505_v59 = vmax.f32 %v1448_v48, 0.0  ;;  %v1494_v62 = vadd.f32 %v1493_v55, %v2581_v54  ;;  %v1452_v29 = vadd.f32 %v1451_v57, %v2581_v54  ;;  %v1495_v43 = vpop.f32.mrb[11].mxu1  ;;  %v1453_v63 = vpop.f32.mrb[11].mxu0 }
 0x24f   : > { %v1506_v0 = vmax.f32 %v1450_v53, 0.0  ;;  %v1454_v52 = vadd.f32 %v1453_v63, %v2581_v54  ;;  %1605 = sbr.rel (!%p2145_p10) target bundleno = 606 (0x25e), region = 92  ;;  %v1625_v54 = vld [vmem:[%s2590_s15] sm:$0xff] (%p2145_p10) }
 0x250   : > { %v1838_v28 = vpack.c.bf16 %v1507_v58, %v1507_v58  ;;  %v1518_v1 = vmax.f32 %v1494_v62, 0.0  ;;  %v1516_v25 = vmax.f32 %v1452_v29, 0.0  ;;  %1626 = vst [vmem:[%s1610_s11] sm:$0xff] (%p2145_p10), %v1625_v54 }
 0x251   : > { %v1837_v32 = vpack.c.bf16 %v1506_v0, %v1505_v59  ;;  %v1517_v56 = vmax.f32 %v1454_v52, 0.0 }
 0x252   : > { %1592 = vst [vmem:[%s2590_s15 + $0x28] sm:$0xf] %v1838_v28  ;;  %v1844_v41 = vpack.c.bf16 %v1518_v1, %v1518_v1 }
 0x253   : > { %1591 = vst [vmem:[%s2590_s15 + $0x20] sm:$0xff] %v1837_v32  ;;  %v1843_v3 = vpack.c.bf16 %v1517_v56, %v1516_v25 }
 0x254   : > { %1598 = vst [vmem:[%s2590_s15 + $0x54] sm:$0xf] %v1844_v41 }
 0x255   : > { %1597 = vst [vmem:[%s2590_s15 + $0x4c] sm:$0xff] %v1843_v3 }
 0x259   : > { %v1827_v10 = vld [vmem:[%s2590_s15 + $0x28] sm:$0xf] }
 0x25a   : > { %v1633_v31 = vld [vmem:[%s2590_s15 + $0x20] sm:$0xff]  ;;  %1828 = vst [vmem:[%s1610_s11 + $0x28] sm:$0xf] %v1827_v10 }
 0x25b   : > { %v1829_v11 = vld [vmem:[%s2590_s15 + $0x54] sm:$0xf]  ;;  %1634 = vst [vmem:[%s1610_s11 + $0x20] sm:$0xff] %v1633_v31 }
 0x25c   : > { %v1643_v60 = vld [vmem:[%s2590_s15 + $0x4c] sm:$0xff]  ;;  %1830 = vst [vmem:[%s1610_s11 + $0xac] sm:$0xf] %v1829_v11 }
 0x25d   : > { %1644 = vst [vmem:[%s1610_s11 + $0xa4] sm:$0xff] %v1643_v60 }
 0x25e PF: > { %s14_s23 = sadd.s32 1, %s2026_s23   ;;  %s2674_s15 = smov %s1998_s16 }
 0x25f   : > { %p11_p1 = scmp.ge.s32.totalorder %s14_s23, 8   ;;  %s2675_s16 = smov %s2153_s14 }
 0x260   : > { %s2676_s17 = smov %s2006_s18  ;;  %s2677_s18 = smov %s2150_s13 }
 0x261   : > { %s2678_s19 = smov %s2018_s21  ;;  %s2679_s20 = smov %s2022_s22 }
 0x262   : > { %s2680_s21 = smov %s2113_s28  ;;  %s2681_s22 = smov %s2685_s26 }
 0x263   :  { %13 = sbr.rel (!%p11_p1) target bundleno = 5 (0x5), region = 175 }

// kernel: decoder_forward.23
= control target key start
LH: loop header
LB: loop body
LE: loop exit
PB: predicated region body
PF: predicated region fallthrough
CT: control target
= control target key end

     0   :  { %s1952_s15 = smov 0   ;;  %s1954_s16 = smov 0   ;;  %s2495_s0 = inlined_call_operand.vmem [shape: bf16[2,16,5632], index: 0, kind: input, shape index: {}, may-alias: {0,1}]   ;;  %s2496_s1 = inlined_call_operand.vmem [shape: bf16[2,16,5632], index: 1, kind: input, shape index: {}, may-alias: {0,1}]   ;;  %s2497_s2 = inlined_call_operand.vmem [shape: bf16[8,144], index: 2, kind: input, shape index: {}]   ;;  %s2498_s3 = inlined_call_operand.vmem [shape: f32[8,1], index: 3, kind: input, shape index: {}]   ;;  %s2499_s4 = inlined_call_operand.vmem [shape: bf16[2,8,4224], index: 4, kind: output, shape index: {}]  }
   0x1   :  { %s1956_s17 = smov 0   ;;  %s1958_s18 = smov 0  }
   0x2   :  { %s1960_s19 = smov 0   ;;  %s1962_s20 = smov 0  }
   0x3   :  { %s1964_s21 = smov 0   ;;  %s1966_s22 = smov 0  }
   0x4   :  { %s1968_s23 = smov 0  }
   0x5 LB: > { %s23_s24 = sadd.s32 1, %s1908_s21  ;;  %s26_s25 = sadd.s32 1, %s1912_s22  ;;  %s1916_s23 = sphi %s1968_s23, %s14_s23   ;;  %s1912_s22 = sphi %s1966_s22, %s2509_s22   ;;  %s1908_s21 = sphi %s1964_s21, %s2508_s21   ;;  %s1904_s20 = sphi %s1962_s20, %s2507_s20   ;;  %s1900_s19 = sphi %s1960_s19, %s2506_s19   ;;  %s1896_s18 = sphi %s1958_s18, %s2505_s18   ;;  %s1892_s17 = sphi %s1956_s17, %s2504_s17   ;;  %s1888_s16 = sphi %s1954_s16, %s2503_s16   ;;  %s1884_s15 = sphi %s1952_s15, %s2502_s15  }
   0x6   : > { %p24_p0 = scmp.ge.s32.totalorder %s23_s24, 3  ;;  %p42_p1 = scmp.ne.s32.totalorder %s1896_s18, %s1892_s17 }
   0x7   : > { %p43_p2 = scmp.eq.s32.totalorder %s1916_s23, 0  ;;  %s35_s5 = sadd.s32 1, %s1896_s18 }
   0x8   : > { %s2002_s26 = scalar_select %p24_p0, 0, %s23_s24  }
   0x9   : > { %s2511_s25 = smov (!%p24_p0, %s26_s25), %s1912_s22  ;;  %p2007_p3 = por %p43_p2, %p42_p1 }
   0xa   : > { %p28_p4 = scmp.ge.s32.totalorder %s2511_s25, 2  ;;  %s59_s28 = sadd.s32 1, %s2002_s26 }
   0xb   : > { %s31_s29 = ssub.s32 %s1908_s21, %s2002_s26  ;;  %s61_s30 = ssub.s32 %s23_s24, %s59_s28 }
   0xc   : > { %s2513_s25 = smov (%p28_p4, %s2511_s25), 0  ;;  %p72_p5 = scmp.ne.s32.totalorder %s1888_s16, %s1884_s15 }
   0xd   : > { %s30_s6 = ssub.s32 %s1912_s22, %s2513_s25  ;;  %s65_s7 = sadd.s32 1, %s1888_s16 }
   0xe   : > { %s32_s8 = sor.u32 %s31_s29, %s30_s6  ;;  %s62_s9 = sor.u32 %s61_s30, %s30_s6 }
   0xf   : > { %p33_p6 = scmp.eq.s32.totalorder %s32_s8, 0  ;;  %p63_p7 = scmp.eq.s32.totalorder %s62_s9, 0 }
  0x10   : > { %p2024_p8 = por %p72_p5, %p43_p2  ;;  %p1679_p9 = scmp.ge.s32.totalorder %s1916_s23, 6 }
  0x11   : > { %s2029_s11 = scalar_select %p33_p6, %s1896_s18, %s35_s5  }
  0x12   : > { %s2032_s12 = scalar_select %p63_p7, %s1888_s16, %s65_s7  }
  0x13   : > { %174 = sbr.rel (%p1679_p9) target bundleno = 56 (0x38), region = 24 }
  0x1a   : > { %177 = sbr.rel (!%p2007_p3) target bundleno = 41 (0x29), region = 28  ;;  %s179_s13 = sand.u32 (%p2007_p3), 1, %s1896_s18  }
  0x1b   : > { %s182_s14 = smul.u32 (%p2007_p3), 11, %s1908_s21 }
  0x1c   : > { %s1737_s24 = smul.u32 (%p2007_p3), 88, %s179_s13 }
  0x1d   : > { %s1738_s28 = smul.u32 (%p2007_p3), 88, %s1912_s22 }
  0x1e   : > { %s181_s8 = scalar_lea.vmem (%p2007_p3), [#allocation4], %s1737_s24 }
  0x1f   : > { %s184_s29 = sadd.s32 (%p2007_p3), %s1738_s28, %s182_s14 }
  0x20   : > { %s1680_s30 = sshll.u32 (%p2007_p3), %s184_s29, 2 }
  0x21   : > { %s186_s7 = scalar_lea.vmem %s2495_s0, %s1680_s30 }
  0x22   : > { %v201_v0 = vld [vmem:[%s186_s7] sm:$0xff]  ;;  %v203_v1 = vld [vmem:[%s186_s7 + $0x8] sm:$0xff]  ;;  %v205_v2 = vld [vmem:[%s186_s7 + $0x10] sm:$0xff] }
  0x23   : > { %202 = vst [vmem:[%s181_s8] sm:$0xff] %v201_v0  ;;  %204 = vst [vmem:[%s181_s8 + $0x8] sm:$0xff] %v203_v1  ;;  %v207_v3 = vld [vmem:[%s186_s7 + $0x18] sm:$0xff]  ;;  %v209_v4 = vld [vmem:[%s186_s7 + $0x20] sm:$0xff] }
  0x24   : > { %206 = vst [vmem:[%s181_s8 + $0x10] sm:$0xff] %v205_v2  ;;  %v211_v5 = vld [vmem:[%s186_s7 + $0xb0] sm:$0xff]  ;;  %208 = vst [vmem:[%s181_s8 + $0x18] sm:$0xff] %v207_v3  ;;  %v213_v6 = vld [vmem:[%s186_s7 + $0xb8] sm:$0xff] }
  0x25   : > { %210 = vst [vmem:[%s181_s8 + $0x20] sm:$0xff] %v209_v4  ;;  %212 = vst [vmem:[%s181_s8 + $0x2c] sm:$0xff] %v211_v5  ;;  %v215_v7 = vld [vmem:[%s186_s7 + $0xc0] sm:$0xff]  ;;  %v217_v8 = vld [vmem:[%s186_s7 + $0xc8] sm:$0xff] }
  0x26   : > { %214 = vst [vmem:[%s181_s8 + $0x34] sm:$0xff] %v213_v6  ;;  %216 = vst [vmem:[%s181_s8 + $0x3c] sm:$0xff] %v215_v7  ;;  %v219_v9 = vld [vmem:[%s186_s7 + $0xd0] sm:$0xff]  ;;  %v1681_v10 = vld [vmem:[%s186_s7 + $0x28] sm:$0xf] }
  0x27   : > { %218 = vst [vmem:[%s181_s8 + $0x44] sm:$0xff] %v217_v8  ;;  %v1683_v11 = vld [vmem:[%s186_s7 + $0xd8] sm:$0xf]  ;;  %220 = vst [vmem:[%s181_s8 + $0x4c] sm:$0xff] %v219_v9 }
  0x28   : > { %1682 = vst [vmem:[%s181_s8 + $0x28] sm:$0xf] %v1681_v10  ;;  %1684 = vst [vmem:[%s181_s8 + $0x54] sm:$0xf] %v1683_v11 }
  0x29 PF: > { %237 = sbr.rel (!%p2024_p8) target bundleno = 56 (0x38), region = 54  ;;  %s239_s27 = sand.u32 (%p2024_p8), 1, %s1888_s16  }
  0x2a   : > { %s1591_s9 = smul.u32 (%p2024_p8), 11, %s1908_s21 }
  0x2b   : > { %s1739_s13 = smul.u32 (%p2024_p8), 88, %s239_s27 }
  0x2c   : > { %s1592_s14 = smul.u32 (%p2024_p8), 88, %s1912_s22 }
  0x2d   : > { %s241_s5 = scalar_lea.vmem (%p2024_p8), [#allocation5], %s1739_s13 }
  0x2e   : > { %s1593_s24 = sadd.s32 (%p2024_p8), %s1592_s14, %s1591_s9 }
  0x2f   : > { %s1685_s28 = sshll.u32 (%p2024_p8), %s1593_s24, 2 }
  0x30   : > { %s1595_s6 = scalar_lea.vmem %s2496_s1, %s1685_s28 }
  0x31   : > { %v1686_v12 = vld [vmem:[%s1595_s6 + $0x2c] sm:$0xff]  ;;  %v1687_v13 = vld [vmem:[%s1595_s6 + $0x34] sm:$0xff]  ;;  %v1688_v14 = vld [vmem:[%s1595_s6 + $0x3c] sm:$0xff] }
  0x32   : > { %263 = vst [vmem:[%s241_s5] sm:$0xff] %v1686_v12  ;;  %265 = vst [vmem:[%s241_s5 + $0x8] sm:$0xff] %v1687_v13  ;;  %v1689_v15 = vld [vmem:[%s1595_s6 + $0x44] sm:$0xff]  ;;  %v1690_v16 = vld [vmem:[%s1595_s6 + $0x4c] sm:$0xff] }
  0x33   : > { %267 = vst [vmem:[%s241_s5 + $0x10] sm:$0xff] %v1688_v14  ;;  %v1691_v17 = vld [vmem:[%s1595_s6 + $0xdc] sm:$0xff]  ;;  %269 = vst [vmem:[%s241_s5 + $0x18] sm:$0xff] %v1689_v15  ;;  %v1692_v18 = vld [vmem:[%s1595_s6 + $0xe4] sm:$0xff] }
  0x34   : > { %271 = vst [vmem:[%s241_s5 + $0x20] sm:$0xff] %v1690_v16  ;;  %273 = vst [vmem:[%s241_s5 + $0x2c] sm:$0xff] %v1691_v17  ;;  %v1693_v19 = vld [vmem:[%s1595_s6 + $0xec] sm:$0xff]  ;;  %v1694_v20 = vld [vmem:[%s1595_s6 + $0xf4] sm:$0xff] }
  0x35   : > { %275 = vst [vmem:[%s241_s5 + $0x34] sm:$0xff] %v1692_v18  ;;  %277 = vst [vmem:[%s241_s5 + $0x3c] sm:$0xff] %v1693_v19  ;;  %v1695_v21 = vld [vmem:[%s1595_s6 + $0xfc] sm:$0xff]  ;;  %v1696_v22 = vld [vmem:[%s1595_s6 + $0x54] sm:$0xf] }
  0x36   : > { %279 = vst [vmem:[%s241_s5 + $0x44] sm:$0xff] %v1694_v20  ;;  %v1698_v23 = vld [vmem:[%s1595_s6 + $0x104] sm:$0xf]  ;;  %281 = vst [vmem:[%s241_s5 + $0x4c] sm:$0xff] %v1695_v21 }
  0x37   : > { %1697 = vst [vmem:[%s241_s5 + $0x28] sm:$0xf] %v1696_v22  ;;  %1699 = vst [vmem:[%s241_s5 + $0x54] sm:$0xf] %v1698_v23 }
  0x38 PF: > { %p1700_p10 = scmp.ge.s32.totalorder %s1916_s23, 1  ;;  %p297_p11 = scmp.lt.s32.totalorder %s1916_s23, 7 }
  0x3a   : > { %p298_p12 = pnand %p1700_p10, %p297_p11 }
  0x3b   : > { %s304_s10 = sand.u32 (!%p298_p12), 1, %s1892_s17   ;;  %s1918_s27 = smov (!%p298_p12), 127   ;;  %v2112_v30 = vld [vmem:[%s2497_s2] sm:$0xff] (!%p298_p12)  ;;  %vm1241_vm0 = vcmask (!%p298_p12), 130048   ;;  %vm521_vm1 = vcmask (!%p298_p12), 1039360   ;;  %vm603_vm2 = vcmask (!%p298_p12), 1031168  }
  0x3c   : > { %301 = sbr.rel (%p298_p12) target bundleno = 593 (0x251), region = 80  ;;  %s1919_s17 = smov (!%p298_p12), 126   ;;  %v2116_v31 = vcombine.high (!%p298_p12), %v2112_v30, %v2112_v30  ;;  %vm685_vm3 = vcmask (!%p298_p12), 506880   ;;  %v1926_v55 = vmov (!%p298_p12), 0   ;;  %vm767_vm4 = vcmask (!%p298_p12), 498688  }
  0x3d   : > { %s1740_s7 = smul.u32 (!%p298_p12), 88, %s304_s10  ;;  %s311_s9 = sand.u32 (!%p298_p12), 1, %s1884_s15   ;;  %1824 = vset.pattern.permute.xlu0 (!%p298_p12), %v1926_v55  ;;  %vm849_vm5 = vcmask (!%p298_p12), 490496   ;;  %vm931_vm6 = vcmask (!%p298_p12), 1014784   ;;  %vm1013_vm7 = vcmask (!%p298_p12), 1006592   ;;  %vm1095_vm8 = vcmask (!%p298_p12), 998400  }
  0x3e   : > { %s2074_s13 = smul.u32 (!%p298_p12), 88, %s311_s9  ;;  %s1920_s24 = smov (!%p298_p12), 62   ;;  %1717 = vmatprep.mubr.msk.bf16.mxu0 (!%p298_p12), %vm1241_vm0, %v2116_v31  ;;  %1718 = vmatprep.mubr.msk.bf16.mxu1 (!%p298_p12), %vm1241_vm0, %v2116_v31 }
  0x3f   : > { %s2054_s8 = scalar_lea.vmem (!%p298_p12), [#allocation4], %s1740_s7  ;;  %s1921_s15 = smov (!%p298_p12), 61  }
  0x40   : > { %v1825_v24 = vld [vmem:[%s2054_s8 + $0x4] ss:$44 sps:$4 sm:$0xff] (!%p298_p12)   ;;  %v1827_v25 = vld [vmem:[%s2054_s8] ss:$44 sps:$4 sm:$0xff] (!%p298_p12)   ;;  %v1828_v26 = vld [vmem:[%s2054_s8 + $0x8] ss:$44 sps:$4 sm:$0xff] (!%p298_p12)  }
  0x41   : > { %499 = vrot.lane.b32.xlu0 (!%p298_p12), %v1825_v24, %s1918_s27  ;;  %v1830_v27 = vld [vmem:[%s2054_s8 + $0xc] ss:$44 sps:$4 sm:$0xff] (!%p298_p12)   ;;  %1245 = vmatprep.subr.bf16.mxu0 (!%p298_p12), %v1825_v24  ;;  %v2064_v28 = vld [vmem:[%s2054_s8 + $0x10] ss:$44 sps:$4 sm:$0xff] (!%p298_p12)   ;;  %s313_s14 = scalar_lea.vmem (!%p298_p12), [#allocation5], %s2074_s13  ;;  %s1922_s28 = smov (!%p298_p12), 60  }
  0x42   : > { %497 = vrot.lane.b32.xlu1 (!%p298_p12), %v1827_v25, %s1918_s27  ;;  %1246 = vmatpush1.bf16.msra.mxu0 (!%p298_p12), %v1827_v25  ;;  %s1923_s29 = smov (!%p298_p12), 124   ;;  %v2101_v29 = vld [vmem:[%s2054_s8 + $0x14] ss:$44 sps:$4 sm:$0xff] (!%p298_p12)   ;;  %s1924_s30 = smov (!%p298_p12), 123   ;;  %v2135_v32 = vld [vmem:[%s2054_s8 + $0x18] ss:$44 sps:$4 sm:$0xff] (!%p298_p12)  }
  0x43   : > { %1286 = vmatprep.subr.bf16.mxu1 %v1830_v27  ;;  %s1925_s10 = smov 122   ;;  %v2140_v33 = vld [vmem:[%s2054_s8 + $0x1c] ss:$44 sps:$4 sm:$0xff]   ;;  %v2145_v34 = vld [vmem:[%s2054_s8 + $0x20] ss:$44 sps:$4 sm:$0xff]   ;;  %p348_p13 = scmp.lt.s32.totalorder %s1904_s20, 1 }
  0x44   : > { %1287 = vmatpush1.bf16.msra.mxu1 %v1828_v26  ;;  %v2190_v41 = vld [vmem:[%s2054_s8 + $0x24] ss:$44 sps:$4 sm:$0xff]   ;;  %v2228_v61 = vld [vmem:[%s2054_s8 + $0x28] ss:$44 sps:$4 sm:$0xff]  }
  0x45   : > { %501 = vrot.lane.b32.xlu0 %v1828_v26, %s1918_s27  ;;  %v2239_v2 = vld [vmem:[%s313_s14] ss:$44 sps:$4 sm:$0xff]   ;;  %s2515_s20 = smov (!%p348_p13, %s1904_s20), 1 }
  0x46   : > { %503 = vrot.lane.b32.xlu1 %v1830_v27, %s1918_s27 }
  0x49   : > { %505 = vrot.lane.b32.xlu0 %v2064_v28, %s1918_s27 }
  0x4a   : > { %581 = vrot.lane.b32.xlu1 %v1825_v24, %s1919_s17 }
  0x4d   : > { %583 = vrot.lane.b32.xlu0 %v1828_v26, %s1919_s17 }
  0x4e   : > { %579 = vrot.lane.b32.xlu1 %v1827_v25, %s1919_s17 }
  0x51   : > { %585 = vrot.lane.b32.xlu0 %v1830_v27, %s1919_s17 }
  0x52   : > { %587 = vrot.lane.b32.xlu1 %v2064_v28, %s1919_s17 }
  0x55   : > { %663 = vrot.lane.b32.xlu0 %v1825_v24, %s1920_s24 }
  0x56   : > { %665 = vrot.lane.b32.xlu1 %v1828_v26, %s1920_s24 }
  0x59   : > { %661 = vrot.lane.b32.xlu0 %v1827_v25, %s1920_s24 }
  0x5a   : > { %667 = vrot.lane.b32.xlu1 %v1830_v27, %s1920_s24 }
  0x5d   : > { %669 = vrot.lane.b32.xlu0 %v2064_v28, %s1920_s24 }
  0x5e   : > { %745 = vrot.lane.b32.xlu1 %v1825_v24, %s1921_s15 }
  0x61   : > { %747 = vrot.lane.b32.xlu0 %v1828_v26, %s1921_s15 }
  0x62   : > { %743 = vrot.lane.b32.xlu1 %v1827_v25, %s1921_s15 }
  0x65   : > { %749 = vrot.lane.b32.xlu0 %v1830_v27, %s1921_s15 }
  0x66   : > { %751 = vrot.lane.b32.xlu1 %v2064_v28, %s1921_s15 }
  0x69   : > { %827 = vrot.lane.b32.xlu0 %v1825_v24, %s1922_s28 }
  0x6a   : > { %829 = vrot.lane.b32.xlu1 %v1828_v26, %s1922_s28 }
  0x6d   : > { %825 = vrot.lane.b32.xlu0 %v1827_v25, %s1922_s28 }
  0x6e   : > { %831 = vrot.lane.b32.xlu1 %v1830_v27, %s1922_s28 }
  0x71   : > { %833 = vrot.lane.b32.xlu0 %v2064_v28, %s1922_s28 }
  0x72   : > { %909 = vrot.lane.b32.xlu1 %v1828_v26, %s1923_s29 }
  0x75   : > { %911 = vrot.lane.b32.xlu0 %v1830_v27, %s1923_s29 }
  0x76   : > { %907 = vrot.lane.b32.xlu1 %v1825_v24, %s1923_s29 }
  0x79   : > { %913 = vrot.lane.b32.xlu0 %v2064_v28, %s1923_s29 }
  0x7a   : > { %915 = vrot.lane.b32.xlu1 %v2101_v29, %s1923_s29 }
  0x7d   : > { %991 = vrot.lane.b32.xlu0 %v1828_v26, %s1924_s30 }
  0x7e   : > { %993 = vrot.lane.b32.xlu1 %v1830_v27, %s1924_s30 }
  0x81   : > { %989 = vrot.lane.b32.xlu0 %v1825_v24, %s1924_s30 }
  0x82   : > { %995 = vrot.lane.b32.xlu1 %v2064_v28, %s1924_s30 }
  0x85   : > { %997 = vrot.lane.b32.xlu0 %v2101_v29, %s1924_s30 }
  0x86   : > { %1073 = vrot.lane.b32.xlu1 %v1828_v26, %s1925_s10 }
  0x89   : > { %1075 = vrot.lane.b32.xlu0 %v1830_v27, %s1925_s10 }
  0x8a   : > { %1071 = vrot.lane.b32.xlu1 %v1825_v24, %s1925_s10 }
  0x8d   : > { %1077 = vrot.lane.b32.xlu0 %v2064_v28, %s1925_s10 }
  0x8e   : > { %1079 = vrot.lane.b32.xlu1 %v2101_v29, %s1925_s10 }
  0x91   : > { %507 = vrot.lane.b32.xlu0 %v2101_v29, %s1918_s27 }
  0x92   : > { %509 = vrot.lane.b32.xlu1 %v2135_v32, %s1918_s27 }
  0x95   : > { %511 = vrot.lane.b32.xlu0 %v2140_v33, %s1918_s27 }
  0x96   : > { %513 = vrot.lane.b32.xlu1 %v2145_v34, %s1918_s27 }
  0x99   : > { %589 = vrot.lane.b32.xlu0 %v2101_v29, %s1919_s17 }
  0x9a   : > { %591 = vrot.lane.b32.xlu1 %v2135_v32, %s1919_s17 }
  0x9d   : > { %593 = vrot.lane.b32.xlu0 %v2140_v33, %s1919_s17 }
  0x9e   : > { %595 = vrot.lane.b32.xlu1 %v2145_v34, %s1919_s17 }
  0xa1   : > { %671 = vrot.lane.b32.xlu0 %v2101_v29, %s1920_s24 }
  0xa2   : > { %673 = vrot.lane.b32.xlu1 %v2135_v32, %s1920_s24 }
  0xa5   : > { %675 = vrot.lane.b32.xlu0 %v2140_v33, %s1920_s24 }
  0xa6   : > { %677 = vrot.lane.b32.xlu1 %v2145_v34, %s1920_s24 }
  0xa9   : > { %753 = vrot.lane.b32.xlu0 %v2101_v29, %s1921_s15 }
  0xaa   : > { %755 = vrot.lane.b32.xlu1 %v2135_v32, %s1921_s15 }
  0xad   : > { %757 = vrot.lane.b32.xlu0 %v2140_v33, %s1921_s15 }
  0xae   : > { %759 = vrot.lane.b32.xlu1 %v2145_v34, %s1921_s15 }
  0xb1   : > { %835 = vrot.lane.b32.xlu0 %v2101_v29, %s1922_s28 }
  0xb2   : > { %837 = vrot.lane.b32.xlu1 %v2135_v32, %s1922_s28 }
  0xb3   : > { %v500_v35 = vpop.permute.xlu0 %499 }
  0xb4   : > { %v498_v36 = vpop.permute.xlu1 %497 }
  0xb5   : > { %839 = vrot.lane.b32.xlu0 %v2140_v33, %s1922_s28  ;;  %v522_v40 = vsel %vm521_vm1, %v498_v36, %v500_v35  ;;  %v1843_v36 = vld [vmem:[%s313_s14 + $0x4] ss:$44 sps:$4 sm:$0xff]  }
  0xb6   : > { %841 = vrot.lane.b32.xlu1 %v2145_v34, %s1922_s28 }
  0xb7   : > { %v502_v37 = vpop.permute.xlu0 %501 }
  0xb8   : > { %v504_v38 = vpop.permute.xlu1 %503  ;;  %v523_v39 = vsel %vm521_vm1, %v500_v35, %v502_v37 }
  0xb9   : > { %917 = vrot.lane.b32.xlu0 %v2135_v32, %s1923_s29  ;;  %1247 = vmatprep.subr.bf16.mxu0 %v523_v39  ;;  %v524_v45 = vsel %vm521_vm1, %v502_v37, %v504_v38 }
  0xba   : > { %919 = vrot.lane.b32.xlu1 %v2140_v33, %s1923_s29  ;;  %1248 = vmatpush1.bf16.msra.mxu0 %v522_v40 }
  0xbb   : > { %v2192_v42 = vpop.permute.xlu0 %505 }
  0xbc   : > { %v582_v43 = vpop.permute.xlu1 %581  ;;  %v525_v44 = vsel %vm521_vm1, %v504_v38, %v2192_v42 }
  0xbd   : > { %921 = vrot.lane.b32.xlu0 %v2145_v34, %s1923_s29  ;;  %1288 = vmatprep.subr.bf16.mxu1 %v525_v44 }
  0xbe   : > { %923 = vrot.lane.b32.xlu1 %v2190_v41, %s1923_s29  ;;  %1289 = vmatpush1.bf16.msra.mxu1 %v524_v45 }
  0xbf   : > { %v584_v46 = vpop.permute.xlu0 %583 }
  0xc0   : > { %v580_v47 = vpop.permute.xlu1 %579  ;;  %v605_v48 = vsel %vm603_vm2, %v582_v43, %v584_v46 }
  0xc1   : > { %999 = vrot.lane.b32.xlu0 %v2135_v32, %s1924_s30  ;;  %1249 = vmatprep.subr.bf16.mxu0 %v605_v48  ;;  %v604_v49 = vsel %vm603_vm2, %v580_v47, %v582_v43 }
  0xc2   : > { %1001 = vrot.lane.b32.xlu1 %v2140_v33, %s1924_s30  ;;  %1250 = vmatpush1.bf16.msra.mxu0 %v604_v49 }
  0xc3   : > { %v586_v50 = vpop.permute.xlu0 %585 }
  0xc4   : > { %v2207_v51 = vpop.permute.xlu1 %587  ;;  %v606_v52 = vsel %vm603_vm2, %v584_v46, %v586_v50 }
  0xc5   : > { %1003 = vrot.lane.b32.xlu0 %v2145_v34, %s1924_s30  ;;  %v607_v53 = vsel %vm603_vm2, %v586_v50, %v2207_v51 }
  0xc6   : > { %1005 = vrot.lane.b32.xlu1 %v2190_v41, %s1924_s30  ;;  %1290 = vmatprep.subr.bf16.mxu1 %v607_v53 }
  0xc7   : > { %1291 = vmatpush1.bf16.msra.mxu1 %v606_v52  ;;  %v664_v54 = vpop.permute.xlu0 %663 }
  0xc8   : > { %v666_v56 = vpop.permute.xlu1 %665 }
  0xc9   : > { %1081 = vrot.lane.b32.xlu0 %v2135_v32, %s1925_s10  ;;  %v687_v57 = vsel %vm685_vm3, %v664_v54, %v666_v56 }
  0xca   : > { %1083 = vrot.lane.b32.xlu1 %v2140_v33, %s1925_s10  ;;  %1251 = vmatprep.subr.bf16.mxu0 %v687_v57 }
  0xcb   : > { %v662_v58 = vpop.permute.xlu0 %661 }
  0xcc   : > { %v668_v59 = vpop.permute.xlu1 %667  ;;  %v686_v60 = vsel %vm685_vm3, %v662_v58, %v664_v54  ;;  %v2317_v54 = vcombine.low %v2112_v30, %v2112_v30 }
  0xcd   : > { %1085 = vrot.lane.b32.xlu0 %v2145_v34, %s1925_s10  ;;  %1252 = vmatpush1.bf16.msra.mxu0 %v686_v60  ;;  %v688_v1 = vsel %vm685_vm3, %v666_v56, %v668_v59  ;;  %v1229_v56 = vld [vmem:[%s2498_s3] sm:$0xff] }
  0xce   : > { %1087 = vrot.lane.b32.xlu1 %v2190_v41, %s1925_s10 }
  0xcf   : > { %v2230_v62 = vpop.permute.xlu0 %669 }
  0xd0   : > { %v746_v63 = vpop.permute.xlu1 %745  ;;  %v689_v0 = vsel %vm685_vm3, %v668_v59, %v2230_v62 }
  0xd1   : > { %515 = vrot.lane.b32.xlu0 %v2190_v41, %s1918_s27  ;;  %1292 = vmatprep.subr.bf16.mxu1 %v689_v0 }
  0xd2   : > { %517 = vrot.lane.b32.xlu1 %v2228_v61, %s1918_s27  ;;  %1293 = vmatpush1.bf16.msra.mxu1 %v688_v1 }
  0xd3   : > { %v748_v3 = vpop.permute.xlu0 %747 }
  0xd4   : > { %v744_v4 = vpop.permute.xlu1 %743  ;;  %v769_v5 = vsel %vm767_vm4, %v746_v63, %v748_v3 }
  0xd5   : > { %519 = vrot.lane.b32.xlu0 %v2239_v2, %s1918_s27  ;;  %1253 = vmatprep.subr.bf16.mxu0 %v769_v5  ;;  %v768_v6 = vsel %vm767_vm4, %v744_v4, %v746_v63  ;;  %s347_s27 = smul.u32 11, %s1900_s19 }
  0xd6   : > { %597 = vrot.lane.b32.xlu1 %v2190_v41, %s1919_s17  ;;  %1254 = vmatpush1.bf16.msra.mxu0 %v768_v6 }
  0xd7   : > { %v750_v7 = vpop.permute.xlu0 %749  ;;  %p350_p0 = scmp.lt.s32.totalorder %s347_s27, 32 }
  0xd8   : > { %v2249_v8 = vpop.permute.xlu1 %751  ;;  %v770_v9 = vsel %vm767_vm4, %v748_v3, %v750_v7 }
  0xd9   : > { %599 = vrot.lane.b32.xlu0 %v2228_v61, %s1919_s17  ;;  %v771_v10 = vsel %vm767_vm4, %v750_v7, %v2249_v8  ;;  %s2517_s27 = smov (!%p350_p0, %s347_s27), 32 }
  0xda   : > { %601 = vrot.lane.b32.xlu1 %v2239_v2, %s1919_s17  ;;  %1294 = vmatprep.subr.bf16.mxu1 %v771_v10  ;;  %s1742_s17 = smul.u32 33, %s2515_s20 }
  0xdb   : > { %1295 = vmatpush1.bf16.msra.mxu1 %v770_v9  ;;  %v828_v11 = vpop.permute.xlu0 %827 }
  0xdc   : > { %v830_v12 = vpop.permute.xlu1 %829  ;;  %s353_s9 = sadd.s32 %s1742_s17, %s2517_s27 }
  0xdd   : > { %679 = vrot.lane.b32.xlu0 %v2190_v41, %s1920_s24  ;;  %v851_v13 = vsel %vm849_vm5, %v828_v11, %v830_v12  ;;  %s1701_s13 = sshll.u32 %s353_s9, 2 }
  0xde   : > { %681 = vrot.lane.b32.xlu1 %v2228_v61, %s1920_s24  ;;  %1255 = vmatprep.subr.bf16.mxu0 %v851_v13  ;;  %s2460_s19 = scalar_lea.vmem %s2499_s4, %s1701_s13 }
  0xdf   : > { %v826_v14 = vpop.permute.xlu0 %825 }
  0xe0   : > { %v832_v15 = vpop.permute.xlu1 %831  ;;  %v850_v16 = vsel %vm849_vm5, %v826_v14, %v828_v11 }
  0xe1   : > { %683 = vrot.lane.b32.xlu0 %v2239_v2, %s1920_s24  ;;  %1256 = vmatpush1.bf16.msra.mxu0 %v850_v16  ;;  %v852_v20 = vsel %vm849_vm5, %v830_v12, %v832_v15 }
  0xe2   : > { %761 = vrot.lane.b32.xlu1 %v2190_v41, %s1921_s15 }
  0xe3   : > { %v2268_v17 = vpop.permute.xlu0 %833 }
  0xe4   : > { %v910_v18 = vpop.permute.xlu1 %909  ;;  %v853_v19 = vsel %vm849_vm5, %v832_v15, %v2268_v17 }
  0xe5   : > { %763 = vrot.lane.b32.xlu0 %v2228_v61, %s1921_s15  ;;  %1296 = vmatprep.subr.bf16.mxu1 %v853_v19 }
  0xe6   : > { %765 = vrot.lane.b32.xlu1 %v2239_v2, %s1921_s15  ;;  %1297 = vmatpush1.bf16.msra.mxu1 %v852_v20 }
  0xe7   : > { %v912_v21 = vpop.permute.xlu0 %911 }
  0xe8   : > { %v908_v22 = vpop.permute.xlu1 %907  ;;  %v933_v23 = vsel %vm931_vm6, %v910_v18, %v912_v21 }
  0xe9   : > { %843 = vrot.lane.b32.xlu0 %v2190_v41, %s1922_s28  ;;  %1257 = vmatprep.subr.bf16.mxu0 %v933_v23  ;;  %v932_v24 = vsel %vm931_vm6, %v908_v22, %v910_v18 }
  0xea   : > { %845 = vrot.lane.b32.xlu1 %v2228_v61, %s1922_s28  ;;  %1258 = vmatpush1.bf16.msra.mxu0 %v932_v24 }
  0xeb   : > { %v914_v25 = vpop.permute.xlu0 %913 }
  0xec   : > { %v2283_v26 = vpop.permute.xlu1 %915  ;;  %v934_v27 = vsel %vm931_vm6, %v912_v21, %v914_v25 }
  0xed   : > { %847 = vrot.lane.b32.xlu0 %v2239_v2, %s1922_s28  ;;  %v935_v35 = vsel %vm931_vm6, %v914_v25, %v2283_v26 }
  0xee   : > { %925 = vrot.lane.b32.xlu1 %v2228_v61, %s1923_s29  ;;  %1298 = vmatprep.subr.bf16.mxu1 %v935_v35 }
  0xef   : > { %1299 = vmatpush1.bf16.msra.mxu1 %v934_v27  ;;  %v992_v37 = vpop.permute.xlu0 %991 }
  0xf0   : > { %v994_v38 = vpop.permute.xlu1 %993 }
  0xf1   : > { %927 = vrot.lane.b32.xlu0 %v2239_v2, %s1923_s29  ;;  %v1015_v39 = vsel %vm1013_vm7, %v992_v37, %v994_v38 }
  0xf2   : > { %929 = vrot.lane.b32.xlu1 %v1843_v36, %s1923_s29  ;;  %1259 = vmatprep.subr.bf16.mxu0 %v1015_v39 }
  0xf3   : > { %v990_v40 = vpop.permute.xlu0 %989 }
  0xf4   : > { %v996_v43 = vpop.permute.xlu1 %995  ;;  %v1014_v44 = vsel %vm1013_vm7, %v990_v40, %v992_v37 }
  0xf5   : > { %1007 = vrot.lane.b32.xlu0 %v2228_v61, %s1924_s30  ;;  %1260 = vmatpush1.bf16.msra.mxu0 %v1014_v44  ;;  %v1016_v48 = vsel %vm1013_vm7, %v994_v38, %v996_v43 }
  0xf6   : > { %1009 = vrot.lane.b32.xlu1 %v2239_v2, %s1924_s30 }
  0xf7   : > { %v2303_v45 = vpop.permute.xlu0 %997 }
  0xf8   : > { %v1074_v46 = vpop.permute.xlu1 %1073  ;;  %v1017_v47 = vsel %vm1013_vm7, %v996_v43, %v2303_v45 }
  0xf9   : > { %1011 = vrot.lane.b32.xlu0 %v1843_v36, %s1924_s30  ;;  %1300 = vmatprep.subr.bf16.mxu1 %v1017_v47 }
  0xfa   : > { %1089 = vrot.lane.b32.xlu1 %v2228_v61, %s1925_s10  ;;  %1301 = vmatpush1.bf16.msra.mxu1 %v1016_v48 }
  0xfb   : > { %v1076_v49 = vpop.permute.xlu0 %1075 }
  0xfc   : > { %v1072_v50 = vpop.permute.xlu1 %1071  ;;  %v1097_v52 = vsel %vm1095_vm8, %v1074_v46, %v1076_v49 }
  0xfd   : > { %1091 = vrot.lane.b32.xlu0 %v2239_v2, %s1925_s10  ;;  %1261 = vmatprep.subr.bf16.mxu0 %v1097_v52  ;;  %v1096_v53 = vsel %vm1095_vm8, %v1072_v50, %v1074_v46 }
  0xfe   : > { %1093 = vrot.lane.b32.xlu1 %v1843_v36, %s1925_s10  ;;  %1262 = vmatpush1.bf16.msra.mxu0 %v1096_v53 }
  0xff   : > { %v1078_v57 = vpop.permute.xlu0 %1077  ;;  %1327 = vmatprep.subr.bf16.mxu0 %v2101_v29 }
 0x100   : > { %v2324_v58 = vpop.permute.xlu1 %1079  ;;  %v1098_v59 = vsel %vm1095_vm8, %v1076_v49, %v1078_v57 }
 0x101   : > { %v1099_v60 = vsel %vm1095_vm8, %v1078_v57, %v2324_v58  ;;  %1278 = vmatmul.mubr.bf16.vlgmr.msra.gmra.mrb[0].mxu0 %v2317_v54  ;;  %1232 = vperm.xlu0 %1824, %v1229_v56  }
 0x102   : > { %1302 = vmatprep.subr.bf16.mxu1 %v1099_v60  ;;  %1328 = vmatpush1.bf16.msra.mxu0 %v2064_v28 }
 0x103   : > { %1303 = vmatpush1.bf16.msra.mxu1 %v1098_v59  ;;  %v508_v30 = vpop.permute.xlu0 %507  ;;  %1719 = vmatprep.mubr.msk.bf16.mxu0 %vm1241_vm0, %v2116_v31 }
 0x104   : > { %v526_v29 = vsel %vm521_vm1, %v2192_v42, %v508_v30  ;;  %v510_v63 = vpop.permute.xlu1 %509  ;;  %1368 = vmatprep.subr.bf16.mxu1 %v2140_v33 }
 0x105   : > { %v527_v0 = vsel %vm521_vm1, %v508_v30, %v510_v63 }
 0x106   : > { %1329 = vmatprep.subr.bf16.mxu0 %v527_v0  ;;  %1319 = vmatmul.mubr.bf16.vlgmr.msra.gmra.mrb[0].mxu1 %v2317_v54 }
 0x107   : > { %1330 = vmatpush1.bf16.msra.mxu0 %v526_v29  ;;  %1369 = vmatpush1.bf16.msra.mxu1 %v2135_v32  ;;  %v512_v28 = vpop.permute.xlu0 %511 }
 0x108   : > { %v528_v1 = vsel %vm521_vm1, %v510_v63, %v512_v28  ;;  %v2340_v2 = vpop.permute.xlu1 %513  ;;  %1720 = vmatprep.mubr.msk.bf16.mxu1 %vm1241_vm0, %v2116_v31 }
 0x109   : > { %v529_v42 = vsel %vm521_vm1, %v512_v28, %v2340_v2 }
 0x10a   : > { %1370 = vmatprep.subr.bf16.mxu1 %v529_v42 }
 0x10b   : > { %1371 = vmatpush1.bf16.msra.mxu1 %v528_v1  ;;  %v590_v33 = vpop.permute.xlu0 %589 }
 0x10c   : > { %v608_v3 = vsel %vm603_vm2, %v2207_v51, %v590_v33  ;;  %v592_v4 = vpop.permute.xlu1 %591 }
 0x10d   : > { %v609_v32 = vsel %vm603_vm2, %v590_v33, %v592_v4 }
 0x10e   : > { %1331 = vmatprep.subr.bf16.mxu0 %v609_v32 }
 0x10f   : > { %1332 = vmatpush1.bf16.msra.mxu0 %v608_v3  ;;  %v594_v5 = vpop.permute.xlu0 %593 }
 0x110   : > { %v610_v6 = vsel %vm603_vm2, %v592_v4, %v594_v5  ;;  %v2350_v7 = vpop.permute.xlu1 %595 }
 0x111   : > { %v611_v9 = vsel %vm603_vm2, %v594_v5, %v2350_v7 }
 0x112   : > { %1372 = vmatprep.subr.bf16.mxu1 %v611_v9 }
 0x113   : > { %1373 = vmatpush1.bf16.msra.mxu1 %v610_v6  ;;  %v672_v10 = vpop.permute.xlu0 %671 }
 0x114   : > { %v690_v11 = vsel %vm685_vm3, %v2230_v62, %v672_v10  ;;  %v674_v51 = vpop.permute.xlu1 %673 }
 0x115   : > { %v691_v12 = vsel %vm685_vm3, %v672_v10, %v674_v51 }
 0x116   : > { %1333 = vmatprep.subr.bf16.mxu0 %v691_v12 }
 0x117   : > { %1334 = vmatpush1.bf16.msra.mxu0 %v690_v11  ;;  %v676_v13 = vpop.permute.xlu0 %675 }
 0x118   : > { %v692_v14 = vsel %vm685_vm3, %v674_v51, %v676_v13  ;;  %v2358_v15 = vpop.permute.xlu1 %677 }
 0x119   : > { %v693_v16 = vsel %vm685_vm3, %v676_v13, %v2358_v15 }
 0x11a   : > { %1374 = vmatprep.subr.bf16.mxu1 %v693_v16 }
 0x11b   : > { %1375 = vmatpush1.bf16.msra.mxu1 %v692_v14  ;;  %v754_v18 = vpop.permute.xlu0 %753 }
 0x11c   : > { %v772_v19 = vsel %vm767_vm4, %v2249_v8, %v754_v18  ;;  %v756_v62 = vpop.permute.xlu1 %755 }
 0x11d   : > { %v773_v20 = vsel %vm767_vm4, %v754_v18, %v756_v62 }
 0x11e   : > { %1335 = vmatprep.subr.bf16.mxu0 %v773_v20 }
 0x11f   : > { %1336 = vmatpush1.bf16.msra.mxu0 %v772_v19  ;;  %v758_v21 = vpop.permute.xlu0 %757 }
 0x120   : > { %v774_v22 = vsel %vm767_vm4, %v756_v62, %v758_v21  ;;  %v2366_v23 = vpop.permute.xlu1 %759 }
 0x121   : > { %v775_v24 = vsel %vm767_vm4, %v758_v21, %v2366_v23 }
 0x122   : > { %1376 = vmatprep.subr.bf16.mxu1 %v775_v24 }
 0x123   : > { %1377 = vmatpush1.bf16.msra.mxu1 %v774_v22  ;;  %v836_v25 = vpop.permute.xlu0 %835 }
 0x124   : > { %v854_v27 = vsel %vm849_vm5, %v2268_v17, %v836_v25  ;;  %v838_v8 = vpop.permute.xlu1 %837 }
 0x125   : > { %v855_v35 = vsel %vm849_vm5, %v836_v25, %v838_v8 }
 0x126   : > { %1337 = vmatprep.subr.bf16.mxu0 %v855_v35 }
 0x127   : > { %1338 = vmatpush1.bf16.msra.mxu0 %v854_v27  ;;  %v840_v36 = vpop.permute.xlu0 %839 }
 0x128   : > { %v856_v37 = vsel %vm849_vm5, %v838_v8, %v840_v36  ;;  %v2374_v38 = vpop.permute.xlu1 %841 }
 0x129   : > { %v857_v39 = vsel %vm849_vm5, %v840_v36, %v2374_v38 }
 0x12a   : > { %1378 = vmatprep.subr.bf16.mxu1 %v857_v39 }
 0x12b   : > { %1379 = vmatpush1.bf16.msra.mxu1 %v856_v37  ;;  %v918_v40 = vpop.permute.xlu0 %917 }
 0x12c   : > { %v936_v43 = vsel %vm931_vm6, %v2283_v26, %v918_v40  ;;  %v920_v17 = vpop.permute.xlu1 %919 }
 0x12d   : > { %v937_v44 = vsel %vm931_vm6, %v918_v40, %v920_v17 }
 0x12e   : > { %1339 = vmatprep.subr.bf16.mxu0 %v937_v44 }
 0x12f   : > { %1340 = vmatpush1.bf16.msra.mxu0 %v936_v43  ;;  %v922_v46 = vpop.permute.xlu0 %921 }
 0x130   : > { %v938_v47 = vsel %vm931_vm6, %v920_v17, %v922_v46  ;;  %v2382_v48 = vpop.permute.xlu1 %923 }
 0x131   : > { %v939_v49 = vsel %vm931_vm6, %v922_v46, %v2382_v48 }
 0x132   : > { %1380 = vmatprep.subr.bf16.mxu1 %v939_v49 }
 0x133   : > { %1381 = vmatpush1.bf16.msra.mxu1 %v938_v47  ;;  %v1000_v50 = vpop.permute.xlu0 %999 }
 0x134   : > { %v1018_v52 = vsel %vm1013_vm7, %v2303_v45, %v1000_v50  ;;  %v1002_v26 = vpop.permute.xlu1 %1001 }
 0x135   : > { %v1019_v53 = vsel %vm1013_vm7, %v1000_v50, %v1002_v26 }
 0x136   : > { %1341 = vmatprep.subr.bf16.mxu0 %v1019_v53 }
 0x137   : > { %1342 = vmatpush1.bf16.msra.mxu0 %v1018_v52  ;;  %v1004_v56 = vpop.permute.xlu0 %1003 }
 0x138   : > { %v1020_v57 = vsel %vm1013_vm7, %v1002_v26, %v1004_v56  ;;  %v2390_v59 = vpop.permute.xlu1 %1005 }
 0x139   : > { %v1021_v60 = vsel %vm1013_vm7, %v1004_v56, %v2390_v59 }
 0x13a   : > { %1382 = vmatprep.subr.bf16.mxu1 %v1021_v60 }
 0x13b   : > { %1383 = vmatpush1.bf16.msra.mxu1 %v1020_v57  ;;  %v1082_v30 = vpop.permute.xlu0 %1081 }
 0x13c   : > { %v1100_v29 = vsel %vm1095_vm8, %v2324_v58, %v1082_v30  ;;  %v1084_v45 = vpop.permute.xlu1 %1083 }
 0x13d   : > { %v1101_v63 = vsel %vm1095_vm8, %v1082_v30, %v1084_v45 }
 0x13e   : > { %1343 = vmatprep.subr.bf16.mxu0 %v1101_v63 }
 0x13f   : > { %1344 = vmatpush1.bf16.msra.mxu0 %v1100_v29  ;;  %v1086_v0 = vpop.permute.xlu0 %1085 }
 0x140   : > { %v1102_v28 = vsel %vm1095_vm8, %v1084_v45, %v1086_v0  ;;  %v2398_v1 = vpop.permute.xlu1 %1087  ;;  %1409 = vmatprep.subr.bf16.mxu0 %v2190_v41 }
 0x141   : > { %v1103_v42 = vsel %vm1095_vm8, %v1086_v0, %v2398_v1 }
 0x142   : > { %1384 = vmatprep.subr.bf16.mxu1 %v1103_v42  ;;  %1360 = vmatmul.mubr.bf16.vlgmr.msra.gmra.mrb[4].mxu0 %v2317_v54 }
 0x143   : > { %1385 = vmatpush1.bf16.msra.mxu1 %v1102_v28  ;;  %1410 = vmatpush1.bf16.msra.mxu0 %v2145_v34  ;;  %v516_v58 = vpop.permute.xlu0 %515 }
 0x144   : > { %v530_v33 = vsel %vm521_vm1, %v2340_v2, %v516_v58  ;;  %v518_v3 = vpop.permute.xlu1 %517  ;;  %1450 = vmatprep.subr.bf16.mxu1 %v1926_v55  ;;  %1721 = vmatprep.mubr.msk.bf16.mxu0 %vm1241_vm0, %v2116_v31 }
 0x145   : > { %v531_v41 = vsel %vm521_vm1, %v516_v58, %v518_v3 }
 0x146   : > { %1411 = vmatprep.subr.bf16.mxu0 %v531_v41  ;;  %1401 = vmatmul.mubr.bf16.vlgmr.msra.gmra.mrb[4].mxu1 %v2317_v54 }
 0x147   : > { %1412 = vmatpush1.bf16.msra.mxu0 %v530_v33  ;;  %1451 = vmatpush1.bf16.msra.mxu1 %v2228_v61  ;;  %v520_v4 = vpop.permute.xlu0 %519 }
 0x148   : > { %v532_v34 = vsel %vm521_vm1, %v518_v3, %v520_v4  ;;  %v598_v32 = vpop.permute.xlu1 %597  ;;  %1452 = vmatprep.subr.bf16.mxu1 %v1926_v55  ;;  %1722 = vmatprep.mubr.msk.bf16.mxu1 %vm1241_vm0, %v2116_v31 }
 0x149   : > { %v612_v9 = vsel %vm603_vm2, %v2350_v7, %v598_v32 }
 0x14b   : > { %1453 = vmatpush1.bf16.msra.mxu1 %v532_v34  ;;  %v600_v2 = vpop.permute.xlu0 %599 }
 0x14c   : > { %v602_v5 = vpop.permute.xlu1 %601  ;;  %v613_v6 = vsel %vm603_vm2, %v598_v32, %v600_v2  ;;  %1454 = vmatprep.subr.bf16.mxu1 %v1926_v55 }
 0x14d   : > { %v614_v61 = vsel %vm603_vm2, %v600_v2, %v602_v5  ;;  %1413 = vmatprep.subr.bf16.mxu0 %v613_v6 }
 0x14e   : > { %1414 = vmatpush1.bf16.msra.mxu0 %v612_v9 }
 0x14f   : > { %1455 = vmatpush1.bf16.msra.mxu1 %v614_v61  ;;  %v680_v10 = vpop.permute.xlu0 %679 }
 0x150   : > { %v694_v11 = vsel %vm685_vm3, %v2358_v15, %v680_v10  ;;  %v682_v31 = vpop.permute.xlu1 %681  ;;  %1456 = vmatprep.subr.bf16.mxu1 %v1926_v55 }
 0x151   : > { %v695_v51 = vsel %vm685_vm3, %v680_v10, %v682_v31 }
 0x152   : > { %1415 = vmatprep.subr.bf16.mxu0 %v695_v51 }
 0x153   : > { %1416 = vmatpush1.bf16.msra.mxu0 %v694_v11  ;;  %v684_v12 = vpop.permute.xlu0 %683 }
 0x154   : > { %v696_v13 = vsel %vm685_vm3, %v682_v31, %v684_v12  ;;  %v762_v7 = vpop.permute.xlu1 %761 }
 0x155   : > { %1457 = vmatpush1.bf16.msra.mxu1 %v696_v13  ;;  %v776_v15 = vsel %vm767_vm4, %v2366_v23, %v762_v7 }
 0x156   : > { %1458 = vmatprep.subr.bf16.mxu1 %v1926_v55 }
 0x157   : > { %v764_v14 = vpop.permute.xlu0 %763 }
 0x158   : > { %v766_v16 = vpop.permute.xlu1 %765  ;;  %v777_v18 = vsel %vm767_vm4, %v762_v7, %v764_v14 }
 0x159   : > { %v778_v19 = vsel %vm767_vm4, %v764_v14, %v766_v16  ;;  %1417 = vmatprep.subr.bf16.mxu0 %v777_v18 }
 0x15a   : > { %1459 = vmatpush1.bf16.msra.mxu1 %v778_v19  ;;  %1418 = vmatpush1.bf16.msra.mxu0 %v776_v15 }
 0x15b   : > { %v844_v62 = vpop.permute.xlu0 %843  ;;  %1460 = vmatprep.subr.bf16.mxu1 %v1926_v55 }
 0x15c   : > { %v858_v20 = vsel %vm849_vm5, %v2374_v38, %v844_v62  ;;  %v846_v21 = vpop.permute.xlu1 %845 }
 0x15d   : > { %v859_v22 = vsel %vm849_vm5, %v844_v62, %v846_v21 }
 0x15e   : > { %1419 = vmatprep.subr.bf16.mxu0 %v859_v22 }
 0x15f   : > { %1420 = vmatpush1.bf16.msra.mxu0 %v858_v20  ;;  %v848_v24 = vpop.permute.xlu0 %847 }
 0x160   : > { %v860_v25 = vsel %vm849_vm5, %v846_v21, %v848_v24  ;;  %v926_v23 = vpop.permute.xlu1 %925 }
 0x161   : > { %1461 = vmatpush1.bf16.msra.mxu1 %v860_v25  ;;  %v940_v36 = vsel %vm931_vm6, %v2382_v48, %v926_v23 }
 0x162   : > { %1462 = vmatprep.subr.bf16.mxu1 %v1926_v55 }
 0x163   : > { %v928_v27 = vpop.permute.xlu0 %927 }
 0x164   : > { %v930_v8 = vpop.permute.xlu1 %929  ;;  %v941_v35 = vsel %vm931_vm6, %v926_v23, %v928_v27 }
 0x165   : > { %v942_v37 = vsel %vm931_vm6, %v928_v27, %v930_v8  ;;  %1421 = vmatprep.subr.bf16.mxu0 %v941_v35 }
 0x166   : > { %1463 = vmatpush1.bf16.msra.mxu1 %v942_v37  ;;  %1422 = vmatpush1.bf16.msra.mxu0 %v940_v36 }
 0x167   : > { %v1008_v38 = vpop.permute.xlu0 %1007  ;;  %1464 = vmatprep.subr.bf16.mxu1 %v1926_v55 }
 0x168   : > { %v1022_v39 = vsel %vm1013_vm7, %v2390_v59, %v1008_v38  ;;  %v1010_v40 = vpop.permute.xlu1 %1009 }
 0x169   : > { %v1023_v43 = vsel %vm1013_vm7, %v1008_v38, %v1010_v40 }
 0x16a   : > { %1423 = vmatprep.subr.bf16.mxu0 %v1023_v43 }
 0x16b   : > { %1424 = vmatpush1.bf16.msra.mxu0 %v1022_v39  ;;  %v1012_v17 = vpop.permute.xlu0 %1011 }
 0x16c   : > { %v1024_v44 = vsel %vm1013_vm7, %v1010_v40, %v1012_v17  ;;  %v1090_v46 = vpop.permute.xlu1 %1089 }
 0x16d   : > { %1465 = vmatpush1.bf16.msra.mxu1 %v1024_v44  ;;  %v1104_v50 = vsel %vm1095_vm8, %v2398_v1, %v1090_v46 }
 0x16e   : > { %1466 = vmatprep.subr.bf16.mxu1 %v1926_v55 }
 0x16f   : > { %v1092_v47 = vpop.permute.xlu0 %1091 }
 0x170   : > { %v1094_v48 = vpop.permute.xlu1 %1093  ;;  %v1105_v49 = vsel %vm1095_vm8, %v1090_v46, %v1092_v47 }
 0x171   : > { %v1106_v52 = vsel %vm1095_vm8, %v1092_v47, %v1094_v48  ;;  %1425 = vmatprep.subr.bf16.mxu0 %v1105_v49 }
 0x172   : > { %1467 = vmatpush1.bf16.msra.mxu1 %v1106_v52  ;;  %1426 = vmatpush1.bf16.msra.mxu0 %v1104_v50 }
 0x175   : > { %1483 = vmatmul.mubr.bf16.vlgmr.msra.gmra.mrb[8].mxu1 %v2317_v54  ;;  %1442 = vmatmul.mubr.bf16.vlgmr.msra.gmra.mrb[8].mxu0 %v2317_v54 }
 0x180   : > { %v1233_v55 = vpop.permute.xlu0 %1232 }
 0x1d4   : > { %v1279_v26 = vpop.f32.mrb[0].mxu0 }
 0x1d5   : > { %v1281_v53 = vpop.f32.mrb[1].mxu0  ;;  %v1280_v56 = vadd.f32 %v1279_v26, %v1233_v55 }
 0x1d6   : > { %v1283_v57 = vpop.f32.mrb[2].mxu0  ;;  %v1282_v59 = vadd.f32 %v1281_v53, %v1233_v55 }
 0x1d7   : > { %v1284_v60 = vpop.f32.mrb[3].mxu0  ;;  %v1490_v30 = vmax.f32 %v1280_v56, 0.0 }
 0x1d8   : > { %v1491_v29 = vmax.f32 %v1282_v59, 0.0 }
 0x1d9   : > { %v1320_v45 = vpop.f32.mrb[0].mxu1 }
 0x1da   : > { %v1322_v54 = vpop.f32.mrb[1].mxu1  ;;  %v1321_v63 = vadd.f32 %v1320_v45, %v1233_v55  ;;  %v1731_v0 = vpack.c.bf16 %v1491_v29, %v1490_v30 }
 0x1db   : > { %v1324_v28 = vpop.f32.mrb[2].mxu1  ;;  %v1323_v1 = vadd.f32 %v1322_v54, %v1233_v55 }
 0x1dc   : > { %v1325_v42 = vpop.f32.mrb[3].mxu1  ;;  %v1492_v58 = vmax.f32 %v1321_v63, 0.0  ;;  %1546 = vst [vmem:[%s2460_s19] sm:$0xff] %v1731_v0 }
 0x1dd   : > { %v1493_v33 = vmax.f32 %v1323_v1, 0.0 }
 0x1df   : > { %v1732_v3 = vpack.c.bf16 %v1493_v33, %v1492_v58 }
 0x1e1   : > { %1547 = vst [vmem:[%s2460_s19 + $0x8] sm:$0xff] %v1732_v3 }
 0x215   : > { %v1361_v41 = vpop.f32.mrb[4].mxu0 }
 0x216   : > { %v1362_v4 = vadd.f32 %v1361_v41, %v1233_v55  ;;  %v1363_v34 = vpop.f32.mrb[5].mxu0 }
 0x217   : > { %v1364_v32 = vadd.f32 %v1363_v34, %v1233_v55  ;;  %v1365_v2 = vpop.f32.mrb[6].mxu0 }
 0x218   : > { %v1494_v5 = vmax.f32 %v1362_v4, 0.0  ;;  %v1366_v6 = vpop.f32.mrb[7].mxu0 }
 0x219   : > { %v1495_v9 = vmax.f32 %v1364_v32, 0.0  ;;  %v1402_v61 = vpop.f32.mrb[4].mxu1 }
 0x21a   : > { %v1403_v10 = vadd.f32 %v1402_v61, %v1233_v55  ;;  %v1404_v11 = vpop.f32.mrb[5].mxu1 }
 0x21b   : > { %v1733_v31 = vpack.c.bf16 %v1495_v9, %v1494_v5  ;;  %v1405_v51 = vadd.f32 %v1404_v11, %v1233_v55  ;;  %v1406_v12 = vpop.f32.mrb[6].mxu1 }
 0x21c   : > { %v1496_v13 = vmax.f32 %v1403_v10, 0.0  ;;  %v1407_v7 = vpop.f32.mrb[7].mxu1 }
 0x21d   : > { %1548 = vst [vmem:[%s2460_s19 + $0x10] sm:$0xff] %v1733_v31  ;;  %v1497_v14 = vmax.f32 %v1405_v51, 0.0 }
 0x21f   : > { %v1734_v16 = vpack.c.bf16 %v1497_v14, %v1496_v13 }
 0x221   : > { %1549 = vst [vmem:[%s2460_s19 + $0x18] sm:$0xff] %v1734_v16 }
 0x248   : > { %v1484_v18 = vpop.f32.mrb[8].mxu1  ;;  %v1443_v15 = vpop.f32.mrb[8].mxu0 }
 0x249   : > { %v1485_v19 = vadd.f32 %v1484_v18, %v1233_v55  ;;  %v1444_v62 = vadd.f32 %v1443_v15, %v1233_v55  ;;  %v1486_v20 = vpop.f32.mrb[9].mxu1  ;;  %v1445_v21 = vpop.f32.mrb[9].mxu0 }
 0x24a   : > { %v1446_v22 = vadd.f32 %v1445_v21, %v1233_v55  ;;  %v1487_v24 = vpop.f32.mrb[10].mxu1  ;;  %v1447_v25 = vpop.f32.mrb[10].mxu0 }
 0x24b   : > { %v1500_v23 = vmax.f32 %v1485_v19, 0.0  ;;  %v1498_v27 = vmax.f32 %v1444_v62, 0.0  ;;  %v1488_v8 = vpop.f32.mrb[11].mxu1  ;;  %v1448_v35 = vpop.f32.mrb[11].mxu0 }
 0x24c   : > { %v1499_v36 = vmax.f32 %v1446_v22, 0.0 }
 0x24d   : > { %v1736_v37 = vpack.c.bf16 %v1500_v23, %v1500_v23 }
 0x24e   : > { %v1735_v38 = vpack.c.bf16 %v1499_v36, %v1498_v27 }
 0x24f   : > { %1551 = vst [vmem:[%s2460_s19 + $0x28] sm:$0xf] %v1736_v37 }
 0x250   : > { %1550 = vst [vmem:[%s2460_s19 + $0x20] sm:$0xff] %v1735_v38 }
 0x251 PF: > { %s14_s23 = sadd.s32 1, %s1916_s23   ;;  %s2502_s15 = smov %s1888_s16 }
 0x252   : > { %p11_p1 = scmp.ge.s32.totalorder %s14_s23, 8   ;;  %s2503_s16 = smov %s2032_s12 }
 0x253   : > { %s2504_s17 = smov %s1896_s18  ;;  %s2505_s18 = smov %s2029_s11 }
 0x254   : > { %s2506_s19 = smov %s1908_s21  ;;  %s2507_s20 = smov %s1912_s22 }
 0x255   : > { %s2508_s21 = smov %s2002_s26  ;;  %s2509_s22 = smov %s2513_s25 }
 0x256   :  { %13 = sbr.rel (!%p11_p1) target bundleno = 5 (0x5), region = 143 }

// kernel: decoder_forward.24
= control target key start
LH: loop header
LB: loop body
LE: loop exit
PB: predicated region body
PF: predicated region fallthrough
CT: control target
= control target key end

     0   :  { %s1594_s15 = smov 0   ;;  %s1596_s16 = smov 0   ;;  %s2008_s0 = inlined_call_operand.vmem [shape: bf16[2,8,17920], index: 0, kind: input, shape index: {}, may-alias: {0,1}]   ;;  %s2009_s1 = inlined_call_operand.vmem [shape: bf16[2,8,17920], index: 1, kind: input, shape index: {}, may-alias: {0,1}]   ;;  %s2010_s2 = inlined_call_operand.vmem [shape: bf16[8,72], index: 2, kind: input, shape index: {}]   ;;  %s2011_s3 = inlined_call_operand.vmem [shape: f32[8,1], index: 3, kind: input, shape index: {}]   ;;  %s2012_s4 = inlined_call_operand.vmem [shape: bf16[2,8,16640], index: 4, kind: output, shape index: {}]  }
   0x1   :  { %s1598_s17 = smov 0   ;;  %s1600_s18 = smov 0  }
   0x2   :  { %s1602_s19 = smov 0  }
   0x3 LB: > { %s23_s20 = sadd.s32 1, %s1552_s17  ;;  %s26_s21 = sadd.s32 1, %s1556_s18  ;;  %s1560_s19 = sphi %s1602_s19, %s14_s19   ;;  %s1556_s18 = sphi %s1600_s18, %s2016_s18   ;;  %s1552_s17 = sphi %s1598_s17, %s2015_s17   ;;  %s1548_s16 = sphi %s1596_s16, %s2014_s16   ;;  %s1544_s15 = sphi %s1594_s15, %s2013_s15  }
   0x4   : > { %p24_p0 = scmp.ge.s32.totalorder %s23_s20, 13  ;;  %p1396_p1 = scmp.ge.s32.totalorder %s1560_s19, 1 }
   0x5   : > { %p204_p2 = scmp.lt.s32.totalorder %s1560_s19, 27 }
   0x6   : > { %s2018_s20 = smov (%p24_p0, %s23_s20), 0  ;;  %s2020_s21 = smov (!%p24_p0, %s26_s21), %s1556_s18 }
   0x7   : > { %p205_p3 = pnand %p1396_p1, %p204_p2  ;;  %p28_p4 = scmp.ge.s32.totalorder %s2020_s21, 2 }
   0x8   : > { %s1624_s22 = smul.u32 (!%p205_p3), 10, %s1544_s15  ;;  %p249_p5 = scmp.lt.s32.totalorder (!%p205_p3), %s1548_s16, 1  ;;  %v1567_v9 = vmov (!%p205_p3), 0   ;;  %v758_v21 = vld [vmem:[%s2011_s3] sm:$0xff] (!%p205_p3)  ;;  %vm335_vm0 = vcmask (!%p205_p3), 1043456   ;;  %vm337_vm1 = vcmask (!%p205_p3), 1039360  }
   0x9   : > { %s2022_s21 = smov (%p28_p4, %s2020_s21), 0  ;;  %208 = sbr.rel (%p205_p3) target bundleno = 462 (0x1ce), region = 36 }
   0xa   : > { %p251_p6 = scmp.lt.s32.totalorder (!%p205_p3), %s1624_s22, 139  ;;  %s258_s26 = sadd.s32 (!%p205_p3), 1, %s1544_s15  ;;  %1056 = vmatprep.mubr.bf16.mxu0 (!%p205_p3), %v1567_v9  ;;  %1097 = vmatprep.mubr.bf16.mxu1 (!%p205_p3), %v1567_v9  ;;  %vm388_vm2 = vcmask (!%p205_p3), 1031168   ;;  %vm489_vm3 = vcmask (!%p205_p3), 1022976   ;;  %vm540_vm4 = vcmask (!%p205_p3), 1014784   ;;  %vm641_vm5 = vcmask (!%p205_p3), 1006592  }
   0xb   : > { %s259_s28 = smul.u32 (!%p205_p3), 10, %s258_s26  ;;  %s1562_s6 = smov (!%p205_p3), 126   ;;  %1521 = vset.pattern.permute.xlu0 (!%p205_p3), %v1567_v9  ;;  %vm692_vm6 = vcmask (!%p205_p3), 998400   ;;  %vm989_vm7 = vcmask (!%p205_p3), 588800  }
   0xc   : > { %s1563_s7 = smov (!%p205_p3), 127   ;;  %s1564_s13 = smov (!%p205_p3), 125  }
   0xd   : > { %p262_p7 = scmp.lt.s32.totalorder (!%p205_p3), %s259_s28, 139  ;;  %s1565_s14 = smov (!%p205_p3), 124  }
   0xe   : > { %s1566_s15 = smov (!%p205_p3), 123   ;;  %p273_p8 = scmp.lt.s32.totalorder (!%p205_p3), %s1624_s22, 129 }
  0x10   : > { %s2024_s16 = smov (!%p249_p5, %s1548_s16), 1  ;;  %s2026_s28 = smov (!%p262_p7, %s259_s28), 139 }
  0x11   : > { %s1472_s23 = smul.u32 140, %s2024_s16 }
  0x12   : > { %s252_s24 = scalar_select %p251_p6, %s1624_s22, 139 }
  0x13   : > { %s265_s8 = sadd.s32 %s1472_s23, %s2026_s28  ;;  %s2028_s22 = smov (!%p273_p8, %s1624_s22), 129 }
  0x14   : > { %s254_s25 = sadd.s32 %s1472_s23, %s252_s24  ;;  %s1398_s9 = sshll.u32 %s265_s8, 2 }
  0x15   : > { %s1397_s27 = sshll.u32 %s254_s25, 2  ;;  %s267_s12 = scalar_lea.vmem %s2009_s1, %s1398_s9 }
  0x16   : > { %s256_s5 = scalar_lea.vmem %s2008_s0, %s1397_s27  ;;  %v1660_v5 = vld [vmem:[%s267_s12] sm:$0xff]  ;;  %v292_v6 = vld [vmem:[%s267_s12 + $0x8] sm:$0xf]  ;;  %s1568_s23 = smov 122  }
  0x17   : > { %v1634_v0 = vld [vmem:[%s256_s5] sm:$0xff]  ;;  %v1636_v1 = vld [vmem:[%s256_s5 + $0x8] sm:$0xff]  ;;  %v1638_v2 = vld [vmem:[%s256_s5 + $0x10] sm:$0xff]  ;;  %293 = vst [vmem:[#allocation2 + $0x28] sm:$0xff] %v1660_v5  ;;  %s1473_s28 = smul.u32 130, %s2024_s16 }
  0x18   : > { %286 = vst [vmem:[#allocation2] sm:$0xff] %v1634_v0  ;;  %369 = vrot.lane.b32.xlu1 %v1634_v0, %s1562_s6  ;;  %317 = vrot.lane.b32.xlu0 %v1634_v0, %s1563_s7  ;;  %287 = vst [vmem:[#allocation2 + $0x8] sm:$0xff] %v1636_v1  ;;  %v1647_v3 = vld [vmem:[%s256_s5 + $0x18] sm:$0xff]  ;;  %v1649_v4 = vld [vmem:[%s256_s5 + $0x20] sm:$0xff] }
  0x19   : > { %288 = vst [vmem:[#allocation2 + $0x10] sm:$0xff] %v1638_v2  ;;  %289 = vst [vmem:[#allocation2 + $0x18] sm:$0xff] %v1647_v3  ;;  %s276_s29 = sadd.s32 %s1473_s28, %s2028_s22 }
  0x1a   : > { %290 = vst [vmem:[#allocation2 + $0x20] sm:$0xff] %v1649_v4  ;;  %294 = vst [vmem:[#allocation2 + $0x30] sm:$0xf] %v292_v6  ;;  %s1399_s30 = sshll.u32 %s276_s29, 2 }
  0x1c   : > { %371 = vrot.lane.b32.xlu1 %v1636_v1, %s1562_s6  ;;  %319 = vrot.lane.b32.xlu0 %v1636_v1, %s1563_s7 }
  0x1e   : > { %v310_v12 = vld [vmem:[#allocation2 + $0x28] sm:$0xf]  ;;  %v413_v14 = vld [vmem:[#allocation2 + $0x2c] sm:$0xf] }
  0x1f   : > { %v408_v8 = vld [vmem:[#allocation2 + $0x4] sm:$0xff]  ;;  %v463_v16 = vld [vmem:[#allocation2 + $0x2c] sm:$0xf] }
  0x20   : > { %v409_v7 = vld [vmem:[#allocation2 + $0xc] sm:$0xff]  ;;  %420 = vrot.lane.b32.xlu0 %v408_v8, %s1562_s6  ;;  %v410_v11 = vld [vmem:[#allocation2 + $0x14] sm:$0xff]  ;;  %v362_v13 = vld [vmem:[#allocation2 + $0x28] sm:$0xf] }
  0x21   : > { %422 = vrot.lane.b32.xlu1 %v409_v7, %s1562_s6  ;;  %v411_v10 = vld [vmem:[#allocation2 + $0x1c] sm:$0xff]  ;;  %v412_v15 = vld [vmem:[#allocation2 + $0x24] sm:$0xff]  ;;  %v514_v17 = vld [vmem:[#allocation2 + $0x2c] sm:$0xf] }
  0x22   : > { %v565_v18 = vld [vmem:[#allocation2 + $0x30] sm:$0xf] }
  0x23   : > { %v615_v19 = vld [vmem:[#allocation2 + $0x30] sm:$0xf] }
  0x24   : > { %470 = vrot.lane.b32.xlu0 %v408_v8, %s1564_s13  ;;  %v666_v20 = vld [vmem:[#allocation2 + $0x30] sm:$0xf] }
  0x25   : > { %472 = vrot.lane.b32.xlu1 %v409_v7, %s1564_s13 }
  0x28   : > { %521 = vrot.lane.b32.xlu0 %v408_v8, %s1565_s14 }
  0x29   : > { %523 = vrot.lane.b32.xlu1 %v409_v7, %s1565_s14 }
  0x2c   : > { %572 = vrot.lane.b32.xlu0 %v1636_v1, %s1565_s14 }
  0x2d   : > { %574 = vrot.lane.b32.xlu1 %v1638_v2, %s1565_s14 }
  0x30   : > { %622 = vrot.lane.b32.xlu0 %v1636_v1, %s1566_s15 }
  0x31   : > { %624 = vrot.lane.b32.xlu1 %v1638_v2, %s1566_s15 }
  0x34   : > { %673 = vrot.lane.b32.xlu0 %v1636_v1, %s1568_s23 }
  0x35   : > { %675 = vrot.lane.b32.xlu1 %v1638_v2, %s1568_s23 }
  0x38   : > { %321 = vrot.lane.b32.xlu0 %v1638_v2, %s1563_s7 }
  0x39   : > { %323 = vrot.lane.b32.xlu1 %v1647_v3, %s1563_s7 }
  0x3c   : > { %373 = vrot.lane.b32.xlu0 %v1638_v2, %s1562_s6 }
  0x3d   : > { %375 = vrot.lane.b32.xlu1 %v1647_v3, %s1562_s6 }
  0x40   : > { %424 = vrot.lane.b32.xlu0 %v410_v11, %s1562_s6 }
  0x41   : > { %426 = vrot.lane.b32.xlu1 %v411_v10, %s1562_s6 }
  0x44   : > { %474 = vrot.lane.b32.xlu0 %v410_v11, %s1564_s13 }
  0x45   : > { %476 = vrot.lane.b32.xlu1 %v411_v10, %s1564_s13 }
  0x48   : > { %525 = vrot.lane.b32.xlu0 %v410_v11, %s1565_s14 }
  0x49   : > { %527 = vrot.lane.b32.xlu1 %v411_v10, %s1565_s14 }
  0x4c   : > { %576 = vrot.lane.b32.xlu0 %v1647_v3, %s1565_s14 }
  0x4d   : > { %578 = vrot.lane.b32.xlu1 %v1649_v4, %s1565_s14 }
  0x50   : > { %626 = vrot.lane.b32.xlu0 %v1647_v3, %s1566_s15 }
  0x51   : > { %628 = vrot.lane.b32.xlu1 %v1649_v4, %s1566_s15 }
  0x54   : > { %677 = vrot.lane.b32.xlu0 %v1647_v3, %s1568_s23 }
  0x55   : > { %679 = vrot.lane.b32.xlu1 %v1649_v4, %s1568_s23 }
  0x58   : > { %325 = vrot.lane.b32.xlu0 %v1649_v4, %s1563_s7 }
  0x59   : > { %327 = vrot.lane.b32.xlu1 %v310_v12, %s1563_s7  ;;  %s1986_s7 = scalar_lea.vmem %s2012_s4, %s1399_s30 }
  0x5c   : > { %377 = vrot.lane.b32.xlu0 %v1649_v4, %s1562_s6 }
  0x5d   : > { %379 = vrot.lane.b32.xlu1 %v362_v13, %s1562_s6 }
  0x60   : > { %428 = vrot.lane.b32.xlu0 %v412_v15, %s1562_s6 }
  0x61   : > { %430 = vrot.lane.b32.xlu1 %v413_v14, %s1562_s6 }
  0x64   : > { %478 = vrot.lane.b32.xlu0 %v412_v15, %s1564_s13 }
  0x65   : > { %480 = vrot.lane.b32.xlu1 %v463_v16, %s1564_s13 }
  0x68   : > { %529 = vrot.lane.b32.xlu0 %v412_v15, %s1565_s14 }
  0x69   : > { %531 = vrot.lane.b32.xlu1 %v514_v17, %s1565_s14 }
  0x6c   : > { %580 = vrot.lane.b32.xlu0 %v1660_v5, %s1565_s14 }
  0x6d   : > { %582 = vrot.lane.b32.xlu1 %v565_v18, %s1565_s14 }
  0x70   : > { %630 = vrot.lane.b32.xlu0 %v1660_v5, %s1566_s15 }
  0x71   : > { %632 = vrot.lane.b32.xlu1 %v615_v19, %s1566_s15 }
  0x74   : > { %681 = vrot.lane.b32.xlu0 %v1660_v5, %s1568_s23 }
  0x75   : > { %683 = vrot.lane.b32.xlu1 %v666_v20, %s1568_s23 }
  0x78   : > { %761 = vperm.xlu0 %1521, %v758_v21  }
  0x8a   : > { %v370_v22 = vpop.permute.xlu1 %369  ;;  %v318_v23 = vpop.permute.xlu0 %317 }
  0x8b   : > { %v329_v26 = vrot.slane %v318_v23, 4  ;;  %v381_v29 = vrot.slane %v370_v22, 4 }
  0x8e   : > { %v1734_v24 = vpop.permute.xlu1 %371  ;;  %v1736_v25 = vpop.permute.xlu0 %319 }
  0x8f   : > { %v382_v27 = vrot.slane %v1734_v24, 4  ;;  %v330_v28 = vrot.slane %v1736_v25, 4 }
  0x91   : > { %v336_v30 = vsel %vm335_vm0, %v329_v26, %v330_v28  ;;  %v387_v32 = vsel %vm335_vm0, %v381_v29, %v382_v27 }
  0x92   : > { %v421_v33 = vpop.permute.xlu0 %420  ;;  %v338_v34 = vsel %vm337_vm1, %v318_v23, %v336_v30  ;;  %v389_v40 = vsel %vm388_vm2, %v370_v22, %v387_v32 }
  0x93   : > { %v1743_v31 = vpop.permute.xlu1 %422  ;;  %v432_v36 = vrot.slane %v421_v33, 4  ;;  %v1401_v37 = vcombine.high %v1634_v0, %v338_v34  ;;  %v1400_v38 = vcombine.low %v1634_v0, %v338_v34 }
  0x94   : > { %v433_v35 = vrot.slane %v1743_v31, 4 }
  0x95   : > { %1024 = vmatprep.subr.bf16.mxu0 %v1401_v37 }
  0x96   : > { %v438_v39 = vsel %vm335_vm0, %v432_v36, %v433_v35  ;;  %v471_v43 = vpop.permute.xlu0 %470  ;;  %1025 = vmatpush1.bf16.msra.mxu0 %v1400_v38  ;;  %v1811_v38 = vld [vmem:[%s2010_s2] sm:$0xf] }
  0x97   : > { %v439_v41 = vsel %vm388_vm2, %v421_v33, %v438_v39  ;;  %v1757_v42 = vpop.permute.xlu1 %472  ;;  %v482_v47 = vrot.slane %v471_v43, 4 }
  0x98   : > { %v1410_v44 = vcombine.low %v389_v40, %v439_v41  ;;  %v1411_v45 = vcombine.high %v389_v40, %v439_v41  ;;  %v483_v46 = vrot.slane %v1757_v42, 4 }
  0x9a   : > { %1026 = vmatprep.subr.bf16.mxu0 %v1411_v45  ;;  %v522_v49 = vpop.permute.xlu0 %521  ;;  %v488_v50 = vsel %vm335_vm0, %v482_v47, %v483_v46 }
  0x9b   : > { %v1760_v48 = vpop.permute.xlu1 %523  ;;  %1027 = vmatpush1.bf16.msra.mxu0 %v1410_v44  ;;  %v533_v52 = vrot.slane %v522_v49, 4  ;;  %v490_v54 = vsel %vm489_vm3, %v471_v43, %v488_v50 }
  0x9c   : > { %v534_v51 = vrot.slane %v1760_v48, 4 }
  0x9e   : > { %v539_v53 = vsel %vm335_vm0, %v533_v52, %v534_v51  ;;  %v573_v57 = vpop.permute.xlu0 %572 }
  0x9f   : > { %v541_v55 = vsel %vm540_vm4, %v522_v49, %v539_v53  ;;  %v1771_v56 = vpop.permute.xlu1 %574  ;;  %v584_v61 = vrot.slane %v573_v57, 4 }
  0xa0   : > { %v1420_v58 = vcombine.low %v490_v54, %v541_v55  ;;  %v1421_v59 = vcombine.high %v490_v54, %v541_v55  ;;  %v585_v60 = vrot.slane %v1771_v56, 4 }
  0xa2   : > { %1028 = vmatprep.subr.bf16.mxu0 %v1421_v59  ;;  %v623_v63 = vpop.permute.xlu0 %622  ;;  %v590_v0 = vsel %vm335_vm0, %v584_v61, %v585_v60 }
  0xa3   : > { %v1774_v62 = vpop.permute.xlu1 %624  ;;  %1029 = vmatpush1.bf16.msra.mxu0 %v1420_v58  ;;  %v634_v6 = vrot.slane %v623_v63, 4  ;;  %v591_v8 = vsel %vm540_vm4, %v573_v57, %v590_v0 }
  0xa4   : > { %v635_v5 = vrot.slane %v1774_v62, 4 }
  0xa6   : > { %v640_v7 = vsel %vm335_vm0, %v634_v6, %v635_v5  ;;  %v674_v12 = vpop.permute.xlu0 %673 }
  0xa7   : > { %v642_v10 = vsel %vm641_vm5, %v623_v63, %v640_v7  ;;  %v1785_v11 = vpop.permute.xlu1 %675  ;;  %v685_v16 = vrot.slane %v674_v12, 4 }
  0xa8   : > { %v1430_v13 = vcombine.low %v591_v8, %v642_v10  ;;  %v1431_v14 = vcombine.high %v591_v8, %v642_v10  ;;  %v686_v15 = vrot.slane %v1785_v11, 4 }
  0xaa   : > { %v691_v17 = vsel %vm335_vm0, %v685_v16, %v686_v15  ;;  %1030 = vmatprep.subr.bf16.mxu0 %v1431_v14  ;;  %v322_v20 = vpop.permute.xlu0 %321 }
  0xab   : > { %v693_v18 = vsel %vm692_vm6, %v674_v12, %v691_v17  ;;  %v1792_v19 = vpop.permute.xlu1 %323  ;;  %1031 = vmatpush1.bf16.msra.mxu0 %v1430_v13  ;;  %v331_v26 = vrot.slane %v322_v20, 4 }
  0xac   : > { %v1440_v21 = vcombine.low %v693_v18, %v693_v18  ;;  %v1441_v22 = vcombine.high %v693_v18, %v693_v18  ;;  %v332_v23 = vrot.slane %v1792_v19, 4 }
  0xad   : > { %v339_v32 = vsel %vm335_vm0, %v330_v28, %v331_v26 }
  0xae   : > { %v341_v29 = vsel %vm335_vm0, %v331_v26, %v332_v23  ;;  %1450 = vmatprep.subr.msk.bf16.mxu0 %vm335_vm0, %v1441_v22  ;;  %v995_v30 = vsel %vm335_vm0, %v1440_v21, 0  ;;  %v374_v36 = vpop.permute.xlu0 %373  ;;  %v340_v37 = vsel %vm337_vm1, %v1736_v25, %v339_v32 }
  0xaf   : > { %v342_v33 = vsel %vm337_vm1, %v322_v20, %v341_v29  ;;  %v1804_v34 = vpop.permute.xlu1 %375  ;;  %1033 = vmatpush1.bf16.msra.mxu0 %v995_v30  ;;  %v383_v41 = vrot.slane %v374_v36, 4  ;;  %v1403_v43 = vcombine.high %v1636_v1, %v340_v37  ;;  %v1402_v44 = vcombine.low %v1636_v1, %v340_v37 }
  0xb0   : > { %v1404_v39 = vcombine.low %v1638_v2, %v342_v33  ;;  %v1405_v40 = vcombine.high %v1638_v2, %v342_v33  ;;  %v384_v28 = vrot.slane %v1804_v34, 4 }
  0xb1   : > { %1065 = vmatprep.subr.bf16.mxu1 %v1403_v43  ;;  %v390_v2 = vsel %vm335_vm0, %v382_v27, %v383_v41 }
  0xb2   : > { %1106 = vmatprep.subr.bf16.mxu0 %v1405_v40  ;;  %1451 = vmatmul.mubr.msk.bf16.vlgmr.msra.gmra.mrb[0].mxu0 %vm989_vm7, %v1811_v38  ;;  %v425_v45 = vpop.permute.xlu0 %424  ;;  %v392_v47 = vsel %vm335_vm0, %v383_v41, %v384_v28  ;;  %v391_v57 = vsel %vm388_vm2, %v1734_v24, %v390_v2 }
  0xb3   : > { %v1820_v25 = vpop.permute.xlu1 %426  ;;  %1107 = vmatpush1.bf16.msra.mxu0 %v1404_v39  ;;  %1066 = vmatpush1.bf16.msra.mxu1 %v1402_v44  ;;  %v434_v1 = vrot.slane %v425_v45, 4  ;;  %v393_v27 = vsel %vm388_vm2, %v374_v36, %v392_v47 }
  0xb4   : > { %v435_v49 = vrot.slane %v1820_v25, 4  ;;  %1138 = vmatprep.mubr.bf16.mxu0 %v1567_v9 }
  0xb5   : > { %v440_v50 = vsel %vm335_vm0, %v433_v35, %v434_v1 }
  0xb6   : > { %v442_v52 = vsel %vm335_vm0, %v434_v1, %v435_v49  ;;  %v475_v55 = vpop.permute.xlu0 %474  ;;  %v441_v58 = vsel %vm388_vm2, %v1743_v31, %v440_v50 }
  0xb7   : > { %v443_v53 = vsel %vm388_vm2, %v425_v45, %v442_v52  ;;  %v1838_v54 = vpop.permute.xlu1 %476  ;;  %v484_v63 = vrot.slane %v475_v55, 4  ;;  %v1413_v0 = vcombine.high %v391_v57, %v441_v58  ;;  %v1412_v6 = vcombine.low %v391_v57, %v441_v58 }
  0xb8   : > { %v1414_v59 = vcombine.low %v393_v27, %v443_v53  ;;  %v1415_v61 = vcombine.high %v393_v27, %v443_v53  ;;  %v485_v35 = vrot.slane %v1838_v54, 4 }
  0xb9   : > { %1067 = vmatprep.subr.bf16.mxu1 %v1413_v0  ;;  %v491_v24 = vsel %vm335_vm0, %v483_v46, %v484_v63 }
  0xba   : > { %1108 = vmatprep.subr.bf16.mxu0 %v1415_v61  ;;  %v526_v8 = vpop.permute.xlu0 %525  ;;  %v493_v31 = vsel %vm335_vm0, %v484_v63, %v485_v35  ;;  %1068 = vmatpush1.bf16.msra.mxu1 %v1412_v6  ;;  %v492_v20 = vsel %vm489_vm3, %v1757_v42, %v491_v24 }
  0xbb   : > { %v1845_v7 = vpop.permute.xlu1 %527  ;;  %1109 = vmatpush1.bf16.msra.mxu0 %v1414_v59  ;;  %v535_v12 = vrot.slane %v526_v8, 4  ;;  %v494_v16 = vsel %vm489_vm3, %v475_v55, %v493_v31 }
  0xbc   : > { %v536_v10 = vrot.slane %v1845_v7, 4 }
  0xbd   : > { %v542_v13 = vsel %vm335_vm0, %v534_v51, %v535_v12 }
  0xbe   : > { %v544_v14 = vsel %vm335_vm0, %v535_v12, %v536_v10  ;;  %v577_v18 = vpop.permute.xlu0 %576  ;;  %v543_v21 = vsel %vm540_vm4, %v1760_v48, %v542_v13 }
  0xbf   : > { %v545_v46 = vsel %vm540_vm4, %v526_v8, %v544_v14  ;;  %v1862_v17 = vpop.permute.xlu1 %578  ;;  %v586_v29 = vrot.slane %v577_v18, 4  ;;  %v1423_v30 = vcombine.high %v492_v20, %v543_v21  ;;  %v1422_v32 = vcombine.low %v492_v20, %v543_v21 }
  0xc0   : > { %v1424_v22 = vcombine.low %v494_v16, %v545_v46  ;;  %v1425_v26 = vcombine.high %v494_v16, %v545_v46  ;;  %v587_v51 = vrot.slane %v1862_v17, 4 }
  0xc1   : > { %1069 = vmatprep.subr.bf16.mxu1 %v1423_v30  ;;  %v592_v42 = vsel %vm335_vm0, %v585_v60, %v586_v29 }
  0xc2   : > { %1110 = vmatprep.subr.bf16.mxu0 %v1425_v26  ;;  %v627_v36 = vpop.permute.xlu0 %626  ;;  %v594_v48 = vsel %vm335_vm0, %v586_v29, %v587_v51  ;;  %1070 = vmatpush1.bf16.msra.mxu1 %v1422_v32  ;;  %v593_v2 = vsel %vm540_vm4, %v1771_v56, %v592_v42 }
  0xc3   : > { %v1869_v33 = vpop.permute.xlu1 %628  ;;  %1111 = vmatpush1.bf16.msra.mxu0 %v1424_v22  ;;  %v636_v39 = vrot.slane %v627_v36, 4  ;;  %v595_v43 = vsel %vm540_vm4, %v577_v18, %v594_v48 }
  0xc4   : > { %v637_v37 = vrot.slane %v1869_v33, 4 }
  0xc5   : > { %v643_v40 = vsel %vm335_vm0, %v635_v5, %v636_v39 }
  0xc6   : > { %v645_v41 = vsel %vm335_vm0, %v636_v39, %v637_v37  ;;  %v678_v45 = vpop.permute.xlu0 %677  ;;  %v644_v47 = vsel %vm641_vm5, %v1774_v62, %v643_v40 }
  0xc7   : > { %v646_v60 = vsel %vm641_vm5, %v627_v36, %v645_v41  ;;  %v1886_v44 = vpop.permute.xlu1 %679  ;;  %v687_v52 = vrot.slane %v678_v45, 4  ;;  %v1433_v27 = vcombine.high %v593_v2, %v644_v47  ;;  %v1432_v53 = vcombine.low %v593_v2, %v644_v47 }
  0xc8   : > { %v1434_v1 = vcombine.low %v595_v43, %v646_v60  ;;  %v1435_v50 = vcombine.high %v595_v43, %v646_v60  ;;  %v688_v5 = vrot.slane %v1886_v44, 4 }
  0xc9   : > { %v694_v55 = vsel %vm335_vm0, %v686_v15, %v687_v52  ;;  %1071 = vmatprep.subr.bf16.mxu1 %v1433_v27 }
  0xca   : > { %v696_v57 = vsel %vm335_vm0, %v687_v52, %v688_v5  ;;  %1112 = vmatprep.subr.bf16.mxu0 %v1435_v50  ;;  %v326_v58 = vpop.permute.xlu0 %325  ;;  %v695_v59 = vsel %vm692_vm6, %v1785_v11, %v694_v55  ;;  %1072 = vmatpush1.bf16.msra.mxu1 %v1432_v53 }
  0xcb   : > { %v697_v56 = vsel %vm692_vm6, %v678_v45, %v696_v57  ;;  %v328_v62 = vpop.permute.xlu1 %327  ;;  %1113 = vmatpush1.bf16.msra.mxu0 %v1434_v1  ;;  %v333_v6 = vrot.slane %v326_v58, 4  ;;  %v1443_v15 = vcombine.high %v695_v59, %v695_v59  ;;  %v1442_v8 = vcombine.low %v695_v59, %v695_v59 }
  0xcc   : > { %v1444_v61 = vcombine.low %v697_v56, %v697_v56  ;;  %v1445_v63 = vcombine.high %v697_v56, %v697_v56  ;;  %v334_v0 = vrot.slane %v328_v62, 4 }
  0xcd   : > { %v343_v24 = vsel %vm335_vm0, %v332_v23, %v333_v6  ;;  %1452 = vmatprep.subr.msk.bf16.mxu1 %vm335_vm0, %v1443_v15  ;;  %v1001_v14 = vsel %vm335_vm0, %v1442_v8, 0 }
  0xce   : > { %v345_v31 = vsel %vm335_vm0, %v333_v6, %v334_v0  ;;  %1454 = vmatprep.subr.msk.bf16.mxu0 %vm335_vm0, %v1445_v63  ;;  %v1007_v12 = vsel %vm335_vm0, %v1444_v61, 0  ;;  %v378_v16 = vpop.permute.xlu0 %377  ;;  %v344_v46 = vsel %vm337_vm1, %v1792_v19, %v343_v24  ;;  %1074 = vmatpush1.bf16.msra.mxu1 %v1001_v14 }
  0xcf   : > { %v346_v13 = vsel %vm337_vm1, %v326_v58, %v345_v31  ;;  %v380_v11 = vpop.permute.xlu1 %379  ;;  %1115 = vmatpush1.bf16.msra.mxu0 %v1007_v12  ;;  %v385_v21 = vrot.slane %v378_v16, 4  ;;  %v1406_v22 = vcombine.low %v1647_v3, %v344_v46  ;;  %v1407_v26 = vcombine.high %v1647_v3, %v344_v46 }
  0xd0   : > { %v1408_v23 = vcombine.low %v1649_v4, %v346_v13  ;;  %v1409_v18 = vcombine.high %v1649_v4, %v346_v13  ;;  %v386_v20 = vrot.slane %v380_v11, 4 }
  0xd1   : > { %1147 = vmatprep.subr.bf16.mxu1 %v1407_v26  ;;  %1453 = vmatmul.mubr.msk.bf16.vlgmr.msra.gmra.mrb[0].mxu1 %vm989_vm7, %v1811_v38  ;;  %v394_v4 = vsel %vm335_vm0, %v384_v28, %v385_v21 }
  0xd2   : > { %1188 = vmatprep.subr.bf16.mxu0 %v1409_v18  ;;  %1455 = vmatmul.mubr.msk.bf16.vlgmr.msra.gmra.mrb[4].mxu0 %vm989_vm7, %v1811_v38  ;;  %v429_v19 = vpop.permute.xlu0 %428  ;;  %v396_v30 = vsel %vm335_vm0, %v385_v21, %v386_v20  ;;  %v395_v41 = vsel %vm388_vm2, %v1804_v34, %v394_v4 }
  0xd3   : > { %v431_v29 = vpop.permute.xlu1 %430  ;;  %1148 = vmatpush1.bf16.msra.mxu1 %v1406_v22  ;;  %v436_v36 = vrot.slane %v429_v19, 4  ;;  %1189 = vmatpush1.bf16.msra.mxu0 %v1408_v23  ;;  %v397_v48 = vsel %vm388_vm2, %v378_v16, %v396_v30 }
  0xd4   : > { %v437_v32 = vrot.slane %v431_v29, 4  ;;  %1179 = vmatprep.mubr.bf16.mxu1 %v1567_v9  ;;  %1220 = vmatprep.mubr.bf16.mxu0 %v1567_v9 }
  0xd5   : > { %v444_v3 = vsel %vm335_vm0, %v435_v49, %v436_v36 }
  0xd6   : > { %v446_v42 = vsel %vm335_vm0, %v436_v36, %v437_v32  ;;  %v479_v40 = vpop.permute.xlu0 %478  ;;  %v445_v43 = vsel %vm388_vm2, %v1820_v25, %v444_v3 }
  0xd7   : > { %v447_v28 = vsel %vm388_vm2, %v429_v19, %v446_v42  ;;  %v481_v39 = vpop.permute.xlu1 %480  ;;  %v486_v2 = vrot.slane %v479_v40, 4  ;;  %v1416_v47 = vcombine.low %v395_v41, %v445_v43  ;;  %v1417_v49 = vcombine.high %v395_v41, %v445_v43 }
  0xd8   : > { %v1418_v60 = vcombine.low %v397_v48, %v447_v28  ;;  %v1419_v9 = vcombine.high %v397_v48, %v447_v28  ;;  %v487_v45 = vrot.slane %v481_v39, 4 }
  0xd9   : > { %1149 = vmatprep.subr.bf16.mxu1 %v1417_v49  ;;  %v495_v52 = vsel %vm335_vm0, %v485_v35, %v486_v2 }
  0xda   : > { %1190 = vmatprep.subr.bf16.mxu0 %v1419_v9  ;;  %v530_v50 = vpop.permute.xlu0 %529  ;;  %v497_v34 = vsel %vm335_vm0, %v486_v2, %v487_v45  ;;  %1150 = vmatpush1.bf16.msra.mxu1 %v1416_v47  ;;  %v496_v35 = vsel %vm489_vm3, %v1838_v54, %v495_v52 }
  0xdb   : > { %v532_v1 = vpop.permute.xlu1 %531  ;;  %1191 = vmatpush1.bf16.msra.mxu0 %v1418_v60  ;;  %v537_v25 = vrot.slane %v530_v50, 4  ;;  %v498_v57 = vsel %vm489_vm3, %v479_v40, %v497_v34 }
  0xdc   : > { %v538_v27 = vrot.slane %v532_v1, 4 }
  0xdd   : > { %v546_v53 = vsel %vm335_vm0, %v536_v10, %v537_v25 }
  0xde   : > { %v548_v55 = vsel %vm335_vm0, %v537_v25, %v538_v27  ;;  %v581_v58 = vpop.permute.xlu0 %580  ;;  %v547_v59 = vsel %vm540_vm4, %v1845_v7, %v546_v53 }
  0xdf   : > { %v549_v56 = vsel %vm540_vm4, %v530_v50, %v548_v55  ;;  %v583_v62 = vpop.permute.xlu1 %582  ;;  %v588_v6 = vrot.slane %v581_v58, 4  ;;  %v1426_v15 = vcombine.low %v496_v35, %v547_v59  ;;  %v1427_v10 = vcombine.high %v496_v35, %v547_v59 }
  0xe0   : > { %v1428_v61 = vcombine.low %v498_v57, %v549_v56  ;;  %v1429_v63 = vcombine.high %v498_v57, %v549_v56  ;;  %v589_v0 = vrot.slane %v583_v62, 4 }
  0xe1   : > { %1151 = vmatprep.subr.bf16.mxu1 %v1427_v10  ;;  %v596_v31 = vsel %vm335_vm0, %v587_v51, %v588_v6 }
  0xe2   : > { %1192 = vmatprep.subr.bf16.mxu0 %v1429_v63  ;;  %v631_v24 = vpop.permute.xlu0 %630  ;;  %v598_v54 = vsel %vm335_vm0, %v588_v6, %v589_v0  ;;  %1152 = vmatpush1.bf16.msra.mxu1 %v1426_v15  ;;  %v597_v51 = vsel %vm540_vm4, %v1862_v17, %v596_v31 }
  0xe3   : > { %v633_v8 = vpop.permute.xlu1 %632  ;;  %1193 = vmatpush1.bf16.msra.mxu0 %v1428_v61  ;;  %v638_v7 = vrot.slane %v631_v24, 4  ;;  %v599_v14 = vsel %vm540_vm4, %v581_v58, %v598_v54 }
  0xe4   : > { %v639_v12 = vrot.slane %v633_v8, 4 }
  0xe5   : > { %v647_v13 = vsel %vm335_vm0, %v637_v37, %v638_v7 }
  0xe6   : > { %v649_v11 = vsel %vm335_vm0, %v638_v7, %v639_v12  ;;  %v682_v23 = vpop.permute.xlu0 %681  ;;  %v648_v18 = vsel %vm641_vm5, %v1869_v33, %v647_v13 }
  0xe7   : > { %v650_v16 = vsel %vm641_vm5, %v631_v24, %v649_v11  ;;  %v684_v46 = vpop.permute.xlu1 %683  ;;  %v689_v26 = vrot.slane %v682_v23, 4  ;;  %v1436_v29 = vcombine.low %v597_v51, %v648_v18  ;;  %v1437_v37 = vcombine.high %v597_v51, %v648_v18 }
  0xe8   : > { %v1438_v20 = vcombine.low %v599_v14, %v650_v16  ;;  %v1439_v21 = vcombine.high %v599_v14, %v650_v16  ;;  %v690_v22 = vrot.slane %v684_v46, 4 }
  0xe9   : > { %v698_v19 = vsel %vm335_vm0, %v688_v5, %v689_v26  ;;  %1153 = vmatprep.subr.bf16.mxu1 %v1437_v37 }
  0xea   : > { %v700_v4 = vsel %vm335_vm0, %v689_v26, %v690_v22  ;;  %1194 = vmatprep.subr.bf16.mxu0 %v1439_v21  ;;  %v699_v17 = vsel %vm692_vm6, %v1886_v44, %v698_v19  ;;  %1154 = vmatpush1.bf16.msra.mxu1 %v1436_v29 }
  0xeb   : > { %v701_v30 = vsel %vm692_vm6, %v682_v23, %v700_v4  ;;  %1195 = vmatpush1.bf16.msra.mxu0 %v1438_v20  ;;  %v1447_v36 = vcombine.high %v699_v17, %v699_v17  ;;  %v1446_v3 = vcombine.low %v699_v17, %v699_v17 }
  0xec   : > { %v1448_v33 = vcombine.low %v701_v30, %v701_v30  ;;  %v1449_v32 = vcombine.high %v701_v30, %v701_v30 }
  0xed   : > { %1456 = vmatprep.subr.msk.bf16.mxu1 %vm335_vm0, %v1447_v36  ;;  %v1013_v5 = vsel %vm335_vm0, %v1446_v3, 0 }
  0xee   : > { %1458 = vmatprep.subr.msk.bf16.mxu0 %vm335_vm0, %v1449_v32  ;;  %v1019_v42 = vsel %vm335_vm0, %v1448_v33, 0  ;;  %1156 = vmatpush1.bf16.msra.mxu1 %v1013_v5 }
  0xef   : > { %1197 = vmatpush1.bf16.msra.mxu0 %v1019_v42 }
  0xf1   : > { %1457 = vmatmul.mubr.msk.bf16.vlgmr.msra.gmra.mrb[4].mxu1 %vm989_vm7, %v1811_v38 }
  0xf2   : > { %1459 = vmatmul.mubr.msk.bf16.vlgmr.msra.gmra.mrb[8].mxu0 %vm989_vm7, %v1811_v38 }
  0xf7   : > { %v762_v44 = vpop.permute.xlu0 %761 }
 0x185   : > { %v1058_v48 = vpop.f32.mrb[0].mxu0 }
 0x186   : > { %v1060_v28 = vpop.f32.mrb[1].mxu0  ;;  %v1059_v39 = vadd.f32 %v1058_v48, %v762_v44 }
 0x187   : > { %v1062_v40 = vpop.f32.mrb[2].mxu0  ;;  %v1061_v41 = vadd.f32 %v1060_v28, %v762_v44 }
 0x188   : > { %v1063_v43 = vpop.f32.mrb[3].mxu0  ;;  %v1229_v60 = vmax.f32 %v1059_v39, 0.0 }
 0x189   : > { %v1230_v9 = vmax.f32 %v1061_v41, 0.0 }
 0x18b   : > { %v1467_v38 = vpack.c.bf16 %v1230_v9, %v1229_v60 }
 0x18d   : > { %1279 = vst [vmem:[%s1986_s7] sm:$0xff] %v1467_v38 }
 0x1a4   : > { %v1099_v2 = vpop.f32.mrb[0].mxu1 }
 0x1a5   : > { %v1140_v45 = vpop.f32.mrb[4].mxu0  ;;  %v1100_v1 = vadd.f32 %v1099_v2, %v762_v44  ;;  %v1101_v50 = vpop.f32.mrb[1].mxu1 }
 0x1a6   : > { %v1141_v47 = vadd.f32 %v1140_v45, %v762_v44  ;;  %v1142_v49 = vpop.f32.mrb[5].mxu0  ;;  %v1102_v25 = vadd.f32 %v1101_v50, %v762_v44  ;;  %v1103_v53 = vpop.f32.mrb[2].mxu1 }
 0x1a7   : > { %v1143_v52 = vadd.f32 %v1142_v49, %v762_v44  ;;  %v1144_v34 = vpop.f32.mrb[6].mxu0  ;;  %v1231_v57 = vmax.f32 %v1100_v1, 0.0  ;;  %v1104_v62 = vpop.f32.mrb[3].mxu1 }
 0x1a8   : > { %v1233_v27 = vmax.f32 %v1141_v47, 0.0  ;;  %v1145_v55 = vpop.f32.mrb[7].mxu0  ;;  %v1232_v58 = vmax.f32 %v1102_v25, 0.0 }
 0x1a9   : > { %v1234_v56 = vmax.f32 %v1143_v52, 0.0 }
 0x1aa   : > { %v1468_v59 = vpack.c.bf16 %v1232_v58, %v1231_v57 }
 0x1ab   : > { %v1469_v35 = vpack.c.bf16 %v1234_v56, %v1233_v27 }
 0x1ac   : > { %1280 = vst [vmem:[%s1986_s7 + $0x8] sm:$0xff] %v1468_v59 }
 0x1ad   : > { %1281 = vst [vmem:[%s1986_s7 + $0x10] sm:$0xff] %v1469_v35 }
 0x1c4   : > { %v1181_v63 = vpop.f32.mrb[4].mxu1 }
 0x1c5   : > { %v1222_v61 = vpop.f32.mrb[8].mxu0  ;;  %v1182_v15 = vadd.f32 %v1181_v63, %v762_v44  ;;  %v1183_v10 = vpop.f32.mrb[5].mxu1 }
 0x1c6   : > { %v1223_v0 = vadd.f32 %v1222_v61, %v762_v44  ;;  %v1224_v6 = vpop.f32.mrb[9].mxu0  ;;  %v1184_v54 = vadd.f32 %v1183_v10, %v762_v44  ;;  %v1185_v12 = vpop.f32.mrb[6].mxu1 }
 0x1c7   : > { %v1225_v8 = vadd.f32 %v1224_v6, %v762_v44  ;;  %v1226_v24 = vpop.f32.mrb[10].mxu0  ;;  %v1235_v13 = vmax.f32 %v1182_v15, 0.0  ;;  %v1186_v14 = vpop.f32.mrb[7].mxu1 }
 0x1c8   : > { %v1237_v31 = vmax.f32 %v1223_v0, 0.0  ;;  %v1227_v7 = vpop.f32.mrb[11].mxu0  ;;  %v1236_v16 = vmax.f32 %v1184_v54, 0.0 }
 0x1c9   : > { %v1238_v11 = vmax.f32 %v1225_v8, 0.0 }
 0x1ca   : > { %v1470_v23 = vpack.c.bf16 %v1236_v16, %v1235_v13 }
 0x1cb   : > { %v1471_v46 = vpack.c.bf16 %v1238_v11, %v1237_v31 }
 0x1cc   : > { %1282 = vst [vmem:[%s1986_s7 + $0x18] sm:$0xff] %v1470_v23 }
 0x1cd   : > { %1283 = vst [vmem:[%s1986_s7 + $0x20] sm:$0xff] %v1471_v46 }
 0x1ce PF: > { %s14_s19 = sadd.s32 1, %s1560_s19   ;;  %s2013_s15 = smov %s1552_s17 }
 0x1cf   : > { %p11_p9 = scmp.ge.s32.totalorder %s14_s19, 28   ;;  %s2014_s16 = smov %s1556_s18 }
 0x1d0   : > { %s2015_s17 = smov %s2018_s20  ;;  %s2016_s18 = smov %s2022_s21 }
 0x1d1   :  { %13 = sbr.rel (!%p11_p9) target bundleno = 3 (0x3), region = 69 }

// kernel: decoder_forward.25
= control target key start
LH: loop header
LB: loop body
LE: loop exit
PB: predicated region body
PF: predicated region fallthrough
CT: control target
= control target key end

     0   :  { %s1615_s15 = smov 0   ;;  %s1617_s16 = smov 0   ;;  %s2018_s0 = inlined_call_operand.vmem [shape: bf16[2,8,17920], index: 0, kind: input, shape index: {}, may-alias: {0,1}]   ;;  %s2019_s1 = inlined_call_operand.vmem [shape: bf16[2,8,17920], index: 1, kind: input, shape index: {}, may-alias: {0,1}]   ;;  %s2020_s2 = inlined_call_operand.vmem [shape: bf16[4,72], index: 2, kind: input, shape index: {}]   ;;  %s2021_s3 = inlined_call_operand.vmem [shape: f32[4,1], index: 3, kind: input, shape index: {}]   ;;  %s2022_s4 = inlined_call_operand.vmem [shape: bf16[2,4,16640], index: 4, kind: output, shape index: {}]  }
   0x1   :  { %s1619_s17 = smov 0   ;;  %s1621_s18 = smov 0  }
   0x2   :  { %s1623_s19 = smov 0  }
   0x3 LB: > { %s23_s20 = sadd.s32 1, %s1572_s17  ;;  %s26_s21 = sadd.s32 1, %s1576_s18  ;;  %s1580_s19 = sphi %s1623_s19, %s14_s19   ;;  %s1576_s18 = sphi %s1621_s18, %s2026_s18   ;;  %s1572_s17 = sphi %s1619_s17, %s2025_s17   ;;  %s1568_s16 = sphi %s1617_s16, %s2024_s16   ;;  %s1564_s15 = sphi %s1615_s15, %s2023_s15  }
   0x4   : > { %p24_p0 = scmp.ge.s32.totalorder %s23_s20, 13  ;;  %p1419_p1 = scmp.ge.s32.totalorder %s1580_s19, 1 }
   0x5   : > { %p204_p2 = scmp.lt.s32.totalorder %s1580_s19, 27 }
   0x6   : > { %s2028_s20 = smov (%p24_p0, %s23_s20), 0  ;;  %s2030_s21 = smov (!%p24_p0, %s26_s21), %s1576_s18 }
   0x7   : > { %p205_p3 = pnand %p1419_p1, %p204_p2  ;;  %p28_p4 = scmp.ge.s32.totalorder %s2030_s21, 2 }
   0x8   : > { %s1645_s22 = smul.u32 (!%p205_p3), 10, %s1564_s15  ;;  %p249_p5 = scmp.lt.s32.totalorder (!%p205_p3), %s1568_s16, 1  ;;  %v1588_v9 = vmov (!%p205_p3), 0   ;;  %v758_v21 = vld [vmem:[%s2021_s3] sm:$0xf] (!%p205_p3)  ;;  %vm335_vm0 = vcmask (!%p205_p3), 1043456  }
   0x9   : > { %s2032_s21 = smov (%p28_p4, %s2030_s21), 0  ;;  %208 = sbr.rel (%p205_p3) target bundleno = 465 (0x1d1), region = 36 }
   0xa   : > { %p251_p6 = scmp.lt.s32.totalorder (!%p205_p3), %s1645_s22, 139  ;;  %s258_s26 = sadd.s32 (!%p205_p3), 1, %s1564_s15  ;;  %1056 = vmatprep.mubr.bf16.mxu0 (!%p205_p3), %v1588_v9  ;;  %1097 = vmatprep.mubr.bf16.mxu1 (!%p205_p3), %v1588_v9  ;;  %vm337_vm1 = vcmask (!%p205_p3), 1039360   ;;  %vm388_vm2 = vcmask (!%p205_p3), 1031168   ;;  %vm489_vm3 = vcmask (!%p205_p3), 1022976   ;;  %vm540_vm4 = vcmask (!%p205_p3), 1014784  }
   0xb   : > { %s259_s28 = smul.u32 (!%p205_p3), 10, %s258_s26  ;;  %s1582_s6 = smov (!%p205_p3), 126   ;;  %1541 = vset.pattern.permute.xlu0 (!%p205_p3), %v1588_v9  ;;  %vm641_vm5 = vcmask (!%p205_p3), 1006592   ;;  %vm692_vm6 = vcmask (!%p205_p3), 998400   ;;  %vm989_vm7 = vcmask (!%p205_p3), 588800  }
   0xc   : > { %s1583_s7 = smov (!%p205_p3), 127   ;;  %s1584_s13 = smov (!%p205_p3), 125  }
   0xd   : > { %p262_p7 = scmp.lt.s32.totalorder (!%p205_p3), %s259_s28, 139  ;;  %s1585_s14 = smov (!%p205_p3), 124  }
   0xe   : > { %s1586_s15 = smov (!%p205_p3), 123   ;;  %p273_p8 = scmp.lt.s32.totalorder (!%p205_p3), %s1645_s22, 129 }
  0x10   : > { %s2034_s16 = smov (!%p249_p5, %s1568_s16), 1  ;;  %s2036_s28 = smov (!%p262_p7, %s259_s28), 139 }
  0x11   : > { %s1491_s23 = smul.u32 140, %s2034_s16 }
  0x12   : > { %s252_s24 = scalar_select %p251_p6, %s1645_s22, 139 }
  0x13   : > { %s265_s8 = sadd.s32 %s1491_s23, %s2036_s28  ;;  %s2038_s22 = smov (!%p273_p8, %s1645_s22), 129 }
  0x14   : > { %s254_s25 = sadd.s32 %s1491_s23, %s252_s24  ;;  %s1421_s9 = sshll.u32 %s265_s8, 2 }
  0x15   : > { %s1420_s27 = sshll.u32 %s254_s25, 2  ;;  %s267_s12 = scalar_lea.vmem %s2019_s1, %s1421_s9 }
  0x16   : > { %s256_s5 = scalar_lea.vmem %s2018_s0, %s1420_s27  ;;  %v1681_v5 = vld [vmem:[%s267_s12] sm:$0xff]  ;;  %v292_v6 = vld [vmem:[%s267_s12 + $0x8] sm:$0xf]  ;;  %s1587_s23 = smov 122  }
  0x17   : > { %v1655_v0 = vld [vmem:[%s256_s5] sm:$0xff]  ;;  %v1657_v1 = vld [vmem:[%s256_s5 + $0x8] sm:$0xff]  ;;  %v1659_v2 = vld [vmem:[%s256_s5 + $0x10] sm:$0xff]  ;;  %293 = vst [vmem:[#allocation2 + $0x28] sm:$0xff] %v1681_v5  ;;  %s1492_s28 = smul.u32 130, %s2034_s16 }
  0x18   : > { %286 = vst [vmem:[#allocation2] sm:$0xff] %v1655_v0  ;;  %369 = vrot.lane.b32.xlu1 %v1655_v0, %s1582_s6  ;;  %317 = vrot.lane.b32.xlu0 %v1655_v0, %s1583_s7  ;;  %287 = vst [vmem:[#allocation2 + $0x8] sm:$0xff] %v1657_v1  ;;  %v1668_v3 = vld [vmem:[%s256_s5 + $0x18] sm:$0xff]  ;;  %v1670_v4 = vld [vmem:[%s256_s5 + $0x20] sm:$0xff] }
  0x19   : > { %288 = vst [vmem:[#allocation2 + $0x10] sm:$0xff] %v1659_v2  ;;  %289 = vst [vmem:[#allocation2 + $0x18] sm:$0xff] %v1668_v3  ;;  %s276_s29 = sadd.s32 %s1492_s28, %s2038_s22 }
  0x1a   : > { %290 = vst [vmem:[#allocation2 + $0x20] sm:$0xff] %v1670_v4  ;;  %294 = vst [vmem:[#allocation2 + $0x30] sm:$0xf] %v292_v6  ;;  %s1422_s30 = sshll.u32 %s276_s29, 1 }
  0x1c   : > { %371 = vrot.lane.b32.xlu1 %v1657_v1, %s1582_s6  ;;  %319 = vrot.lane.b32.xlu0 %v1657_v1, %s1583_s7 }
  0x1e   : > { %v310_v12 = vld [vmem:[#allocation2 + $0x28] sm:$0xf]  ;;  %v413_v14 = vld [vmem:[#allocation2 + $0x2c] sm:$0xf] }
  0x1f   : > { %v408_v8 = vld [vmem:[#allocation2 + $0x4] sm:$0xff]  ;;  %v514_v16 = vld [vmem:[#allocation2 + $0x2c] sm:$0xf] }
  0x20   : > { %v409_v7 = vld [vmem:[#allocation2 + $0xc] sm:$0xff]  ;;  %420 = vrot.lane.b32.xlu0 %v408_v8, %s1582_s6  ;;  %v410_v10 = vld [vmem:[#allocation2 + $0x14] sm:$0xff]  ;;  %v362_v15 = vld [vmem:[#allocation2 + $0x28] sm:$0xf] }
  0x21   : > { %422 = vrot.lane.b32.xlu1 %v409_v7, %s1582_s6  ;;  %v411_v11 = vld [vmem:[#allocation2 + $0x1c] sm:$0xff]  ;;  %v412_v13 = vld [vmem:[#allocation2 + $0x24] sm:$0xff]  ;;  %v463_v17 = vld [vmem:[#allocation2 + $0x2c] sm:$0xf] }
  0x22   : > { %v615_v18 = vld [vmem:[#allocation2 + $0x30] sm:$0xf] }
  0x23   : > { %v565_v19 = vld [vmem:[#allocation2 + $0x30] sm:$0xf] }
  0x24   : > { %470 = vrot.lane.b32.xlu0 %v408_v8, %s1584_s13  ;;  %v666_v20 = vld [vmem:[#allocation2 + $0x30] sm:$0xf] }
  0x25   : > { %472 = vrot.lane.b32.xlu1 %v409_v7, %s1584_s13 }
  0x28   : > { %521 = vrot.lane.b32.xlu0 %v408_v8, %s1585_s14 }
  0x29   : > { %523 = vrot.lane.b32.xlu1 %v409_v7, %s1585_s14 }
  0x2c   : > { %572 = vrot.lane.b32.xlu0 %v1657_v1, %s1585_s14 }
  0x2d   : > { %574 = vrot.lane.b32.xlu1 %v1659_v2, %s1585_s14 }
  0x30   : > { %622 = vrot.lane.b32.xlu0 %v1657_v1, %s1586_s15 }
  0x31   : > { %624 = vrot.lane.b32.xlu1 %v1659_v2, %s1586_s15 }
  0x34   : > { %321 = vrot.lane.b32.xlu0 %v1659_v2, %s1583_s7 }
  0x35   : > { %673 = vrot.lane.b32.xlu1 %v1657_v1, %s1587_s23 }
  0x38   : > { %675 = vrot.lane.b32.xlu0 %v1659_v2, %s1587_s23 }
  0x39   : > { %323 = vrot.lane.b32.xlu1 %v1668_v3, %s1583_s7 }
  0x3c   : > { %373 = vrot.lane.b32.xlu0 %v1659_v2, %s1582_s6 }
  0x3d   : > { %424 = vrot.lane.b32.xlu1 %v410_v10, %s1582_s6 }
  0x40   : > { %375 = vrot.lane.b32.xlu0 %v1668_v3, %s1582_s6 }
  0x41   : > { %426 = vrot.lane.b32.xlu1 %v411_v11, %s1582_s6 }
  0x44   : > { %474 = vrot.lane.b32.xlu0 %v410_v10, %s1584_s13 }
  0x45   : > { %525 = vrot.lane.b32.xlu1 %v410_v10, %s1585_s14 }
  0x48   : > { %476 = vrot.lane.b32.xlu0 %v411_v11, %s1584_s13 }
  0x49   : > { %527 = vrot.lane.b32.xlu1 %v411_v11, %s1585_s14 }
  0x4c   : > { %576 = vrot.lane.b32.xlu0 %v1668_v3, %s1585_s14 }
  0x4d   : > { %626 = vrot.lane.b32.xlu1 %v1668_v3, %s1586_s15 }
  0x50   : > { %578 = vrot.lane.b32.xlu0 %v1670_v4, %s1585_s14 }
  0x51   : > { %628 = vrot.lane.b32.xlu1 %v1670_v4, %s1586_s15 }
  0x54   : > { %677 = vrot.lane.b32.xlu0 %v1668_v3, %s1587_s23 }
  0x55   : > { %325 = vrot.lane.b32.xlu1 %v1670_v4, %s1583_s7 }
  0x58   : > { %679 = vrot.lane.b32.xlu0 %v1670_v4, %s1587_s23 }
  0x59   : > { %327 = vrot.lane.b32.xlu1 %v310_v12, %s1583_s7 }
  0x5c   : > { %377 = vrot.lane.b32.xlu0 %v1670_v4, %s1582_s6 }
  0x5d   : > { %428 = vrot.lane.b32.xlu1 %v412_v13, %s1582_s6 }
  0x60   : > { %379 = vrot.lane.b32.xlu0 %v362_v15, %s1582_s6 }
  0x61   : > { %430 = vrot.lane.b32.xlu1 %v413_v14, %s1582_s6  ;;  %s278_s6 = scalar_lea.vmem %s2022_s4, %s1422_s30 }
  0x64   : > { %478 = vrot.lane.b32.xlu0 %v412_v13, %s1584_s13 }
  0x65   : > { %529 = vrot.lane.b32.xlu1 %v412_v13, %s1585_s14 }
  0x68   : > { %480 = vrot.lane.b32.xlu0 %v463_v17, %s1584_s13 }
  0x69   : > { %531 = vrot.lane.b32.xlu1 %v514_v16, %s1585_s14 }
  0x6c   : > { %580 = vrot.lane.b32.xlu0 %v1681_v5, %s1585_s14 }
  0x6d   : > { %630 = vrot.lane.b32.xlu1 %v1681_v5, %s1586_s15 }
  0x70   : > { %582 = vrot.lane.b32.xlu0 %v565_v19, %s1585_s14 }
  0x71   : > { %632 = vrot.lane.b32.xlu1 %v615_v18, %s1586_s15 }
  0x74   : > { %681 = vrot.lane.b32.xlu0 %v1681_v5, %s1587_s23 }
  0x75   : > { %683 = vrot.lane.b32.xlu1 %v666_v20, %s1587_s23 }
  0x78   : > { %761 = vperm.xlu0 %1541, %v758_v21  }
  0x8a   : > { %v370_v22 = vpop.permute.xlu1 %369  ;;  %v318_v23 = vpop.permute.xlu0 %317 }
  0x8b   : > { %v381_v24 = vrot.slane %v370_v22, 4  ;;  %v329_v27 = vrot.slane %v318_v23, 4 }
  0x8e   : > { %v1755_v25 = vpop.permute.xlu1 %371  ;;  %v1757_v26 = vpop.permute.xlu0 %319 }
  0x8f   : > { %v382_v28 = vrot.slane %v1755_v25, 4  ;;  %v330_v29 = vrot.slane %v1757_v26, 4 }
  0x91   : > { %v336_v30 = vsel %vm335_vm0, %v329_v27, %v330_v29  ;;  %v387_v32 = vsel %vm335_vm0, %v381_v24, %v382_v28 }
  0x92   : > { %v421_v33 = vpop.permute.xlu0 %420  ;;  %v338_v34 = vsel %vm337_vm1, %v318_v23, %v336_v30  ;;  %v389_v40 = vsel %vm388_vm2, %v370_v22, %v387_v32 }
  0x93   : > { %v1762_v31 = vpop.permute.xlu1 %422  ;;  %v432_v36 = vrot.slane %v421_v33, 4  ;;  %v1424_v37 = vcombine.high %v1655_v0, %v338_v34  ;;  %v1423_v38 = vcombine.low %v1655_v0, %v338_v34 }
  0x94   : > { %v433_v35 = vrot.slane %v1762_v31, 4 }
  0x95   : > { %1024 = vmatprep.subr.bf16.mxu0 %v1424_v37 }
  0x96   : > { %v438_v39 = vsel %vm335_vm0, %v432_v36, %v433_v35  ;;  %v471_v43 = vpop.permute.xlu0 %470  ;;  %1025 = vmatpush1.bf16.msra.mxu0 %v1423_v38 }
  0x97   : > { %v439_v41 = vsel %vm388_vm2, %v421_v33, %v438_v39  ;;  %v1776_v42 = vpop.permute.xlu1 %472  ;;  %v482_v47 = vrot.slane %v471_v43, 4 }
  0x98   : > { %v1433_v44 = vcombine.low %v389_v40, %v439_v41  ;;  %v1434_v45 = vcombine.high %v389_v40, %v439_v41  ;;  %v483_v46 = vrot.slane %v1776_v42, 4 }
  0x9a   : > { %1026 = vmatprep.subr.bf16.mxu0 %v1434_v45  ;;  %v522_v49 = vpop.permute.xlu0 %521  ;;  %v488_v50 = vsel %vm335_vm0, %v482_v47, %v483_v46 }
  0x9b   : > { %v1779_v48 = vpop.permute.xlu1 %523  ;;  %1027 = vmatpush1.bf16.msra.mxu0 %v1433_v44  ;;  %v533_v52 = vrot.slane %v522_v49, 4  ;;  %v490_v54 = vsel %vm489_vm3, %v471_v43, %v488_v50 }
  0x9c   : > { %v534_v51 = vrot.slane %v1779_v48, 4 }
  0x9e   : > { %v539_v53 = vsel %vm335_vm0, %v533_v52, %v534_v51  ;;  %v573_v57 = vpop.permute.xlu0 %572 }
  0x9f   : > { %v541_v55 = vsel %vm540_vm4, %v522_v49, %v539_v53  ;;  %v1790_v56 = vpop.permute.xlu1 %574  ;;  %v584_v61 = vrot.slane %v573_v57, 4 }
  0xa0   : > { %v1443_v58 = vcombine.low %v490_v54, %v541_v55  ;;  %v1444_v59 = vcombine.high %v490_v54, %v541_v55  ;;  %v585_v60 = vrot.slane %v1790_v56, 4 }
  0xa2   : > { %1028 = vmatprep.subr.bf16.mxu0 %v1444_v59  ;;  %v623_v63 = vpop.permute.xlu0 %622  ;;  %v590_v0 = vsel %vm335_vm0, %v584_v61, %v585_v60 }
  0xa3   : > { %v1793_v62 = vpop.permute.xlu1 %624  ;;  %1029 = vmatpush1.bf16.msra.mxu0 %v1443_v58  ;;  %v634_v6 = vrot.slane %v623_v63, 4  ;;  %v591_v8 = vsel %vm540_vm4, %v573_v57, %v590_v0 }
  0xa4   : > { %v635_v5 = vrot.slane %v1793_v62, 4 }
  0xa6   : > { %v640_v7 = vsel %vm335_vm0, %v634_v6, %v635_v5  ;;  %v322_v12 = vpop.permute.xlu0 %321 }
  0xa7   : > { %v642_v10 = vsel %vm641_vm5, %v623_v63, %v640_v7  ;;  %v674_v11 = vpop.permute.xlu1 %673  ;;  %v331_v15 = vrot.slane %v322_v12, 4 }
  0xa8   : > { %v1453_v13 = vcombine.low %v591_v8, %v642_v10  ;;  %v1454_v14 = vcombine.high %v591_v8, %v642_v10  ;;  %v685_v16 = vrot.slane %v674_v11, 4 }
  0xa9   : > { %v339_v17 = vsel %vm335_vm0, %v330_v29, %v331_v15 }
  0xaa   : > { %1030 = vmatprep.subr.bf16.mxu0 %v1454_v14  ;;  %v1807_v19 = vpop.permute.xlu0 %675  ;;  %v340_v20 = vsel %vm337_vm1, %v1757_v26, %v339_v17 }
  0xab   : > { %v1805_v18 = vpop.permute.xlu1 %323  ;;  %1031 = vmatpush1.bf16.msra.mxu0 %v1453_v13  ;;  %v686_v22 = vrot.slane %v1807_v19, 4  ;;  %v1426_v23 = vcombine.high %v1657_v1, %v340_v20  ;;  %v1425_v24 = vcombine.low %v1657_v1, %v340_v20 }
  0xac   : > { %v332_v21 = vrot.slane %v1805_v18, 4 }
  0xad   : > { %v691_v29 = vsel %vm335_vm0, %v685_v16, %v686_v22  ;;  %1065 = vmatprep.subr.bf16.mxu1 %v1426_v23 }
  0xae   : > { %v341_v27 = vsel %vm335_vm0, %v331_v15, %v332_v21  ;;  %1066 = vmatpush1.bf16.msra.mxu1 %v1425_v24  ;;  %v374_v26 = vpop.permute.xlu0 %373  ;;  %v693_v32 = vsel %vm692_vm6, %v674_v11, %v691_v29 }
  0xaf   : > { %v425_v30 = vpop.permute.xlu1 %424  ;;  %v342_v33 = vsel %vm337_vm1, %v322_v12, %v341_v27  ;;  %v383_v36 = vrot.slane %v374_v26, 4  ;;  %v1464_v37 = vcombine.high %v693_v32, %v693_v32  ;;  %v1463_v1 = vcombine.low %v693_v32, %v693_v32 }
  0xb0   : > { %v434_v34 = vrot.slane %v425_v30, 4  ;;  %v1428_v41 = vcombine.high %v1659_v2, %v342_v33  ;;  %v1427_v53 = vcombine.low %v1659_v2, %v342_v33 }
  0xb1   : > { %v390_v39 = vsel %vm335_vm0, %v382_v28, %v383_v36  ;;  %1473 = vmatprep.subr.msk.bf16.mxu0 %vm335_vm0, %v1464_v37  ;;  %v995_v40 = vsel %vm335_vm0, %v1463_v1, 0  ;;  %v1843_v28 = vld [vmem:[%s2020_s2] sm:$0x3] }
  0xb2   : > { %v440_v38 = vsel %vm335_vm0, %v433_v35, %v434_v34  ;;  %v1834_v44 = vpop.permute.xlu0 %375  ;;  %1033 = vmatpush1.bf16.msra.mxu0 %v995_v40  ;;  %v391_v45 = vsel %vm388_vm2, %v1755_v25, %v390_v39 }
  0xb3   : > { %v1832_v43 = vpop.permute.xlu1 %426  ;;  %v441_v35 = vsel %vm388_vm2, %v1762_v31, %v440_v38  ;;  %v384_v49 = vrot.slane %v1834_v44, 4  ;;  %1106 = vmatprep.subr.bf16.mxu0 %v1428_v41 }
  0xb4   : > { %v435_v47 = vrot.slane %v1832_v43, 4  ;;  %v1436_v50 = vcombine.high %v391_v45, %v441_v35  ;;  %v1435_v52 = vcombine.low %v391_v45, %v441_v35 }
  0xb5   : > { %v392_v31 = vsel %vm335_vm0, %v383_v36, %v384_v49  ;;  %1474 = vmatmul.mubr.msk.bf16.vlgmr.msra.gmra.mrb[0].mxu0 %vm989_vm7, %v1843_v28 }
  0xb6   : > { %v442_v25 = vsel %vm335_vm0, %v434_v34, %v435_v47  ;;  %1067 = vmatprep.subr.bf16.mxu1 %v1436_v50  ;;  %v475_v55 = vpop.permute.xlu0 %474  ;;  %1107 = vmatpush1.bf16.msra.mxu0 %v1427_v53  ;;  %v393_v57 = vsel %vm388_vm2, %v374_v26, %v392_v31 }
  0xb7   : > { %v526_v54 = vpop.permute.xlu1 %525  ;;  %1068 = vmatpush1.bf16.msra.mxu1 %v1435_v52  ;;  %v443_v2 = vsel %vm388_vm2, %v425_v30, %v442_v25  ;;  %v484_v59 = vrot.slane %v475_v55, 4  ;;  %1138 = vmatprep.mubr.bf16.mxu0 %v1588_v9 }
  0xb8   : > { %v535_v58 = vrot.slane %v526_v54, 4  ;;  %v1437_v61 = vcombine.low %v393_v57, %v443_v2  ;;  %v1438_v63 = vcombine.high %v393_v57, %v443_v2 }
  0xb9   : > { %v491_v6 = vsel %vm335_vm0, %v483_v46, %v484_v59 }
  0xba   : > { %v542_v0 = vsel %vm335_vm0, %v534_v51, %v535_v58  ;;  %1108 = vmatprep.subr.bf16.mxu0 %v1438_v63  ;;  %v1867_v8 = vpop.permute.xlu0 %476  ;;  %v492_v10 = vsel %vm489_vm3, %v1776_v42, %v491_v6 }
  0xbb   : > { %v1865_v7 = vpop.permute.xlu1 %527  ;;  %1109 = vmatpush1.bf16.msra.mxu0 %v1437_v61  ;;  %v543_v11 = vsel %vm540_vm4, %v1779_v48, %v542_v0  ;;  %v485_v51 = vrot.slane %v1867_v8, 4 }
  0xbc   : > { %v536_v12 = vrot.slane %v1865_v7, 4  ;;  %v1446_v13 = vcombine.high %v492_v10, %v543_v11  ;;  %v1445_v14 = vcombine.low %v492_v10, %v543_v11 }
  0xbd   : > { %v493_v15 = vsel %vm335_vm0, %v484_v59, %v485_v51 }
  0xbe   : > { %v544_v46 = vsel %vm335_vm0, %v535_v58, %v536_v12  ;;  %1069 = vmatprep.subr.bf16.mxu1 %v1446_v13  ;;  %v577_v42 = vpop.permute.xlu0 %576  ;;  %v494_v48 = vsel %vm489_vm3, %v475_v55, %v493_v15 }
  0xbf   : > { %v627_v16 = vpop.permute.xlu1 %626  ;;  %1070 = vmatpush1.bf16.msra.mxu1 %v1445_v14  ;;  %v545_v17 = vsel %vm540_vm4, %v526_v54, %v544_v46  ;;  %v586_v23 = vrot.slane %v577_v42, 4 }
  0xc0   : > { %v636_v20 = vrot.slane %v627_v16, 4  ;;  %v1447_v24 = vcombine.low %v494_v48, %v545_v17  ;;  %v1448_v27 = vcombine.high %v494_v48, %v545_v17 }
  0xc1   : > { %v592_v30 = vsel %vm335_vm0, %v585_v60, %v586_v23 }
  0xc2   : > { %v643_v29 = vsel %vm335_vm0, %v635_v5, %v636_v20  ;;  %1110 = vmatprep.subr.bf16.mxu0 %v1448_v27  ;;  %v1891_v32 = vpop.permute.xlu0 %578  ;;  %v593_v33 = vsel %vm540_vm4, %v1790_v56, %v592_v30 }
  0xc3   : > { %v1889_v26 = vpop.permute.xlu1 %628  ;;  %1111 = vmatpush1.bf16.msra.mxu0 %v1447_v24  ;;  %v644_v34 = vsel %vm641_vm5, %v1793_v62, %v643_v29  ;;  %v587_v5 = vrot.slane %v1891_v32, 4 }
  0xc4   : > { %v637_v36 = vrot.slane %v1889_v26, 4  ;;  %v1456_v37 = vcombine.high %v593_v33, %v644_v34  ;;  %v1455_v1 = vcombine.low %v593_v33, %v644_v34 }
  0xc5   : > { %v594_v38 = vsel %vm335_vm0, %v586_v23, %v587_v5 }
  0xc6   : > { %v645_v60 = vsel %vm335_vm0, %v636_v20, %v637_v36  ;;  %1071 = vmatprep.subr.bf16.mxu1 %v1456_v37  ;;  %v678_v56 = vpop.permute.xlu0 %677  ;;  %v595_v62 = vsel %vm540_vm4, %v577_v42, %v594_v38 }
  0xc7   : > { %v326_v39 = vpop.permute.xlu1 %325  ;;  %1072 = vmatpush1.bf16.msra.mxu1 %v1455_v1  ;;  %v646_v40 = vsel %vm641_vm5, %v627_v16, %v645_v60  ;;  %v687_v45 = vrot.slane %v678_v56, 4 }
  0xc8   : > { %v333_v41 = vrot.slane %v326_v39, 4  ;;  %v1457_v35 = vcombine.low %v595_v62, %v646_v40  ;;  %v1458_v50 = vcombine.high %v595_v62, %v646_v40 }
  0xc9   : > { %v694_v53 = vsel %vm335_vm0, %v686_v22, %v687_v45 }
  0xca   : > { %v343_v52 = vsel %vm335_vm0, %v332_v21, %v333_v41  ;;  %1112 = vmatprep.subr.bf16.mxu0 %v1458_v50  ;;  %v1913_v31 = vpop.permute.xlu0 %679  ;;  %v695_v54 = vsel %vm692_vm6, %v1807_v19, %v694_v53 }
  0xcb   : > { %v328_v25 = vpop.permute.xlu1 %327  ;;  %1113 = vmatpush1.bf16.msra.mxu0 %v1457_v35  ;;  %v344_v55 = vsel %vm337_vm1, %v1805_v18, %v343_v52  ;;  %v688_v2 = vrot.slane %v1913_v31, 4  ;;  %v1466_v58 = vcombine.high %v695_v54, %v695_v54  ;;  %v1465_v21 = vcombine.low %v695_v54, %v695_v54 }
  0xcc   : > { %v334_v57 = vrot.slane %v328_v25, 4  ;;  %v1430_v19 = vcombine.high %v1668_v3, %v344_v55  ;;  %v1429_v46 = vcombine.low %v1668_v3, %v344_v55 }
  0xcd   : > { %v696_v22 = vsel %vm335_vm0, %v687_v45, %v688_v2  ;;  %1475 = vmatprep.subr.msk.bf16.mxu1 %vm335_vm0, %v1466_v58  ;;  %v1001_v61 = vsel %vm335_vm0, %v1465_v21, 0 }
  0xce   : > { %v345_v59 = vsel %vm335_vm0, %v333_v41, %v334_v57  ;;  %1074 = vmatpush1.bf16.msra.mxu1 %v1001_v61  ;;  %v378_v18 = vpop.permute.xlu0 %377  ;;  %v697_v0 = vsel %vm692_vm6, %v678_v56, %v696_v22 }
  0xcf   : > { %v429_v63 = vpop.permute.xlu1 %428  ;;  %v346_v6 = vsel %vm337_vm1, %v326_v39, %v345_v59  ;;  %v385_v11 = vrot.slane %v378_v18, 4  ;;  %1147 = vmatprep.subr.bf16.mxu1 %v1430_v19  ;;  %v1468_v13 = vcombine.high %v697_v0, %v697_v0  ;;  %v1467_v14 = vcombine.low %v697_v0, %v697_v0 }
  0xd0   : > { %v436_v10 = vrot.slane %v429_v63, 4  ;;  %v1432_v48 = vcombine.high %v1670_v4, %v346_v6  ;;  %v1431_v29 = vcombine.low %v1670_v4, %v346_v6 }
  0xd1   : > { %v394_v16 = vsel %vm335_vm0, %v384_v49, %v385_v11  ;;  %1476 = vmatmul.mubr.msk.bf16.vlgmr.msra.gmra.mrb[0].mxu1 %vm989_vm7, %v1843_v28  ;;  %1477 = vmatprep.subr.msk.bf16.mxu0 %vm335_vm0, %v1468_v13  ;;  %v1007_v42 = vsel %vm335_vm0, %v1467_v14, 0 }
  0xd2   : > { %v444_v15 = vsel %vm335_vm0, %v435_v47, %v436_v10  ;;  %1148 = vmatpush1.bf16.msra.mxu1 %v1429_v46  ;;  %v380_v3 = vpop.permute.xlu0 %379  ;;  %1115 = vmatpush1.bf16.msra.mxu0 %v1007_v42  ;;  %v395_v47 = vsel %vm388_vm2, %v1834_v44, %v394_v16 }
  0xd3   : > { %v431_v17 = vpop.permute.xlu1 %430  ;;  %v445_v20 = vsel %vm388_vm2, %v1832_v43, %v444_v15  ;;  %v386_v23 = vrot.slane %v380_v3, 4  ;;  %1188 = vmatprep.subr.bf16.mxu0 %v1432_v48  ;;  %1179 = vmatprep.mubr.bf16.mxu1 %v1588_v9 }
  0xd4   : > { %v437_v49 = vrot.slane %v431_v17, 4  ;;  %v1439_v24 = vcombine.low %v395_v47, %v445_v20  ;;  %v1440_v27 = vcombine.high %v395_v47, %v445_v20 }
  0xd5   : > { %v396_v33 = vsel %vm335_vm0, %v385_v11, %v386_v23  ;;  %1478 = vmatmul.mubr.msk.bf16.vlgmr.msra.gmra.mrb[4].mxu0 %vm989_vm7, %v1843_v28 }
  0xd6   : > { %v446_v30 = vsel %vm335_vm0, %v436_v10, %v437_v49  ;;  %1149 = vmatprep.subr.bf16.mxu1 %v1440_v27  ;;  %v479_v43 = vpop.permute.xlu0 %478  ;;  %1189 = vmatpush1.bf16.msra.mxu0 %v1431_v29  ;;  %v397_v34 = vsel %vm388_vm2, %v378_v18, %v396_v33 }
  0xd7   : > { %v530_v44 = vpop.permute.xlu1 %529  ;;  %1150 = vmatpush1.bf16.msra.mxu1 %v1439_v24  ;;  %v447_v37 = vsel %vm388_vm2, %v429_v63, %v446_v30  ;;  %v486_v60 = vrot.slane %v479_v43, 4  ;;  %1220 = vmatprep.mubr.bf16.mxu0 %v1588_v9 }
  0xd8   : > { %v537_v1 = vrot.slane %v530_v44, 4  ;;  %v1441_v38 = vcombine.low %v397_v34, %v447_v37  ;;  %v1442_v4 = vcombine.high %v397_v34, %v447_v37 }
  0xd9   : > { %v495_v56 = vsel %vm335_vm0, %v485_v51, %v486_v60 }
  0xda   : > { %v546_v39 = vsel %vm335_vm0, %v536_v12, %v537_v1  ;;  %1190 = vmatprep.subr.bf16.mxu0 %v1442_v4  ;;  %v481_v40 = vpop.permute.xlu0 %480  ;;  %v496_v41 = vsel %vm489_vm3, %v1867_v8, %v495_v56  ;;  %v1264_v4 = vlaneseq }
  0xdb   : > { %v532_v62 = vpop.permute.xlu1 %531  ;;  %1191 = vmatpush1.bf16.msra.mxu0 %v1441_v38  ;;  %v547_v45 = vsel %vm540_vm4, %v1865_v7, %v546_v39  ;;  %v487_v9 = vrot.slane %v481_v40, 4 }
  0xdc   : > { %v538_v35 = vrot.slane %v532_v62, 4  ;;  %v1449_v50 = vcombine.low %v496_v41, %v547_v45  ;;  %v1450_v52 = vcombine.high %v496_v41, %v547_v45 }
  0xdd   : > { %v497_v53 = vsel %vm335_vm0, %v486_v60, %v487_v9  ;;  %v1589_v60 = vmov 1983009808  }
  0xde   : > { %v548_v12 = vsel %vm335_vm0, %v537_v1, %v538_v35  ;;  %1151 = vmatprep.subr.bf16.mxu1 %v1450_v52  ;;  %v581_v25 = vpop.permute.xlu0 %580  ;;  %v498_v54 = vsel %vm489_vm3, %v479_v43, %v497_v53  ;;  %v1262_v38 = vunpack.c.l.s4 %v1589_v60 }
  0xdf   : > { %v631_v51 = vpop.permute.xlu1 %630  ;;  %1152 = vmatpush1.bf16.msra.mxu1 %v1449_v50  ;;  %v549_v55 = vsel %vm540_vm4, %v530_v44, %v548_v12  ;;  %v588_v57 = vrot.slane %v581_v25, 4 }
  0xe0   : > { %v638_v8 = vrot.slane %v631_v51, 4  ;;  %v1451_v58 = vcombine.low %v498_v54, %v549_v55  ;;  %v1452_v7 = vcombine.high %v498_v54, %v549_v55  ;;  %v1263_v56 = vunpack.c.0.s8 %v1262_v38 }
  0xe1   : > { %v596_v59 = vsel %vm335_vm0, %v587_v5, %v588_v57 }
  0xe2   : > { %v647_v21 = vsel %vm335_vm0, %v637_v36, %v638_v8  ;;  %1192 = vmatprep.subr.bf16.mxu0 %v1452_v7  ;;  %v583_v61 = vpop.permute.xlu0 %582  ;;  %v597_v19 = vsel %vm540_vm4, %v1891_v32, %v596_v59 }
  0xe3   : > { %v633_v22 = vpop.permute.xlu1 %632  ;;  %1193 = vmatpush1.bf16.msra.mxu0 %v1451_v58  ;;  %v648_v63 = vsel %vm641_vm5, %v1889_v26, %v647_v21  ;;  %v589_v0 = vrot.slane %v583_v61, 4 }
  0xe4   : > { %v639_v18 = vrot.slane %v633_v22, 4  ;;  %v1459_v6 = vcombine.low %v597_v19, %v648_v63  ;;  %v1460_v10 = vcombine.high %v597_v19, %v648_v63 }
  0xe5   : > { %v598_v11 = vsel %vm335_vm0, %v588_v57, %v589_v0 }
  0xe6   : > { %v649_v36 = vsel %vm335_vm0, %v638_v8, %v639_v18  ;;  %1153 = vmatprep.subr.bf16.mxu1 %v1460_v10  ;;  %v682_v13 = vpop.permute.xlu0 %681  ;;  %v599_v14 = vsel %vm540_vm4, %v581_v25, %v598_v11 }
  0xe7   : > { %v684_v5 = vpop.permute.xlu1 %683  ;;  %1154 = vmatpush1.bf16.msra.mxu1 %v1459_v6  ;;  %v650_v46 = vsel %vm641_vm5, %v631_v51, %v649_v36  ;;  %v689_v15 = vrot.slane %v682_v13, 4 }
  0xe8   : > { %v690_v32 = vrot.slane %v684_v5, 4  ;;  %v1461_v16 = vcombine.low %v599_v14, %v650_v46  ;;  %v1462_v26 = vcombine.high %v599_v14, %v650_v46 }
  0xe9   : > { %v698_v42 = vsel %vm335_vm0, %v688_v2, %v689_v15 }
  0xea   : > { %v700_v48 = vsel %vm335_vm0, %v689_v15, %v690_v32  ;;  %1194 = vmatprep.subr.bf16.mxu0 %v1462_v26  ;;  %v699_v3 = vsel %vm692_vm6, %v1913_v31, %v698_v42 }
  0xeb   : > { %v701_v17 = vsel %vm692_vm6, %v682_v13, %v700_v48  ;;  %1195 = vmatpush1.bf16.msra.mxu0 %v1461_v16  ;;  %v1470_v49 = vcombine.high %v699_v3, %v699_v3  ;;  %v1469_v23 = vcombine.low %v699_v3, %v699_v3 }
  0xec   : > { %v1471_v47 = vcombine.low %v701_v17, %v701_v17  ;;  %v1472_v20 = vcombine.high %v701_v17, %v701_v17 }
  0xed   : > { %1479 = vmatprep.subr.msk.bf16.mxu1 %vm335_vm0, %v1470_v49  ;;  %v1013_v24 = vsel %vm335_vm0, %v1469_v23, 0 }
  0xee   : > { %1481 = vmatprep.subr.msk.bf16.mxu0 %vm335_vm0, %v1472_v20  ;;  %v1019_v2 = vsel %vm335_vm0, %v1471_v47, 0  ;;  %1156 = vmatpush1.bf16.msra.mxu1 %v1013_v24 }
  0xef   : > { %1197 = vmatpush1.bf16.msra.mxu0 %v1019_v2 }
  0xf1   : > { %1480 = vmatmul.mubr.msk.bf16.vlgmr.msra.gmra.mrb[4].mxu1 %vm989_vm7, %v1843_v28 }
  0xf2   : > { %1482 = vmatmul.mubr.msk.bf16.vlgmr.msra.gmra.mrb[8].mxu0 %vm989_vm7, %v1843_v28  ;;  %v1265_v28 = vshrl.u32 %v1264_v4, 7 }
  0xf4   : > { %v1266_v52 = vsub.s32 %v1263_v56, %v1265_v28 }
  0xf7   : > { %v762_v31 = vpop.permute.xlu0 %761 }
 0x188   : > { %v1058_v27 = vpop.f32.mrb[0].mxu0 }
 0x189   : > { %v1060_v29 = vpop.f32.mrb[1].mxu0  ;;  %v1059_v30 = vadd.f32 %v1058_v27, %v762_v31 }
 0x18a   : > { %v1062_v33 = vpop.f32.mrb[2].mxu0  ;;  %v1061_v44 = vadd.f32 %v1060_v29, %v762_v31 }
 0x18b   : > { %v1063_v43 = vpop.f32.mrb[3].mxu0  ;;  %v1229_v34 = vmax.f32 %v1059_v30, 0.0 }
 0x18c   : > { %v1230_v37 = vmax.f32 %v1061_v44, 0.0 }
 0x18e   : > { %v1483_v1 = vpack.c.bf16 %v1230_v37, %v1229_v34 }
 0x190   : > { %v1267_v58 = vrot.slane %v1483_v1, %v1266_v52 }
 0x1a4   : > { %v1099_v39 = vpop.f32.mrb[0].mxu1 }
 0x1a5   : > { %v1100_v62 = vadd.f32 %v1099_v39, %v762_v31  ;;  %v1101_v40 = vpop.f32.mrb[1].mxu1 }
 0x1a6   : > { %v1102_v41 = vadd.f32 %v1101_v40, %v762_v31  ;;  %v1103_v45 = vpop.f32.mrb[2].mxu1 }
 0x1a7   : > { %v1231_v35 = vmax.f32 %v1100_v62, 0.0  ;;  %v1104_v9 = vpop.f32.mrb[3].mxu1 }
 0x1a8   : > { %v1232_v50 = vmax.f32 %v1102_v41, 0.0  ;;  %v1140_v12 = vpop.f32.mrb[4].mxu0 }
 0x1a9   : > { %v1141_v53 = vadd.f32 %v1140_v12, %v762_v31  ;;  %v1142_v51 = vpop.f32.mrb[5].mxu0 }
 0x1aa   : > { %v1484_v25 = vpack.c.bf16 %v1232_v50, %v1231_v35  ;;  %v1143_v54 = vadd.f32 %v1142_v51, %v762_v31  ;;  %v1144_v55 = vpop.f32.mrb[6].mxu0 }
 0x1ab   : > { %v1233_v8 = vmax.f32 %v1141_v53, 0.0  ;;  %v1145_v57 = vpop.f32.mrb[7].mxu0 }
 0x1ac   : > { %v1274_v7 = vrot.slane %v1484_v25, %v1266_v52  ;;  %v1234_v21 = vmax.f32 %v1143_v54, 0.0 }
 0x1ae   : > { %v1275_v59 = vcombine.low %v1267_v58, %v1274_v7  ;;  %v1485_v22 = vpack.c.bf16 %v1234_v21, %v1233_v8 }
 0x1b0   : > { %1304 = vst [vmem:[%s278_s6] sm:$0xff] %v1275_v59  ;;  %v1284_v48 = vrot.slane %v1485_v22, %v1266_v52 }
 0x1c4   : > { %v1181_v61 = vpop.f32.mrb[4].mxu1 }
 0x1c5   : > { %v1222_v19 = vpop.f32.mrb[8].mxu0  ;;  %v1182_v63 = vadd.f32 %v1181_v61, %v762_v31  ;;  %v1183_v0 = vpop.f32.mrb[5].mxu1 }
 0x1c6   : > { %v1223_v18 = vadd.f32 %v1222_v19, %v762_v31  ;;  %v1224_v6 = vpop.f32.mrb[9].mxu0  ;;  %v1184_v10 = vadd.f32 %v1183_v0, %v762_v31  ;;  %v1185_v11 = vpop.f32.mrb[6].mxu1 }
 0x1c7   : > { %v1225_v36 = vadd.f32 %v1224_v6, %v762_v31  ;;  %v1226_v5 = vpop.f32.mrb[10].mxu0  ;;  %v1235_v13 = vmax.f32 %v1182_v63, 0.0  ;;  %v1186_v46 = vpop.f32.mrb[7].mxu1 }
 0x1c8   : > { %v1237_v14 = vmax.f32 %v1223_v18, 0.0  ;;  %v1227_v32 = vpop.f32.mrb[11].mxu0  ;;  %v1236_v15 = vmax.f32 %v1184_v10, 0.0 }
 0x1c9   : > { %v1238_v16 = vmax.f32 %v1225_v36, 0.0 }
 0x1ca   : > { %v1486_v26 = vpack.c.bf16 %v1236_v15, %v1235_v13 }
 0x1cb   : > { %v1487_v42 = vpack.c.bf16 %v1238_v16, %v1237_v14 }
 0x1cc   : > { %v1291_v17 = vrot.slane %v1486_v26, %v1266_v52 }
 0x1cd   : > { %1488 = vst.sshfl [vmem:[%s278_s6 + $0x10] sm:$0x33 pattern:$0x76325410] %v1487_v42 }
 0x1ce   : > { %v1292_v3 = vcombine.low %v1284_v48, %v1291_v17 }
 0x1d0   : > { %1305 = vst [vmem:[%s278_s6 + $0x8] sm:$0xff] %v1292_v3 }
 0x1d1 PF: > { %s14_s19 = sadd.s32 1, %s1580_s19   ;;  %s2023_s15 = smov %s1572_s17 }
 0x1d2   : > { %p11_p9 = scmp.ge.s32.totalorder %s14_s19, 28   ;;  %s2024_s16 = smov %s1576_s18 }
 0x1d3   : > { %s2025_s17 = smov %s2028_s20  ;;  %s2026_s18 = smov %s2032_s21 }
 0x1d4   :  { %13 = sbr.rel (!%p11_p9) target bundleno = 3 (0x3), region = 69 }

// kernel: decoder_forward.26
= control target key start
LH: loop header
LB: loop body
LE: loop exit
PB: predicated region body
PF: predicated region fallthrough
CT: control target
= control target key end

     0   :  { %s2144_s15 = smov 0   ;;  %s2146_s16 = smov 0   ;;  %s2594_s0 = inlined_call_operand.vmem [shape: bf16[2,4,67584], index: 0, kind: input, shape index: {}, may-alias: {0,1}]   ;;  %s2595_s1 = inlined_call_operand.vmem [shape: bf16[2,4,67584], index: 1, kind: input, shape index: {}, may-alias: {0,1}]   ;;  %s2596_s2 = inlined_call_operand.vmem [shape: bf16[4,36], index: 2, kind: input, shape index: {}]   ;;  %s2597_s3 = inlined_call_operand.vmem [shape: f32[4,1], index: 3, kind: input, shape index: {}]   ;;  %s2598_s4 = inlined_call_operand.vmem [shape: bf16[2,4,66048], index: 4, kind: output, shape index: {}]  }
   0x1   :  { %s2148_s17 = smov 0   ;;  %s2150_s18 = smov 0  }
   0x2   :  { %s2152_s19 = smov 0  }
   0x3 LB: > { %s23_s20 = sadd.s32 1, %s2101_s17  ;;  %s26_s21 = sadd.s32 1, %s2105_s18  ;;  %s2109_s19 = sphi %s2152_s19, %s14_s19   ;;  %s2105_s18 = sphi %s2150_s18, %s2602_s18   ;;  %s2101_s17 = sphi %s2148_s17, %s2601_s17   ;;  %s2097_s16 = sphi %s2146_s16, %s2600_s16   ;;  %s2093_s15 = sphi %s2144_s15, %s2599_s15  }
   0x4   : > { %p24_p0 = scmp.ge.s32.totalorder %s23_s20, 43  ;;  %p1884_p1 = scmp.ge.s32.totalorder %s2109_s19, 1 }
   0x5   : > { %p204_p2 = scmp.lt.s32.totalorder %s2109_s19, 87 }
   0x6   : > { %s2604_s20 = smov (%p24_p0, %s23_s20), 0  ;;  %s2606_s21 = smov (!%p24_p0, %s26_s21), %s2105_s18 }
   0x7   : > { %p205_p3 = pnand %p1884_p1, %p204_p2  ;;  %p28_p4 = scmp.ge.s32.totalorder %s2606_s21, 2 }
   0x8   : > { %s2177_s22 = smul.u32 (!%p205_p3), 12, %s2093_s15  ;;  %p249_p5 = scmp.lt.s32.totalorder (!%p205_p3), %s2097_s16, 1  ;;  %v366_v0 = vlaneseq (!%p205_p3)  ;;  %v2111_v1 = vmov (!%p205_p3), 1983009808   ;;  %v2118_v41 = vmov (!%p205_p3), 0   ;;  %vm436_vm0 = vcmask (!%p205_p3), 1043456  }
   0x9   : > { %s2608_s21 = smov (%p28_p4, %s2606_s21), 0  ;;  %208 = sbr.rel (%p205_p3) target bundleno = 491 (0x1eb), region = 36 }
   0xa   : > { %v364_v2 = vunpack.c.l.s4 (!%p205_p3), %v2111_v1  ;;  %p251_p6 = scmp.lt.s32.totalorder (!%p205_p3), %s2177_s22, 527  ;;  %v367_v4 = vshrl.u32 (!%p205_p3), %v366_v0, 7  ;;  %s258_s26 = sadd.s32 (!%p205_p3), 1, %s2093_s15  ;;  %1465 = vmatprep.mubr.bf16.mxu0 (!%p205_p3), %v2118_v41  ;;  %1506 = vmatprep.mubr.bf16.mxu1 (!%p205_p3), %v2118_v41  ;;  %v1236_v61 = vld [vmem:[%s2597_s3] sm:$0xf] (!%p205_p3)  ;;  %vm438_vm1 = vcmask (!%p205_p3), 1039360  }
   0xb   : > { %s259_s28 = smul.u32 (!%p205_p3), 12, %s258_s26  ;;  %s2112_s6 = smov (!%p205_p3), 126   ;;  %2004 = vset.pattern.permute.xlu0 (!%p205_p3), %v2118_v41  ;;  %vm544_vm2 = vcmask (!%p205_p3), 1031168   ;;  %vm756_vm3 = vcmask (!%p205_p3), 1022976   ;;  %vm863_vm4 = vcmask (!%p205_p3), 1014784   ;;  %vm1075_vm5 = vcmask (!%p205_p3), 1006592  }
   0xc   : > { %v365_v3 = vunpack.c.0.s8 (!%p205_p3), %v364_v2  ;;  %s2113_s7 = smov (!%p205_p3), 127   ;;  %s2114_s13 = smov (!%p205_p3), 125   ;;  %vm1181_vm6 = vcmask (!%p205_p3), 998400   ;;  %vm1396_vm7 = vcmask (!%p205_p3), 1041408   ;;  %vm1392_vm8 = vcmask (!%p205_p3), 293888  }
   0xd   : > { %p262_p7 = scmp.lt.s32.totalorder (!%p205_p3), %s259_s28, 527  ;;  %s2115_s14 = smov (!%p205_p3), 124  }
   0xe   : > { %v2186_v5 = vsub.s32 (!%p205_p3), %v365_v3, %v367_v4  ;;  %s2116_s15 = smov (!%p205_p3), 123   ;;  %p273_p8 = scmp.lt.s32.totalorder (!%p205_p3), %s2177_s22, 515 }
  0x10   : > { %s2610_s16 = smov (!%p249_p5, %s2097_s16), 1  ;;  %s2612_s28 = smov (!%p262_p7, %s259_s28), 527 }
  0x11   : > { %s1954_s23 = smul.u32 528, %s2610_s16 }
  0x12   : > { %s252_s24 = scalar_select %p251_p6, %s2177_s22, 527 }
  0x13   : > { %s265_s8 = sadd.s32 %s1954_s23, %s2612_s28  ;;  %s1955_s28 = smul.u32 516, %s2610_s16 }
  0x14   : > { %s254_s25 = sadd.s32 %s1954_s23, %s252_s24  ;;  %s1886_s9 = sshll.u32 %s265_s8, 1 }
  0x15   : > { %s1885_s27 = sshll.u32 %s254_s25, 1  ;;  %s267_s12 = scalar_lea.vmem %s2595_s1, %s1886_s9 }
  0x16   : > { %s256_s5 = scalar_lea.vmem %s2594_s0, %s1885_s27  ;;  %v2214_v17 = vld [vmem:[%s267_s12] sm:$0xff]  ;;  %v288_v18 = vld [vmem:[%s267_s12 + $0x8] sm:$0x3]  ;;  %s2117_s23 = smov 122  }
  0x17   : > { %v281_v6 = vld [vmem:[%s256_s5] sm:$0xff]  ;;  %v282_v7 = vld [vmem:[%s256_s5 + $0x8] sm:$0xff]  ;;  %v2192_v8 = vld [vmem:[%s256_s5 + $0x10] sm:$0xff]  ;;  %289 = vst [vmem:[#allocation2 + $0x18] sm:$0xff] %v2214_v17  ;;  %v932_v42 = vrot.slane %v2214_v17, %v2186_v5  ;;  %v1030_v44 = vcombine.low %v2214_v17, %v2214_v17  ;;  %v925_v56 = vcombine.high %v2214_v17, %v2214_v17  ;;  %s2614_s22 = smov (!%p273_p8, %s2177_s22), 515 }
  0x18   : > { %284 = vst [vmem:[#allocation2] sm:$0xff] %v281_v6  ;;  %v477_v9 = vrot.slane %v281_v6, %v2186_v5  ;;  %v470_v10 = vcombine.high %v281_v6, %v281_v6  ;;  %v362_v11 = vcombine.low %v281_v6, %v281_v6  ;;  %285 = vst [vmem:[#allocation2 + $0x8] sm:$0xff] %v282_v7  ;;  %s276_s29 = sadd.s32 %s1955_s28, %s2614_s22 }
  0x19   : > { %286 = vst [vmem:[#allocation2 + $0x10] sm:$0xff] %v2192_v8  ;;  %1888 = vst.sshfl [vmem:[#allocation3] sm:$0xf pattern:$0x76325410] %v281_v6  ;;  %v895_v12 = vcombine.high %v282_v7, %v282_v7  ;;  %v492_v13 = vrot.slane %v282_v7, %v2186_v5  ;;  %v2203_v15 = vcombine.high %v2192_v8, %v2192_v8  ;;  %s1887_s30 = sshll.u32 %s276_s29, 1 }
  0x1a   : > { %1890 = vst.sshfl [vmem:[#allocation3 + $0x10] sm:$0xf pattern:$0x76325410] %v282_v7  ;;  %522 = vrot.lane.b32.xlu1 %v477_v9, %s2112_s6  ;;  %417 = vrot.lane.b32.xlu0 %v477_v9, %s2113_s7  ;;  %v369_v14 = vrot.slane %v362_v11, %v2186_v5  ;;  %v484_v16 = vrot.slane %v470_v10, %v2186_v5  ;;  %290 = vst [vmem:[#allocation2 + $0x20] sm:$0x3] %v288_v18 }
  0x1b   : > { %1892 = vst.sshfl [vmem:[#allocation3 + $0x20] sm:$0xf pattern:$0x76325410] %v2192_v8  ;;  %v377_v25 = vcombine.low %v282_v7, %v282_v7  ;;  %v917_v31 = vrot.slane %v2192_v8, %v2186_v5  ;;  %v909_v32 = vrot.slane %v895_v12, %v2186_v5  ;;  %v1015_v33 = vcombine.low %v2192_v8, %v2192_v8 }
  0x1c   : > { %1889 = vst.sshfl [vmem:[#allocation3 + $0x8] sm:$0xf pattern:$0x76325410] %v470_v10  ;;  %v924_v43 = vrot.slane %v2203_v15, %v2186_v5  ;;  %v1037_v45 = vrot.slane %v1030_v44, %v2186_v5  ;;  %v939_v57 = vrot.slane %v925_v56, %v2186_v5 }
  0x1d   : > { %1891 = vst.sshfl [vmem:[#allocation3 + $0x18] sm:$0xf pattern:$0x76325410] %v895_v12  ;;  %v384_v29 = vrot.slane %v377_v25, %v2186_v5  ;;  %v1022_v34 = vrot.slane %v1015_v33, %v2186_v5 }
  0x1e   : > { %1893 = vst.sshfl [vmem:[#allocation3 + $0x28] sm:$0xf pattern:$0x76325410] %v2203_v15  ;;  %526 = vrot.lane.b32.xlu1 %v492_v13, %s2112_s6  ;;  %415 = vrot.lane.b32.xlu0 %v369_v14, %s2113_s7 }
  0x1f   : > { %v568_v19 = vld [vmem:[#allocation2 + $0x4] sm:$0xff]  ;;  %v2017_v46 = vld [vmem:[#allocation2 + $0x18] ss:$0 sps:$4 sm:$0x33]  }
  0x20   : > { %v675_v20 = vld [vmem:[#allocation2 + $0xc] sm:$0xff]  ;;  %v590_v21 = vrot.slane %v568_v19, %v2186_v5  ;;  %v576_v22 = vcombine.low %v568_v19, %v568_v19  ;;  %v682_v28 = vcombine.high %v568_v19, %v568_v19  ;;  %v570_v35 = vld [vmem:[#allocation2 + $0x14] sm:$0xff]  ;;  %v414_v47 = vrot.slane %v2017_v46, %v2186_v5  ;;  %v2018_v48 = vld [vmem:[#allocation2 + $0x1c] ss:$0 sps:$4 sm:$0x33]  }
  0x21   : > { %v591_v24 = vcombine.low %v675_v20, %v675_v20  ;;  %v704_v26 = vrot.slane %v675_v20, %v2186_v5  ;;  %v606_v36 = vcombine.low %v570_v35, %v570_v35  ;;  %v697_v38 = vcombine.high %v675_v20, %v675_v20  ;;  %v1894_v49 = vld.sshfl [vmem:[#allocation2 + $0x18] sm:$0x3 pattern:$0x76325410] }
  0x22   : > { %631 = vrot.lane.b32.xlu1 %v590_v21, %s2112_s6  ;;  %524 = vrot.lane.b32.xlu0 %v484_v16, %s2112_s6  ;;  %v583_v23 = vrot.slane %v576_v22, %v2186_v5  ;;  %v696_v30 = vrot.slane %v682_v28, %v2186_v5  ;;  %v719_v39 = vrot.slane %v570_v35, %v2186_v5  ;;  %v2020_v53 = vld [vmem:[#allocation2 + $0x1c] ss:$0 sps:$4 sm:$0x33]   ;;  %v2022_v58 = vld [vmem:[#allocation2 + $0x20] ss:$0 sps:$4 sm:$0x33]  }
  0x23   : > { %v598_v27 = vrot.slane %v591_v24, %v2186_v5  ;;  %v613_v37 = vrot.slane %v606_v36, %v2186_v5  ;;  %v711_v40 = vrot.slane %v697_v38, %v2186_v5  ;;  %v628_v50 = vrot.slane %v2018_v48, %v2186_v5  ;;  %v1895_v54 = vld.sshfl [vmem:[#allocation2 + $0x1c] sm:$0x3 pattern:$0x76325410] }
  0x24   : > { %v712_v51 = vcombine.high %v570_v35, %v570_v35  ;;  %v840_v55 = vrot.slane %v2020_v53, %v2186_v5  ;;  %v1896_v59 = vld.sshfl [vmem:[#allocation2 + $0x20] sm:$0x3 pattern:$0x76325410]  ;;  %v1052_v60 = vrot.slane %v2022_v58, %v2186_v5 }
  0x26   : > { %734 = vrot.lane.b32.xlu1 %v590_v21, %s2114_s13  ;;  %629 = vrot.lane.b32.xlu0 %v583_v23, %s2112_s6  ;;  %v726_v52 = vrot.slane %v712_v51, %v2186_v5 }
  0x2a   : > { %738 = vrot.lane.b32.xlu1 %v704_v26, %s2114_s13  ;;  %633 = vrot.lane.b32.xlu0 %v598_v27, %s2112_s6 }
  0x2e   : > { %419 = vrot.lane.b32.xlu1 %v384_v29, %s2113_s7  ;;  %736 = vrot.lane.b32.xlu0 %v696_v30, %s2114_s13 }
  0x32   : > { %843 = vrot.lane.b32.xlu1 %v590_v21, %s2115_s14  ;;  %841 = vrot.lane.b32.xlu0 %v583_v23, %s2115_s14 }
  0x36   : > { %947 = vrot.lane.b32.xlu1 %v492_v13, %s2115_s14  ;;  %845 = vrot.lane.b32.xlu0 %v598_v27, %s2115_s14 }
  0x3a   : > { %951 = vrot.lane.b32.xlu1 %v917_v31, %s2115_s14  ;;  %949 = vrot.lane.b32.xlu0 %v909_v32, %s2115_s14 }
  0x3e   : > { %1055 = vrot.lane.b32.xlu1 %v492_v13, %s2116_s15  ;;  %1053 = vrot.lane.b32.xlu0 %v384_v29, %s2116_s15 }
  0x42   : > { %1159 = vrot.lane.b32.xlu1 %v492_v13, %s2117_s23  ;;  %1057 = vrot.lane.b32.xlu0 %v1022_v34, %s2116_s15 }
  0x46   : > { %1163 = vrot.lane.b32.xlu1 %v917_v31, %s2117_s23  ;;  %1161 = vrot.lane.b32.xlu0 %v909_v32, %s2117_s23 }
  0x4a   : > { %423 = vrot.lane.b32.xlu1 %v1022_v34, %s2113_s7  ;;  %421 = vrot.lane.b32.xlu0 %v492_v13, %s2113_s7 }
  0x4e   : > { %530 = vrot.lane.b32.xlu1 %v917_v31, %s2112_s6  ;;  %528 = vrot.lane.b32.xlu0 %v909_v32, %s2112_s6 }
  0x52   : > { %637 = vrot.lane.b32.xlu1 %v613_v37, %s2112_s6  ;;  %635 = vrot.lane.b32.xlu0 %v704_v26, %s2112_s6 }
  0x56   : > { %742 = vrot.lane.b32.xlu1 %v719_v39, %s2114_s13  ;;  %740 = vrot.lane.b32.xlu0 %v711_v40, %s2114_s13 }
  0x5a   : > { %849 = vrot.lane.b32.xlu1 %v613_v37, %s2115_s14  ;;  %847 = vrot.lane.b32.xlu0 %v704_v26, %s2115_s14 }
  0x5e   : > { %955 = vrot.lane.b32.xlu1 %v932_v42, %s2115_s14  ;;  %953 = vrot.lane.b32.xlu0 %v924_v43, %s2115_s14 }
  0x62   : > { %1061 = vrot.lane.b32.xlu1 %v1037_v45, %s2116_s15  ;;  %1059 = vrot.lane.b32.xlu0 %v917_v31, %s2116_s15 }
  0x66   : > { %1167 = vrot.lane.b32.xlu1 %v932_v42, %s2117_s23  ;;  %1165 = vrot.lane.b32.xlu0 %v924_v43, %s2117_s23 }
  0x6a   : > { %427 = vrot.lane.b32.xlu1 %v414_v47, %s2113_s7  ;;  %425 = vrot.lane.b32.xlu0 %v917_v31, %s2113_s7 }
  0x6e   : > { %534 = vrot.lane.b32.xlu1 %v1894_v49, %s2112_s6  ;;  %532 = vrot.lane.b32.xlu0 %v924_v43, %s2112_s6 }
  0x72   : > { %641 = vrot.lane.b32.xlu1 %v628_v50, %s2112_s6  ;;  %639 = vrot.lane.b32.xlu0 %v719_v39, %s2112_s6  ;;  %s2570_s6 = scalar_lea.vmem %s2598_s4, %s1887_s30 }
  0x76   : > { %746 = vrot.lane.b32.xlu1 %v1895_v54, %s2114_s13  ;;  %744 = vrot.lane.b32.xlu0 %v726_v52, %s2114_s13 }
  0x7a   : > { %853 = vrot.lane.b32.xlu1 %v840_v55, %s2115_s14  ;;  %851 = vrot.lane.b32.xlu0 %v719_v39, %s2115_s14 }
  0x7e   : > { %959 = vrot.lane.b32.xlu1 %v1896_v59, %s2115_s14  ;;  %957 = vrot.lane.b32.xlu0 %v939_v57, %s2115_s14 }
  0x82   : > { %1065 = vrot.lane.b32.xlu1 %v1052_v60, %s2116_s15  ;;  %1063 = vrot.lane.b32.xlu0 %v932_v42, %s2116_s15 }
  0x86   : > { %1171 = vrot.lane.b32.xlu1 %v1896_v59, %s2117_s23  ;;  %1169 = vrot.lane.b32.xlu0 %v939_v57, %s2117_s23 }
  0x8a   : > { %1239 = vperm.xlu0 %2004, %v1236_v61  }
  0x8c   : > { %v523_v62 = vpop.permute.xlu1 %522  ;;  %v418_v63 = vpop.permute.xlu0 %417 }
  0x8d   : > { %v430_v2 = vrot.slane %v418_v63, 4  ;;  %v536_v9 = vrot.slane %v523_v62, 4 }
  0x90   : > { %v2305_v0 = vpop.permute.xlu1 %526  ;;  %v416_v1 = vpop.permute.xlu0 %415 }
  0x91   : > { %v429_v3 = vrot.slane %v416_v1, 4  ;;  %v538_v10 = vrot.slane %v2305_v0, 4 }
  0x93   : > { %v437_v4 = vsel %vm436_vm0, %v429_v3, %v430_v2 }
  0x94   : > { %v439_v6 = vsel %vm438_vm1, %v416_v1, %v437_v4  ;;  %v632_v7 = vpop.permute.xlu1 %631  ;;  %v525_v8 = vpop.permute.xlu0 %524 }
  0x95   : > { %456 = vst [vmem:[#allocation3] sm:$0xcc] %v439_v6  ;;  %v537_v11 = vrot.slane %v525_v8, 4  ;;  %v644_v18 = vrot.slane %v632_v7, 4 }
  0x97   : > { %v543_v12 = vsel %vm436_vm0, %v536_v9, %v537_v11  ;;  %v546_v13 = vsel %vm436_vm0, %v537_v11, %v538_v10 }
  0x98   : > { %v545_v14 = vsel %vm544_vm2, %v523_v62, %v543_v12  ;;  %v547_v15 = vsel %vm544_vm2, %v525_v8, %v546_v13  ;;  %v735_v16 = vpop.permute.xlu1 %734  ;;  %v630_v17 = vpop.permute.xlu0 %629 }
  0x99   : > { %562 = vst [vmem:[#allocation3 + $0x30] sm:$0x33] %v545_v14  ;;  %563 = vst [vmem:[#allocation3 + $0x38] sm:$0x33] %v547_v15  ;;  %v643_v19 = vrot.slane %v630_v17, 4  ;;  %v748_v29 = vrot.slane %v735_v16, 4 }
  0x9b   : > { %v650_v20 = vsel %vm436_vm0, %v643_v19, %v644_v18 }
  0x9c   : > { %v651_v21 = vsel %vm544_vm2, %v630_v17, %v650_v20  ;;  %v2318_v22 = vpop.permute.xlu1 %738  ;;  %v2320_v23 = vpop.permute.xlu0 %633 }
  0x9d   : > { %668 = vst [vmem:[#allocation3 + $0x30] sm:$0xcc] %v651_v21  ;;  %v645_v24 = vrot.slane %v2320_v23, 4  ;;  %v750_v30 = vrot.slane %v2318_v22, 4 }
  0x9f   : > { %v652_v25 = vsel %vm436_vm0, %v644_v18, %v645_v24 }
  0xa0   : > { %v653_v26 = vsel %vm544_vm2, %v632_v7, %v652_v25  ;;  %v2327_v27 = vpop.permute.xlu1 %419  ;;  %v737_v28 = vpop.permute.xlu0 %736 }
  0xa1   : > { %669 = vst [vmem:[#allocation3 + $0x38] sm:$0xcc] %v653_v26  ;;  %v431_v31 = vrot.slane %v2327_v27, 4  ;;  %v749_v32 = vrot.slane %v737_v28, 4 }
  0xa3   : > { %v440_v33 = vsel %vm436_vm0, %v430_v2, %v431_v31  ;;  %v755_v34 = vsel %vm436_vm0, %v748_v29, %v749_v32  ;;  %v758_v35 = vsel %vm436_vm0, %v749_v32, %v750_v30 }
  0xa4   : > { %v441_v36 = vsel %vm438_vm1, %v418_v63, %v440_v33  ;;  %v757_v37 = vsel %vm756_vm3, %v735_v16, %v755_v34  ;;  %v759_v38 = vsel %vm756_vm3, %v737_v28, %v758_v35  ;;  %v844_v39 = vpop.permute.xlu1 %843  ;;  %v842_v40 = vpop.permute.xlu0 %841  ;;  %v2023_v42 = vld [vmem:[#allocation3 + $0x4] ss:$48 sps:$4 sm:$0xff]   ;;  %v2025_v43 = vld [vmem:[#allocation3] ss:$48 sps:$4 sm:$0xff]  }
  0xa5   : > { %457 = vst [vmem:[#allocation3 + $0x8] sm:$0xcc] %v441_v36  ;;  %774 = vst [vmem:[#allocation3 + $0x60] sm:$0x33] %v757_v37  ;;  %v856_v44 = vrot.slane %v844_v39, 4  ;;  %v855_v45 = vrot.slane %v842_v40, 4  ;;  %1433 = vmatprep.subr.bf16.mxu0 %v2023_v42 }
  0xa6   : > { %775 = vst [vmem:[#allocation3 + $0x68] sm:$0x33] %v759_v38  ;;  %1434 = vmatpush1.bf16.msra.mxu0 %v2025_v43 }
  0xa7   : > { %v862_v46 = vsel %vm436_vm0, %v855_v45, %v856_v44 }
  0xa8   : > { %v864_v47 = vsel %vm863_vm4, %v842_v40, %v862_v46  ;;  %v948_v48 = vpop.permute.xlu1 %947  ;;  %v2343_v49 = vpop.permute.xlu0 %845 }
  0xa9   : > { %881 = vst [vmem:[#allocation3 + $0x60] sm:$0xcc] %v864_v47  ;;  %v857_v50 = vrot.slane %v2343_v49, 4  ;;  %v961_v57 = vrot.slane %v948_v48, 4 }
  0xab   : > { %v865_v51 = vsel %vm436_vm0, %v856_v44, %v857_v50 }
  0xac   : > { %v866_v52 = vsel %vm863_vm4, %v844_v39, %v865_v51  ;;  %v2350_v53 = vpop.permute.xlu1 %951  ;;  %v950_v54 = vpop.permute.xlu0 %949  ;;  %v2026_v55 = vld [vmem:[#allocation3 + $0xc] ss:$48 sps:$4 sm:$0xff]   ;;  %v2028_v56 = vld [vmem:[#allocation3 + $0x8] ss:$48 sps:$4 sm:$0xff]  }
  0xad   : > { %882 = vst [vmem:[#allocation3 + $0x68] sm:$0xcc] %v866_v52  ;;  %v963_v58 = vrot.slane %v2350_v53, 4  ;;  %v962_v59 = vrot.slane %v950_v54, 4  ;;  %1474 = vmatprep.subr.bf16.mxu1 %v2026_v55 }
  0xae   : > { %1475 = vmatpush1.bf16.msra.mxu1 %v2028_v56 }
  0xaf   : > { %v968_v60 = vsel %vm436_vm0, %v961_v57, %v962_v59  ;;  %v970_v61 = vsel %vm436_vm0, %v962_v59, %v963_v58 }
  0xb0   : > { %v969_v62 = vsel %vm863_vm4, %v948_v48, %v968_v60  ;;  %v971_v63 = vsel %vm863_vm4, %v950_v54, %v970_v61  ;;  %v1056_v1 = vpop.permute.xlu1 %1055  ;;  %v1054_v2 = vpop.permute.xlu0 %1053 }
  0xb1   : > { %986 = vst [vmem:[#allocation3 + $0x90] sm:$0x33] %v969_v62  ;;  %987 = vst [vmem:[#allocation3 + $0x98] sm:$0x33] %v971_v63  ;;  %v1068_v3 = vrot.slane %v1056_v1, 4  ;;  %v1067_v4 = vrot.slane %v1054_v2, 4 }
  0xb3   : > { %v1074_v6 = vsel %vm436_vm0, %v1067_v4, %v1068_v3 }
  0xb4   : > { %v1076_v7 = vsel %vm1075_vm5, %v1054_v2, %v1074_v6  ;;  %v1160_v8 = vpop.permute.xlu1 %1159  ;;  %v2361_v9 = vpop.permute.xlu0 %1057 }
  0xb5   : > { %1093 = vst [vmem:[#allocation3 + $0x90] sm:$0xcc] %v1076_v7  ;;  %v1069_v11 = vrot.slane %v2361_v9, 4  ;;  %v1173_v16 = vrot.slane %v1160_v8, 4 }
  0xb7   : > { %v1077_v12 = vsel %vm436_vm0, %v1068_v3, %v1069_v11 }
  0xb8   : > { %v1078_v13 = vsel %vm1075_vm5, %v1056_v1, %v1077_v12  ;;  %v2368_v14 = vpop.permute.xlu1 %1163  ;;  %v1162_v15 = vpop.permute.xlu0 %1161 }
  0xb9   : > { %1094 = vst [vmem:[#allocation3 + $0x98] sm:$0xcc] %v1078_v13  ;;  %v1175_v17 = vrot.slane %v2368_v14, 4  ;;  %v1174_v18 = vrot.slane %v1162_v15, 4 }
  0xbb   : > { %v1180_v19 = vsel %vm436_vm0, %v1173_v16, %v1174_v18  ;;  %v1183_v20 = vsel %vm436_vm0, %v1174_v18, %v1175_v17 }
  0xbc   : > { %v1182_v21 = vsel %vm1181_vm6, %v1160_v8, %v1180_v19  ;;  %v1184_v25 = vsel %vm1181_vm6, %v1162_v15, %v1183_v20  ;;  %v2377_v26 = vpop.permute.xlu1 %423  ;;  %v422_v28 = vpop.permute.xlu0 %421  ;;  %v2029_v29 = vld [vmem:[#allocation3 + $0x64] ss:$48 sps:$4 sm:$0xff]   ;;  %v2031_v32 = vld [vmem:[#allocation3 + $0x60] ss:$48 sps:$4 sm:$0xff]  }
  0xbd   : > { %1199 = vst [vmem:[#allocation3 + $0xc0] sm:$0x33] %v1182_v21  ;;  %1200 = vst [vmem:[#allocation3 + $0xc8] sm:$0x33] %v1184_v25  ;;  %v433_v33 = vrot.slane %v2377_v26, 4  ;;  %v432_v34 = vrot.slane %v422_v28, 4  ;;  %1435 = vmatprep.subr.bf16.mxu0 %v2029_v29 }
  0xbe   : > { %1436 = vmatpush1.bf16.msra.mxu0 %v2031_v32 }
  0xbf   : > { %v442_v35 = vsel %vm436_vm0, %v431_v31, %v432_v34  ;;  %v444_v36 = vsel %vm436_vm0, %v432_v34, %v433_v33 }
  0xc0   : > { %v443_v37 = vsel %vm438_vm1, %v2327_v27, %v442_v35  ;;  %v445_v38 = vsel %vm438_vm1, %v422_v28, %v444_v36  ;;  %v2389_v39 = vpop.permute.xlu1 %530  ;;  %v529_v40 = vpop.permute.xlu0 %528  ;;  %v2032_v42 = vld [vmem:[#allocation3 + $0x6c] ss:$48 sps:$4 sm:$0xff]   ;;  %v2034_v43 = vld [vmem:[#allocation3 + $0x68] ss:$48 sps:$4 sm:$0xff]  }
  0xc1   : > { %458 = vst [vmem:[#allocation3 + $0x10] sm:$0xcc] %v443_v37  ;;  %459 = vst [vmem:[#allocation3 + $0x18] sm:$0xcc] %v445_v38  ;;  %v540_v44 = vrot.slane %v2389_v39, 4  ;;  %v539_v31 = vrot.slane %v529_v40, 4  ;;  %1476 = vmatprep.subr.bf16.mxu1 %v2032_v42 }
  0xc2   : > { %1477 = vmatpush1.bf16.msra.mxu1 %v2034_v43 }
  0xc3   : > { %v548_v45 = vsel %vm436_vm0, %v538_v10, %v539_v31  ;;  %v550_v27 = vsel %vm436_vm0, %v539_v31, %v540_v44 }
  0xc4   : > { %v549_v46 = vsel %vm544_vm2, %v2305_v0, %v548_v45  ;;  %v551_v47 = vsel %vm544_vm2, %v529_v40, %v550_v27  ;;  %v2401_v48 = vpop.permute.xlu1 %637  ;;  %v636_v51 = vpop.permute.xlu0 %635  ;;  %v1230_v52 = vld [vmem:[#allocation3 + $0xc0] sm:$0x33]  ;;  %v1231_v54 = vld [vmem:[#allocation3 + $0xc8] sm:$0x33] }
  0xc5   : > { %564 = vst [vmem:[#allocation3 + $0x40] sm:$0x33] %v549_v46  ;;  %565 = vst [vmem:[#allocation3 + $0x48] sm:$0x33] %v551_v47  ;;  %v647_v10 = vrot.slane %v2401_v48, 4  ;;  %v646_v55 = vrot.slane %v636_v51, 4  ;;  %v1923_v56 = vcombine.high %v1230_v52, %v1230_v52  ;;  %v1925_v57 = vcombine.high %v1231_v54, %v1231_v54 }
  0xc6   : > { %v1922_v59 = vcombine.low %v1230_v52, %v1230_v52  ;;  %v1924_v60 = vcombine.low %v1231_v54, %v1231_v54 }
  0xc7   : > { %v654_v0 = vsel %vm436_vm0, %v645_v24, %v646_v55  ;;  %v656_v61 = vsel %vm436_vm0, %v646_v55, %v647_v10  ;;  %1934 = vmatprep.subr.msk.bf16.mxu0 %vm1396_vm7, %v1923_v56  ;;  %1936 = vmatprep.subr.msk.bf16.mxu1 %vm1396_vm7, %v1925_v57 }
  0xc8   : > { %v655_v62 = vsel %vm544_vm2, %v2320_v23, %v654_v0  ;;  %v657_v63 = vsel %vm544_vm2, %v636_v51, %v656_v61  ;;  %v2415_v1 = vpop.permute.xlu1 %742  ;;  %v741_v2 = vpop.permute.xlu0 %740  ;;  %v1398_v3 = vsel %vm1396_vm7, %v1922_v59, 0  ;;  %v1404_v24 = vsel %vm1396_vm7, %v1924_v60, 0  ;;  %v2423_v23 = vld [vmem:[%s2596_s2] sm:$0x3] }
  0xc9   : > { %670 = vst [vmem:[#allocation3 + $0x40] sm:$0xcc] %v655_v62  ;;  %671 = vst [vmem:[#allocation3 + $0x48] sm:$0xcc] %v657_v63  ;;  %v752_v4 = vrot.slane %v2415_v1, 4  ;;  %v751_v6 = vrot.slane %v741_v2, 4  ;;  %1438 = vmatpush1.bf16.msra.mxu0 %v1398_v3  ;;  %1479 = vmatpush1.bf16.msra.mxu1 %v1404_v24 }
  0xcb   : > { %v760_v7 = vsel %vm436_vm0, %v750_v30, %v751_v6  ;;  %v762_v8 = vsel %vm436_vm0, %v751_v6, %v752_v4 }
  0xcc   : > { %v761_v12 = vsel %vm756_vm3, %v2318_v22, %v760_v7  ;;  %v763_v13 = vsel %vm756_vm3, %v741_v2, %v762_v8  ;;  %v2434_v15 = vpop.permute.xlu1 %849  ;;  %v848_v16 = vpop.permute.xlu0 %847  ;;  %1935 = vmatmul.mubr.msk.bf16.vlgmr.msra.gmra.mrb[0].mxu0 %vm1392_vm8, %v2423_v23  ;;  %1937 = vmatmul.mubr.msk.bf16.vlgmr.msra.gmra.mrb[0].mxu1 %vm1392_vm8, %v2423_v23 }
  0xcd   : > { %776 = vst [vmem:[#allocation3 + $0x70] sm:$0x33] %v761_v12  ;;  %777 = vst [vmem:[#allocation3 + $0x78] sm:$0x33] %v763_v13  ;;  %v859_v30 = vrot.slane %v2434_v15, 4  ;;  %v858_v18 = vrot.slane %v848_v16, 4  ;;  %1547 = vmatprep.mubr.bf16.mxu0 %v2118_v41  ;;  %1588 = vmatprep.mubr.bf16.mxu1 %v2118_v41 }
  0xcf   : > { %v867_v22 = vsel %vm436_vm0, %v857_v50, %v858_v18  ;;  %v869_v19 = vsel %vm436_vm0, %v858_v18, %v859_v30 }
  0xd0   : > { %v868_v20 = vsel %vm863_vm4, %v2343_v49, %v867_v22  ;;  %v870_v21 = vsel %vm863_vm4, %v848_v16, %v869_v19  ;;  %v2452_v25 = vpop.permute.xlu1 %955  ;;  %v954_v28 = vpop.permute.xlu0 %953  ;;  %v2039_v29 = vld [vmem:[#allocation3 + $0x10] ss:$48 sps:$4 sm:$0xff]   ;;  %v2041_v32 = vld [vmem:[#allocation3 + $0x14] ss:$48 sps:$4 sm:$0xff]   ;;  %v2042_v50 = vld [vmem:[#allocation3 + $0x18] ss:$48 sps:$4 sm:$0xff]  }
  0xd1   : > { %883 = vst [vmem:[#allocation3 + $0x70] sm:$0xcc] %v868_v20  ;;  %884 = vst [vmem:[#allocation3 + $0x78] sm:$0xcc] %v870_v21  ;;  %v965_v34 = vrot.slane %v2452_v25, 4  ;;  %v964_v35 = vrot.slane %v954_v28, 4  ;;  %1515 = vmatprep.subr.bf16.mxu0 %v2041_v32 }
  0xd2   : > { %v2044_v36 = vld [vmem:[#allocation3 + $0x1c] ss:$48 sps:$4 sm:$0xff]   ;;  %1516 = vmatpush1.bf16.msra.mxu0 %v2039_v29 }
  0xd3   : > { %v972_v37 = vsel %vm436_vm0, %v963_v58, %v964_v35  ;;  %v974_v49 = vsel %vm436_vm0, %v964_v35, %v965_v34  ;;  %1556 = vmatprep.subr.bf16.mxu1 %v2044_v36 }
  0xd4   : > { %v973_v38 = vsel %vm863_vm4, %v2350_v53, %v972_v37  ;;  %v975_v40 = vsel %vm863_vm4, %v954_v28, %v974_v49  ;;  %v2464_v42 = vpop.permute.xlu1 %1061  ;;  %v1060_v43 = vpop.permute.xlu0 %1059  ;;  %1557 = vmatpush1.bf16.msra.mxu1 %v2042_v50 }
  0xd5   : > { %988 = vst [vmem:[#allocation3 + $0xa0] sm:$0x33] %v973_v38  ;;  %989 = vst [vmem:[#allocation3 + $0xa8] sm:$0x33] %v975_v40  ;;  %v1071_v31 = vrot.slane %v2464_v42, 4  ;;  %v1070_v45 = vrot.slane %v1060_v43, 4 }
  0xd7   : > { %v1079_v58 = vsel %vm436_vm0, %v1069_v11, %v1070_v45  ;;  %v1081_v53 = vsel %vm436_vm0, %v1070_v45, %v1071_v31 }
  0xd8   : > { %v1080_v27 = vsel %vm1075_vm5, %v2361_v9, %v1079_v58  ;;  %v1082_v46 = vsel %vm1075_vm5, %v1060_v43, %v1081_v53  ;;  %v2476_v47 = vpop.permute.xlu1 %1167  ;;  %v1166_v51 = vpop.permute.xlu0 %1165 }
  0xd9   : > { %1095 = vst [vmem:[#allocation3 + $0xa0] sm:$0xcc] %v1080_v27  ;;  %1096 = vst [vmem:[#allocation3 + $0xa8] sm:$0xcc] %v1082_v46  ;;  %v1177_v52 = vrot.slane %v2476_v47, 4  ;;  %v1176_v54 = vrot.slane %v1166_v51, 4 }
  0xdb   : > { %v1185_v11 = vsel %vm436_vm0, %v1175_v17, %v1176_v54  ;;  %v1187_v55 = vsel %vm436_vm0, %v1176_v54, %v1177_v52 }
  0xdc   : > { %v1186_v9 = vsel %vm1181_vm6, %v2368_v14, %v1185_v11  ;;  %v1188_v56 = vsel %vm1181_vm6, %v1166_v51, %v1187_v55  ;;  %v428_v57 = vpop.permute.xlu1 %427  ;;  %v426_v59 = vpop.permute.xlu0 %425 }
  0xdd   : > { %1201 = vst [vmem:[#allocation3 + $0xd0] sm:$0x33] %v1186_v9  ;;  %1202 = vst [vmem:[#allocation3 + $0xd8] sm:$0x33] %v1188_v56  ;;  %v435_v60 = vrot.slane %v428_v57, 4  ;;  %v434_v0 = vrot.slane %v426_v59, 4 }
  0xdf   : > { %v446_v61 = vsel %vm436_vm0, %v433_v33, %v434_v0  ;;  %v448_v17 = vsel %vm436_vm0, %v434_v0, %v435_v60 }
  0xe0   : > { %v447_v62 = vsel %vm438_vm1, %v2377_v26, %v446_v61  ;;  %v449_v63 = vsel %vm438_vm1, %v426_v59, %v448_v17  ;;  %v535_v14 = vpop.permute.xlu1 %534  ;;  %v533_v2 = vpop.permute.xlu0 %532  ;;  %v2045_v3 = vld [vmem:[#allocation3 + $0x70] ss:$48 sps:$4 sm:$0xff]   ;;  %v2047_v24 = vld [vmem:[#allocation3 + $0x74] ss:$48 sps:$4 sm:$0xff]   ;;  %v2048_v8 = vld [vmem:[#allocation3 + $0x78] ss:$48 sps:$4 sm:$0xff]  }
  0xe1   : > { %460 = vst [vmem:[#allocation3 + $0x20] sm:$0xcc] %v447_v62  ;;  %461 = vst [vmem:[#allocation3 + $0x28] sm:$0xcc] %v449_v63  ;;  %v542_v6 = vrot.slane %v535_v14, 4  ;;  %v541_v7 = vrot.slane %v533_v2, 4  ;;  %1517 = vmatprep.subr.bf16.mxu0 %v2047_v24 }
  0xe2   : > { %v2050_v12 = vld [vmem:[#allocation3 + $0x7c] ss:$48 sps:$4 sm:$0xff]   ;;  %1518 = vmatpush1.bf16.msra.mxu0 %v2045_v3 }
  0xe3   : > { %v552_v33 = vsel %vm436_vm0, %v540_v44, %v541_v7  ;;  %v554_v13 = vsel %vm436_vm0, %v541_v7, %v542_v6  ;;  %1558 = vmatprep.subr.bf16.mxu1 %v2050_v12 }
  0xe4   : > { %v553_v26 = vsel %vm544_vm2, %v2389_v39, %v552_v33  ;;  %v555_v16 = vsel %vm544_vm2, %v533_v2, %v554_v13  ;;  %v642_v18 = vpop.permute.xlu1 %641  ;;  %v640_v22 = vpop.permute.xlu0 %639  ;;  %v1232_v19 = vld [vmem:[#allocation3 + $0xd0] sm:$0x33]  ;;  %v1233_v20 = vld [vmem:[#allocation3 + $0xd8] sm:$0x33]  ;;  %1559 = vmatpush1.bf16.msra.mxu1 %v2048_v8 }
  0xe5   : > { %566 = vst [vmem:[#allocation3 + $0x50] sm:$0x33] %v553_v26  ;;  %567 = vst [vmem:[#allocation3 + $0x58] sm:$0x33] %v555_v16  ;;  %v649_v21 = vrot.slane %v642_v18, 4  ;;  %v648_v28 = vrot.slane %v640_v22, 4  ;;  %v1927_v29 = vcombine.high %v1232_v19, %v1232_v19  ;;  %v1929_v44 = vcombine.high %v1233_v20, %v1233_v20 }
  0xe6   : > { %v1926_v32 = vcombine.low %v1232_v19, %v1232_v19  ;;  %v1928_v35 = vcombine.low %v1233_v20, %v1233_v20 }
  0xe7   : > { %v658_v39 = vsel %vm436_vm0, %v647_v10, %v648_v28  ;;  %v660_v50 = vsel %vm436_vm0, %v648_v28, %v649_v21  ;;  %1938 = vmatprep.subr.msk.bf16.mxu0 %vm1396_vm7, %v1927_v29  ;;  %1940 = vmatprep.subr.msk.bf16.mxu1 %vm1396_vm7, %v1929_v44 }
  0xe8   : > { %v659_v36 = vsel %vm544_vm2, %v2401_v48, %v658_v39  ;;  %v661_v37 = vsel %vm544_vm2, %v640_v22, %v660_v50  ;;  %v747_v49 = vpop.permute.xlu1 %746  ;;  %v745_v38 = vpop.permute.xlu0 %744  ;;  %v1410_v40 = vsel %vm1396_vm7, %v1926_v32, 0  ;;  %v1416_v43 = vsel %vm1396_vm7, %v1928_v35, 0 }
  0xe9   : > { %672 = vst [vmem:[#allocation3 + $0x50] sm:$0xcc] %v659_v36  ;;  %673 = vst [vmem:[#allocation3 + $0x58] sm:$0xcc] %v661_v37  ;;  %v754_v10 = vrot.slane %v747_v49, 4  ;;  %v753_v45 = vrot.slane %v745_v38, 4  ;;  %1520 = vmatpush1.bf16.msra.mxu0 %v1410_v40  ;;  %1561 = vmatpush1.bf16.msra.mxu1 %v1416_v43 }
  0xeb   : > { %v764_v58 = vsel %vm436_vm0, %v752_v4, %v753_v45  ;;  %v766_v48 = vsel %vm436_vm0, %v753_v45, %v754_v10 }
  0xec   : > { %v765_v53 = vsel %vm756_vm3, %v2415_v1, %v764_v58  ;;  %v767_v27 = vsel %vm756_vm3, %v745_v38, %v766_v48  ;;  %v854_v46 = vpop.permute.xlu1 %853  ;;  %v852_v51 = vpop.permute.xlu0 %851  ;;  %1939 = vmatmul.mubr.msk.bf16.vlgmr.msra.gmra.mrb[4].mxu0 %vm1392_vm8, %v2423_v23  ;;  %1941 = vmatmul.mubr.msk.bf16.vlgmr.msra.gmra.mrb[4].mxu1 %vm1392_vm8, %v2423_v23 }
  0xed   : > { %778 = vst [vmem:[#allocation3 + $0x80] sm:$0x33] %v765_v53  ;;  %779 = vst [vmem:[#allocation3 + $0x88] sm:$0x33] %v767_v27  ;;  %v861_v54 = vrot.slane %v854_v46, 4  ;;  %v860_v11 = vrot.slane %v852_v51, 4  ;;  %1629 = vmatprep.mubr.bf16.mxu0 %v2118_v41  ;;  %1670 = vmatprep.mubr.bf16.mxu1 %v2118_v41 }
  0xef   : > { %v871_v1 = vsel %vm436_vm0, %v859_v30, %v860_v11  ;;  %v873_v4 = vsel %vm436_vm0, %v860_v11, %v861_v54 }
  0xf0   : > { %v872_v55 = vsel %vm863_vm4, %v2434_v15, %v871_v1  ;;  %v874_v9 = vsel %vm863_vm4, %v852_v51, %v873_v4  ;;  %v960_v56 = vpop.permute.xlu1 %959  ;;  %v958_v57 = vpop.permute.xlu0 %957  ;;  %v2055_v59 = vld [vmem:[#allocation3 + $0x20] ss:$48 sps:$4 sm:$0xff]   ;;  %v2057_v60 = vld [vmem:[#allocation3 + $0x24] ss:$48 sps:$4 sm:$0xff]   ;;  %v2058_v41 = vld [vmem:[#allocation3 + $0x28] ss:$48 sps:$4 sm:$0xff]  }
  0xf1   : > { %885 = vst [vmem:[#allocation3 + $0x80] sm:$0xcc] %v872_v55  ;;  %886 = vst [vmem:[#allocation3 + $0x88] sm:$0xcc] %v874_v9  ;;  %v967_v0 = vrot.slane %v960_v56, 4  ;;  %v966_v61 = vrot.slane %v958_v57, 4  ;;  %1597 = vmatprep.subr.bf16.mxu0 %v2057_v60 }
  0xf2   : > { %v2060_v17 = vld [vmem:[#allocation3 + $0x2c] ss:$48 sps:$4 sm:$0xff]   ;;  %1598 = vmatpush1.bf16.msra.mxu0 %v2055_v59 }
  0xf3   : > { %v976_v30 = vsel %vm436_vm0, %v965_v34, %v966_v61  ;;  %v978_v62 = vsel %vm436_vm0, %v966_v61, %v967_v0  ;;  %1638 = vmatprep.subr.bf16.mxu1 %v2060_v17 }
  0xf4   : > { %v977_v15 = vsel %vm863_vm4, %v2452_v25, %v976_v30  ;;  %v979_v63 = vsel %vm863_vm4, %v958_v57, %v978_v62  ;;  %v1066_v14 = vpop.permute.xlu1 %1065  ;;  %v1064_v2 = vpop.permute.xlu0 %1063  ;;  %1639 = vmatpush1.bf16.msra.mxu1 %v2058_v41 }
  0xf5   : > { %990 = vst [vmem:[#allocation3 + $0xb0] sm:$0x33] %v977_v15  ;;  %991 = vst [vmem:[#allocation3 + $0xb8] sm:$0x33] %v979_v63  ;;  %v1073_v3 = vrot.slane %v1066_v14, 4  ;;  %v1072_v24 = vrot.slane %v1064_v2, 4 }
  0xf7   : > { %v1083_v34 = vsel %vm436_vm0, %v1071_v31, %v1072_v24  ;;  %v1085_v6 = vsel %vm436_vm0, %v1072_v24, %v1073_v3 }
  0xf8   : > { %v1084_v7 = vsel %vm1075_vm5, %v2464_v42, %v1083_v34  ;;  %v1086_v25 = vsel %vm1075_vm5, %v1064_v2, %v1085_v6  ;;  %v1172_v8 = vpop.permute.xlu1 %1171  ;;  %v1170_v12 = vpop.permute.xlu0 %1169 }
  0xf9   : > { %1097 = vst [vmem:[#allocation3 + $0xb0] sm:$0xcc] %v1084_v7  ;;  %1098 = vst [vmem:[#allocation3 + $0xb8] sm:$0xcc] %v1086_v25  ;;  %v1179_v33 = vrot.slane %v1172_v8, 4  ;;  %v1178_v13 = vrot.slane %v1170_v12, 4 }
  0xfb   : > { %v1189_v26 = vsel %vm436_vm0, %v1177_v52, %v1178_v13  ;;  %v1191_v16 = vsel %vm436_vm0, %v1178_v13, %v1179_v33 }
  0xfc   : > { %v1190_v31 = vsel %vm1181_vm6, %v2476_v47, %v1189_v26  ;;  %v1192_v18 = vsel %vm1181_vm6, %v1170_v12, %v1191_v16 }
  0xfd   : > { %1203 = vst [vmem:[#allocation3 + $0xe0] sm:$0x33] %v1190_v31  ;;  %1204 = vst [vmem:[#allocation3 + $0xe8] sm:$0x33] %v1192_v18 }
 0x100   : > { %v2061_v42 = vld [vmem:[#allocation3 + $0x80] ss:$48 sps:$4 sm:$0xff]   ;;  %v2063_v22 = vld [vmem:[#allocation3 + $0x84] ss:$48 sps:$4 sm:$0xff]   ;;  %v2064_v19 = vld [vmem:[#allocation3 + $0x88] ss:$48 sps:$4 sm:$0xff]  }
 0x101   : > { %v2066_v20 = vld [vmem:[#allocation3 + $0x8c] ss:$48 sps:$4 sm:$0xff]   ;;  %1599 = vmatprep.subr.bf16.mxu0 %v2063_v22 }
 0x102   : > { %1640 = vmatprep.subr.bf16.mxu1 %v2066_v20  ;;  %1600 = vmatpush1.bf16.msra.mxu0 %v2061_v42 }
 0x103   : > { %1641 = vmatpush1.bf16.msra.mxu1 %v2064_v19 }
 0x104   : > { %v1234_v21 = vld [vmem:[#allocation3 + $0xe0] sm:$0x33]  ;;  %v1235_v52 = vld [vmem:[#allocation3 + $0xe8] sm:$0x33] }
 0x105   : > { %v1931_v28 = vcombine.high %v1234_v21, %v1234_v21  ;;  %v1933_v29 = vcombine.high %v1235_v52, %v1235_v52  ;;  %v1930_v47 = vcombine.low %v1234_v21, %v1234_v21  ;;  %v1932_v44 = vcombine.low %v1235_v52, %v1235_v52 }
 0x107   : > { %1942 = vmatprep.subr.msk.bf16.mxu0 %vm1396_vm7, %v1931_v28  ;;  %1944 = vmatprep.subr.msk.bf16.mxu1 %vm1396_vm7, %v1933_v29  ;;  %v1422_v32 = vsel %vm1396_vm7, %v1930_v47, 0  ;;  %v1428_v35 = vsel %vm1396_vm7, %v1932_v44, 0 }
 0x108   : > { %1602 = vmatpush1.bf16.msra.mxu0 %v1422_v32  ;;  %1643 = vmatpush1.bf16.msra.mxu1 %v1428_v35 }
 0x109   : > { %v1240_v39 = vpop.permute.xlu0 %1239 }
 0x10b   : > { %1943 = vmatmul.mubr.msk.bf16.vlgmr.msra.gmra.mrb[8].mxu0 %vm1392_vm8, %v2423_v23  ;;  %1945 = vmatmul.mubr.msk.bf16.vlgmr.msra.gmra.mrb[8].mxu1 %vm1392_vm8, %v2423_v23 }
 0x19f   : > { %v1467_v50 = vpop.f32.mrb[0].mxu0  ;;  %v1508_v36 = vpop.f32.mrb[0].mxu1 }
 0x1a0   : > { %v1469_v37 = vpop.f32.mrb[1].mxu0  ;;  %v1510_v49 = vpop.f32.mrb[1].mxu1  ;;  %v1468_v38 = vadd.f32 %v1467_v50, %v1240_v39  ;;  %v1509_v40 = vadd.f32 %v1508_v36, %v1240_v39 }
 0x1a1   : > { %v1471_v43 = vpop.f32.mrb[2].mxu0  ;;  %v1512_v10 = vpop.f32.mrb[2].mxu1  ;;  %v1470_v45 = vadd.f32 %v1469_v37, %v1240_v39  ;;  %v1511_v58 = vadd.f32 %v1510_v49, %v1240_v39 }
 0x1a2   : > { %v1472_v48 = vpop.f32.mrb[3].mxu0  ;;  %v1513_v53 = vpop.f32.mrb[3].mxu1  ;;  %v1679_v27 = vmax.f32 %v1468_v38, 0.0  ;;  %v1681_v46 = vmax.f32 %v1509_v40, 0.0 }
 0x1a3   : > { %v1680_v23 = vmax.f32 %v1470_v45, 0.0  ;;  %v1682_v51 = vmax.f32 %v1511_v58, 0.0 }
 0x1a5   : > { %v1946_v54 = vpack.c.bf16 %v1680_v23, %v1679_v27  ;;  %v1947_v11 = vpack.c.bf16 %v1682_v51, %v1681_v46 }
 0x1a7   : > { %v1723_v1 = vrot.slane %v1946_v54, %v2186_v5  ;;  %v1730_v4 = vrot.slane %v1947_v11, %v2186_v5 }
 0x1a9   : > { %v1731_v55 = vcombine.low %v1723_v1, %v1730_v4 }
 0x1ab   : > { %1769 = vst [vmem:[%s2570_s6] sm:$0xff] %v1731_v55 }
 0x1bf   : > { %v1549_v9 = vpop.f32.mrb[4].mxu0  ;;  %v1590_v56 = vpop.f32.mrb[4].mxu1 }
 0x1c0   : > { %v1550_v57 = vadd.f32 %v1549_v9, %v1240_v39  ;;  %v1591_v59 = vadd.f32 %v1590_v56, %v1240_v39  ;;  %v1551_v60 = vpop.f32.mrb[5].mxu0  ;;  %v1592_v0 = vpop.f32.mrb[5].mxu1 }
 0x1c1   : > { %v1552_v61 = vadd.f32 %v1551_v60, %v1240_v39  ;;  %v1593_v41 = vadd.f32 %v1592_v0, %v1240_v39  ;;  %v1553_v17 = vpop.f32.mrb[6].mxu0  ;;  %v1594_v30 = vpop.f32.mrb[6].mxu1 }
 0x1c2   : > { %v1683_v62 = vmax.f32 %v1550_v57, 0.0  ;;  %v1685_v15 = vmax.f32 %v1591_v59, 0.0  ;;  %v1554_v63 = vpop.f32.mrb[7].mxu0  ;;  %v1595_v14 = vpop.f32.mrb[7].mxu1 }
 0x1c3   : > { %v1684_v2 = vmax.f32 %v1552_v61, 0.0  ;;  %v1686_v3 = vmax.f32 %v1593_v41, 0.0 }
 0x1c5   : > { %v1948_v24 = vpack.c.bf16 %v1684_v2, %v1683_v62  ;;  %v1949_v34 = vpack.c.bf16 %v1686_v3, %v1685_v15 }
 0x1c7   : > { %v1740_v6 = vrot.slane %v1948_v24, %v2186_v5  ;;  %v1747_v7 = vrot.slane %v1949_v34, %v2186_v5 }
 0x1c9   : > { %v1748_v25 = vcombine.low %v1740_v6, %v1747_v7 }
 0x1cb   : > { %1770 = vst [vmem:[%s2570_s6 + $0x8] sm:$0xff] %v1748_v25 }
 0x1de   : > { %v1631_v8 = vpop.f32.mrb[8].mxu0  ;;  %v1672_v12 = vpop.f32.mrb[8].mxu1 }
 0x1df   : > { %v1632_v33 = vadd.f32 %v1631_v8, %v1240_v39  ;;  %v1673_v13 = vadd.f32 %v1672_v12, %v1240_v39  ;;  %v1633_v26 = vpop.f32.mrb[9].mxu0  ;;  %v1674_v16 = vpop.f32.mrb[9].mxu1 }
 0x1e0   : > { %v1634_v31 = vadd.f32 %v1633_v26, %v1240_v39  ;;  %v1675_v18 = vadd.f32 %v1674_v16, %v1240_v39  ;;  %v1635_v42 = vpop.f32.mrb[10].mxu0  ;;  %v1676_v22 = vpop.f32.mrb[10].mxu1 }
 0x1e1   : > { %v1687_v19 = vmax.f32 %v1632_v33, 0.0  ;;  %v1689_v20 = vmax.f32 %v1673_v13, 0.0  ;;  %v1636_v21 = vpop.f32.mrb[11].mxu0  ;;  %v1677_v52 = vpop.f32.mrb[11].mxu1 }
 0x1e2   : > { %v1688_v28 = vmax.f32 %v1634_v31, 0.0  ;;  %v1690_v29 = vmax.f32 %v1675_v18, 0.0 }
 0x1e4   : > { %v1950_v47 = vpack.c.bf16 %v1688_v28, %v1687_v19  ;;  %v1951_v44 = vpack.c.bf16 %v1690_v29, %v1689_v20 }
 0x1e6   : > { %v1757_v32 = vrot.slane %v1950_v47, %v2186_v5  ;;  %v1764_v35 = vrot.slane %v1951_v44, %v2186_v5 }
 0x1e8   : > { %v1765_v50 = vcombine.low %v1757_v32, %v1764_v35 }
 0x1ea   : > { %1771 = vst [vmem:[%s2570_s6 + $0x10] sm:$0xff] %v1765_v50 }
 0x1eb PF: > { %s14_s19 = sadd.s32 1, %s2109_s19   ;;  %s2599_s15 = smov %s2101_s17 }
 0x1ec   : > { %p11_p9 = scmp.ge.s32.totalorder %s14_s19, 88   ;;  %s2600_s16 = smov %s2105_s18 }
 0x1ed   : > { %s2601_s17 = smov %s2604_s20  ;;  %s2602_s18 = smov %s2608_s21 }
 0x1ee   :  { %13 = sbr.rel (!%p11_p9) target bundleno = 3 (0x3), region = 69 }

// kernel: decoder_forward.27
= control target key start
LH: loop header
LB: loop body
LE: loop exit
PB: predicated region body
PF: predicated region fallthrough
CT: control target
= control target key end

     0   :  { %s816_s14 = smov 0   ;;  %s818_s15 = smov 0   ;;  %s890_s0 = inlined_call_operand.vmem [shape: bf16[2,4,65536], index: 0, kind: input, shape index: {}]   ;;  %s891_s1 = inlined_call_operand.vmem [shape: bf16[1,4], index: 1, kind: input, shape index: {}]   ;;  %s892_s2 = inlined_call_operand.<no memory space> [shape: f32[1,1], index: 2, kind: input, shape index: {}]   ;;  %s893_s3 = inlined_call_operand.vmem [shape: f32[2,1,65536], index: 3, kind: output, shape index: {}]  }
   0x1   :  { %v8_v0 = vstv %s892_s2  ;;  %s820_s16 = smov 0   ;;  %s822_s17 = smov 0  }
   0x2   :  { %9 = vst [vmem:[#allocation2] sm:$0x1] %v8_v0  ;;  %s824_s18 = smov 0  }
   0x3 LB: > { %s24_s2 = sadd.s32 1, %s780_s16  ;;  %s27_s19 = sadd.s32 1, %s784_s17  ;;  %s788_s18 = sphi %s824_s18, %s15_s18   ;;  %s784_s17 = sphi %s822_s17, %s897_s17   ;;  %s780_s16 = sphi %s820_s16, %s896_s16   ;;  %s776_s15 = sphi %s818_s15, %s895_s15   ;;  %s772_s14 = sphi %s816_s14, %s894_s14  }
   0x4   : > { %p25_p0 = scmp.ge.s32.totalorder %s24_s2, 64  ;;  %p648_p1 = scmp.ge.s32.totalorder %s788_s18, 1 }
   0x5   : > { %p160_p2 = scmp.lt.s32.totalorder %s788_s18, 129 }
   0x6   : > { %s899_s2 = smov (%p25_p0, %s24_s2), 0  ;;  %s901_s19 = smov (!%p25_p0, %s27_s19), %s784_s17 }
   0x7   : > { %p161_p3 = pnand %p648_p1, %p160_p2  ;;  %p29_p4 = scmp.ge.s32.totalorder %s901_s19, 2 }
   0x8   : > { %s649_s20 = sshll.u32 (!%p161_p3), %s772_s14, 3  ;;  %p192_p5 = scmp.lt.s32.totalorder (!%p161_p3), %s776_s15, 1  ;;  %v220_v1 = vlaneseq (!%p161_p3)  ;;  %v790_v2 = vmov (!%p161_p3), 1983009808   ;;  %v791_v4 = vmov (!%p161_p3), 0   ;;  %vm264_vm0 = vcmask (!%p161_p3), 1041408  }
   0x9   : > { %s903_s19 = smov (%p29_p4, %s901_s19), 0  ;;  %164 = sbr.rel (%p161_p3) target bundleno = 292 (0x124), region = 32 }
   0xa   : > { %p194_p6 = scmp.lt.s32.totalorder (!%p161_p3), %s649_s20, 511  ;;  %v228_v3 = vunpack.c.l.s4 (!%p161_p3), %v790_v2  ;;  %321 = vmatprep.mubr.bf16.mxu0 (!%p161_p3), %v791_v4  ;;  %362 = vmatprep.mubr.bf16.mxu1 (!%p161_p3), %v791_v4  ;;  %v849_v5 = vshrl.u32 (!%p161_p3), %v220_v1, 7  ;;  %v214_v6 = vld [vmem:[#allocation2] sm:$0x1] (!%p161_p3)  ;;  %vm260_vm1 = vcmask (!%p161_p3), 31744  }
   0xb   : > { %715 = vset.pattern.permute.xlu0 (!%p161_p3), %v791_v4  ;;  %v211_v22 = vld [vmem:[%s891_s1] sm:$0x1] (!%p161_p3) }
   0xc   : > { %v229_v7 = vunpack.c.0.s8 (!%p161_p3), %v228_v3  ;;  %217 = vperm.xlu0 (!%p161_p3), %715, %v214_v6   ;;  %v222_v26 = vsub.s32 (!%p161_p3), 0, %v849_v5  ;;  %v792_v6 = vmov (!%p161_p3), 1966171168  }
   0xe   : > { %v232_v8 = vsub.s32 (!%p161_p3), %v229_v7, %v849_v5  ;;  %v514_v7 = vunpack.c.l.s4 (!%p161_p3), %v792_v6 }
  0x10   : > { %s905_s15 = smov (!%p192_p5, %s776_s15), 1  ;;  %s907_s20 = smov (!%p194_p6, %s649_s20), 511 }
  0x11   : > { %s650_s21 = sshll.u32 %s905_s15, 9 }
  0x12   : > { %s851_s22 = sadd.s32 %s650_s21, %s907_s20 }
  0x13   : > { %s651_s23 = sshll.u32 %s851_s22, 1  ;;  %s208_s4 = scalar_lea.vmem %s893_s3, %s851_s22 }
  0x14   : > { %s199_s26 = scalar_lea.vmem %s890_s0, %s651_s23 }
  0x15   : > { %v212_v9 = vld [vmem:[%s199_s26] sm:$0xff]  ;;  %v213_v10 = vld [vmem:[%s199_s26 + $0x8] sm:$0xff] }
  0x16   : > { %v233_v11 = vrot.slane %v212_v9, %v232_v8  ;;  %v243_v12 = vcombine.high %v213_v10, %v213_v10  ;;  %v250_v13 = vrot.slane %v213_v10, %v232_v8  ;;  %v226_v14 = vcombine.high %v212_v9, %v212_v9 }
  0x17   : > { %v515_v10 = vunpack.c.0.s8 %v514_v7 }
  0x18   : > { %v241_v15 = vcombine.high %v233_v11, %v233_v11  ;;  %v266_v16 = vsel %vm264_vm0, %v233_v11, 0  ;;  %v240_v17 = vrot.slane %v226_v14, %v232_v8  ;;  %v258_v18 = vcombine.high %v250_v13, %v250_v13 }
  0x19   : > { %v257_v19 = vrot.slane %v243_v12, %v232_v8  ;;  %v278_v24 = vsel %vm264_vm0, %v250_v13, 0 }
  0x1a   : > { %654 = vmatprep.subr.msk.bf16.mxu0 %vm264_vm0, %v241_v15  ;;  %v242_v20 = vcombine.high %v240_v17, %v240_v17  ;;  %v272_v21 = vsel %vm264_vm0, %v240_v17, 0 }
  0x1b   : > { %290 = vmatpush1.bf16.msra.mxu0 %v266_v16  ;;  %v259_v23 = vcombine.high %v257_v19, %v257_v19  ;;  %v284_v25 = vsel %vm264_vm0, %v257_v19, 0 }
  0x1c   : > { %656 = vmatprep.subr.msk.bf16.mxu1 %vm264_vm0, %v242_v20  ;;  %658 = vmatprep.subr.msk.bf16.mxu0 %vm264_vm0, %v258_v18  ;;  %v518_v18 = vsub.s32 %v515_v10, %v849_v5 }
  0x1d   : > { %331 = vmatpush1.bf16.msra.mxu1 %v272_v21 }
  0x1e   : > { %655 = vmatmul.mubr.msk.bf16.vlgmr.msra.gmra.mrb[0].mxu0 %vm260_vm1, %v211_v22  ;;  %660 = vmatprep.subr.msk.bf16.mxu1 %vm264_vm0, %v259_v23 }
  0x1f   : > { %372 = vmatpush1.bf16.msra.mxu0 %v278_v24  ;;  %403 = vmatprep.mubr.bf16.mxu0 %v791_v4 }
  0x20   : > { %657 = vmatmul.mubr.msk.bf16.vlgmr.msra.gmra.mrb[0].mxu1 %vm260_vm1, %v211_v22 }
  0x21   : > { %413 = vmatpush1.bf16.msra.mxu1 %v284_v25  ;;  %444 = vmatprep.mubr.bf16.mxu1 %v791_v4 }
  0x26   : > { %659 = vmatmul.mubr.msk.bf16.vlgmr.msra.gmra.mrb[4].mxu0 %vm260_vm1, %v211_v22 }
  0x28   : > { %661 = vmatmul.mubr.msk.bf16.vlgmr.msra.gmra.mrb[4].mxu1 %vm260_vm1, %v211_v22 }
  0x8b   : > { %v218_v27 = vpop.permute.xlu0 %217 }
  0x8c   : > { %v223_v28 = vrot.slane %v218_v27, %v222_v26 }
  0xf1   : > { %v323_v29 = vpop.f32.mrb[0].mxu0 }
  0xf2   : > { %v324_v30 = vadd.f32 %v323_v29, %v223_v28  ;;  %v325_v31 = vpop.f32.mrb[1].mxu0 }
  0xf3   : > { %v326_v32 = vadd.f32 %v325_v31, %v223_v28  ;;  %v327_v33 = vpop.f32.mrb[2].mxu0  ;;  %v364_v34 = vpop.f32.mrb[0].mxu1 }
  0xf4   : > { %v662_v35 = vmul.f32 -1.442695, %v324_v30  ;;  %v365_v36 = vadd.f32 %v364_v34, %v223_v28  ;;  %v328_v37 = vpop.f32.mrb[3].mxu0  ;;  %v366_v38 = vpop.f32.mrb[1].mxu1 }
  0xf5   : > { %v663_v39 = vmul.f32 -1.442695, %v326_v32  ;;  %v367_v40 = vadd.f32 %v366_v38, %v223_v28  ;;  %v368_v41 = vpop.f32.mrb[2].mxu1 }
  0xf6   : > { %718 = vpow2.f32 %v662_v35  ;;  %v664_v42 = vmul.f32 -1.442695, %v365_v36  ;;  %v369_v43 = vpop.f32.mrb[3].mxu1 }
  0xf7   : > { %720 = vpow2.f32 %v663_v39  ;;  %v665_v44 = vmul.f32 -1.442695, %v367_v40 }
  0xf8   : > { %722 = vpow2.f32 %v664_v42 }
  0xf9   : > { %724 = vpow2.f32 %v665_v44  ;;  %v405_v45 = vpop.f32.mrb[4].mxu0 }
  0xfa   : > { %v406_v46 = vadd.f32 %v405_v45, %v223_v28  ;;  %v407_v47 = vpop.f32.mrb[5].mxu0 }
  0xfb   : > { %v408_v48 = vadd.f32 %v407_v47, %v223_v28  ;;  %v409_v49 = vpop.f32.mrb[6].mxu0  ;;  %v446_v50 = vpop.f32.mrb[4].mxu1 }
  0xfc   : > { %v666_v51 = vmul.f32 -1.442695, %v406_v46  ;;  %v447_v52 = vadd.f32 %v446_v50, %v223_v28  ;;  %v410_v53 = vpop.f32.mrb[7].mxu0  ;;  %v448_v54 = vpop.f32.mrb[5].mxu1 }
  0xfd   : > { %v667_v55 = vmul.f32 -1.442695, %v408_v48  ;;  %v449_v56 = vadd.f32 %v448_v54, %v223_v28  ;;  %v450_v57 = vpop.f32.mrb[6].mxu1 }
  0xfe   : > { %726 = vpow2.f32 %v666_v51  ;;  %v668_v58 = vmul.f32 -1.442695, %v447_v52  ;;  %v451_v59 = vpop.f32.mrb[7].mxu1 }
  0xff   : > { %728 = vpow2.f32 %v667_v55  ;;  %v669_v60 = vmul.f32 -1.442695, %v449_v56 }
 0x100   : > { %v719_v61 = vpop.eup %718  ;;  %730 = vpow2.f32 %v668_v58 }
 0x101   : > { %v721_v62 = vpop.eup %720  ;;  %v477_v63 = vadd.f32 1.0, %v719_v61  ;;  %732 = vpow2.f32 %v669_v60 }
 0x102   : > { %v723_v0 = vpop.eup %722  ;;  %v478_v1 = vadd.f32 1.0, %v721_v62 }
 0x103   : > { %v725_v2 = vpop.eup %724  ;;  %734 = vrcp.f32 %v477_v63  ;;  %v479_v3 = vadd.f32 1.0, %v723_v0 }
 0x104   : > { %736 = vrcp.f32 %v478_v1  ;;  %v480_v4 = vadd.f32 1.0, %v725_v2 }
 0x105   : > { %738 = vrcp.f32 %v479_v3 }
 0x106   : > { %740 = vrcp.f32 %v480_v4 }
 0x108   : > { %v727_v8 = vpop.eup %726 }
 0x109   : > { %v729_v9 = vpop.eup %728  ;;  %v481_v11 = vadd.f32 1.0, %v727_v8 }
 0x10a   : > { %v731_v12 = vpop.eup %730  ;;  %v482_v13 = vadd.f32 1.0, %v729_v9 }
 0x10b   : > { %v733_v14 = vpop.eup %732  ;;  %742 = vrcp.f32 %v481_v11  ;;  %v483_v15 = vadd.f32 1.0, %v731_v12 }
 0x10c   : > { %744 = vrcp.f32 %v482_v13  ;;  %v484_v16 = vadd.f32 1.0, %v733_v14 }
 0x10d   : > { %v735_v17 = vpop.eup %734  ;;  %746 = vrcp.f32 %v483_v15 }
 0x10e   : > { %v737_v19 = vpop.eup %736  ;;  %748 = vrcp.f32 %v484_v16 }
 0x10f   : > { %v739_v20 = vpop.eup %738  ;;  %v509_v21 = vcombine.low %v735_v17, %v737_v19 }
 0x110   : > { %v741_v22 = vpop.eup %740 }
 0x111   : > { %v519_v23 = vrot.slane %v509_v21, %v518_v18  ;;  %v510_v24 = vcombine.low %v739_v20, %v741_v22 }
 0x113   : > { %v526_v25 = vrot.slane %v510_v24, %v518_v18 }
 0x115   : > { %v743_v26 = vpop.eup %742  ;;  %v541_v27 = vcombine.low %v519_v23, %v526_v25 }
 0x116   : > { %v745_v28 = vpop.eup %744 }
 0x117   : > { %v747_v29 = vpop.eup %746  ;;  %v511_v30 = vcombine.low %v743_v26, %v745_v28  ;;  %v549_v35 = vrot.slane %v541_v27, %v518_v18 }
 0x118   : > { %v749_v31 = vpop.eup %748 }
 0x119   : > { %v533_v32 = vrot.slane %v511_v30, %v518_v18  ;;  %v512_v33 = vcombine.low %v747_v29, %v749_v31 }
 0x11b   : > { %v540_v34 = vrot.slane %v512_v33, %v518_v18 }
 0x11d   : > { %v542_v5 = vcombine.low %v533_v32, %v540_v34 }
 0x11f   : > { %v556_v36 = vrot.slane %v542_v5, %v518_v18 }
 0x121   : > { %v557_v37 = vcombine.low %v549_v35, %v556_v36 }
 0x123   : > { %559 = vst [vmem:[%s208_s4] sm:$0xff] %v557_v37 }
 0x124 PF: > { %s15_s18 = sadd.s32 1, %s788_s18   ;;  %s894_s14 = smov %s780_s16 }
 0x125   : > { %p12_p7 = scmp.ge.s32.totalorder %s15_s18, 130   ;;  %s895_s15 = smov %s784_s17 }
 0x126   : > { %s896_s16 = smov %s899_s2  ;;  %s897_s17 = smov %s903_s19 }
 0x127   :  { %14 = sbr.rel (!%p12_p7) target bundleno = 3 (0x3), region = 62 }

</bundles_post_ra>
